<compile_context>
chip_gen: v7x
topology: tpu7x:2x2x1
jax: 0.10.0
libtpu: 0.0.40
codegen_flags: <defaults>
</compile_context>

<pallas_src>
import functools

import jax
import jax.numpy as jnp
from jax.experimental import pallas as pl
from jax.experimental.pallas import tpu as pltpu


def _induction_kernel(x_ref,
                      w0_ref, b0_ref, whh0_ref,
                      w1_ref, b1_ref, whh1_ref,
                      wfc_ref, bfc_ref,
                      out_ref,
                      proj_ref, h0_ref,
                      *, seq_len, batch, fuse_directions):
    T, B = seq_len, batch
    H = wfc_ref.shape[1]          # hidden size == f_dim
    G = 4 * H                     # gate width per direction

    f32 = jnp.float32
    zBH = jnp.zeros((B, H), f32)
    z2BH = jnp.zeros((2 * B, H), f32)

    def step(pre_f, pre_r, h_st, c_st, whh_ref):
        """One interleaved step: fwd (rows [:B]) + rev (rows [B:]) together."""
        if fuse_directions:
            # Block-diagonal LHS (2B, 2H): both directions ride a single
            # (2B, 2H) @ (2H, 4H) matmul; K = 256 fills the v6e/v7x MXU.
            lhs = jnp.concatenate(
                [jnp.concatenate([h_st[:B], zBH], axis=1),
                 jnp.concatenate([zBH, h_st[B:]], axis=1)], axis=0)
            g = jnp.dot(lhs, whh_ref[...], preferred_element_type=f32)
            gates = g + jnp.concatenate([pre_f, pre_r], axis=0)
        else:
            # v5e path: 128x128 MXU already has K full at H=128; two
            # independent dots per step that the scheduler overlaps.
            g_f = jnp.dot(h_st[:B], whh_ref[0:H, :], preferred_element_type=f32)
            g_r = jnp.dot(h_st[B:], whh_ref[H:2 * H, :], preferred_element_type=f32)
            gates = jnp.concatenate([g_f + pre_f, g_r + pre_r], axis=0)
        # PyTorch gate order: i, f, g, o.  H = 128 -> vreg-aligned lane slices.
        i = jax.nn.sigmoid(gates[:, 0 * H:1 * H])
        f = jax.nn.sigmoid(gates[:, 1 * H:2 * H])
        gg = jnp.tanh(gates[:, 2 * H:3 * H])
        o = jax.nn.sigmoid(gates[:, 3 * H:4 * H])
        c_st = f * c_st + i * gg
        h_st = o * jnp.tanh(c_st)
        return h_st, c_st

    # ---- layer-0 input projections, ALL timesteps and BOTH directions in one
    #      (T*B, H) @ (H, 8H) MXU matmul (b_ih + b_hh pre-folded in wrapper).
    proj_ref[...] = jnp.dot(x_ref[...], w0_ref[...],
                            preferred_element_type=f32) + b0_ref[...]

    # ---- layer 0: fwd and rev recurrences interleaved (step s: fwd t=s,
    #      rev t=T-1-s) -> sequential chain of T fused steps.
    h_st, c_st = z2BH, z2BH
    for s in range(T):
        tf, tr = s, T - 1 - s
        pre_f = proj_ref[tf * B:(tf + 1) * B, 0:G]
        pre_r = proj_ref[tr * B:(tr + 1) * B, G:2 * G]
        h_st, c_st = step(pre_f, pre_r, h_st, c_st, whh0_ref)
        # Store straight into the [fwd | rev] lane layout layer 1 consumes;
        # no concat buffer is ever materialized.
        h0_ref[tf * B:(tf + 1) * B, 0:H] = h_st[:B]
        h0_ref[tr * B:(tr + 1) * B, H:2 * H] = h_st[B:]

    # ---- layer-1 input projections, both directions in one
    #      (T*B, 2H) @ (2H, 8H) matmul (projection scratch reused).
    proj_ref[...] = jnp.dot(h0_ref[...], w1_ref[...],
                            preferred_element_type=f32) + b1_ref[...]

    # ---- layer 1: interleaved fwd/rev; only the running time-sum is kept
    #      (mean over time commutes with the final Linear).
    h_st, c_st = z2BH, z2BH
    sum_st = z2BH
    for s in range(T):
        tf, tr = s, T - 1 - s
        pre_f = proj_ref[tf * B:(tf + 1) * B, 0:G]
        pre_r = proj_ref[tr * B:(tr + 1) * B, G:2 * G]
        h_st, c_st = step(pre_f, pre_r, h_st, c_st, whh1_ref)
        sum_st = sum_st + h_st

    # ---- fc on the time-mean: one (B, 2H) @ (2H, H) matmul, lane-dense store.
    hmean = jnp.concatenate([sum_st[:B], sum_st[B:]], axis=1) * (1.0 / T)
    out_ref[...] = (jnp.dot(hmean, wfc_ref[...], preferred_element_type=f32)
                    + bfc_ref[...])


def induction_pallas(x, params, *, fuse_directions=True):
    T, B, F = x.shape
    H = F
    G = 4 * H
    # Static sublane/lane slicing in the kernel assumes these alignments.
    assert B % 8 == 0 and H % 128 == 0, "pad batch to 8 and f_dim to 128"

    (w_ih0, w_hh0, b_ih0, b_hh0,
     w_ih0r, w_hh0r, b_ih0r, b_hh0r,
     w_ih1, w_hh1, b_ih1, b_hh1,
     w_ih1r, w_hh1r, b_ih1r, b_hh1r,
     w_fc, b_fc) = params

    f32 = jnp.float32
    args = [
        x.reshape(T * B, F).astype(f32),
        # Layer 0: input weights of both directions packed along N -> (F, 8H);
        # biases b_ih + b_hh folded; recurrent weights stacked along K -> (2H, 4H).
        jnp.concatenate([w_ih0.T, w_ih0r.T], axis=1).astype(f32),
        jnp.concatenate([b_ih0 + b_hh0, b_ih0r + b_hh0r]).reshape(1, 2 * G).astype(f32),
        jnp.concatenate([w_hh0.T, w_hh0r.T], axis=0).astype(f32),
        # Layer 1: the (4H, 2H) input weights of both directions packed into
        # (2H, 8H); the concat(fwd, bwd) boundary becomes the K axis.
        jnp.concatenate([w_ih1.T, w_ih1r.T], axis=1).astype(f32),
        jnp.concatenate([b_ih1 + b_hh1, b_ih1r + b_hh1r]).reshape(1, 2 * G).astype(f32),
        jnp.concatenate([w_hh1.T, w_hh1r.T], axis=0).astype(f32),
        # fc: torch (H, 2H) weight transposed -> (2H, H); the fwd/rev split of
        # its input is exactly the row split of this matrix.
        w_fc.T.astype(f32),
        b_fc.reshape(1, H).astype(f32),
    ]

    vmem = pl.BlockSpec(memory_space=pltpu.MemorySpace.VMEM)
    kernel = functools.partial(_induction_kernel, seq_len=T, batch=B,
                               fuse_directions=fuse_directions)

    flops = (2 * T * B * F * 8 * H                       # layer-0 input proj
             + 2 * T * B * 2 * H * 8 * H                 # layer-1 input proj
             + 2 * 2 * T * (2 * B) * (2 * H) * (4 * H)   # recurrent matmuls
             + 2 * B * 2 * H * H)                        # fc
    transcendentals = 2 * T * 5 * 2 * B * H              # sigmoid/tanh gates
    bytes_accessed = int(sum(int(a.size) * a.dtype.itemsize for a in args)
                         + B * H * 4)

    return pl.pallas_call(
        kernel,
        out_shape=jax.ShapeDtypeStruct((B, H), f32),
        in_specs=[vmem] * len(args),
        out_specs=vmem,
        scratch_shapes=[
            pltpu.VMEM((T * B, 2 * G), f32),   # gate pre-activations, both dirs
            pltpu.VMEM((T * B, 2 * H), f32),   # layer-0 hidden states [fwd|rev]
        ],
        compiler_params=pltpu.CompilerParams(
            vmem_limit_bytes=32 * 1024 * 1024),
        cost_estimate=pl.CostEstimate(flops=flops,
                                      transcendentals=transcendentals,
                                      bytes_accessed=bytes_accessed),
    )(*args)


# ----------------------------- pure-JAX reference ----------------------------

def _lstm_cell_ref(x_t, h, c, w_ih, w_hh, b_ih, b_hh):
    gates = x_t @ w_ih.T + b_ih + h @ w_hh.T + b_hh
    i, f, g, o = jnp.split(gates, 4, axis=-1)
    c = jax.nn.sigmoid(f) * c + jax.nn.sigmoid(i) * jnp.tanh(g)
    h = jax.nn.sigmoid(o) * jnp.tanh(c)
    return h, c


def _run_direction_ref(xs, w_ih, w_hh, b_ih, b_hh, reverse):
    T, B, _ = xs.shape
    H = w_hh.shape[1]
    h = jnp.zeros((B, H), jnp.float32)
    c = jnp.zeros((B, H), jnp.float32)
    outs = [None] * T
    order = range(T - 1, -1, -1) if reverse else range(T)
    for t in order:
        h, c = _lstm_cell_ref(xs[t], h, c, w_ih, w_hh, b_ih, b_hh)
        outs[t] = h
    return jnp.stack(outs, axis=0)


def induction_ref(x, params):
    """Pure-JAX reference mirroring the PyTorch forward."""
    (w_ih0, w_hh0, b_ih0, b_hh0,
     w_ih0r, w_hh0r, b_ih0r, b_hh0r,
     w_ih1, w_hh1, b_ih1, b_hh1,
     w_ih1r, w_hh1r, b_ih1r, b_hh1r,
     w_fc, b_fc) = params
    h0 = jnp.concatenate(
        [_run_direction_ref(x, w_ih0, w_hh0, b_ih0, b_hh0, reverse=False),
         _run_direction_ref(x, w_ih0r, w_hh0r, b_ih0r, b_hh0r, reverse=True)],
        axis=-1)
    h1 = jnp.concatenate(
        [_run_direction_ref(h0, w_ih1, w_hh1, b_ih1, b_hh1, reverse=False),
         _run_direction_ref(h0, w_ih1r, w_hh1r, b_ih1r, b_hh1r, reverse=True)],
        axis=-1)
    y = h1 @ w_fc.T + b_fc
    return jnp.mean(y, axis=0)


def init_params(key, f_dim):
    """Deterministic synthetic init (PyTorch LSTM/Linear uniform bounds)."""
    H = f_dim
    G = 4 * H
    k_lstm = 1.0 / (H ** 0.5)
    k_fc = 1.0 / ((2 * H) ** 0.5)

    keys = iter(jax.random.split(key, 18))

    def u(shape, bound):
        return jax.random.uniform(next(keys), shape, jnp.float32, -bound, bound)

    w_ih0, w_hh0 = u((G, H), k_lstm), u((G, H), k_lstm)
    b_ih0, b_hh0 = u((G,), k_lstm), u((G,), k_lstm)
    w_ih0r, w_hh0r = u((G, H), k_lstm), u((G, H), k_lstm)
    b_ih0r, b_hh0r = u((G,), k_lstm), u((G,), k_lstm)
    w_ih1, w_hh1 = u((G, 2 * H), k_lstm), u((G, H), k_lstm)
    b_ih1, b_hh1 = u((G,), k_lstm), u((G,), k_lstm)
    w_ih1r, w_hh1r = u((G, 2 * H), k_lstm), u((G, H), k_lstm)
    b_ih1r, b_hh1r = u((G,), k_lstm), u((G,), k_lstm)
    w_fc, b_fc = u((H, 2 * H), k_fc), u((H,), k_fc)

    return (w_ih0, w_hh0, b_ih0, b_hh0,
            w_ih0r, w_hh0r, b_ih0r, b_hh0r,
            w_ih1, w_hh1, b_ih1, b_hh1,
            w_ih1r, w_hh1r, b_ih1r, b_hh1r,
            w_fc, b_fc)


if __name__ == "__main__":
    key = jax.random.PRNGKey(0)
    kx, kp = jax.random.split(key)

    T, B, f_dim = 8, 8, 128                    # seq=8, batch=8, f_dim=128
    x = jax.random.normal(kx, (T, B, f_dim), jnp.float32)
    params = init_params(kp, f_dim)

    ref = induction_ref(x, params)

    # Default path: interleaved + block-diagonal direction fusion (v6e/v7x).
    out = jax.block_until_ready(induction_pallas(x, params))
    assert out.shape == (B, f_dim)
    err = float(jnp.max(jnp.abs(out - ref)))
    assert jnp.allclose(out, ref, atol=1e-4, rtol=1e-4), err

    # v5e-style path: plain fwd/rev interleave with two K=128 dots per step.
    out2 = jax.block_until_ready(
        induction_pallas(x, params, fuse_directions=False))
    err2 = float(jnp.max(jnp.abs(out2 - ref)))
    assert jnp.allclose(out2, ref, atol=1e-4, rtol=1e-4), err2

    print("KERNEL_OK")
</pallas_src>

<mosaic_0001>
module attributes {stable_mosaic.version = 11 : i64} {
  func.func @_induction_kernel(%arg0: memref<64x128xf32, #tpu.memory_space<vmem>>, %arg1: memref<128x1024xf32, #tpu.memory_space<vmem>>, %arg2: memref<1x1024xf32, #tpu.memory_space<vmem>>, %arg3: memref<256x512xf32, #tpu.memory_space<vmem>>, %arg4: memref<256x1024xf32, #tpu.memory_space<vmem>>, %arg5: memref<1x1024xf32, #tpu.memory_space<vmem>>, %arg6: memref<256x512xf32, #tpu.memory_space<vmem>>, %arg7: memref<256x128xf32, #tpu.memory_space<vmem>>, %arg8: memref<1x128xf32, #tpu.memory_space<vmem>>, %arg9: memref<8x128xf32, #tpu.memory_space<vmem>>, %arg10: memref<64x1024xf32, #tpu.memory_space<vmem>>, %arg11: memref<64x256xf32, #tpu.memory_space<vmem>>) attributes {dimension_semantics = [], scalar_prefetch = 0 : i64, scratch_operands = 2 : i64, tpu.core_type = #tpu.core_type<tc>} {
    %cst = arith.constant 0.000000e+00 : f32
    %0 = vector.broadcast %cst : f32 to vector<8x128xf32>
    %cst_0 = arith.constant 0.000000e+00 : f32
    %1 = vector.broadcast %cst_0 : f32 to vector<16x128xf32>
    %c0 = arith.constant 0 : index
    %c0_1 = arith.constant 0 : index
    %2 = vector.load %arg0[%c0, %c0_1] : memref<64x128xf32, #tpu.memory_space<vmem>>, vector<64x128xf32>
    %c0_2 = arith.constant 0 : index
    %c0_3 = arith.constant 0 : index
    %3 = vector.load %arg1[%c0_2, %c0_3] : memref<128x1024xf32, #tpu.memory_space<vmem>>, vector<128x1024xf32>
    %cst_4 = arith.constant dense<0.000000e+00> : vector<64x1024xf32>
    %4 = tpu.matmul %2, %3, %cst_4 {dimension_numbers = #tpu.dot_dimension_numbers<[1], [0], [0], [1], [0, 0, 1, 1], [], []>} : vector<64x128xf32>, vector<128x1024xf32>, vector<64x1024xf32> -> vector<64x1024xf32>
    %c0_5 = arith.constant 0 : index
    %c0_6 = arith.constant 0 : index
    %5 = vector.load %arg2[%c0_5, %c0_6] : memref<1x1024xf32, #tpu.memory_space<vmem>>, vector<1x1024xf32>
    %6 = vector.broadcast %5 : vector<1x1024xf32> to vector<64x1024xf32>
    %7 = arith.addf %4, %6 : vector<64x1024xf32>
    %c0_7 = arith.constant 0 : index
    %c0_8 = arith.constant 0 : index
    %8 = vector.load %arg10[%c0_7, %c0_8] : memref<64x1024xf32, #tpu.memory_space<vmem>>, vector<64x1024xf32>
    tpu.vector_store %arg10[%c0_7, %c0_8], %7 {strides = array<i32>} : memref<64x1024xf32, #tpu.memory_space<vmem>>, vector<64x1024xf32>,
    %c0_9 = arith.constant 0 : index
    %c0_10 = arith.constant 0 : index
    %9 = vector.load %arg10[%c0_9, %c0_10] : memref<64x1024xf32, #tpu.memory_space<vmem>>, vector<8x512xf32>
    %c56 = arith.constant 56 : index
    %c512 = arith.constant 512 : index
    %10 = vector.load %arg10[%c56, %c512] : memref<64x1024xf32, #tpu.memory_space<vmem>>, vector<8x512xf32>
    %11 = vector.extract_strided_slice %1 {offsets = [0, 0], sizes = [8, 128], strides = [1, 1]} : vector<16x128xf32> to vector<8x128xf32>
    %12 = tpu.concatenate %11, %0 in 1 : vector<8x128xf32>, vector<8x128xf32> -> vector<8x256xf32>
    %13 = vector.extract_strided_slice %1 {offsets = [8, 0], sizes = [8, 128], strides = [1, 1]} : vector<16x128xf32> to vector<8x128xf32>
    %14 = tpu.concatenate %0, %13 in 1 : vector<8x128xf32>, vector<8x128xf32> -> vector<8x256xf32>
    %15 = tpu.concatenate %12, %14 in 0 : vector<8x256xf32>, vector<8x256xf32> -> vector<16x256xf32>
    %c0_11 = arith.constant 0 : index
    %c0_12 = arith.constant 0 : index
    %16 = vector.load %arg3[%c0_11, %c0_12] : memref<256x512xf32, #tpu.memory_space<vmem>>, vector<256x512xf32>
    %cst_13 = arith.constant dense<0.000000e+00> : vector<16x512xf32>
    %17 = tpu.matmul %15, %16, %cst_13 {dimension_numbers = #tpu.dot_dimension_numbers<[1], [0], [0], [1], [0, 0, 1, 1], [], []>} : vector<16x256xf32>, vector<256x512xf32>, vector<16x512xf32> -> vector<16x512xf32>
    %18 = tpu.concatenate %9, %10 in 0 : vector<8x512xf32>, vector<8x512xf32> -> vector<16x512xf32>
    %19 = arith.addf %17, %18 : vector<16x512xf32>
    %20 = vector.extract_strided_slice %19 {offsets = [0, 0], sizes = [16, 128], strides = [1, 1]} : vector<16x512xf32> to vector<16x128xf32>
    %21 = arith.negf %20 : vector<16x128xf32>
    %22 = math.exp %21 : vector<16x128xf32>
    %cst_14 = arith.constant 1.000000e+00 : f32
    %23 = vector.broadcast %cst_14 : f32 to vector<16x128xf32>
    %24 = arith.addf %23, %22 : vector<16x128xf32>
    %25 = arith.divf %23, %24 : vector<16x128xf32>
    %26 = vector.extract_strided_slice %19 {offsets = [0, 128], sizes = [16, 128], strides = [1, 1]} : vector<16x512xf32> to vector<16x128xf32>
    %27 = arith.negf %26 : vector<16x128xf32>
    %28 = math.exp %27 : vector<16x128xf32>
    %cst_15 = arith.constant 1.000000e+00 : f32
    %29 = vector.broadcast %cst_15 : f32 to vector<16x128xf32>
    %30 = arith.addf %29, %28 : vector<16x128xf32>
    %31 = arith.divf %29, %30 : vector<16x128xf32>
    %32 = vector.extract_strided_slice %19 {offsets = [0, 256], sizes = [16, 128], strides = [1, 1]} : vector<16x512xf32> to vector<16x128xf32>
    %33 = math.tanh %32 : vector<16x128xf32>
    %34 = vector.extract_strided_slice %19 {offsets = [0, 384], sizes = [16, 128], strides = [1, 1]} : vector<16x512xf32> to vector<16x128xf32>
    %35 = arith.negf %34 : vector<16x128xf32>
    %36 = math.exp %35 : vector<16x128xf32>
    %cst_16 = arith.constant 1.000000e+00 : f32
    %37 = vector.broadcast %cst_16 : f32 to vector<16x128xf32>
    %38 = arith.addf %37, %36 : vector<16x128xf32>
    %39 = arith.divf %37, %38 : vector<16x128xf32>
    %40 = arith.mulf %31, %1 : vector<16x128xf32>
    %41 = arith.mulf %25, %33 : vector<16x128xf32>
    %42 = arith.addf %40, %41 : vector<16x128xf32>
    %43 = math.tanh %42 : vector<16x128xf32>
    %44 = arith.mulf %39, %43 : vector<16x128xf32>
    %45 = vector.extract_strided_slice %44 {offsets = [0, 0], sizes = [8, 128], strides = [1, 1]} : vector<16x128xf32> to vector<8x128xf32>
    %c0_17 = arith.constant 0 : index
    %c0_18 = arith.constant 0 : index
    %46 = vector.load %arg11[%c0_17, %c0_18] : memref<64x256xf32, #tpu.memory_space<vmem>>, vector<8x128xf32>
    tpu.vector_store %arg11[%c0_17, %c0_18], %45 {strides = array<i32>} : memref<64x256xf32, #tpu.memory_space<vmem>>, vector<8x128xf32>,
    %47 = vector.extract_strided_slice %44 {offsets = [8, 0], sizes = [8, 128], strides = [1, 1]} : vector<16x128xf32> to vector<8x128xf32>
    %c56_19 = arith.constant 56 : index
    %c128 = arith.constant 128 : index
    %48 = vector.load %arg11[%c56_19, %c128] : memref<64x256xf32, #tpu.memory_space<vmem>>, vector<8x128xf32>
    tpu.vector_store %arg11[%c56_19, %c128], %47 {strides = array<i32>} : memref<64x256xf32, #tpu.memory_space<vmem>>, vector<8x128xf32>,
    %c8 = arith.constant 8 : index
    %c0_20 = arith.constant 0 : index
    %49 = vector.load %arg10[%c8, %c0_20] : memref<64x1024xf32, #tpu.memory_space<vmem>>, vector<8x512xf32>
    %c48 = arith.constant 48 : index
    %c512_21 = arith.constant 512 : index
    %50 = vector.load %arg10[%c48, %c512_21] : memref<64x1024xf32, #tpu.memory_space<vmem>>, vector<8x512xf32>
    %51 = vector.extract_strided_slice %44 {offsets = [0, 0], sizes = [8, 128], strides = [1, 1]} : vector<16x128xf32> to vector<8x128xf32>
    %52 = tpu.concatenate %51, %0 in 1 : vector<8x128xf32>, vector<8x128xf32> -> vector<8x256xf32>
    %53 = vector.extract_strided_slice %44 {offsets = [8, 0], sizes = [8, 128], strides = [1, 1]} : vector<16x128xf32> to vector<8x128xf32>
    %54 = tpu.concatenate %0, %53 in 1 : vector<8x128xf32>, vector<8x128xf32> -> vector<8x256xf32>
    %55 = tpu.concatenate %52, %54 in 0 : vector<8x256xf32>, vector<8x256xf32> -> vector<16x256xf32>
    %c0_22 = arith.constant 0 : index
    %c0_23 = arith.constant 0 : index
    %56 = vector.load %arg3[%c0_22, %c0_23] : memref<256x512xf32, #tpu.memory_space<vmem>>, vector<256x512xf32>
    %cst_24 = arith.constant dense<0.000000e+00> : vector<16x512xf32>
    %57 = tpu.matmul %55, %56, %cst_24 {dimension_numbers = #tpu.dot_dimension_numbers<[1], [0], [0], [1], [0, 0, 1, 1], [], []>} : vector<16x256xf32>, vector<256x512xf32>, vector<16x512xf32> -> vector<16x512xf32>
    %58 = tpu.concatenate %49, %50 in 0 : vector<8x512xf32>, vector<8x512xf32> -> vector<16x512xf32>
    %59 = arith.addf %57, %58 : vector<16x512xf32>
    %60 = vector.extract_strided_slice %59 {offsets = [0, 0], sizes = [16, 128], strides = [1, 1]} : vector<16x512xf32> to vector<16x128xf32>
    %61 = arith.negf %60 : vector<16x128xf32>
    %62 = math.exp %61 : vector<16x128xf32>
    %cst_25 = arith.constant 1.000000e+00 : f32
    %63 = vector.broadcast %cst_25 : f32 to vector<16x128xf32>
    %64 = arith.addf %63, %62 : vector<16x128xf32>
    %65 = arith.divf %63, %64 : vector<16x128xf32>
    %66 = vector.extract_strided_slice %59 {offsets = [0, 128], sizes = [16, 128], strides = [1, 1]} : vector<16x512xf32> to vector<16x128xf32>
    %67 = arith.negf %66 : vector<16x128xf32>
    %68 = math.exp %67 : vector<16x128xf32>
    %cst_26 = arith.constant 1.000000e+00 : f32
    %69 = vector.broadcast %cst_26 : f32 to vector<16x128xf32>
    %70 = arith.addf %69, %68 : vector<16x128xf32>
    %71 = arith.divf %69, %70 : vector<16x128xf32>
    %72 = vector.extract_strided_slice %59 {offsets = [0, 256], sizes = [16, 128], strides = [1, 1]} : vector<16x512xf32> to vector<16x128xf32>
    %73 = math.tanh %72 : vector<16x128xf32>
    %74 = vector.extract_strided_slice %59 {offsets = [0, 384], sizes = [16, 128], strides = [1, 1]} : vector<16x512xf32> to vector<16x128xf32>
    %75 = arith.negf %74 : vector<16x128xf32>
    %76 = math.exp %75 : vector<16x128xf32>
    %cst_27 = arith.constant 1.000000e+00 : f32
    %77 = vector.broadcast %cst_27 : f32 to vector<16x128xf32>
    %78 = arith.addf %77, %76 : vector<16x128xf32>
    %79 = arith.divf %77, %78 : vector<16x128xf32>
    %80 = arith.mulf %71, %42 : vector<16x128xf32>
    %81 = arith.mulf %65, %73 : vector<16x128xf32>
    %82 = arith.addf %80, %81 : vector<16x128xf32>
    %83 = math.tanh %82 : vector<16x128xf32>
    %84 = arith.mulf %79, %83 : vector<16x128xf32>
    %85 = vector.extract_strided_slice %84 {offsets = [0, 0], sizes = [8, 128], strides = [1, 1]} : vector<16x128xf32> to vector<8x128xf32>
    %c8_28 = arith.constant 8 : index
    %c0_29 = arith.constant 0 : index
    %86 = vector.load %arg11[%c8_28, %c0_29] : memref<64x256xf32, #tpu.memory_space<vmem>>, vector<8x128xf32>
    tpu.vector_store %arg11[%c8_28, %c0_29], %85 {strides = array<i32>} : memref<64x256xf32, #tpu.memory_space<vmem>>, vector<8x128xf32>,
    %87 = vector.extract_strided_slice %84 {offsets = [8, 0], sizes = [8, 128], strides = [1, 1]} : vector<16x128xf32> to vector<8x128xf32>
    %c48_30 = arith.constant 48 : index
    %c128_31 = arith.constant 128 : index
    %88 = vector.load %arg11[%c48_30, %c128_31] : memref<64x256xf32, #tpu.memory_space<vmem>>, vector<8x128xf32>
    tpu.vector_store %arg11[%c48_30, %c128_31], %87 {strides = array<i32>} : memref<64x256xf32, #tpu.memory_space<vmem>>, vector<8x128xf32>,
    %c16 = arith.constant 16 : index
    %c0_32 = arith.constant 0 : index
    %89 = vector.load %arg10[%c16, %c0_32] : memref<64x1024xf32, #tpu.memory_space<vmem>>, vector<8x512xf32>
    %c40 = arith.constant 40 : index
    %c512_33 = arith.constant 512 : index
    %90 = vector.load %arg10[%c40, %c512_33] : memref<64x1024xf32, #tpu.memory_space<vmem>>, vector<8x512xf32>
    %91 = vector.extract_strided_slice %84 {offsets = [0, 0], sizes = [8, 128], strides = [1, 1]} : vector<16x128xf32> to vector<8x128xf32>
    %92 = tpu.concatenate %91, %0 in 1 : vector<8x128xf32>, vector<8x128xf32> -> vector<8x256xf32>
    %93 = vector.extract_strided_slice %84 {offsets = [8, 0], sizes = [8, 128], strides = [1, 1]} : vector<16x128xf32> to vector<8x128xf32>
    %94 = tpu.concatenate %0, %93 in 1 : vector<8x128xf32>, vector<8x128xf32> -> vector<8x256xf32>
    %95 = tpu.concatenate %92, %94 in 0 : vector<8x256xf32>, vector<8x256xf32> -> vector<16x256xf32>
    %c0_34 = arith.constant 0 : index
    %c0_35 = arith.constant 0 : index
    %96 = vector.load %arg3[%c0_34, %c0_35] : memref<256x512xf32, #tpu.memory_space<vmem>>, vector<256x512xf32>
    %cst_36 = arith.constant dense<0.000000e+00> : vector<16x512xf32>
    %97 = tpu.matmul %95, %96, %cst_36 {dimension_numbers = #tpu.dot_dimension_numbers<[1], [0], [0], [1], [0, 0, 1, 1], [], []>} : vector<16x256xf32>, vector<256x512xf32>, vector<16x512xf32> -> vector<16x512xf32>
    %98 = tpu.concatenate %89, %90 in 0 : vector<8x512xf32>, vector<8x512xf32> -> vector<16x512xf32>
    %99 = arith.addf %97, %98 : vector<16x512xf32>
    %100 = vector.extract_strided_slice %99 {offsets = [0, 0], sizes = [16, 128], strides = [1, 1]} : vector<16x512xf32> to vector<16x128xf32>
    %101 = arith.negf %100 : vector<16x128xf32>
    %102 = math.exp %101 : vector<16x128xf32>
    %cst_37 = arith.constant 1.000000e+00 : f32
    %103 = vector.broadcast %cst_37 : f32 to vector<16x128xf32>
    %104 = arith.addf %103, %102 : vector<16x128xf32>
    %105 = arith.divf %103, %104 : vector<16x128xf32>
    %106 = vector.extract_strided_slice %99 {offsets = [0, 128], sizes = [16, 128], strides = [1, 1]} : vector<16x512xf32> to vector<16x128xf32>
    %107 = arith.negf %106 : vector<16x128xf32>
    %108 = math.exp %107 : vector<16x128xf32>
    %cst_38 = arith.constant 1.000000e+00 : f32
    %109 = vector.broadcast %cst_38 : f32 to vector<16x128xf32>
    %110 = arith.addf %109, %108 : vector<16x128xf32>
    %111 = arith.divf %109, %110 : vector<16x128xf32>
    %112 = vector.extract_strided_slice %99 {offsets = [0, 256], sizes = [16, 128], strides = [1, 1]} : vector<16x512xf32> to vector<16x128xf32>
    %113 = math.tanh %112 : vector<16x128xf32>
    %114 = vector.extract_strided_slice %99 {offsets = [0, 384], sizes = [16, 128], strides = [1, 1]} : vector<16x512xf32> to vector<16x128xf32>
    %115 = arith.negf %114 : vector<16x128xf32>
    %116 = math.exp %115 : vector<16x128xf32>
    %cst_39 = arith.constant 1.000000e+00 : f32
    %117 = vector.broadcast %cst_39 : f32 to vector<16x128xf32>
    %118 = arith.addf %117, %116 : vector<16x128xf32>
    %119 = arith.divf %117, %118 : vector<16x128xf32>
    %120 = arith.mulf %111, %82 : vector<16x128xf32>
    %121 = arith.mulf %105, %113 : vector<16x128xf32>
    %122 = arith.addf %120, %121 : vector<16x128xf32>
    %123 = math.tanh %122 : vector<16x128xf32>
    %124 = arith.mulf %119, %123 : vector<16x128xf32>
    %125 = vector.extract_strided_slice %124 {offsets = [0, 0], sizes = [8, 128], strides = [1, 1]} : vector<16x128xf32> to vector<8x128xf32>
    %c16_40 = arith.constant 16 : index
    %c0_41 = arith.constant 0 : index
    %126 = vector.load %arg11[%c16_40, %c0_41] : memref<64x256xf32, #tpu.memory_space<vmem>>, vector<8x128xf32>
    tpu.vector_store %arg11[%c16_40, %c0_41], %125 {strides = array<i32>} : memref<64x256xf32, #tpu.memory_space<vmem>>, vector<8x128xf32>,
    %127 = vector.extract_strided_slice %124 {offsets = [8, 0], sizes = [8, 128], strides = [1, 1]} : vector<16x128xf32> to vector<8x128xf32>
    %c40_42 = arith.constant 40 : index
    %c128_43 = arith.constant 128 : index
    %128 = vector.load %arg11[%c40_42, %c128_43] : memref<64x256xf32, #tpu.memory_space<vmem>>, vector<8x128xf32>
    tpu.vector_store %arg11[%c40_42, %c128_43], %127 {strides = array<i32>} : memref<64x256xf32, #tpu.memory_space<vmem>>, vector<8x128xf32>,
    %c24 = arith.constant 24 : index
    %c0_44 = arith.constant 0 : index
    %129 = vector.load %arg10[%c24, %c0_44] : memref<64x1024xf32, #tpu.memory_space<vmem>>, vector<8x512xf32>
    %c32 = arith.constant 32 : index
    %c512_45 = arith.constant 512 : index
    %130 = vector.load %arg10[%c32, %c512_45] : memref<64x1024xf32, #tpu.memory_space<vmem>>, vector<8x512xf32>
    %131 = vector.extract_strided_slice %124 {offsets = [0, 0], sizes = [8, 128], strides = [1, 1]} : vector<16x128xf32> to vector<8x128xf32>
    %132 = tpu.concatenate %131, %0 in 1 : vector<8x128xf32>, vector<8x128xf32> -> vector<8x256xf32>
    %133 = vector.extract_strided_slice %124 {offsets = [8, 0], sizes = [8, 128], strides = [1, 1]} : vector<16x128xf32> to vector<8x128xf32>
    %134 = tpu.concatenate %0, %133 in 1 : vector<8x128xf32>, vector<8x128xf32> -> vector<8x256xf32>
    %135 = tpu.concatenate %132, %134 in 0 : vector<8x256xf32>, vector<8x256xf32> -> vector<16x256xf32>
    %c0_46 = arith.constant 0 : index
    %c0_47 = arith.constant 0 : index
    %136 = vector.load %arg3[%c0_46, %c0_47] : memref<256x512xf32, #tpu.memory_space<vmem>>, vector<256x512xf32>
    %cst_48 = arith.constant dense<0.000000e+00> : vector<16x512xf32>
    %137 = tpu.matmul %135, %136, %cst_48 {dimension_numbers = #tpu.dot_dimension_numbers<[1], [0], [0], [1], [0, 0, 1, 1], [], []>} : vector<16x256xf32>, vector<256x512xf32>, vector<16x512xf32> -> vector<16x512xf32>
    %138 = tpu.concatenate %129, %130 in 0 : vector<8x512xf32>, vector<8x512xf32> -> vector<16x512xf32>
    %139 = arith.addf %137, %138 : vector<16x512xf32>
    %140 = vector.extract_strided_slice %139 {offsets = [0, 0], sizes = [16, 128], strides = [1, 1]} : vector<16x512xf32> to vector<16x128xf32>
    %141 = arith.negf %140 : vector<16x128xf32>
    %142 = math.exp %141 : vector<16x128xf32>
    %cst_49 = arith.constant 1.000000e+00 : f32
    %143 = vector.broadcast %cst_49 : f32 to vector<16x128xf32>
    %144 = arith.addf %143, %142 : vector<16x128xf32>
    %145 = arith.divf %143, %144 : vector<16x128xf32>
    %146 = vector.extract_strided_slice %139 {offsets = [0, 128], sizes = [16, 128], strides = [1, 1]} : vector<16x512xf32> to vector<16x128xf32>
    %147 = arith.negf %146 : vector<16x128xf32>
    %148 = math.exp %147 : vector<16x128xf32>
    %cst_50 = arith.constant 1.000000e+00 : f32
    %149 = vector.broadcast %cst_50 : f32 to vector<16x128xf32>
    %150 = arith.addf %149, %148 : vector<16x128xf32>
    %151 = arith.divf %149, %150 : vector<16x128xf32>
    %152 = vector.extract_strided_slice %139 {offsets = [0, 256], sizes = [16, 128], strides = [1, 1]} : vector<16x512xf32> to vector<16x128xf32>
    %153 = math.tanh %152 : vector<16x128xf32>
    %154 = vector.extract_strided_slice %139 {offsets = [0, 384], sizes = [16, 128], strides = [1, 1]} : vector<16x512xf32> to vector<16x128xf32>
    %155 = arith.negf %154 : vector<16x128xf32>
    %156 = math.exp %155 : vector<16x128xf32>
    %cst_51 = arith.constant 1.000000e+00 : f32
    %157 = vector.broadcast %cst_51 : f32 to vector<16x128xf32>
    %158 = arith.addf %157, %156 : vector<16x128xf32>
    %159 = arith.divf %157, %158 : vector<16x128xf32>
    %160 = arith.mulf %151, %122 : vector<16x128xf32>
    %161 = arith.mulf %145, %153 : vector<16x128xf32>
    %162 = arith.addf %160, %161 : vector<16x128xf32>
    %163 = math.tanh %162 : vector<16x128xf32>
    %164 = arith.mulf %159, %163 : vector<16x128xf32>
    %165 = vector.extract_strided_slice %164 {offsets = [0, 0], sizes = [8, 128], strides = [1, 1]} : vector<16x128xf32> to vector<8x128xf32>
    %c24_52 = arith.constant 24 : index
    %c0_53 = arith.constant 0 : index
    %166 = vector.load %arg11[%c24_52, %c0_53] : memref<64x256xf32, #tpu.memory_space<vmem>>, vector<8x128xf32>
    tpu.vector_store %arg11[%c24_52, %c0_53], %165 {strides = array<i32>} : memref<64x256xf32, #tpu.memory_space<vmem>>, vector<8x128xf32>,
    %167 = vector.extract_strided_slice %164 {offsets = [8, 0], sizes = [8, 128], strides = [1, 1]} : vector<16x128xf32> to vector<8x128xf32>
    %c32_54 = arith.constant 32 : index
    %c128_55 = arith.constant 128 : index
    %168 = vector.load %arg11[%c32_54, %c128_55] : memref<64x256xf32, #tpu.memory_space<vmem>>, vector<8x128xf32>
    tpu.vector_store %arg11[%c32_54, %c128_55], %167 {strides = array<i32>} : memref<64x256xf32, #tpu.memory_space<vmem>>, vector<8x128xf32>,
    %c32_56 = arith.constant 32 : index
    %c0_57 = arith.constant 0 : index
    %169 = vector.load %arg10[%c32_56, %c0_57] : memref<64x1024xf32, #tpu.memory_space<vmem>>, vector<8x512xf32>
    %c24_58 = arith.constant 24 : index
    %c512_59 = arith.constant 512 : index
    %170 = vector.load %arg10[%c24_58, %c512_59] : memref<64x1024xf32, #tpu.memory_space<vmem>>, vector<8x512xf32>
    %171 = vector.extract_strided_slice %164 {offsets = [0, 0], sizes = [8, 128], strides = [1, 1]} : vector<16x128xf32> to vector<8x128xf32>
    %172 = tpu.concatenate %171, %0 in 1 : vector<8x128xf32>, vector<8x128xf32> -> vector<8x256xf32>
    %173 = vector.extract_strided_slice %164 {offsets = [8, 0], sizes = [8, 128], strides = [1, 1]} : vector<16x128xf32> to vector<8x128xf32>
    %174 = tpu.concatenate %0, %173 in 1 : vector<8x128xf32>, vector<8x128xf32> -> vector<8x256xf32>
    %175 = tpu.concatenate %172, %174 in 0 : vector<8x256xf32>, vector<8x256xf32> -> vector<16x256xf32>
    %c0_60 = arith.constant 0 : index
    %c0_61 = arith.constant 0 : index
    %176 = vector.load %arg3[%c0_60, %c0_61] : memref<256x512xf32, #tpu.memory_space<vmem>>, vector<256x512xf32>
    %cst_62 = arith.constant dense<0.000000e+00> : vector<16x512xf32>
    %177 = tpu.matmul %175, %176, %cst_62 {dimension_numbers = #tpu.dot_dimension_numbers<[1], [0], [0], [1], [0, 0, 1, 1], [], []>} : vector<16x256xf32>, vector<256x512xf32>, vector<16x512xf32> -> vector<16x512xf32>
    %178 = tpu.concatenate %169, %170 in 0 : vector<8x512xf32>, vector<8x512xf32> -> vector<16x512xf32>
    %179 = arith.addf %177, %178 : vector<16x512xf32>
    %180 = vector.extract_strided_slice %179 {offsets = [0, 0], sizes = [16, 128], strides = [1, 1]} : vector<16x512xf32> to vector<16x128xf32>
    %181 = arith.negf %180 : vector<16x128xf32>
    %182 = math.exp %181 : vector<16x128xf32>
    %cst_63 = arith.constant 1.000000e+00 : f32
    %183 = vector.broadcast %cst_63 : f32 to vector<16x128xf32>
    %184 = arith.addf %183, %182 : vector<16x128xf32>
    %185 = arith.divf %183, %184 : vector<16x128xf32>
    %186 = vector.extract_strided_slice %179 {offsets = [0, 128], sizes = [16, 128], strides = [1, 1]} : vector<16x512xf32> to vector<16x128xf32>
    %187 = arith.negf %186 : vector<16x128xf32>
    %188 = math.exp %187 : vector<16x128xf32>
    %cst_64 = arith.constant 1.000000e+00 : f32
    %189 = vector.broadcast %cst_64 : f32 to vector<16x128xf32>
    %190 = arith.addf %189, %188 : vector<16x128xf32>
    %191 = arith.divf %189, %190 : vector<16x128xf32>
    %192 = vector.extract_strided_slice %179 {offsets = [0, 256], sizes = [16, 128], strides = [1, 1]} : vector<16x512xf32> to vector<16x128xf32>
    %193 = math.tanh %192 : vector<16x128xf32>
    %194 = vector.extract_strided_slice %179 {offsets = [0, 384], sizes = [16, 128], strides = [1, 1]} : vector<16x512xf32> to vector<16x128xf32>
    %195 = arith.negf %194 : vector<16x128xf32>
    %196 = math.exp %195 : vector<16x128xf32>
    %cst_65 = arith.constant 1.000000e+00 : f32
    %197 = vector.broadcast %cst_65 : f32 to vector<16x128xf32>
    %198 = arith.addf %197, %196 : vector<16x128xf32>
    %199 = arith.divf %197, %198 : vector<16x128xf32>
    %200 = arith.mulf %191, %162 : vector<16x128xf32>
    %201 = arith.mulf %185, %193 : vector<16x128xf32>
    %202 = arith.addf %200, %201 : vector<16x128xf32>
    %203 = math.tanh %202 : vector<16x128xf32>
    %204 = arith.mulf %199, %203 : vector<16x128xf32>
    %205 = vector.extract_strided_slice %204 {offsets = [0, 0], sizes = [8, 128], strides = [1, 1]} : vector<16x128xf32> to vector<8x128xf32>
    %c32_66 = arith.constant 32 : index
    %c0_67 = arith.constant 0 : index
    %206 = vector.load %arg11[%c32_66, %c0_67] : memref<64x256xf32, #tpu.memory_space<vmem>>, vector<8x128xf32>
    tpu.vector_store %arg11[%c32_66, %c0_67], %205 {strides = array<i32>} : memref<64x256xf32, #tpu.memory_space<vmem>>, vector<8x128xf32>,
    %207 = vector.extract_strided_slice %204 {offsets = [8, 0], sizes = [8, 128], strides = [1, 1]} : vector<16x128xf32> to vector<8x128xf32>
    %c24_68 = arith.constant 24 : index
    %c128_69 = arith.constant 128 : index
    %208 = vector.load %arg11[%c24_68, %c128_69] : memref<64x256xf32, #tpu.memory_space<vmem>>, vector<8x128xf32>
    tpu.vector_store %arg11[%c24_68, %c128_69], %207 {strides = array<i32>} : memref<64x256xf32, #tpu.memory_space<vmem>>, vector<8x128xf32>,
    %c40_70 = arith.constant 40 : index
    %c0_71 = arith.constant 0 : index
    %209 = vector.load %arg10[%c40_70, %c0_71] : memref<64x1024xf32, #tpu.memory_space<vmem>>, vector<8x512xf32>
    %c16_72 = arith.constant 16 : index
    %c512_73 = arith.constant 512 : index
    %210 = vector.load %arg10[%c16_72, %c512_73] : memref<64x1024xf32, #tpu.memory_space<vmem>>, vector<8x512xf32>
    %211 = vector.extract_strided_slice %204 {offsets = [0, 0], sizes = [8, 128], strides = [1, 1]} : vector<16x128xf32> to vector<8x128xf32>
    %212 = tpu.concatenate %211, %0 in 1 : vector<8x128xf32>, vector<8x128xf32> -> vector<8x256xf32>
    %213 = vector.extract_strided_slice %204 {offsets = [8, 0], sizes = [8, 128], strides = [1, 1]} : vector<16x128xf32> to vector<8x128xf32>
    %214 = tpu.concatenate %0, %213 in 1 : vector<8x128xf32>, vector<8x128xf32> -> vector<8x256xf32>
    %215 = tpu.concatenate %212, %214 in 0 : vector<8x256xf32>, vector<8x256xf32> -> vector<16x256xf32>
    %c0_74 = arith.constant 0 : index
    %c0_75 = arith.constant 0 : index
    %216 = vector.load %arg3[%c0_74, %c0_75] : memref<256x512xf32, #tpu.memory_space<vmem>>, vector<256x512xf32>
    %cst_76 = arith.constant dense<0.000000e+00> : vector<16x512xf32>
    %217 = tpu.matmul %215, %216, %cst_76 {dimension_numbers = #tpu.dot_dimension_numbers<[1], [0], [0], [1], [0, 0, 1, 1], [], []>} : vector<16x256xf32>, vector<256x512xf32>, vector<16x512xf32> -> vector<16x512xf32>
    %218 = tpu.concatenate %209, %210 in 0 : vector<8x512xf32>, vector<8x512xf32> -> vector<16x512xf32>
    %219 = arith.addf %217, %218 : vector<16x512xf32>
    %220 = vector.extract_strided_slice %219 {offsets = [0, 0], sizes = [16, 128], strides = [1, 1]} : vector<16x512xf32> to vector<16x128xf32>
    %221 = arith.negf %220 : vector<16x128xf32>
    %222 = math.exp %221 : vector<16x128xf32>
    %cst_77 = arith.constant 1.000000e+00 : f32
    %223 = vector.broadcast %cst_77 : f32 to vector<16x128xf32>
    %224 = arith.addf %223, %222 : vector<16x128xf32>
    %225 = arith.divf %223, %224 : vector<16x128xf32>
    %226 = vector.extract_strided_slice %219 {offsets = [0, 128], sizes = [16, 128], strides = [1, 1]} : vector<16x512xf32> to vector<16x128xf32>
    %227 = arith.negf %226 : vector<16x128xf32>
    %228 = math.exp %227 : vector<16x128xf32>
    %cst_78 = arith.constant 1.000000e+00 : f32
    %229 = vector.broadcast %cst_78 : f32 to vector<16x128xf32>
    %230 = arith.addf %229, %228 : vector<16x128xf32>
    %231 = arith.divf %229, %230 : vector<16x128xf32>
    %232 = vector.extract_strided_slice %219 {offsets = [0, 256], sizes = [16, 128], strides = [1, 1]} : vector<16x512xf32> to vector<16x128xf32>
    %233 = math.tanh %232 : vector<16x128xf32>
    %234 = vector.extract_strided_slice %219 {offsets = [0, 384], sizes = [16, 128], strides = [1, 1]} : vector<16x512xf32> to vector<16x128xf32>
    %235 = arith.negf %234 : vector<16x128xf32>
    %236 = math.exp %235 : vector<16x128xf32>
    %cst_79 = arith.constant 1.000000e+00 : f32
    %237 = vector.broadcast %cst_79 : f32 to vector<16x128xf32>
    %238 = arith.addf %237, %236 : vector<16x128xf32>
    %239 = arith.divf %237, %238 : vector<16x128xf32>
    %240 = arith.mulf %231, %202 : vector<16x128xf32>
    %241 = arith.mulf %225, %233 : vector<16x128xf32>
    %242 = arith.addf %240, %241 : vector<16x128xf32>
    %243 = math.tanh %242 : vector<16x128xf32>
    %244 = arith.mulf %239, %243 : vector<16x128xf32>
    %245 = vector.extract_strided_slice %244 {offsets = [0, 0], sizes = [8, 128], strides = [1, 1]} : vector<16x128xf32> to vector<8x128xf32>
    %c40_80 = arith.constant 40 : index
    %c0_81 = arith.constant 0 : index
    %246 = vector.load %arg11[%c40_80, %c0_81] : memref<64x256xf32, #tpu.memory_space<vmem>>, vector<8x128xf32>
    tpu.vector_store %arg11[%c40_80, %c0_81], %245 {strides = array<i32>} : memref<64x256xf32, #tpu.memory_space<vmem>>, vector<8x128xf32>,
    %247 = vector.extract_strided_slice %244 {offsets = [8, 0], sizes = [8, 128], strides = [1, 1]} : vector<16x128xf32> to vector<8x128xf32>
    %c16_82 = arith.constant 16 : index
    %c128_83 = arith.constant 128 : index
    %248 = vector.load %arg11[%c16_82, %c128_83] : memref<64x256xf32, #tpu.memory_space<vmem>>, vector<8x128xf32>
    tpu.vector_store %arg11[%c16_82, %c128_83], %247 {strides = array<i32>} : memref<64x256xf32, #tpu.memory_space<vmem>>, vector<8x128xf32>,
    %c48_84 = arith.constant 48 : index
    %c0_85 = arith.constant 0 : index
    %249 = vector.load %arg10[%c48_84, %c0_85] : memref<64x1024xf32, #tpu.memory_space<vmem>>, vector<8x512xf32>
    %c8_86 = arith.constant 8 : index
    %c512_87 = arith.constant 512 : index
    %250 = vector.load %arg10[%c8_86, %c512_87] : memref<64x1024xf32, #tpu.memory_space<vmem>>, vector<8x512xf32>
    %251 = vector.extract_strided_slice %244 {offsets = [0, 0], sizes = [8, 128], strides = [1, 1]} : vector<16x128xf32> to vector<8x128xf32>
    %252 = tpu.concatenate %251, %0 in 1 : vector<8x128xf32>, vector<8x128xf32> -> vector<8x256xf32>
    %253 = vector.extract_strided_slice %244 {offsets = [8, 0], sizes = [8, 128], strides = [1, 1]} : vector<16x128xf32> to vector<8x128xf32>
    %254 = tpu.concatenate %0, %253 in 1 : vector<8x128xf32>, vector<8x128xf32> -> vector<8x256xf32>
    %255 = tpu.concatenate %252, %254 in 0 : vector<8x256xf32>, vector<8x256xf32> -> vector<16x256xf32>
    %c0_88 = arith.constant 0 : index
    %c0_89 = arith.constant 0 : index
    %256 = vector.load %arg3[%c0_88, %c0_89] : memref<256x512xf32, #tpu.memory_space<vmem>>, vector<256x512xf32>
    %cst_90 = arith.constant dense<0.000000e+00> : vector<16x512xf32>
    %257 = tpu.matmul %255, %256, %cst_90 {dimension_numbers = #tpu.dot_dimension_numbers<[1], [0], [0], [1], [0, 0, 1, 1], [], []>} : vector<16x256xf32>, vector<256x512xf32>, vector<16x512xf32> -> vector<16x512xf32>
    %258 = tpu.concatenate %249, %250 in 0 : vector<8x512xf32>, vector<8x512xf32> -> vector<16x512xf32>
    %259 = arith.addf %257, %258 : vector<16x512xf32>
    %260 = vector.extract_strided_slice %259 {offsets = [0, 0], sizes = [16, 128], strides = [1, 1]} : vector<16x512xf32> to vector<16x128xf32>
    %261 = arith.negf %260 : vector<16x128xf32>
    %262 = math.exp %261 : vector<16x128xf32>
    %cst_91 = arith.constant 1.000000e+00 : f32
    %263 = vector.broadcast %cst_91 : f32 to vector<16x128xf32>
    %264 = arith.addf %263, %262 : vector<16x128xf32>
    %265 = arith.divf %263, %264 : vector<16x128xf32>
    %266 = vector.extract_strided_slice %259 {offsets = [0, 128], sizes = [16, 128], strides = [1, 1]} : vector<16x512xf32> to vector<16x128xf32>
    %267 = arith.negf %266 : vector<16x128xf32>
    %268 = math.exp %267 : vector<16x128xf32>
    %cst_92 = arith.constant 1.000000e+00 : f32
    %269 = vector.broadcast %cst_92 : f32 to vector<16x128xf32>
    %270 = arith.addf %269, %268 : vector<16x128xf32>
    %271 = arith.divf %269, %270 : vector<16x128xf32>
    %272 = vector.extract_strided_slice %259 {offsets = [0, 256], sizes = [16, 128], strides = [1, 1]} : vector<16x512xf32> to vector<16x128xf32>
    %273 = math.tanh %272 : vector<16x128xf32>
    %274 = vector.extract_strided_slice %259 {offsets = [0, 384], sizes = [16, 128], strides = [1, 1]} : vector<16x512xf32> to vector<16x128xf32>
    %275 = arith.negf %274 : vector<16x128xf32>
    %276 = math.exp %275 : vector<16x128xf32>
    %cst_93 = arith.constant 1.000000e+00 : f32
    %277 = vector.broadcast %cst_93 : f32 to vector<16x128xf32>
    %278 = arith.addf %277, %276 : vector<16x128xf32>
    %279 = arith.divf %277, %278 : vector<16x128xf32>
    %280 = arith.mulf %271, %242 : vector<16x128xf32>
    %281 = arith.mulf %265, %273 : vector<16x128xf32>
    %282 = arith.addf %280, %281 : vector<16x128xf32>
    %283 = math.tanh %282 : vector<16x128xf32>
    %284 = arith.mulf %279, %283 : vector<16x128xf32>
    %285 = vector.extract_strided_slice %284 {offsets = [0, 0], sizes = [8, 128], strides = [1, 1]} : vector<16x128xf32> to vector<8x128xf32>
    %c48_94 = arith.constant 48 : index
    %c0_95 = arith.constant 0 : index
    %286 = vector.load %arg11[%c48_94, %c0_95] : memref<64x256xf32, #tpu.memory_space<vmem>>, vector<8x128xf32>
    tpu.vector_store %arg11[%c48_94, %c0_95], %285 {strides = array<i32>} : memref<64x256xf32, #tpu.memory_space<vmem>>, vector<8x128xf32>,
    %287 = vector.extract_strided_slice %284 {offsets = [8, 0], sizes = [8, 128], strides = [1, 1]} : vector<16x128xf32> to vector<8x128xf32>
    %c8_96 = arith.constant 8 : index
    %c128_97 = arith.constant 128 : index
    %288 = vector.load %arg11[%c8_96, %c128_97] : memref<64x256xf32, #tpu.memory_space<vmem>>, vector<8x128xf32>
    tpu.vector_store %arg11[%c8_96, %c128_97], %287 {strides = array<i32>} : memref<64x256xf32, #tpu.memory_space<vmem>>, vector<8x128xf32>,
    %c56_98 = arith.constant 56 : index
    %c0_99 = arith.constant 0 : index
    %289 = vector.load %arg10[%c56_98, %c0_99] : memref<64x1024xf32, #tpu.memory_space<vmem>>, vector<8x512xf32>
    %c0_100 = arith.constant 0 : index
    %c512_101 = arith.constant 512 : index
    %290 = vector.load %arg10[%c0_100, %c512_101] : memref<64x1024xf32, #tpu.memory_space<vmem>>, vector<8x512xf32>
    %291 = vector.extract_strided_slice %284 {offsets = [0, 0], sizes = [8, 128], strides = [1, 1]} : vector<16x128xf32> to vector<8x128xf32>
    %292 = tpu.concatenate %291, %0 in 1 : vector<8x128xf32>, vector<8x128xf32> -> vector<8x256xf32>
    %293 = vector.extract_strided_slice %284 {offsets = [8, 0], sizes = [8, 128], strides = [1, 1]} : vector<16x128xf32> to vector<8x128xf32>
    %294 = tpu.concatenate %0, %293 in 1 : vector<8x128xf32>, vector<8x128xf32> -> vector<8x256xf32>
    %295 = tpu.concatenate %292, %294 in 0 : vector<8x256xf32>, vector<8x256xf32> -> vector<16x256xf32>
    %c0_102 = arith.constant 0 : index
    %c0_103 = arith.constant 0 : index
    %296 = vector.load %arg3[%c0_102, %c0_103] : memref<256x512xf32, #tpu.memory_space<vmem>>, vector<256x512xf32>
    %cst_104 = arith.constant dense<0.000000e+00> : vector<16x512xf32>
    %297 = tpu.matmul %295, %296, %cst_104 {dimension_numbers = #tpu.dot_dimension_numbers<[1], [0], [0], [1], [0, 0, 1, 1], [], []>} : vector<16x256xf32>, vector<256x512xf32>, vector<16x512xf32> -> vector<16x512xf32>
    %298 = tpu.concatenate %289, %290 in 0 : vector<8x512xf32>, vector<8x512xf32> -> vector<16x512xf32>
    %299 = arith.addf %297, %298 : vector<16x512xf32>
    %300 = vector.extract_strided_slice %299 {offsets = [0, 0], sizes = [16, 128], strides = [1, 1]} : vector<16x512xf32> to vector<16x128xf32>
    %301 = arith.negf %300 : vector<16x128xf32>
    %302 = math.exp %301 : vector<16x128xf32>
    %cst_105 = arith.constant 1.000000e+00 : f32
    %303 = vector.broadcast %cst_105 : f32 to vector<16x128xf32>
    %304 = arith.addf %303, %302 : vector<16x128xf32>
    %305 = arith.divf %303, %304 : vector<16x128xf32>
    %306 = vector.extract_strided_slice %299 {offsets = [0, 128], sizes = [16, 128], strides = [1, 1]} : vector<16x512xf32> to vector<16x128xf32>
    %307 = arith.negf %306 : vector<16x128xf32>
    %308 = math.exp %307 : vector<16x128xf32>
    %cst_106 = arith.constant 1.000000e+00 : f32
    %309 = vector.broadcast %cst_106 : f32 to vector<16x128xf32>
    %310 = arith.addf %309, %308 : vector<16x128xf32>
    %311 = arith.divf %309, %310 : vector<16x128xf32>
    %312 = vector.extract_strided_slice %299 {offsets = [0, 256], sizes = [16, 128], strides = [1, 1]} : vector<16x512xf32> to vector<16x128xf32>
    %313 = math.tanh %312 : vector<16x128xf32>
    %314 = vector.extract_strided_slice %299 {offsets = [0, 384], sizes = [16, 128], strides = [1, 1]} : vector<16x512xf32> to vector<16x128xf32>
    %315 = arith.negf %314 : vector<16x128xf32>
    %316 = math.exp %315 : vector<16x128xf32>
    %cst_107 = arith.constant 1.000000e+00 : f32
    %317 = vector.broadcast %cst_107 : f32 to vector<16x128xf32>
    %318 = arith.addf %317, %316 : vector<16x128xf32>
    %319 = arith.divf %317, %318 : vector<16x128xf32>
    %320 = arith.mulf %311, %282 : vector<16x128xf32>
    %321 = arith.mulf %305, %313 : vector<16x128xf32>
    %322 = arith.addf %320, %321 : vector<16x128xf32>
    %323 = math.tanh %322 : vector<16x128xf32>
    %324 = arith.mulf %319, %323 : vector<16x128xf32>
    %325 = vector.extract_strided_slice %324 {offsets = [0, 0], sizes = [8, 128], strides = [1, 1]} : vector<16x128xf32> to vector<8x128xf32>
    %c56_108 = arith.constant 56 : index
    %c0_109 = arith.constant 0 : index
    %326 = vector.load %arg11[%c56_108, %c0_109] : memref<64x256xf32, #tpu.memory_space<vmem>>, vector<8x128xf32>
    tpu.vector_store %arg11[%c56_108, %c0_109], %325 {strides = array<i32>} : memref<64x256xf32, #tpu.memory_space<vmem>>, vector<8x128xf32>,
    %327 = vector.extract_strided_slice %324 {offsets = [8, 0], sizes = [8, 128], strides = [1, 1]} : vector<16x128xf32> to vector<8x128xf32>
    %c0_110 = arith.constant 0 : index
    %c128_111 = arith.constant 128 : index
    %328 = vector.load %arg11[%c0_110, %c128_111] : memref<64x256xf32, #tpu.memory_space<vmem>>, vector<8x128xf32>
    tpu.vector_store %arg11[%c0_110, %c128_111], %327 {strides = array<i32>} : memref<64x256xf32, #tpu.memory_space<vmem>>, vector<8x128xf32>,
    %c0_112 = arith.constant 0 : index
    %c0_113 = arith.constant 0 : index
    %329 = vector.load %arg11[%c0_112, %c0_113] : memref<64x256xf32, #tpu.memory_space<vmem>>, vector<64x256xf32>
    %c0_114 = arith.constant 0 : index
    %c0_115 = arith.constant 0 : index
    %330 = vector.load %arg4[%c0_114, %c0_115] : memref<256x1024xf32, #tpu.memory_space<vmem>>, vector<256x1024xf32>
    %cst_116 = arith.constant dense<0.000000e+00> : vector<64x1024xf32>
    %331 = tpu.matmul %329, %330, %cst_116 {dimension_numbers = #tpu.dot_dimension_numbers<[1], [0], [0], [1], [0, 0, 1, 1], [], []>} : vector<64x256xf32>, vector<256x1024xf32>, vector<64x1024xf32> -> vector<64x1024xf32>
    %c0_117 = arith.constant 0 : index
    %c0_118 = arith.constant 0 : index
    %332 = vector.load %arg5[%c0_117, %c0_118] : memref<1x1024xf32, #tpu.memory_space<vmem>>, vector<1x1024xf32>
    %333 = vector.broadcast %332 : vector<1x1024xf32> to vector<64x1024xf32>
    %334 = arith.addf %331, %333 : vector<64x1024xf32>
    %c0_119 = arith.constant 0 : index
    %c0_120 = arith.constant 0 : index
    %335 = vector.load %arg10[%c0_119, %c0_120] : memref<64x1024xf32, #tpu.memory_space<vmem>>, vector<64x1024xf32>
    tpu.vector_store %arg10[%c0_119, %c0_120], %334 {strides = array<i32>} : memref<64x1024xf32, #tpu.memory_space<vmem>>, vector<64x1024xf32>,
    %c0_121 = arith.constant 0 : index
    %c0_122 = arith.constant 0 : index
    %336 = vector.load %arg10[%c0_121, %c0_122] : memref<64x1024xf32, #tpu.memory_space<vmem>>, vector<8x512xf32>
    %c56_123 = arith.constant 56 : index
    %c512_124 = arith.constant 512 : index
    %337 = vector.load %arg10[%c56_123, %c512_124] : memref<64x1024xf32, #tpu.memory_space<vmem>>, vector<8x512xf32>
    %338 = vector.extract_strided_slice %1 {offsets = [0, 0], sizes = [8, 128], strides = [1, 1]} : vector<16x128xf32> to vector<8x128xf32>
    %339 = tpu.concatenate %338, %0 in 1 : vector<8x128xf32>, vector<8x128xf32> -> vector<8x256xf32>
    %340 = vector.extract_strided_slice %1 {offsets = [8, 0], sizes = [8, 128], strides = [1, 1]} : vector<16x128xf32> to vector<8x128xf32>
    %341 = tpu.concatenate %0, %340 in 1 : vector<8x128xf32>, vector<8x128xf32> -> vector<8x256xf32>
    %342 = tpu.concatenate %339, %341 in 0 : vector<8x256xf32>, vector<8x256xf32> -> vector<16x256xf32>
    %c0_125 = arith.constant 0 : index
    %c0_126 = arith.constant 0 : index
    %343 = vector.load %arg6[%c0_125, %c0_126] : memref<256x512xf32, #tpu.memory_space<vmem>>, vector<256x512xf32>
    %cst_127 = arith.constant dense<0.000000e+00> : vector<16x512xf32>
    %344 = tpu.matmul %342, %343, %cst_127 {dimension_numbers = #tpu.dot_dimension_numbers<[1], [0], [0], [1], [0, 0, 1, 1], [], []>} : vector<16x256xf32>, vector<256x512xf32>, vector<16x512xf32> -> vector<16x512xf32>
    %345 = tpu.concatenate %336, %337 in 0 : vector<8x512xf32>, vector<8x512xf32> -> vector<16x512xf32>
    %346 = arith.addf %344, %345 : vector<16x512xf32>
    %347 = vector.extract_strided_slice %346 {offsets = [0, 0], sizes = [16, 128], strides = [1, 1]} : vector<16x512xf32> to vector<16x128xf32>
    %348 = arith.negf %347 : vector<16x128xf32>
    %349 = math.exp %348 : vector<16x128xf32>
    %cst_128 = arith.constant 1.000000e+00 : f32
    %350 = vector.broadcast %cst_128 : f32 to vector<16x128xf32>
    %351 = arith.addf %350, %349 : vector<16x128xf32>
    %352 = arith.divf %350, %351 : vector<16x128xf32>
    %353 = vector.extract_strided_slice %346 {offsets = [0, 128], sizes = [16, 128], strides = [1, 1]} : vector<16x512xf32> to vector<16x128xf32>
    %354 = arith.negf %353 : vector<16x128xf32>
    %355 = math.exp %354 : vector<16x128xf32>
    %cst_129 = arith.constant 1.000000e+00 : f32
    %356 = vector.broadcast %cst_129 : f32 to vector<16x128xf32>
    %357 = arith.addf %356, %355 : vector<16x128xf32>
    %358 = arith.divf %356, %357 : vector<16x128xf32>
    %359 = vector.extract_strided_slice %346 {offsets = [0, 256], sizes = [16, 128], strides = [1, 1]} : vector<16x512xf32> to vector<16x128xf32>
    %360 = math.tanh %359 : vector<16x128xf32>
    %361 = vector.extract_strided_slice %346 {offsets = [0, 384], sizes = [16, 128], strides = [1, 1]} : vector<16x512xf32> to vector<16x128xf32>
    %362 = arith.negf %361 : vector<16x128xf32>
    %363 = math.exp %362 : vector<16x128xf32>
    %cst_130 = arith.constant 1.000000e+00 : f32
    %364 = vector.broadcast %cst_130 : f32 to vector<16x128xf32>
    %365 = arith.addf %364, %363 : vector<16x128xf32>
    %366 = arith.divf %364, %365 : vector<16x128xf32>
    %367 = arith.mulf %358, %1 : vector<16x128xf32>
    %368 = arith.mulf %352, %360 : vector<16x128xf32>
    %369 = arith.addf %367, %368 : vector<16x128xf32>
    %370 = math.tanh %369 : vector<16x128xf32>
    %371 = arith.mulf %366, %370 : vector<16x128xf32>
    %372 = arith.addf %1, %371 : vector<16x128xf32>
    %c8_131 = arith.constant 8 : index
    %c0_132 = arith.constant 0 : index
    %373 = vector.load %arg10[%c8_131, %c0_132] : memref<64x1024xf32, #tpu.memory_space<vmem>>, vector<8x512xf32>
    %c48_133 = arith.constant 48 : index
    %c512_134 = arith.constant 512 : index
    %374 = vector.load %arg10[%c48_133, %c512_134] : memref<64x1024xf32, #tpu.memory_space<vmem>>, vector<8x512xf32>
    %375 = vector.extract_strided_slice %371 {offsets = [0, 0], sizes = [8, 128], strides = [1, 1]} : vector<16x128xf32> to vector<8x128xf32>
    %376 = tpu.concatenate %375, %0 in 1 : vector<8x128xf32>, vector<8x128xf32> -> vector<8x256xf32>
    %377 = vector.extract_strided_slice %371 {offsets = [8, 0], sizes = [8, 128], strides = [1, 1]} : vector<16x128xf32> to vector<8x128xf32>
    %378 = tpu.concatenate %0, %377 in 1 : vector<8x128xf32>, vector<8x128xf32> -> vector<8x256xf32>
    %379 = tpu.concatenate %376, %378 in 0 : vector<8x256xf32>, vector<8x256xf32> -> vector<16x256xf32>
    %c0_135 = arith.constant 0 : index
    %c0_136 = arith.constant 0 : index
    %380 = vector.load %arg6[%c0_135, %c0_136] : memref<256x512xf32, #tpu.memory_space<vmem>>, vector<256x512xf32>
    %cst_137 = arith.constant dense<0.000000e+00> : vector<16x512xf32>
    %381 = tpu.matmul %379, %380, %cst_137 {dimension_numbers = #tpu.dot_dimension_numbers<[1], [0], [0], [1], [0, 0, 1, 1], [], []>} : vector<16x256xf32>, vector<256x512xf32>, vector<16x512xf32> -> vector<16x512xf32>
    %382 = tpu.concatenate %373, %374 in 0 : vector<8x512xf32>, vector<8x512xf32> -> vector<16x512xf32>
    %383 = arith.addf %381, %382 : vector<16x512xf32>
    %384 = vector.extract_strided_slice %383 {offsets = [0, 0], sizes = [16, 128], strides = [1, 1]} : vector<16x512xf32> to vector<16x128xf32>
    %385 = arith.negf %384 : vector<16x128xf32>
    %386 = math.exp %385 : vector<16x128xf32>
    %cst_138 = arith.constant 1.000000e+00 : f32
    %387 = vector.broadcast %cst_138 : f32 to vector<16x128xf32>
    %388 = arith.addf %387, %386 : vector<16x128xf32>
    %389 = arith.divf %387, %388 : vector<16x128xf32>
    %390 = vector.extract_strided_slice %383 {offsets = [0, 128], sizes = [16, 128], strides = [1, 1]} : vector<16x512xf32> to vector<16x128xf32>
    %391 = arith.negf %390 : vector<16x128xf32>
    %392 = math.exp %391 : vector<16x128xf32>
    %cst_139 = arith.constant 1.000000e+00 : f32
    %393 = vector.broadcast %cst_139 : f32 to vector<16x128xf32>
    %394 = arith.addf %393, %392 : vector<16x128xf32>
    %395 = arith.divf %393, %394 : vector<16x128xf32>
    %396 = vector.extract_strided_slice %383 {offsets = [0, 256], sizes = [16, 128], strides = [1, 1]} : vector<16x512xf32> to vector<16x128xf32>
    %397 = math.tanh %396 : vector<16x128xf32>
    %398 = vector.extract_strided_slice %383 {offsets = [0, 384], sizes = [16, 128], strides = [1, 1]} : vector<16x512xf32> to vector<16x128xf32>
    %399 = arith.negf %398 : vector<16x128xf32>
    %400 = math.exp %399 : vector<16x128xf32>
    %cst_140 = arith.constant 1.000000e+00 : f32
    %401 = vector.broadcast %cst_140 : f32 to vector<16x128xf32>
    %402 = arith.addf %401, %400 : vector<16x128xf32>
    %403 = arith.divf %401, %402 : vector<16x128xf32>
    %404 = arith.mulf %395, %369 : vector<16x128xf32>
    %405 = arith.mulf %389, %397 : vector<16x128xf32>
    %406 = arith.addf %404, %405 : vector<16x128xf32>
    %407 = math.tanh %406 : vector<16x128xf32>
    %408 = arith.mulf %403, %407 : vector<16x128xf32>
    %409 = arith.addf %372, %408 : vector<16x128xf32>
    %c16_141 = arith.constant 16 : index
    %c0_142 = arith.constant 0 : index
    %410 = vector.load %arg10[%c16_141, %c0_142] : memref<64x1024xf32, #tpu.memory_space<vmem>>, vector<8x512xf32>
    %c40_143 = arith.constant 40 : index
    %c512_144 = arith.constant 512 : index
    %411 = vector.load %arg10[%c40_143, %c512_144] : memref<64x1024xf32, #tpu.memory_space<vmem>>, vector<8x512xf32>
    %412 = vector.extract_strided_slice %408 {offsets = [0, 0], sizes = [8, 128], strides = [1, 1]} : vector<16x128xf32> to vector<8x128xf32>
    %413 = tpu.concatenate %412, %0 in 1 : vector<8x128xf32>, vector<8x128xf32> -> vector<8x256xf32>
    %414 = vector.extract_strided_slice %408 {offsets = [8, 0], sizes = [8, 128], strides = [1, 1]} : vector<16x128xf32> to vector<8x128xf32>
    %415 = tpu.concatenate %0, %414 in 1 : vector<8x128xf32>, vector<8x128xf32> -> vector<8x256xf32>
    %416 = tpu.concatenate %413, %415 in 0 : vector<8x256xf32>, vector<8x256xf32> -> vector<16x256xf32>
    %c0_145 = arith.constant 0 : index
    %c0_146 = arith.constant 0 : index
    %417 = vector.load %arg6[%c0_145, %c0_146] : memref<256x512xf32, #tpu.memory_space<vmem>>, vector<256x512xf32>
    %cst_147 = arith.constant dense<0.000000e+00> : vector<16x512xf32>
    %418 = tpu.matmul %416, %417, %cst_147 {dimension_numbers = #tpu.dot_dimension_numbers<[1], [0], [0], [1], [0, 0, 1, 1], [], []>} : vector<16x256xf32>, vector<256x512xf32>, vector<16x512xf32> -> vector<16x512xf32>
    %419 = tpu.concatenate %410, %411 in 0 : vector<8x512xf32>, vector<8x512xf32> -> vector<16x512xf32>
    %420 = arith.addf %418, %419 : vector<16x512xf32>
    %421 = vector.extract_strided_slice %420 {offsets = [0, 0], sizes = [16, 128], strides = [1, 1]} : vector<16x512xf32> to vector<16x128xf32>
    %422 = arith.negf %421 : vector<16x128xf32>
    %423 = math.exp %422 : vector<16x128xf32>
    %cst_148 = arith.constant 1.000000e+00 : f32
    %424 = vector.broadcast %cst_148 : f32 to vector<16x128xf32>
    %425 = arith.addf %424, %423 : vector<16x128xf32>
    %426 = arith.divf %424, %425 : vector<16x128xf32>
    %427 = vector.extract_strided_slice %420 {offsets = [0, 128], sizes = [16, 128], strides = [1, 1]} : vector<16x512xf32> to vector<16x128xf32>
    %428 = arith.negf %427 : vector<16x128xf32>
    %429 = math.exp %428 : vector<16x128xf32>
    %cst_149 = arith.constant 1.000000e+00 : f32
    %430 = vector.broadcast %cst_149 : f32 to vector<16x128xf32>
    %431 = arith.addf %430, %429 : vector<16x128xf32>
    %432 = arith.divf %430, %431 : vector<16x128xf32>
    %433 = vector.extract_strided_slice %420 {offsets = [0, 256], sizes = [16, 128], strides = [1, 1]} : vector<16x512xf32> to vector<16x128xf32>
    %434 = math.tanh %433 : vector<16x128xf32>
    %435 = vector.extract_strided_slice %420 {offsets = [0, 384], sizes = [16, 128], strides = [1, 1]} : vector<16x512xf32> to vector<16x128xf32>
    %436 = arith.negf %435 : vector<16x128xf32>
    %437 = math.exp %436 : vector<16x128xf32>
    %cst_150 = arith.constant 1.000000e+00 : f32
    %438 = vector.broadcast %cst_150 : f32 to vector<16x128xf32>
    %439 = arith.addf %438, %437 : vector<16x128xf32>
    %440 = arith.divf %438, %439 : vector<16x128xf32>
    %441 = arith.mulf %432, %406 : vector<16x128xf32>
    %442 = arith.mulf %426, %434 : vector<16x128xf32>
    %443 = arith.addf %441, %442 : vector<16x128xf32>
    %444 = math.tanh %443 : vector<16x128xf32>
    %445 = arith.mulf %440, %444 : vector<16x128xf32>
    %446 = arith.addf %409, %445 : vector<16x128xf32>
    %c24_151 = arith.constant 24 : index
    %c0_152 = arith.constant 0 : index
    %447 = vector.load %arg10[%c24_151, %c0_152] : memref<64x1024xf32, #tpu.memory_space<vmem>>, vector<8x512xf32>
    %c32_153 = arith.constant 32 : index
    %c512_154 = arith.constant 512 : index
    %448 = vector.load %arg10[%c32_153, %c512_154] : memref<64x1024xf32, #tpu.memory_space<vmem>>, vector<8x512xf32>
    %449 = vector.extract_strided_slice %445 {offsets = [0, 0], sizes = [8, 128], strides = [1, 1]} : vector<16x128xf32> to vector<8x128xf32>
    %450 = tpu.concatenate %449, %0 in 1 : vector<8x128xf32>, vector<8x128xf32> -> vector<8x256xf32>
    %451 = vector.extract_strided_slice %445 {offsets = [8, 0], sizes = [8, 128], strides = [1, 1]} : vector<16x128xf32> to vector<8x128xf32>
    %452 = tpu.concatenate %0, %451 in 1 : vector<8x128xf32>, vector<8x128xf32> -> vector<8x256xf32>
    %453 = tpu.concatenate %450, %452 in 0 : vector<8x256xf32>, vector<8x256xf32> -> vector<16x256xf32>
    %c0_155 = arith.constant 0 : index
    %c0_156 = arith.constant 0 : index
    %454 = vector.load %arg6[%c0_155, %c0_156] : memref<256x512xf32, #tpu.memory_space<vmem>>, vector<256x512xf32>
    %cst_157 = arith.constant dense<0.000000e+00> : vector<16x512xf32>
    %455 = tpu.matmul %453, %454, %cst_157 {dimension_numbers = #tpu.dot_dimension_numbers<[1], [0], [0], [1], [0, 0, 1, 1], [], []>} : vector<16x256xf32>, vector<256x512xf32>, vector<16x512xf32> -> vector<16x512xf32>
    %456 = tpu.concatenate %447, %448 in 0 : vector<8x512xf32>, vector<8x512xf32> -> vector<16x512xf32>
    %457 = arith.addf %455, %456 : vector<16x512xf32>
    %458 = vector.extract_strided_slice %457 {offsets = [0, 0], sizes = [16, 128], strides = [1, 1]} : vector<16x512xf32> to vector<16x128xf32>
    %459 = arith.negf %458 : vector<16x128xf32>
    %460 = math.exp %459 : vector<16x128xf32>
    %cst_158 = arith.constant 1.000000e+00 : f32
    %461 = vector.broadcast %cst_158 : f32 to vector<16x128xf32>
    %462 = arith.addf %461, %460 : vector<16x128xf32>
    %463 = arith.divf %461, %462 : vector<16x128xf32>
    %464 = vector.extract_strided_slice %457 {offsets = [0, 128], sizes = [16, 128], strides = [1, 1]} : vector<16x512xf32> to vector<16x128xf32>
    %465 = arith.negf %464 : vector<16x128xf32>
    %466 = math.exp %465 : vector<16x128xf32>
    %cst_159 = arith.constant 1.000000e+00 : f32
    %467 = vector.broadcast %cst_159 : f32 to vector<16x128xf32>
    %468 = arith.addf %467, %466 : vector<16x128xf32>
    %469 = arith.divf %467, %468 : vector<16x128xf32>
    %470 = vector.extract_strided_slice %457 {offsets = [0, 256], sizes = [16, 128], strides = [1, 1]} : vector<16x512xf32> to vector<16x128xf32>
    %471 = math.tanh %470 : vector<16x128xf32>
    %472 = vector.extract_strided_slice %457 {offsets = [0, 384], sizes = [16, 128], strides = [1, 1]} : vector<16x512xf32> to vector<16x128xf32>
    %473 = arith.negf %472 : vector<16x128xf32>
    %474 = math.exp %473 : vector<16x128xf32>
    %cst_160 = arith.constant 1.000000e+00 : f32
    %475 = vector.broadcast %cst_160 : f32 to vector<16x128xf32>
    %476 = arith.addf %475, %474 : vector<16x128xf32>
    %477 = arith.divf %475, %476 : vector<16x128xf32>
    %478 = arith.mulf %469, %443 : vector<16x128xf32>
    %479 = arith.mulf %463, %471 : vector<16x128xf32>
    %480 = arith.addf %478, %479 : vector<16x128xf32>
    %481 = math.tanh %480 : vector<16x128xf32>
    %482 = arith.mulf %477, %481 : vector<16x128xf32>
    %483 = arith.addf %446, %482 : vector<16x128xf32>
    %c32_161 = arith.constant 32 : index
    %c0_162 = arith.constant 0 : index
    %484 = vector.load %arg10[%c32_161, %c0_162] : memref<64x1024xf32, #tpu.memory_space<vmem>>, vector<8x512xf32>
    %c24_163 = arith.constant 24 : index
    %c512_164 = arith.constant 512 : index
    %485 = vector.load %arg10[%c24_163, %c512_164] : memref<64x1024xf32, #tpu.memory_space<vmem>>, vector<8x512xf32>
    %486 = vector.extract_strided_slice %482 {offsets = [0, 0], sizes = [8, 128], strides = [1, 1]} : vector<16x128xf32> to vector<8x128xf32>
    %487 = tpu.concatenate %486, %0 in 1 : vector<8x128xf32>, vector<8x128xf32> -> vector<8x256xf32>
    %488 = vector.extract_strided_slice %482 {offsets = [8, 0], sizes = [8, 128], strides = [1, 1]} : vector<16x128xf32> to vector<8x128xf32>
    %489 = tpu.concatenate %0, %488 in 1 : vector<8x128xf32>, vector<8x128xf32> -> vector<8x256xf32>
    %490 = tpu.concatenate %487, %489 in 0 : vector<8x256xf32>, vector<8x256xf32> -> vector<16x256xf32>
    %c0_165 = arith.constant 0 : index
    %c0_166 = arith.constant 0 : index
    %491 = vector.load %arg6[%c0_165, %c0_166] : memref<256x512xf32, #tpu.memory_space<vmem>>, vector<256x512xf32>
    %cst_167 = arith.constant dense<0.000000e+00> : vector<16x512xf32>
    %492 = tpu.matmul %490, %491, %cst_167 {dimension_numbers = #tpu.dot_dimension_numbers<[1], [0], [0], [1], [0, 0, 1, 1], [], []>} : vector<16x256xf32>, vector<256x512xf32>, vector<16x512xf32> -> vector<16x512xf32>
    %493 = tpu.concatenate %484, %485 in 0 : vector<8x512xf32>, vector<8x512xf32> -> vector<16x512xf32>
    %494 = arith.addf %492, %493 : vector<16x512xf32>
    %495 = vector.extract_strided_slice %494 {offsets = [0, 0], sizes = [16, 128], strides = [1, 1]} : vector<16x512xf32> to vector<16x128xf32>
    %496 = arith.negf %495 : vector<16x128xf32>
    %497 = math.exp %496 : vector<16x128xf32>
    %cst_168 = arith.constant 1.000000e+00 : f32
    %498 = vector.broadcast %cst_168 : f32 to vector<16x128xf32>
    %499 = arith.addf %498, %497 : vector<16x128xf32>
    %500 = arith.divf %498, %499 : vector<16x128xf32>
    %501 = vector.extract_strided_slice %494 {offsets = [0, 128], sizes = [16, 128], strides = [1, 1]} : vector<16x512xf32> to vector<16x128xf32>
    %502 = arith.negf %501 : vector<16x128xf32>
    %503 = math.exp %502 : vector<16x128xf32>
    %cst_169 = arith.constant 1.000000e+00 : f32
    %504 = vector.broadcast %cst_169 : f32 to vector<16x128xf32>
    %505 = arith.addf %504, %503 : vector<16x128xf32>
    %506 = arith.divf %504, %505 : vector<16x128xf32>
    %507 = vector.extract_strided_slice %494 {offsets = [0, 256], sizes = [16, 128], strides = [1, 1]} : vector<16x512xf32> to vector<16x128xf32>
    %508 = math.tanh %507 : vector<16x128xf32>
    %509 = vector.extract_strided_slice %494 {offsets = [0, 384], sizes = [16, 128], strides = [1, 1]} : vector<16x512xf32> to vector<16x128xf32>
    %510 = arith.negf %509 : vector<16x128xf32>
    %511 = math.exp %510 : vector<16x128xf32>
    %cst_170 = arith.constant 1.000000e+00 : f32
    %512 = vector.broadcast %cst_170 : f32 to vector<16x128xf32>
    %513 = arith.addf %512, %511 : vector<16x128xf32>
    %514 = arith.divf %512, %513 : vector<16x128xf32>
    %515 = arith.mulf %506, %480 : vector<16x128xf32>
    %516 = arith.mulf %500, %508 : vector<16x128xf32>
    %517 = arith.addf %515, %516 : vector<16x128xf32>
    %518 = math.tanh %517 : vector<16x128xf32>
    %519 = arith.mulf %514, %518 : vector<16x128xf32>
    %520 = arith.addf %483, %519 : vector<16x128xf32>
    %c40_171 = arith.constant 40 : index
    %c0_172 = arith.constant 0 : index
    %521 = vector.load %arg10[%c40_171, %c0_172] : memref<64x1024xf32, #tpu.memory_space<vmem>>, vector<8x512xf32>
    %c16_173 = arith.constant 16 : index
    %c512_174 = arith.constant 512 : index
    %522 = vector.load %arg10[%c16_173, %c512_174] : memref<64x1024xf32, #tpu.memory_space<vmem>>, vector<8x512xf32>
    %523 = vector.extract_strided_slice %519 {offsets = [0, 0], sizes = [8, 128], strides = [1, 1]} : vector<16x128xf32> to vector<8x128xf32>
    %524 = tpu.concatenate %523, %0 in 1 : vector<8x128xf32>, vector<8x128xf32> -> vector<8x256xf32>
    %525 = vector.extract_strided_slice %519 {offsets = [8, 0], sizes = [8, 128], strides = [1, 1]} : vector<16x128xf32> to vector<8x128xf32>
    %526 = tpu.concatenate %0, %525 in 1 : vector<8x128xf32>, vector<8x128xf32> -> vector<8x256xf32>
    %527 = tpu.concatenate %524, %526 in 0 : vector<8x256xf32>, vector<8x256xf32> -> vector<16x256xf32>
    %c0_175 = arith.constant 0 : index
    %c0_176 = arith.constant 0 : index
    %528 = vector.load %arg6[%c0_175, %c0_176] : memref<256x512xf32, #tpu.memory_space<vmem>>, vector<256x512xf32>
    %cst_177 = arith.constant dense<0.000000e+00> : vector<16x512xf32>
    %529 = tpu.matmul %527, %528, %cst_177 {dimension_numbers = #tpu.dot_dimension_numbers<[1], [0], [0], [1], [0, 0, 1, 1], [], []>} : vector<16x256xf32>, vector<256x512xf32>, vector<16x512xf32> -> vector<16x512xf32>
    %530 = tpu.concatenate %521, %522 in 0 : vector<8x512xf32>, vector<8x512xf32> -> vector<16x512xf32>
    %531 = arith.addf %529, %530 : vector<16x512xf32>
    %532 = vector.extract_strided_slice %531 {offsets = [0, 0], sizes = [16, 128], strides = [1, 1]} : vector<16x512xf32> to vector<16x128xf32>
    %533 = arith.negf %532 : vector<16x128xf32>
    %534 = math.exp %533 : vector<16x128xf32>
    %cst_178 = arith.constant 1.000000e+00 : f32
    %535 = vector.broadcast %cst_178 : f32 to vector<16x128xf32>
    %536 = arith.addf %535, %534 : vector<16x128xf32>
    %537 = arith.divf %535, %536 : vector<16x128xf32>
    %538 = vector.extract_strided_slice %531 {offsets = [0, 128], sizes = [16, 128], strides = [1, 1]} : vector<16x512xf32> to vector<16x128xf32>
    %539 = arith.negf %538 : vector<16x128xf32>
    %540 = math.exp %539 : vector<16x128xf32>
    %cst_179 = arith.constant 1.000000e+00 : f32
    %541 = vector.broadcast %cst_179 : f32 to vector<16x128xf32>
    %542 = arith.addf %541, %540 : vector<16x128xf32>
    %543 = arith.divf %541, %542 : vector<16x128xf32>
    %544 = vector.extract_strided_slice %531 {offsets = [0, 256], sizes = [16, 128], strides = [1, 1]} : vector<16x512xf32> to vector<16x128xf32>
    %545 = math.tanh %544 : vector<16x128xf32>
    %546 = vector.extract_strided_slice %531 {offsets = [0, 384], sizes = [16, 128], strides = [1, 1]} : vector<16x512xf32> to vector<16x128xf32>
    %547 = arith.negf %546 : vector<16x128xf32>
    %548 = math.exp %547 : vector<16x128xf32>
    %cst_180 = arith.constant 1.000000e+00 : f32
    %549 = vector.broadcast %cst_180 : f32 to vector<16x128xf32>
    %550 = arith.addf %549, %548 : vector<16x128xf32>
    %551 = arith.divf %549, %550 : vector<16x128xf32>
    %552 = arith.mulf %543, %517 : vector<16x128xf32>
    %553 = arith.mulf %537, %545 : vector<16x128xf32>
    %554 = arith.addf %552, %553 : vector<16x128xf32>
    %555 = math.tanh %554 : vector<16x128xf32>
    %556 = arith.mulf %551, %555 : vector<16x128xf32>
    %557 = arith.addf %520, %556 : vector<16x128xf32>
    %c48_181 = arith.constant 48 : index
    %c0_182 = arith.constant 0 : index
    %558 = vector.load %arg10[%c48_181, %c0_182] : memref<64x1024xf32, #tpu.memory_space<vmem>>, vector<8x512xf32>
    %c8_183 = arith.constant 8 : index
    %c512_184 = arith.constant 512 : index
    %559 = vector.load %arg10[%c8_183, %c512_184] : memref<64x1024xf32, #tpu.memory_space<vmem>>, vector<8x512xf32>
    %560 = vector.extract_strided_slice %556 {offsets = [0, 0], sizes = [8, 128], strides = [1, 1]} : vector<16x128xf32> to vector<8x128xf32>
    %561 = tpu.concatenate %560, %0 in 1 : vector<8x128xf32>, vector<8x128xf32> -> vector<8x256xf32>
    %562 = vector.extract_strided_slice %556 {offsets = [8, 0], sizes = [8, 128], strides = [1, 1]} : vector<16x128xf32> to vector<8x128xf32>
    %563 = tpu.concatenate %0, %562 in 1 : vector<8x128xf32>, vector<8x128xf32> -> vector<8x256xf32>
    %564 = tpu.concatenate %561, %563 in 0 : vector<8x256xf32>, vector<8x256xf32> -> vector<16x256xf32>
    %c0_185 = arith.constant 0 : index
    %c0_186 = arith.constant 0 : index
    %565 = vector.load %arg6[%c0_185, %c0_186] : memref<256x512xf32, #tpu.memory_space<vmem>>, vector<256x512xf32>
    %cst_187 = arith.constant dense<0.000000e+00> : vector<16x512xf32>
    %566 = tpu.matmul %564, %565, %cst_187 {dimension_numbers = #tpu.dot_dimension_numbers<[1], [0], [0], [1], [0, 0, 1, 1], [], []>} : vector<16x256xf32>, vector<256x512xf32>, vector<16x512xf32> -> vector<16x512xf32>
    %567 = tpu.concatenate %558, %559 in 0 : vector<8x512xf32>, vector<8x512xf32> -> vector<16x512xf32>
    %568 = arith.addf %566, %567 : vector<16x512xf32>
    %569 = vector.extract_strided_slice %568 {offsets = [0, 0], sizes = [16, 128], strides = [1, 1]} : vector<16x512xf32> to vector<16x128xf32>
    %570 = arith.negf %569 : vector<16x128xf32>
    %571 = math.exp %570 : vector<16x128xf32>
    %cst_188 = arith.constant 1.000000e+00 : f32
    %572 = vector.broadcast %cst_188 : f32 to vector<16x128xf32>
    %573 = arith.addf %572, %571 : vector<16x128xf32>
    %574 = arith.divf %572, %573 : vector<16x128xf32>
    %575 = vector.extract_strided_slice %568 {offsets = [0, 128], sizes = [16, 128], strides = [1, 1]} : vector<16x512xf32> to vector<16x128xf32>
    %576 = arith.negf %575 : vector<16x128xf32>
    %577 = math.exp %576 : vector<16x128xf32>
    %cst_189 = arith.constant 1.000000e+00 : f32
    %578 = vector.broadcast %cst_189 : f32 to vector<16x128xf32>
    %579 = arith.addf %578, %577 : vector<16x128xf32>
    %580 = arith.divf %578, %579 : vector<16x128xf32>
    %581 = vector.extract_strided_slice %568 {offsets = [0, 256], sizes = [16, 128], strides = [1, 1]} : vector<16x512xf32> to vector<16x128xf32>
    %582 = math.tanh %581 : vector<16x128xf32>
    %583 = vector.extract_strided_slice %568 {offsets = [0, 384], sizes = [16, 128], strides = [1, 1]} : vector<16x512xf32> to vector<16x128xf32>
    %584 = arith.negf %583 : vector<16x128xf32>
    %585 = math.exp %584 : vector<16x128xf32>
    %cst_190 = arith.constant 1.000000e+00 : f32
    %586 = vector.broadcast %cst_190 : f32 to vector<16x128xf32>
    %587 = arith.addf %586, %585 : vector<16x128xf32>
    %588 = arith.divf %586, %587 : vector<16x128xf32>
    %589 = arith.mulf %580, %554 : vector<16x128xf32>
    %590 = arith.mulf %574, %582 : vector<16x128xf32>
    %591 = arith.addf %589, %590 : vector<16x128xf32>
    %592 = math.tanh %591 : vector<16x128xf32>
    %593 = arith.mulf %588, %592 : vector<16x128xf32>
    %594 = arith.addf %557, %593 : vector<16x128xf32>
    %c56_191 = arith.constant 56 : index
    %c0_192 = arith.constant 0 : index
    %595 = vector.load %arg10[%c56_191, %c0_192] : memref<64x1024xf32, #tpu.memory_space<vmem>>, vector<8x512xf32>
    %c0_193 = arith.constant 0 : index
    %c512_194 = arith.constant 512 : index
    %596 = vector.load %arg10[%c0_193, %c512_194] : memref<64x1024xf32, #tpu.memory_space<vmem>>, vector<8x512xf32>
    %597 = vector.extract_strided_slice %593 {offsets = [0, 0], sizes = [8, 128], strides = [1, 1]} : vector<16x128xf32> to vector<8x128xf32>
    %598 = tpu.concatenate %597, %0 in 1 : vector<8x128xf32>, vector<8x128xf32> -> vector<8x256xf32>
    %599 = vector.extract_strided_slice %593 {offsets = [8, 0], sizes = [8, 128], strides = [1, 1]} : vector<16x128xf32> to vector<8x128xf32>
    %600 = tpu.concatenate %0, %599 in 1 : vector<8x128xf32>, vector<8x128xf32> -> vector<8x256xf32>
    %601 = tpu.concatenate %598, %600 in 0 : vector<8x256xf32>, vector<8x256xf32> -> vector<16x256xf32>
    %c0_195 = arith.constant 0 : index
    %c0_196 = arith.constant 0 : index
    %602 = vector.load %arg6[%c0_195, %c0_196] : memref<256x512xf32, #tpu.memory_space<vmem>>, vector<256x512xf32>
    %cst_197 = arith.constant dense<0.000000e+00> : vector<16x512xf32>
    %603 = tpu.matmul %601, %602, %cst_197 {dimension_numbers = #tpu.dot_dimension_numbers<[1], [0], [0], [1], [0, 0, 1, 1], [], []>} : vector<16x256xf32>, vector<256x512xf32>, vector<16x512xf32> -> vector<16x512xf32>
    %604 = tpu.concatenate %595, %596 in 0 : vector<8x512xf32>, vector<8x512xf32> -> vector<16x512xf32>
    %605 = arith.addf %603, %604 : vector<16x512xf32>
    %606 = vector.extract_strided_slice %605 {offsets = [0, 0], sizes = [16, 128], strides = [1, 1]} : vector<16x512xf32> to vector<16x128xf32>
    %607 = arith.negf %606 : vector<16x128xf32>
    %608 = math.exp %607 : vector<16x128xf32>
    %cst_198 = arith.constant 1.000000e+00 : f32
    %609 = vector.broadcast %cst_198 : f32 to vector<16x128xf32>
    %610 = arith.addf %609, %608 : vector<16x128xf32>
    %611 = arith.divf %609, %610 : vector<16x128xf32>
    %612 = vector.extract_strided_slice %605 {offsets = [0, 128], sizes = [16, 128], strides = [1, 1]} : vector<16x512xf32> to vector<16x128xf32>
    %613 = arith.negf %612 : vector<16x128xf32>
    %614 = math.exp %613 : vector<16x128xf32>
    %cst_199 = arith.constant 1.000000e+00 : f32
    %615 = vector.broadcast %cst_199 : f32 to vector<16x128xf32>
    %616 = arith.addf %615, %614 : vector<16x128xf32>
    %617 = arith.divf %615, %616 : vector<16x128xf32>
    %618 = vector.extract_strided_slice %605 {offsets = [0, 256], sizes = [16, 128], strides = [1, 1]} : vector<16x512xf32> to vector<16x128xf32>
    %619 = math.tanh %618 : vector<16x128xf32>
    %620 = vector.extract_strided_slice %605 {offsets = [0, 384], sizes = [16, 128], strides = [1, 1]} : vector<16x512xf32> to vector<16x128xf32>
    %621 = arith.negf %620 : vector<16x128xf32>
    %622 = math.exp %621 : vector<16x128xf32>
    %cst_200 = arith.constant 1.000000e+00 : f32
    %623 = vector.broadcast %cst_200 : f32 to vector<16x128xf32>
    %624 = arith.addf %623, %622 : vector<16x128xf32>
    %625 = arith.divf %623, %624 : vector<16x128xf32>
    %626 = arith.mulf %617, %591 : vector<16x128xf32>
    %627 = arith.mulf %611, %619 : vector<16x128xf32>
    %628 = arith.addf %626, %627 : vector<16x128xf32>
    %629 = math.tanh %628 : vector<16x128xf32>
    %630 = arith.mulf %625, %629 : vector<16x128xf32>
    %631 = arith.addf %594, %630 : vector<16x128xf32>
    %632 = vector.extract_strided_slice %631 {offsets = [0, 0], sizes = [8, 128], strides = [1, 1]} : vector<16x128xf32> to vector<8x128xf32>
    %633 = vector.extract_strided_slice %631 {offsets = [8, 0], sizes = [8, 128], strides = [1, 1]} : vector<16x128xf32> to vector<8x128xf32>
    %634 = tpu.concatenate %632, %633 in 1 : vector<8x128xf32>, vector<8x128xf32> -> vector<8x256xf32>
    %cst_201 = arith.constant 1.250000e-01 : f32
    %635 = vector.broadcast %cst_201 : f32 to vector<8x256xf32>
    %636 = arith.mulf %634, %635 : vector<8x256xf32>
    %c0_202 = arith.constant 0 : index
    %c0_203 = arith.constant 0 : index
    %637 = vector.load %arg7[%c0_202, %c0_203] : memref<256x128xf32, #tpu.memory_space<vmem>>, vector<256x128xf32>
    %cst_204 = arith.constant dense<0.000000e+00> : vector<8x128xf32>
    %638 = tpu.matmul %636, %637, %cst_204 {dimension_numbers = #tpu.dot_dimension_numbers<[1], [0], [0], [1], [0, 0, 1, 1], [], []>} : vector<8x256xf32>, vector<256x128xf32>, vector<8x128xf32> -> vector<8x128xf32>
    %c0_205 = arith.constant 0 : index
    %c0_206 = arith.constant 0 : index
    %639 = vector.load %arg8[%c0_205, %c0_206] : memref<1x128xf32, #tpu.memory_space<vmem>>, vector<1x128xf32>
    %640 = vector.broadcast %639 : vector<1x128xf32> to vector<8x128xf32>
    %641 = arith.addf %638, %640 : vector<8x128xf32>
    %c0_207 = arith.constant 0 : index
    %c0_208 = arith.constant 0 : index
    %642 = vector.load %arg9[%c0_207, %c0_208] : memref<8x128xf32, #tpu.memory_space<vmem>>, vector<8x128xf32>
    tpu.vector_store %arg9[%c0_207, %c0_208], %641 {strides = array<i32>} : memref<8x128xf32, #tpu.memory_space<vmem>>, vector<8x128xf32>,
    return
  }
}

</mosaic_0001>

<bundles_post_ra>
// kernel: tpu_custom_call.1
= control target key start
LH: loop header
LB: loop body
LE: loop exit
PB: predicated region body
PF: predicated region fallthrough
CT: control target
= control target key end

     0   :  { %14 = vsyncpa [#allocation5], 0  ;;  %s12386_s0 = inlined_call_operand.hbm [shape: f32[64,128], index: 0, kind: input, shape index: {}]   ;;  %s12387_s1 = inlined_call_operand.hbm [shape: f32[128,1024], index: 1, kind: input, shape index: {}]   ;;  %s12388_s2 = inlined_call_operand.hbm [shape: f32[1,1024], index: 2, kind: input, shape index: {}]   ;;  %s12389_s3 = inlined_call_operand.hbm [shape: f32[256,512], index: 3, kind: input, shape index: {}]   ;;  %s12390_s4 = inlined_call_operand.hbm [shape: f32[256,1024], index: 4, kind: input, shape index: {}]   ;;  %s12391_s5 = inlined_call_operand.vmem [shape: f32[1,1024], index: 5, kind: input, shape index: {}]   ;;  %s12392_s6 = inlined_call_operand.hbm [shape: f32[256,512], index: 6, kind: input, shape index: {}]   ;;  %s12393_s7 = inlined_call_operand.hbm [shape: f32[256,128], index: 7, kind: input, shape index: {}]   ;;  %s12394_s8 = inlined_call_operand.vmem [shape: f32[1,128], index: 8, kind: input, shape index: {}]   ;;  %s12395_s9 = inlined_call_operand.hbm [shape: f32[8,128], index: 9, kind: output, shape index: {}]  }
   0x1   :  { %15 = vsyncpa [#allocation8], 0 }
   0x2   :  { %16 = vsyncpa [#allocation11], 0 }
   0x3   :  { %17 = vsyncpa [#allocation14], 0 }
   0x4   :  { %18 = vsyncpa [#allocation6], 0  ;;  %s9889_s30 = smov [#allocation7]   ;;  %s9703_s13 = scalar_lea.hbm %s12387_s1, 16384 }
   0x5   :  { %s36_s10 = sshll.u32 %s9889_s30, 4  ;;  %p9704_p0 = scmp.ne.s32.totalorder %s12387_s1, %s9703_s13  ;;  %s37_s10 = int_to_ptr.vmem [resolvable:$true] %s36_s10 }
   0x6   :  { %p9707_p1 = scmp.lt.u32.totalorder %s9703_s13, %s12387_s1 }
   0x8   :  { %p9709_p2 = pnand %p9707_p1, %p9704_p0 }
   0xa   :  { %9712 = shalt.err (!%p9709_p2)
}
   0xb   :  { %s9713_s18 = scalar_lea.vmem %s37_s10, 16384  ;;  %p9718_p4 = scmp.lt.s32.totalorder %s37_s10, %s37_s10 }
   0xc   :  { %p9714_p3 = scmp.ne.s32.totalorder %s37_s10, %s9713_s18  ;;  %p9719_p5 = scmp.lt.s32.totalorder %s9713_s18, %s9713_s18 }
   0xe   :  { %p9720_p6 = por %p9719_p5, %p9718_p4 }
  0x10   :  { %p9721_p7 = pnand %p9720_p6, %p9714_p3 }
  0x12   :  { %9724 = shalt.err (!%p9721_p7)
}
  0x13   :  { %s9890_s19 = smov 1024   ;;  %s9891_s20 = smov 64  }
  0x14   :  { %42 = dma.hbm_to_vmem [thread:$0]  %s12387_s1, 16384, %s37_s10, [#allocation8], %s9890_s19, %s9890_s19, %s9891_s20  }
  0x15   :  { %s9892_s23 = smov [#allocation10]   ;;  %s9725_s27 = scalar_lea.hbm %s12389_s3, 16384 }
  0x16   :  { %s58_s24 = sshll.u32 %s9892_s23, 4  ;;  %p9726_p8 = scmp.ne.s32.totalorder %s12389_s3, %s9725_s27  ;;  %s59_s24 = int_to_ptr.vmem [resolvable:$true] %s58_s24 }
  0x17   :  { %p9729_p9 = scmp.lt.u32.totalorder %s9725_s27, %s12389_s3 }
  0x19   :  { %p9731_p10 = pnand %p9729_p9, %p9726_p8 }
  0x1b   :  { %9734 = shalt.err (!%p9731_p10)
}
  0x1c   :  { %s9735_s12 = scalar_lea.vmem %s59_s24, 16384  ;;  %p9740_p12 = scmp.lt.s32.totalorder %s59_s24, %s59_s24 }
  0x1d   :  { %p9736_p11 = scmp.ne.s32.totalorder %s59_s24, %s9735_s12  ;;  %p9741_p13 = scmp.lt.s32.totalorder %s9735_s12, %s9735_s12 }
  0x1f   :  { %p9742_p0 = por %p9741_p13, %p9740_p12 }
  0x21   :  { %p9743_p1 = pnand %p9742_p0, %p9736_p11 }
  0x23   :  { %9746 = shalt.err (!%p9743_p1)
}
  0x24   :  { %s9893_s1 = smov 512   ;;  %s9894_s10 = smov 32  }
  0x25   :  { %64 = dma.hbm_to_vmem [thread:$0]  %s12389_s3, 16384, %s59_s24, [#allocation11], %s9893_s1, %s9893_s1, %s9894_s10  }
  0x26   :  { %s9895_s15 = smov [#allocation13]   ;;  %s9896_s17 = smov [#allocation4]  }
  0x27   :  { %s84_s16 = sshll.u32 %s9895_s15, 4  ;;  %s24_s18 = sshll.u32 %s9896_s17, 4  ;;  %s85_s16 = int_to_ptr.vmem [resolvable:$true] %s84_s16  ;;  %s9981_s18 = int_to_ptr.vmem [resolvable:$true] %s24_s18 }
  0x28   :  { %s9747_s23 = scalar_lea.hbm %s12392_s6, 16384 }
  0x29   :  { %p9748_p2 = scmp.ne.s32.totalorder %s12392_s6, %s9747_s23  ;;  %p9751_p3 = scmp.lt.u32.totalorder %s9747_s23, %s12392_s6 }
  0x2b   :  { %p9753_p4 = pnand %p9751_p3, %p9748_p2 }
  0x2d   :  { %9756 = shalt.err (!%p9753_p4)
}
  0x2e   :  { %s9757_s3 = scalar_lea.vmem %s85_s16, 16384  ;;  %p9762_p6 = scmp.lt.s32.totalorder %s85_s16, %s85_s16 }
  0x2f   :  { %p9758_p5 = scmp.ne.s32.totalorder %s85_s16, %s9757_s3  ;;  %p9763_p7 = scmp.lt.s32.totalorder %s9757_s3, %s9757_s3 }
  0x31   :  { %p9764_p8 = por %p9763_p7, %p9762_p6 }
  0x33   :  { %p9765_p9 = pnand %p9764_p8, %p9758_p5 }
  0x35   :  { %9768 = shalt.err (!%p9765_p9)
}
  0x36   :  { %90 = dma.hbm_to_vmem [thread:$0]  %s12392_s6, 16384, %s85_s16, [#allocation14], %s9893_s1, %s9893_s1, %s9894_s10  }
  0x37   :  { %s9769_s12 = scalar_lea.hbm %s12386_s0, 1024 }
  0x38   :  { %p9770_p10 = scmp.ne.s32.totalorder %s12386_s0, %s9769_s12  ;;  %p9773_p11 = scmp.lt.u32.totalorder %s9769_s12, %s12386_s0 }
  0x3a   :  { %p9775_p12 = pnand %p9773_p11, %p9770_p10 }
  0x3c   :  { %9778 = shalt.err (!%p9775_p12)
}
  0x3d   :  { %s9779_s21 = scalar_lea.vmem %s9981_s18, 1024  ;;  %p9784_p0 = scmp.lt.s32.totalorder %s9981_s18, %s9981_s18 }
  0x3e   :  { %p9780_p13 = scmp.ne.s32.totalorder %s9981_s18, %s9779_s21  ;;  %p9785_p1 = scmp.lt.s32.totalorder %s9779_s21, %s9779_s21 }
  0x40   :  { %p9786_p2 = por %p9785_p1, %p9784_p0 }
  0x42   :  { %p9787_p3 = pnand %p9786_p2, %p9780_p13 }
  0x44   :  { %9790 = shalt.err (!%p9787_p3)
}
  0x45   :  { %s9897_s6 = smov 128   ;;  %s9898_s1 = smov 8  }
  0x46   :  { %30 = dma.hbm_to_vmem [thread:$0]  %s12386_s0, 1024, %s9981_s18, [#allocation5], %s9897_s6, %s9897_s6, %s9898_s1  }
  0x47   :  { %s9899_s22 = smov [#allocation9]   ;;  %s9900_s25 = smov [#allocation12]  }
  0x48   :  { %s49_s23 = sshll.u32 %s9899_s22, 4  ;;  %s70_s26 = sshll.u32 %s9900_s25, 4  ;;  %s50_s23 = int_to_ptr.vmem [resolvable:$true] %s49_s23  ;;  %s10015_s26 = int_to_ptr.vmem [resolvable:$true] %s70_s26 }
  0x49   :  { %s9791_s3 = scalar_lea.hbm %s12388_s2, 128 }
  0x4a   :  { %p9792_p4 = scmp.ne.s32.totalorder %s12388_s2, %s9791_s3  ;;  %p9795_p5 = scmp.lt.u32.totalorder %s9791_s3, %s12388_s2 }
  0x4c   :  { %p9797_p6 = pnand %p9795_p5, %p9792_p4 }
  0x4e   :  { %9800 = shalt.err (!%p9797_p6)
}
  0x4f   :  { %s9801_s0 = scalar_lea.vmem %s50_s23, 128  ;;  %p9806_p8 = scmp.lt.s32.totalorder %s50_s23, %s50_s23 }
  0x50   :  { %p9802_p7 = scmp.ne.s32.totalorder %s50_s23, %s9801_s0  ;;  %p9807_p9 = scmp.lt.s32.totalorder %s9801_s0, %s9801_s0 }
  0x52   :  { %p9808_p10 = por %p9807_p9, %p9806_p8 }
  0x54   :  { %p9809_p11 = pnand %p9808_p10, %p9802_p7 }
  0x56   :  { %9812 = shalt.err (!%p9809_p11)
}
  0x57   :  { %52 = dma.hbm_to_vmem [thread:$0]  %s12388_s2, 128, %s50_s23, [#allocation8]  }
  0x58   :  { %s9813_s15 = scalar_lea.hbm %s12390_s4, 32768 }
  0x59   :  { %p9814_p12 = scmp.ne.s32.totalorder %s12390_s4, %s9813_s15  ;;  %p9817_p13 = scmp.lt.u32.totalorder %s9813_s15, %s12390_s4 }
  0x5b   :  { %p9819_p0 = pnand %p9817_p13, %p9814_p12 }
  0x5d   :  { %9822 = shalt.err (!%p9819_p0)
}
  0x5e   :  { %s9823_s22 = scalar_lea.vmem %s10015_s26, 32768  ;;  %p9828_p2 = scmp.lt.s32.totalorder %s10015_s26, %s10015_s26 }
  0x5f   :  { %p9824_p1 = scmp.ne.s32.totalorder %s10015_s26, %s9823_s22  ;;  %p9829_p3 = scmp.lt.s32.totalorder %s9823_s22, %s9823_s22 }
  0x61   :  { %p9830_p4 = por %p9829_p3, %p9828_p2 }
  0x63   :  { %p9831_p5 = pnand %p9830_p4, %p9824_p1 }
  0x65   :  { %9834 = shalt.err (!%p9831_p5)
}
  0x66   :  { %76 = dma.hbm_to_vmem [thread:$0]  %s12390_s4, 32768, %s10015_s26, [#allocation11], %s9890_s19, %s9890_s19, %s9891_s20  }
  0x67   :  { %s9901_s25 = smov [#allocation15]   ;;  %s9835_s24 = scalar_lea.hbm %s12393_s7, 4096 }
  0x68   :  { %s96_s27 = sshll.u32 %s9901_s25, 4  ;;  %p9836_p6 = scmp.ne.s32.totalorder %s12393_s7, %s9835_s24  ;;  %s97_s27 = int_to_ptr.vmem [resolvable:$true] %s96_s27 }
  0x69   :  { %p9839_p7 = scmp.lt.u32.totalorder %s9835_s24, %s12393_s7 }
  0x6b   :  { %p9841_p8 = pnand %p9839_p7, %p9836_p6 }
  0x6d   :  { %9844 = shalt.err (!%p9841_p8)
}
  0x6e   :  { %s9845_s18 = scalar_lea.vmem %s97_s27, 4096  ;;  %p9850_p10 = scmp.lt.s32.totalorder %s97_s27, %s97_s27 }
  0x6f   :  { %p9846_p9 = scmp.ne.s32.totalorder %s97_s27, %s9845_s18  ;;  %p9851_p11 = scmp.lt.s32.totalorder %s9845_s18, %s9845_s18 }
  0x71   :  { %p9852_p12 = por %p9851_p11, %p9850_p10 }
  0x73   :  { %p9853_p13 = pnand %p9852_p12, %p9846_p9 }
  0x75   :  { %9856 = shalt.err (!%p9853_p13)
}
  0x76   :  { %102 = dma.hbm_to_vmem [thread:$0]  %s12393_s7, 4096, %s97_s27, [#allocation14], %s9897_s6, %s9897_s6, %s9898_s1  }
  0x77   :  { %9879 = dma.done.wait [#allocation5], 1024  }
  0x78   :  { %9880 = vsyncadd [#allocation5], 4294966272 }
  0x79   :  { %9881 = dma.done.wait [#allocation8], 16512  }
  0x7a   :  { %9882 = vsyncadd [#allocation8], 4294950784 }
  0x7b   :  { %9883 = dma.done.wait [#allocation11], 49152  }
  0x7c   :  { %9884 = vsyncadd [#allocation11], 4294918144 }
  0x7d   :  { %9885 = dma.done.wait [#allocation14], 20480  }
  0x7e   :  { %9886 = vsyncadd [#allocation14], 4294946816  ;;  %v12396_v0 = vmov 0.0   ;;  %v135_v1 = vld [vmem:[#allocation7 + $0x8] sm:$0xff]  ;;  %v137_v3 = vld [vmem:[#allocation7 + $0x18] sm:$0xff]  ;;  %s9903_s1 = smov [#allocation16]  }
  0x7f   :  { %368 = vmatprep.mubr.f32.mxu0 %v12396_v0  ;;  %481 = vmatprep.mubr.f32.mxu1 %v12396_v0  ;;  %v143_v2 = vld [vmem:[#allocation7 + $0x48] sm:$0xff]  ;;  %v145_v5 = vld [vmem:[#allocation7 + $0x58] sm:$0xff]  ;;  %v134_v6 = vld [vmem:[#allocation7] sm:$0xff]  ;;  %s6312_s26 = sshll.u32 %s9903_s1, 4  ;;  %s6313_s26 = int_to_ptr.vmem [resolvable:$true] %s6312_s26 }
  0x80   :  { %v6456_v4 = vpack.c.bf16 %v143_v2, %v135_v1  ;;  %v142_v7 = vld [vmem:[#allocation7 + $0x40] sm:$0xff]  ;;  %v6488_v8 = vpack.c.bf16 %v145_v5, %v137_v3  ;;  %v136_v10 = vld [vmem:[#allocation7 + $0x10] sm:$0xff]  ;;  %v151_v12 = vld [vmem:[#allocation7 + $0x88] sm:$0xff]  ;;  %s9857_s12 = scalar_lea.vmem %s6313_s26, 128  ;;  %p9862_p1 = scmp.lt.s32.totalorder %s6313_s26, %s6313_s26 }
  0x81   :  { %v6458_v9 = vpack.c.bf16 %v142_v7, %v134_v6  ;;  %v144_v11 = vld [vmem:[#allocation7 + $0x50] sm:$0xff]  ;;  %v159_v14 = vld [vmem:[#allocation7 + $0xc8] sm:$0xff]  ;;  %v153_v15 = vld [vmem:[#allocation7 + $0x98] sm:$0xff]  ;;  %p9858_p0 = scmp.ne.s32.totalorder %s6313_s26, %s9857_s12  ;;  %p9863_p2 = scmp.lt.s32.totalorder %s9857_s12, %s9857_s12 }
  0x82   :  { %6457 = vmatprep.subr.bf16.mxu0 %v6456_v4  ;;  %v6490_v13 = vpack.c.bf16 %v144_v11, %v136_v10  ;;  %v161_v16 = vld [vmem:[#allocation7 + $0xd8] sm:$0xff]  ;;  %6489 = vmatprep.subr.bf16.mxu1 %v6488_v8  ;;  %v6460_v17 = vpack.c.bf16 %v159_v14, %v151_v12  ;;  %v150_v19 = vld [vmem:[#allocation7 + $0x80] sm:$0xff]  ;;  %v152_v21 = vld [vmem:[#allocation7 + $0x90] sm:$0xff] }
  0x83   :  { %6459 = vmatpush1.bf16.msra.mxu0 %v6458_v9  ;;  %v6492_v18 = vpack.c.bf16 %v161_v16, %v153_v15  ;;  %v158_v20 = vld [vmem:[#allocation7 + $0xc0] sm:$0xff]  ;;  %v160_v23 = vld [vmem:[#allocation7 + $0xd0] sm:$0xff]  ;;  %v167_v24 = vld [vmem:[#allocation7 + $0x108] sm:$0xff]  ;;  %p9864_p3 = por %p9863_p2, %p9862_p1 }
  0x84   :  { %6491 = vmatpush1.bf16.msra.mxu1 %v6490_v13  ;;  %v6462_v22 = vpack.c.bf16 %v158_v20, %v150_v19  ;;  %v175_v25 = vld [vmem:[#allocation7 + $0x148] sm:$0xff]  ;;  %6461 = vmatprep.subr.bf16.mxu0 %v6460_v17  ;;  %v6494_v26 = vpack.c.bf16 %v160_v23, %v152_v21  ;;  %v169_v28 = vld [vmem:[#allocation7 + $0x118] sm:$0xff]  ;;  %v166_v30 = vld [vmem:[#allocation7 + $0x100] sm:$0xff] }
  0x85   :  { %6493 = vmatprep.subr.bf16.mxu1 %v6492_v18  ;;  %v6464_v27 = vpack.c.bf16 %v175_v25, %v167_v24  ;;  %v177_v29 = vld [vmem:[#allocation7 + $0x158] sm:$0xff]  ;;  %v174_v32 = vld [vmem:[#allocation7 + $0x140] sm:$0xff]  ;;  %v168_v33 = vld [vmem:[#allocation7 + $0x110] sm:$0xff]  ;;  %p9865_p4 = pnand %p9864_p3, %p9858_p0 }
  0x86   :  { %v6496_v31 = vpack.c.bf16 %v177_v29, %v169_v28  ;;  %v176_v34 = vld [vmem:[#allocation7 + $0x150] sm:$0xff]  ;;  %v6466_v35 = vpack.c.bf16 %v174_v32, %v166_v30  ;;  %v183_v36 = vld [vmem:[#allocation7 + $0x188] sm:$0xff]  ;;  %v185_v38 = vld [vmem:[#allocation7 + $0x198] sm:$0xff] }
  0x87   :  { %6463 = vmatpush1.bf16.msra.mxu0 %v6462_v22  ;;  %v191_v37 = vld [vmem:[#allocation7 + $0x1c8] sm:$0xff]  ;;  %v6498_v39 = vpack.c.bf16 %v176_v34, %v168_v33  ;;  %v193_v41 = vld [vmem:[#allocation7 + $0x1d8] sm:$0xff]  ;;  %v182_v42 = vld [vmem:[#allocation7 + $0x180] sm:$0xff] }
  0x88   :  { %6495 = vmatpush1.bf16.msra.mxu1 %v6494_v26  ;;  %6465 = vmatprep.subr.bf16.mxu0 %v6464_v27  ;;  %v6468_v40 = vpack.c.bf16 %v191_v37, %v183_v36  ;;  %v190_v43 = vld [vmem:[#allocation7 + $0x1c0] sm:$0xff]  ;;  %v6500_v44 = vpack.c.bf16 %v193_v41, %v185_v38  ;;  %v184_v45 = vld [vmem:[#allocation7 + $0x190] sm:$0xff]  ;;  %v199_v47 = vld [vmem:[#allocation7 + $0x208] sm:$0xff] }
  0x89   :  { %6497 = vmatprep.subr.bf16.mxu1 %v6496_v31  ;;  %v192_v46 = vld [vmem:[#allocation7 + $0x1d0] sm:$0xff]  ;;  %v207_v48 = vld [vmem:[#allocation7 + $0x248] sm:$0xff]  ;;  %v201_v49 = vld [vmem:[#allocation7 + $0x218] sm:$0xff]  ;;  %v6470_v51 = vpack.c.bf16 %v190_v43, %v182_v42 }
  0x8a   :  { %v209_v50 = vld [vmem:[#allocation7 + $0x258] sm:$0xff]  ;;  %v6502_v52 = vpack.c.bf16 %v192_v46, %v184_v45  ;;  %v6472_v53 = vpack.c.bf16 %v207_v48, %v199_v47  ;;  %v198_v54 = vld [vmem:[#allocation7 + $0x200] sm:$0xff]  ;;  %v200_v56 = vld [vmem:[#allocation7 + $0x210] sm:$0xff] }
  0x8b   :  { %6467 = vmatpush1.bf16.msra.mxu0 %v6466_v35  ;;  %v206_v55 = vld [vmem:[#allocation7 + $0x240] sm:$0xff]  ;;  %v6504_v57 = vpack.c.bf16 %v209_v50, %v201_v49  ;;  %v208_v58 = vld [vmem:[#allocation7 + $0x250] sm:$0xff]  ;;  %v215_v59 = vld [vmem:[#allocation7 + $0x288] sm:$0xff] }
  0x8c   :  { %6499 = vmatpush1.bf16.msra.mxu1 %v6498_v39  ;;  %6469 = vmatprep.subr.bf16.mxu0 %v6468_v40  ;;  %v223_v60 = vld [vmem:[#allocation7 + $0x2c8] sm:$0xff]  ;;  %v217_v61 = vld [vmem:[#allocation7 + $0x298] sm:$0xff]  ;;  %v6474_v63 = vpack.c.bf16 %v206_v55, %v198_v54  ;;  %v6506_v1 = vpack.c.bf16 %v208_v58, %v200_v56  ;;  %v214_v3 = vld [vmem:[#allocation7 + $0x280] sm:$0xff] }
  0x8d   :  { %6501 = vmatprep.subr.bf16.mxu1 %v6500_v44  ;;  %v225_v62 = vld [vmem:[#allocation7 + $0x2d8] sm:$0xff]  ;;  %v6476_v2 = vpack.c.bf16 %v223_v60, %v215_v59  ;;  %v222_v4 = vld [vmem:[#allocation7 + $0x2c0] sm:$0xff]  ;;  %v216_v5 = vld [vmem:[#allocation7 + $0x290] sm:$0xff] }
  0x8e   :  { %v6508_v6 = vpack.c.bf16 %v225_v62, %v217_v61  ;;  %v224_v7 = vld [vmem:[#allocation7 + $0x2d0] sm:$0xff]  ;;  %v231_v8 = vld [vmem:[#allocation7 + $0x308] sm:$0xff]  ;;  %v233_v10 = vld [vmem:[#allocation7 + $0x318] sm:$0xff]  ;;  %v6478_v12 = vpack.c.bf16 %v222_v4, %v214_v3 }
  0x8f   :  { %6471 = vmatpush1.bf16.msra.mxu0 %v6470_v51  ;;  %v239_v9 = vld [vmem:[#allocation7 + $0x348] sm:$0xff]  ;;  %v241_v11 = vld [vmem:[#allocation7 + $0x358] sm:$0xff]  ;;  %v6510_v13 = vpack.c.bf16 %v224_v7, %v216_v5  ;;  %v230_v15 = vld [vmem:[#allocation7 + $0x300] sm:$0xff] }
  0x90   :  { %6503 = vmatpush1.bf16.msra.mxu1 %v6502_v52  ;;  %6473 = vmatprep.subr.bf16.mxu0 %v6472_v53  ;;  %v6480_v14 = vpack.c.bf16 %v239_v9, %v231_v8  ;;  %v238_v16 = vld [vmem:[#allocation7 + $0x340] sm:$0xff]  ;;  %v232_v17 = vld [vmem:[#allocation7 + $0x310] sm:$0xff]  ;;  %v6512_v18 = vpack.c.bf16 %v241_v11, %v233_v10  ;;  %v247_v20 = vld [vmem:[#allocation7 + $0x388] sm:$0xff] }
  0x91   :  { %6505 = vmatprep.subr.bf16.mxu1 %v6504_v57  ;;  %v240_v19 = vld [vmem:[#allocation7 + $0x350] sm:$0xff]  ;;  %v255_v21 = vld [vmem:[#allocation7 + $0x3c8] sm:$0xff]  ;;  %v249_v22 = vld [vmem:[#allocation7 + $0x398] sm:$0xff]  ;;  %v6482_v24 = vpack.c.bf16 %v238_v16, %v230_v15 }
  0x92   :  { %v257_v23 = vld [vmem:[#allocation7 + $0x3d8] sm:$0xff]  ;;  %v6514_v25 = vpack.c.bf16 %v240_v19, %v232_v17  ;;  %v6484_v26 = vpack.c.bf16 %v255_v21, %v247_v20  ;;  %v246_v27 = vld [vmem:[#allocation7 + $0x380] sm:$0xff]  ;;  %v248_v29 = vld [vmem:[#allocation7 + $0x390] sm:$0xff] }
  0x93   :  { %6475 = vmatpush1.bf16.msra.mxu0 %v6474_v63  ;;  %v254_v28 = vld [vmem:[#allocation7 + $0x3c0] sm:$0xff]  ;;  %v6516_v30 = vpack.c.bf16 %v257_v23, %v249_v22  ;;  %v256_v31 = vld [vmem:[#allocation7 + $0x3d0] sm:$0xff]  ;;  %v139_v32 = vld [vmem:[#allocation7 + $0x28] sm:$0xff] }
  0x94   :  { %6507 = vmatpush1.bf16.msra.mxu1 %v6506_v1  ;;  %6477 = vmatprep.subr.bf16.mxu0 %v6476_v2  ;;  %v147_v33 = vld [vmem:[#allocation7 + $0x68] sm:$0xff]  ;;  %v141_v34 = vld [vmem:[#allocation7 + $0x38] sm:$0xff]  ;;  %v6486_v36 = vpack.c.bf16 %v254_v28, %v246_v27  ;;  %v6518_v37 = vpack.c.bf16 %v256_v31, %v248_v29  ;;  %v138_v39 = vld [vmem:[#allocation7 + $0x20] sm:$0xff] }
  0x95   :  { %6509 = vmatprep.subr.bf16.mxu1 %v6508_v6  ;;  %v149_v35 = vld [vmem:[#allocation7 + $0x78] sm:$0xff]  ;;  %v6520_v38 = vpack.c.bf16 %v147_v33, %v139_v32  ;;  %v146_v40 = vld [vmem:[#allocation7 + $0x60] sm:$0xff]  ;;  %v140_v42 = vld [vmem:[#allocation7 + $0x30] sm:$0xff] }
  0x96   :  { %v6552_v41 = vpack.c.bf16 %v149_v35, %v141_v34  ;;  %v148_v43 = vld [vmem:[#allocation7 + $0x70] sm:$0xff]  ;;  %v155_v44 = vld [vmem:[#allocation7 + $0xa8] sm:$0xff]  ;;  %v10066_v46 = vld [vmem:[#allocation4] sm:$0xff]  ;;  %v6522_v47 = vpack.c.bf16 %v146_v40, %v138_v39 }
  0x97   :  { %6479 = vmatpush1.bf16.msra.mxu0 %v6478_v12  ;;  %v163_v45 = vld [vmem:[#allocation7 + $0xe8] sm:$0xff]  ;;  %v157_v48 = vld [vmem:[#allocation7 + $0xb8] sm:$0xff]  ;;  %v6554_v50 = vpack.c.bf16 %v148_v43, %v140_v42  ;;  %v154_v51 = vld [vmem:[#allocation7 + $0xa0] sm:$0xff] }
  0x98   :  { %6511 = vmatpush1.bf16.msra.mxu1 %v6510_v13  ;;  %6481 = vmatprep.subr.bf16.mxu0 %v6480_v14  ;;  %v165_v49 = vld [vmem:[#allocation7 + $0xf8] sm:$0xff]  ;;  %v162_v52 = vld [vmem:[#allocation7 + $0xe0] sm:$0xff]  ;;  %v6524_v53 = vpack.c.bf16 %v163_v45, %v155_v44  ;;  %v156_v54 = vld [vmem:[#allocation7 + $0xb0] sm:$0xff] }
  0x99   :  { %6513 = vmatprep.subr.bf16.mxu1 %v6512_v18  ;;  %v164_v55 = vld [vmem:[#allocation7 + $0xf0] sm:$0xff]  ;;  %v6556_v56 = vpack.c.bf16 %v165_v49, %v157_v48  ;;  %v171_v57 = vld [vmem:[#allocation7 + $0x128] sm:$0xff]  ;;  %v6526_v60 = vpack.c.bf16 %v162_v52, %v154_v51  ;;  %v173_v61 = vld [vmem:[#allocation7 + $0x138] sm:$0xff] }
  0x9a   :  { %v179_v58 = vld [vmem:[#allocation7 + $0x168] sm:$0xff]  ;;  %v181_v62 = vld [vmem:[#allocation7 + $0x178] sm:$0xff]  ;;  %v6558_v63 = vpack.c.bf16 %v164_v55, %v156_v54  ;;  %v170_v1 = vld [vmem:[#allocation7 + $0x120] sm:$0xff] }
  0x9b   :  { %6483 = vmatpush1.bf16.msra.mxu0 %v6482_v24  ;;  %v10070_v59 = vld [vmem:[#allocation4 + $0x8] sm:$0xff]  ;;  %v178_v2 = vld [vmem:[#allocation7 + $0x160] sm:$0xff]  ;;  %v6528_v3 = vpack.c.bf16 %v179_v58, %v171_v57  ;;  %v172_v4 = vld [vmem:[#allocation7 + $0x130] sm:$0xff]  ;;  %v6560_v6 = vpack.c.bf16 %v181_v62, %v173_v61 }
  0x9c   :  { %6515 = vmatpush1.bf16.msra.mxu1 %v6514_v25  ;;  %6485 = vmatprep.subr.bf16.mxu0 %v6484_v26  ;;  %v180_v5 = vld [vmem:[#allocation7 + $0x170] sm:$0xff]  ;;  %v187_v7 = vld [vmem:[#allocation7 + $0x1a8] sm:$0xff]  ;;  %v6530_v10 = vpack.c.bf16 %v178_v2, %v170_v1  ;;  %v189_v11 = vld [vmem:[#allocation7 + $0x1b8] sm:$0xff] }
  0x9d   :  { %6517 = vmatprep.subr.bf16.mxu1 %v6516_v30  ;;  %v195_v8 = vld [vmem:[#allocation7 + $0x1e8] sm:$0xff]  ;;  %v10076_v9 = vld [vmem:[#allocation4 + $0x10] sm:$0xff]  ;;  %v197_v12 = vld [vmem:[#allocation7 + $0x1f8] sm:$0xff]  ;;  %v6562_v13 = vpack.c.bf16 %v180_v5, %v172_v4 }
  0x9e   :  { %v186_v14 = vld [vmem:[#allocation7 + $0x1a0] sm:$0xff]  ;;  %v6532_v16 = vpack.c.bf16 %v195_v8, %v187_v7  ;;  %v188_v17 = vld [vmem:[#allocation7 + $0x1b0] sm:$0xff]  ;;  %v6564_v19 = vpack.c.bf16 %v197_v12, %v189_v11  ;;  %v203_v20 = vld [vmem:[#allocation7 + $0x228] sm:$0xff] }
  0x9f   :  { %6487 = vmatpush1.bf16.msra.mxu0 %v6486_v36  ;;  %v194_v15 = vld [vmem:[#allocation7 + $0x1e0] sm:$0xff]  ;;  %v196_v18 = vld [vmem:[#allocation7 + $0x1f0] sm:$0xff]  ;;  %v211_v21 = vld [vmem:[#allocation7 + $0x268] sm:$0xff] }
  0xa0   :  { %6519 = vmatpush1.bf16.msra.mxu1 %v6518_v37  ;;  %6521 = vmatprep.subr.bf16.mxu0 %v6520_v38  ;;  %v10082_v22 = vld [vmem:[#allocation4 + $0x18] sm:$0xff]  ;;  %v6534_v23 = vpack.c.bf16 %v194_v15, %v186_v14  ;;  %v6566_v26 = vpack.c.bf16 %v196_v18, %v188_v17  ;;  %v202_v27 = vld [vmem:[#allocation7 + $0x220] sm:$0xff]  ;;  %v6536_v29 = vpack.c.bf16 %v211_v21, %v203_v20  ;;  %v204_v30 = vld [vmem:[#allocation7 + $0x230] sm:$0xff] }
  0xa1   :  { %6553 = vmatprep.subr.bf16.mxu1 %v6552_v41  ;;  %v205_v24 = vld [vmem:[#allocation7 + $0x238] sm:$0xff]  ;;  %v210_v28 = vld [vmem:[#allocation7 + $0x260] sm:$0xff]  ;;  %v212_v31 = vld [vmem:[#allocation7 + $0x270] sm:$0xff] }
  0xa2   :  { %369 = vmatmul.mubr.f32.vlgmr.msra.gmra.mrb[0].mxu0 %v10066_v46  ;;  %v213_v25 = vld [vmem:[#allocation7 + $0x278] sm:$0xff]  ;;  %v219_v33 = vld [vmem:[#allocation7 + $0x2a8] sm:$0xff]  ;;  %v10088_v35 = vld [vmem:[#allocation4 + $0x20] sm:$0xff]  ;;  %v6538_v36 = vpack.c.bf16 %v210_v28, %v202_v27  ;;  %v6570_v39 = vpack.c.bf16 %v212_v31, %v204_v30 }
  0xa3   :  { %482 = vmatmul.mubr.f32.vlgmr.msra.gmra.mrb[0].mxu1 %v10066_v46  ;;  %6523 = vmatpush1.bf16.msra.mxu0 %v6522_v47  ;;  %v6568_v32 = vpack.c.bf16 %v213_v25, %v205_v24  ;;  %v227_v34 = vld [vmem:[#allocation7 + $0x2e8] sm:$0xff]  ;;  %v221_v37 = vld [vmem:[#allocation7 + $0x2b8] sm:$0xff]  ;;  %v218_v40 = vld [vmem:[#allocation7 + $0x2a0] sm:$0xff] }
  0xa4   :  { %6555 = vmatpush1.bf16.msra.mxu1 %v6554_v50  ;;  %374 = vmatprep.mubr.f32.mxu0 %v12396_v0  ;;  %v229_v38 = vld [vmem:[#allocation7 + $0x2f8] sm:$0xff]  ;;  %v226_v41 = vld [vmem:[#allocation7 + $0x2e0] sm:$0xff]  ;;  %v6540_v42 = vpack.c.bf16 %v227_v34, %v219_v33  ;;  %v220_v43 = vld [vmem:[#allocation7 + $0x2b0] sm:$0xff] }
  0xa5   :  { %487 = vmatprep.mubr.f32.mxu1 %v12396_v0  ;;  %6525 = vmatprep.subr.bf16.mxu0 %v6524_v53  ;;  %v228_v44 = vld [vmem:[#allocation7 + $0x2f0] sm:$0xff]  ;;  %v6572_v45 = vpack.c.bf16 %v229_v38, %v221_v37  ;;  %v235_v47 = vld [vmem:[#allocation7 + $0x328] sm:$0xff]  ;;  %v6542_v50 = vpack.c.bf16 %v226_v41, %v218_v40  ;;  %v237_v51 = vld [vmem:[#allocation7 + $0x338] sm:$0xff] }
  0xa6   :  { %6557 = vmatprep.subr.bf16.mxu1 %v6556_v56  ;;  %375 = vmatmul.mubr.f32.gmra.mrb[2].mxu0 %v10070_v59  ;;  %v243_v48 = vld [vmem:[#allocation7 + $0x368] sm:$0xff]  ;;  %v245_v52 = vld [vmem:[#allocation7 + $0x378] sm:$0xff]  ;;  %v6574_v53 = vpack.c.bf16 %v228_v44, %v220_v43  ;;  %v234_v54 = vld [vmem:[#allocation7 + $0x320] sm:$0xff] }
  0xa7   :  { %488 = vmatmul.mubr.f32.gmra.mrb[2].mxu1 %v10070_v59  ;;  %6527 = vmatpush1.bf16.msra.mxu0 %v6526_v60  ;;  %v10094_v49 = vld [vmem:[#allocation4 + $0x28] sm:$0xff]  ;;  %v242_v55 = vld [vmem:[#allocation7 + $0x360] sm:$0xff]  ;;  %v6544_v56 = vpack.c.bf16 %v243_v48, %v235_v47  ;;  %v236_v57 = vld [vmem:[#allocation7 + $0x330] sm:$0xff]  ;;  %v6576_v60 = vpack.c.bf16 %v245_v52, %v237_v51 }
  0xa8   :  { %6559 = vmatpush1.bf16.msra.mxu1 %v6558_v63  ;;  %380 = vmatprep.mubr.f32.mxu0 %v12396_v0  ;;  %v244_v58 = vld [vmem:[#allocation7 + $0x370] sm:$0xff]  ;;  %v251_v61 = vld [vmem:[#allocation7 + $0x3a8] sm:$0xff]  ;;  %v6546_v1 = vpack.c.bf16 %v242_v55, %v234_v54  ;;  %v253_v2 = vld [vmem:[#allocation7 + $0x3b8] sm:$0xff] }
  0xa9   :  { %493 = vmatprep.mubr.f32.mxu1 %v12396_v0  ;;  %6529 = vmatprep.subr.bf16.mxu0 %v6528_v3  ;;  %v259_v62 = vld [vmem:[#allocation7 + $0x3e8] sm:$0xff]  ;;  %v10100_v63 = vld [vmem:[#allocation4 + $0x30] sm:$0xff]  ;;  %v261_v3 = vld [vmem:[#allocation7 + $0x3f8] sm:$0xff]  ;;  %v6578_v4 = vpack.c.bf16 %v244_v58, %v236_v57 }
  0xaa   :  { %6561 = vmatprep.subr.bf16.mxu1 %v6560_v6  ;;  %381 = vmatmul.mubr.f32.gmra.mrb[4].mxu0 %v10076_v9  ;;  %v250_v5 = vld [vmem:[#allocation7 + $0x3a0] sm:$0xff]  ;;  %v6548_v7 = vpack.c.bf16 %v259_v62, %v251_v61  ;;  %v252_v8 = vld [vmem:[#allocation7 + $0x3b0] sm:$0xff]  ;;  %v6580_v11 = vpack.c.bf16 %v261_v3, %v253_v2  ;;  %v10106_v14 = vld [vmem:[#allocation4 + $0x38] sm:$0xff] }
  0xab   :  { %494 = vmatmul.mubr.f32.gmra.mrb[4].mxu1 %v10076_v9  ;;  %6531 = vmatpush1.bf16.msra.mxu0 %v6530_v10  ;;  %v258_v6 = vld [vmem:[#allocation7 + $0x3e0] sm:$0xff]  ;;  %v260_v10 = vld [vmem:[#allocation7 + $0x3f0] sm:$0xff]  ;;  %v832_v20 = vld [vmem:[#allocation10 + $0x20] sm:$0xff] }
  0xac   :  { %6563 = vmatpush1.bf16.msra.mxu1 %v6562_v13  ;;  %386 = vmatprep.mubr.f32.mxu0 %v12396_v0  ;;  %v829_v12 = vld [vmem:[#allocation10 + $0x8] sm:$0xff]  ;;  %v6550_v15 = vpack.c.bf16 %v258_v6, %v250_v5  ;;  %v835_v17 = vld [vmem:[#allocation10 + $0x38] sm:$0xff]  ;;  %v6582_v18 = vpack.c.bf16 %v260_v10, %v252_v8  ;;  %v830_v21 = vld [vmem:[#allocation10 + $0x10] sm:$0xff] }
  0xad   :  { %499 = vmatprep.mubr.f32.mxu1 %v12396_v0  ;;  %6533 = vmatprep.subr.bf16.mxu0 %v6532_v16  ;;  %v833_v13 = vld [vmem:[#allocation10 + $0x28] sm:$0xff]  ;;  %v831_v16 = vld [vmem:[#allocation10 + $0x18] sm:$0xff]  ;;  %v834_v24 = vld [vmem:[#allocation10 + $0x30] sm:$0xff] }
  0xae   :  { %6565 = vmatprep.subr.bf16.mxu1 %v6564_v19  ;;  %387 = vmatmul.mubr.f32.gmra.mrb[6].mxu0 %v10082_v22  ;;  %v828_v19 = vld [vmem:[#allocation10] sm:$0xff]  ;;  %v837_v25 = vld [vmem:[#allocation10 + $0x48] sm:$0xff]  ;;  %v10113_v27 = vpack.c.bf16 %v835_v17, %v831_v16  ;;  %v839_v28 = vld [vmem:[#allocation10 + $0x58] sm:$0xff]  ;;  %v10119_v31 = vpack.c.bf16 %v834_v24, %v830_v21 }
  0xaf   :  { %500 = vmatmul.mubr.f32.gmra.mrb[6].mxu1 %v10082_v22  ;;  %6535 = vmatpush1.bf16.msra.mxu0 %v6534_v23  ;;  %v10110_v23 = vpack.c.bf16 %v833_v13, %v829_v12  ;;  %v10116_v30 = vpack.c.bf16 %v832_v20, %v828_v19  ;;  %v836_v33 = vld [vmem:[#allocation10 + $0x40] sm:$0xff]  ;;  %v842_v38 = vld [vmem:[#allocation10 + $0x70] sm:$0xff]  ;;  %v849_v40 = vld [vmem:[#allocation10 + $0xa8] sm:$0xff] }
  0xb0   :  { %6567 = vmatpush1.bf16.msra.mxu1 %v6566_v26  ;;  %392 = vmatprep.mubr.f32.mxu0 %v12396_v0  ;;  %v841_v26 = vld [vmem:[#allocation10 + $0x68] sm:$0xff]  ;;  %v840_v34 = vld [vmem:[#allocation10 + $0x60] sm:$0xff]  ;;  %v847_v41 = vld [vmem:[#allocation10 + $0x98] sm:$0xff] }
  0xb1   :  { %505 = vmatprep.mubr.f32.mxu1 %v12396_v0  ;;  %6537 = vmatprep.subr.bf16.mxu0 %v6536_v29  ;;  %v843_v29 = vld [vmem:[#allocation10 + $0x78] sm:$0xff]  ;;  %v10131_v43 = vpack.c.bf16 %v840_v34, %v836_v33  ;;  %v844_v47 = vld [vmem:[#allocation10 + $0x80] sm:$0xff]  ;;  %v853_v52 = vld [vmem:[#allocation10 + $0xc8] sm:$0xff] }
  0xb2   :  { %6569 = vmatprep.subr.bf16.mxu1 %v6568_v32  ;;  %393 = vmatmul.mubr.f32.gmra.mrb[8].mxu0 %v10088_v35  ;;  %v10121_v32 = vpack.c.bf16 %v841_v26, %v837_v25  ;;  %v10125_v37 = vpack.c.bf16 %v843_v29, %v839_v28  ;;  %v848_v48 = vld [vmem:[#allocation10 + $0xa0] sm:$0xff]  ;;  %v855_v54 = vld [vmem:[#allocation10 + $0xd8] sm:$0xff]  ;;  %v854_v62 = vld [vmem:[#allocation10 + $0xd0] sm:$0xff] }
  0xb3   :  { %506 = vmatmul.mubr.f32.gmra.mrb[8].mxu1 %v10088_v35  ;;  %6539 = vmatpush1.bf16.msra.mxu0 %v6538_v36  ;;  %v838_v36 = vld [vmem:[#allocation10 + $0x50] sm:$0xff]  ;;  %v859_v55 = vld [vmem:[#allocation10 + $0xf8] sm:$0xff]  ;;  %v856_v61 = vld [vmem:[#allocation10 + $0xe0] sm:$0xff] }
  0xb4   :  { %6571 = vmatpush1.bf16.msra.mxu1 %v6570_v39  ;;  %398 = vmatprep.mubr.f32.mxu0 %v12396_v0  ;;  %v845_v39 = vld [vmem:[#allocation10 + $0x88] sm:$0xff]  ;;  %v10135_v44 = vpack.c.bf16 %v842_v38, %v838_v36  ;;  %v858_v2 = vld [vmem:[#allocation10 + $0xf0] sm:$0xff]  ;;  %v867_v5 = vld [vmem:[#allocation10 + $0x138] sm:$0xff] }
  0xb5   :  { %511 = vmatprep.mubr.f32.mxu1 %v12396_v0  ;;  %6541 = vmatprep.subr.bf16.mxu0 %v6540_v42  ;;  %v851_v42 = vld [vmem:[#allocation10 + $0xb8] sm:$0xff]  ;;  %v861_v3 = vld [vmem:[#allocation10 + $0x108] sm:$0xff]  ;;  %v860_v10 = vld [vmem:[#allocation10 + $0x100] sm:$0xff] }
  0xb6   :  { %6573 = vmatprep.subr.bf16.mxu1 %v6572_v45  ;;  %399 = vmatmul.mubr.f32.gmra.mrb[10].mxu0 %v10094_v49  ;;  %v10137_v45 = vpack.c.bf16 %v849_v40, %v845_v39  ;;  %v10140_v51 = vpack.c.bf16 %v851_v42, %v847_v41  ;;  %v862_v12 = vld [vmem:[#allocation10 + $0x110] sm:$0xff]  ;;  %v869_v16 = vld [vmem:[#allocation10 + $0x148] sm:$0xff]  ;;  %v868_v24 = vld [vmem:[#allocation10 + $0x140] sm:$0xff] }
  0xb7   :  { %512 = vmatmul.mubr.f32.gmra.mrb[10].mxu1 %v10094_v49  ;;  %6543 = vmatpush1.bf16.msra.mxu0 %v6542_v50  ;;  %v846_v50 = vld [vmem:[#allocation10 + $0x90] sm:$0xff]  ;;  %v873_v17 = vld [vmem:[#allocation10 + $0x168] sm:$0xff]  ;;  %v872_v25 = vld [vmem:[#allocation10 + $0x160] sm:$0xff] }
  0xb8   :  { %6575 = vmatpush1.bf16.msra.mxu1 %v6574_v53  ;;  %404 = vmatprep.mubr.f32.mxu0 %v12396_v0  ;;  %v857_v53 = vld [vmem:[#allocation10 + $0xe8] sm:$0xff]  ;;  %v10185_v21 = vpack.c.bf16 %v873_v17, %v869_v16  ;;  %v870_v26 = vld [vmem:[#allocation10 + $0x150] sm:$0xff]  ;;  %v883_v36 = vld [vmem:[#allocation10 + $0x1b8] sm:$0xff]  ;;  %v10194_v38 = vpack.c.bf16 %v872_v25, %v868_v24 }
  0xb9   :  { %517 = vmatprep.mubr.f32.mxu1 %v12396_v0  ;;  %6545 = vmatprep.subr.bf16.mxu0 %v6544_v56  ;;  %v10146_v56 = vpack.c.bf16 %v848_v48, %v844_v47  ;;  %v10153_v58 = vpack.c.bf16 %v857_v53, %v853_v52  ;;  %v874_v29 = vld [vmem:[#allocation10 + $0x170] sm:$0xff]  ;;  %v877_v33 = vld [vmem:[#allocation10 + $0x188] sm:$0xff]  ;;  %v876_v41 = vld [vmem:[#allocation10 + $0x180] sm:$0xff] }
  0xba   :  { %6577 = vmatprep.subr.bf16.mxu1 %v6576_v60  ;;  %405 = vmatmul.mubr.f32.gmra.mrb[12].mxu0 %v10100_v63  ;;  %v852_v60 = vld [vmem:[#allocation10 + $0xc0] sm:$0xff]  ;;  %v881_v34 = vld [vmem:[#allocation10 + $0x1a8] sm:$0xff]  ;;  %v10199_v39 = vpack.c.bf16 %v874_v29, %v870_v26  ;;  %v878_v47 = vld [vmem:[#allocation10 + $0x190] sm:$0xff] }
  0xbb   :  { %518 = vmatmul.mubr.f32.gmra.mrb[12].mxu1 %v10100_v63  ;;  %6547 = vmatpush1.bf16.msra.mxu0 %v6546_v1  ;;  %v10156_v1 = vpack.c.bf16 %v859_v55, %v855_v54  ;;  %v10162_v6 = vpack.c.bf16 %v856_v61, %v852_v60  ;;  %v10201_v40 = vpack.c.bf16 %v881_v34, %v877_v33  ;;  %v880_v42 = vld [vmem:[#allocation10 + $0x1a0] sm:$0xff]  ;;  %v889_v52 = vld [vmem:[#allocation10 + $0x1e8] sm:$0xff]  ;;  %v891_v53 = vld [vmem:[#allocation10 + $0x1f8] sm:$0xff] }
  0xbc   :  { %6579 = vmatpush1.bf16.msra.mxu1 %v6578_v4  ;;  %410 = vmatprep.mubr.f32.mxu0 %v12396_v0  ;;  %v865_v4 = vld [vmem:[#allocation10 + $0x128] sm:$0xff]  ;;  %v10210_v54 = vpack.c.bf16 %v880_v42, %v876_v41  ;;  %v884_v61 = vld [vmem:[#allocation10 + $0x1c0] sm:$0xff]  ;;  %v898_v24 = vld [vmem:[#allocation10 + $0x230] sm:$0xff] }
  0xbd   :  { %523 = vmatprep.mubr.f32.mxu1 %v12396_v0  ;;  %6549 = vmatprep.subr.bf16.mxu0 %v6548_v7  ;;  %v10167_v7 = vpack.c.bf16 %v858_v2, %v854_v62  ;;  %v10169_v8 = vpack.c.bf16 %v865_v4, %v861_v3  ;;  %v888_v62 = vld [vmem:[#allocation10 + $0x1e0] sm:$0xff]  ;;  %v886_v2 = vld [vmem:[#allocation10 + $0x1d0] sm:$0xff]  ;;  %v901_v25 = vld [vmem:[#allocation10 + $0x248] sm:$0xff] }
  0xbe   :  { %6581 = vmatprep.subr.bf16.mxu1 %v6580_v11  ;;  %411 = vmatmul.mubr.f32.gmra.mrb[14].mxu0 %v10106_v14  ;;  %v864_v11 = vld [vmem:[#allocation10 + $0x120] sm:$0xff]  ;;  %v890_v4 = vld [vmem:[#allocation10 + $0x1f0] sm:$0xff]  ;;  %v905_v26 = vld [vmem:[#allocation10 + $0x268] sm:$0xff] }
  0xbf   :  { %524 = vmatmul.mubr.f32.gmra.mrb[14].mxu1 %v10106_v14  ;;  %6551 = vmatpush1.bf16.msra.mxu0 %v6550_v15  ;;  %v866_v15 = vld [vmem:[#allocation10 + $0x130] sm:$0xff]  ;;  %v10178_v19 = vpack.c.bf16 %v864_v11, %v860_v10  ;;  %v899_v10 = vld [vmem:[#allocation10 + $0x238] sm:$0xff]  ;;  %v10226_v11 = vpack.c.bf16 %v888_v62, %v884_v61  ;;  %v892_v16 = vld [vmem:[#allocation10 + $0x200] sm:$0xff] }
  0xc0   :  { %6583 = vmatpush1.bf16.msra.mxu1 %v6582_v18  ;;  %594 = vmatprep.mubr.f32.mxu0 %v12396_v0  ;;  %v875_v18 = vld [vmem:[#allocation10 + $0x178] sm:$0xff]  ;;  %v10183_v20 = vpack.c.bf16 %v866_v15, %v862_v12  ;;  %v10231_v12 = vpack.c.bf16 %v890_v4, %v886_v2  ;;  %v896_v17 = vld [vmem:[#allocation10 + $0x220] sm:$0xff]  ;;  %v902_v42 = vld [vmem:[#allocation10 + $0x250] sm:$0xff] }
  0xc1   :  { %707 = vmatprep.mubr.f32.mxu1 %v12396_v0  ;;  %6585 = vmatprep.subr.bf16.mxu0 %v10110_v23  ;;  %v907_v29 = vld [vmem:[#allocation10 + $0x278] sm:$0xff]  ;;  %v10242_v33 = vpack.c.bf16 %v896_v17, %v892_v16  ;;  %v904_v41 = vld [vmem:[#allocation10 + $0x260] sm:$0xff]  ;;  %v921_v16 = vld [vmem:[#allocation10 + $0x2e8] sm:$0xff] }
  0xc2   :  { %6649 = vmatprep.subr.bf16.mxu1 %v10113_v27  ;;  %595 = vmatmul.mubr.f32.vlgmr.msra.gmra.mrb[16].mxu0 %v10066_v46  ;;  %v908_v2 = vld [vmem:[#allocation10 + $0x280] sm:$0xff]  ;;  %v919_v17 = vld [vmem:[#allocation10 + $0x2d8] sm:$0xff] }
  0xc3   :  { %708 = vmatmul.mubr.f32.vlgmr.msra.gmra.mrb[16].mxu1 %v10066_v46  ;;  %6587 = vmatpush1.bf16.msra.mxu0 %v10116_v30  ;;  %v850_v46 = vld [vmem:[#allocation10 + $0xb0] sm:$0xff]  ;;  %v912_v4 = vld [vmem:[#allocation10 + $0x2a0] sm:$0xff] }
  0xc4   :  { %6651 = vmatpush1.bf16.msra.mxu1 %v10119_v31  ;;  %6589 = vmatprep.subr.bf16.mxu0 %v10121_v32  ;;  %v10151_v57 = vpack.c.bf16 %v850_v46, %v846_v50  ;;  %v882_v50 = vld [vmem:[#allocation10 + $0x1b0] sm:$0xff]  ;;  %v885_v46 = vld [vmem:[#allocation10 + $0x1c8] sm:$0xff] }
  0xc5   :  { %6653 = vmatprep.subr.bf16.mxu1 %v10125_v37  ;;  %600 = vmatprep.mubr.f32.mxu0 %v12396_v0  ;;  %v10215_v55 = vpack.c.bf16 %v882_v50, %v878_v47  ;;  %v10217_v60 = vpack.c.bf16 %v889_v52, %v885_v46  ;;  %v906_v50 = vld [vmem:[#allocation10 + $0x270] sm:$0xff]  ;;  %v909_v46 = vld [vmem:[#allocation10 + $0x288] sm:$0xff] }
  0xc6   :  { %713 = vmatprep.mubr.f32.mxu1 %v12396_v0  ;;  %601 = vmatmul.mubr.f32.gmra.mrb[18].mxu0 %v10070_v59  ;;  %v913_v52 = vld [vmem:[#allocation10 + $0x2a8] sm:$0xff]  ;;  %v10261_v61 = vpack.c.bf16 %v906_v50, %v902_v42  ;;  %v922_v42 = vld [vmem:[#allocation10 + $0x2f0] sm:$0xff] }
  0xc7   :  { %6591 = vmatpush1.bf16.msra.mxu0 %v10131_v43  ;;  %714 = vmatmul.mubr.f32.gmra.mrb[18].mxu1 %v10070_v59  ;;  %v863_v59 = vld [vmem:[#allocation10 + $0x118] sm:$0xff]  ;;  %v10263_v62 = vpack.c.bf16 %v913_v52, %v909_v46  ;;  %v925_v50 = vld [vmem:[#allocation10 + $0x308] sm:$0xff] }
  0xc8   :  { %6655 = vmatpush1.bf16.msra.mxu1 %v10135_v44  ;;  %6593 = vmatprep.subr.bf16.mxu0 %v10137_v45  ;;  %v10172_v13 = vpack.c.bf16 %v867_v5, %v863_v59  ;;  %v893_v59 = vld [vmem:[#allocation10 + $0x208] sm:$0xff]  ;;  %v927_v52 = vld [vmem:[#allocation10 + $0x318] sm:$0xff] }
  0xc9   :  { %6657 = vmatprep.subr.bf16.mxu1 %v10140_v51  ;;  %606 = vmatprep.mubr.f32.mxu0 %v12396_v0  ;;  %v897_v5 = vld [vmem:[#allocation10 + $0x228] sm:$0xff] }
  0xca   :  { %719 = vmatprep.mubr.f32.mxu1 %v12396_v0  ;;  %607 = vmatmul.mubr.f32.gmra.mrb[20].mxu0 %v10076_v9  ;;  %v10233_v15 = vpack.c.bf16 %v897_v5, %v893_v59  ;;  %v910_v59 = vld [vmem:[#allocation10 + $0x290] sm:$0xff]  ;;  %v929_v46 = vld [vmem:[#allocation10 + $0x328] sm:$0xff] }
  0xcb   :  { %6595 = vmatpush1.bf16.msra.mxu0 %v10146_v56  ;;  %720 = vmatmul.mubr.f32.gmra.mrb[20].mxu1 %v10076_v9  ;;  %v871_v9 = vld [vmem:[#allocation10 + $0x158] sm:$0xff] }
  0xcc   :  { %6659 = vmatpush1.bf16.msra.mxu1 %v10151_v57  ;;  %6597 = vmatprep.subr.bf16.mxu0 %v10153_v58  ;;  %v10188_v28 = vpack.c.bf16 %v875_v18, %v871_v9  ;;  %v894_v9 = vld [vmem:[#allocation10 + $0x210] sm:$0xff] }
  0xcd   :  { %6661 = vmatprep.subr.bf16.mxu1 %v10156_v1  ;;  %612 = vmatprep.mubr.f32.mxu0 %v12396_v0  ;;  %v10247_v34 = vpack.c.bf16 %v898_v24, %v894_v9  ;;  %v923_v9 = vld [vmem:[#allocation10 + $0x2f8] sm:$0xff]  ;;  %v10269_v24 = vpack.c.bf16 %v912_v4, %v908_v2  ;;  %v10287_v4 = vpack.c.bf16 %v929_v46, %v925_v50  ;;  %v932_v50 = vld [vmem:[#allocation10 + $0x340] sm:$0xff] }
  0xce   :  { %725 = vmatprep.mubr.f32.mxu1 %v12396_v0  ;;  %613 = vmatmul.mubr.f32.gmra.mrb[22].mxu0 %v10082_v22  ;;  %v936_v46 = vld [vmem:[#allocation10 + $0x360] sm:$0xff] }
  0xcf   :  { %6599 = vmatpush1.bf16.msra.mxu0 %v10162_v6  ;;  %726 = vmatmul.mubr.f32.gmra.mrb[22].mxu1 %v10082_v22  ;;  %v879_v22 = vld [vmem:[#allocation10 + $0x198] sm:$0xff]  ;;  %12600 = vst [vmem:[#allocation27_spill] sm:$0xff] %v10287_v4 }
  0xd0   :  { %6663 = vmatpush1.bf16.msra.mxu1 %v10167_v7  ;;  %6601 = vmatprep.subr.bf16.mxu0 %v10169_v8  ;;  %v10204_v48 = vpack.c.bf16 %v883_v36, %v879_v22  ;;  %v10249_v22 = vpack.c.bf16 %v905_v26, %v901_v25  ;;  %v900_v36 = vld [vmem:[#allocation10 + $0x240] sm:$0xff] }
  0xd1   :  { %6665 = vmatprep.subr.bf16.mxu1 %v10172_v13  ;;  %618 = vmatprep.mubr.f32.mxu0 %v12396_v0 }
  0xd2   :  { %731 = vmatprep.mubr.f32.mxu1 %v12396_v0  ;;  %619 = vmatmul.mubr.f32.gmra.mrb[24].mxu0 %v10088_v35 }
  0xd3   :  { %6603 = vmatpush1.bf16.msra.mxu0 %v10178_v19  ;;  %732 = vmatmul.mubr.f32.gmra.mrb[24].mxu1 %v10088_v35  ;;  %v887_v35 = vld [vmem:[#allocation10 + $0x1d8] sm:$0xff] }
  0xd4   :  { %6667 = vmatpush1.bf16.msra.mxu1 %v10183_v20  ;;  %6605 = vmatprep.subr.bf16.mxu0 %v10185_v21  ;;  %v10220_v3 = vpack.c.bf16 %v891_v53, %v887_v35  ;;  %v915_v35 = vld [vmem:[#allocation10 + $0x2b8] sm:$0xff]  ;;  %v10257_v53 = vpack.c.bf16 %v904_v41, %v900_v36  ;;  %v918_v36 = vld [vmem:[#allocation10 + $0x2d0] sm:$0xff]  ;;  %v10278_v41 = vpack.c.bf16 %v923_v9, %v919_v17  ;;  %v933_v9 = vld [vmem:[#allocation10 + $0x348] sm:$0xff] }
  0xd5   :  { %6669 = vmatprep.subr.bf16.mxu1 %v10188_v28  ;;  %624 = vmatprep.mubr.f32.mxu0 %v12396_v0  ;;  %v10285_v2 = vpack.c.bf16 %v922_v42, %v918_v36  ;;  %v930_v17 = vld [vmem:[#allocation10 + $0x330] sm:$0xff] }
  0xd6   :  { %737 = vmatprep.mubr.f32.mxu1 %v12396_v0  ;;  %625 = vmatmul.mubr.f32.gmra.mrb[26].mxu0 %v10094_v49  ;;  %12597 = vst [vmem:[#allocation24_spill] sm:$0xff] %v10278_v41 }
  0xd7   :  { %6607 = vmatpush1.bf16.msra.mxu0 %v10194_v38  ;;  %738 = vmatmul.mubr.f32.gmra.mrb[26].mxu1 %v10094_v49  ;;  %v895_v49 = vld [vmem:[#allocation10 + $0x218] sm:$0xff]  ;;  %12599 = vst [vmem:[#allocation26_spill] sm:$0xff] %v10285_v2 }
  0xd8   :  { %6671 = vmatpush1.bf16.msra.mxu1 %v10199_v39  ;;  %6609 = vmatprep.subr.bf16.mxu0 %v10201_v40  ;;  %v10236_v18 = vpack.c.bf16 %v899_v10, %v895_v49  ;;  %v914_v49 = vld [vmem:[#allocation10 + $0x2b0] sm:$0xff]  ;;  %v917_v10 = vld [vmem:[#allocation10 + $0x2c8] sm:$0xff] }
  0xd9   :  { %6673 = vmatprep.subr.bf16.mxu1 %v10204_v48  ;;  %630 = vmatprep.mubr.f32.mxu0 %v12396_v0  ;;  %v10273_v25 = vpack.c.bf16 %v914_v49, %v910_v59  ;;  %v10275_v26 = vpack.c.bf16 %v921_v16, %v917_v10  ;;  %v924_v59 = vld [vmem:[#allocation10 + $0x300] sm:$0xff]  ;;  %v926_v10 = vld [vmem:[#allocation10 + $0x310] sm:$0xff] }
  0xda   :  { %743 = vmatprep.mubr.f32.mxu1 %v12396_v0  ;;  %631 = vmatmul.mubr.f32.gmra.mrb[28].mxu0 %v10100_v63  ;;  %v928_v49 = vld [vmem:[#allocation10 + $0x320] sm:$0xff]  ;;  %v10297_v36 = vpack.c.bf16 %v930_v17, %v926_v10 }
  0xdb   :  { %6611 = vmatpush1.bf16.msra.mxu0 %v10210_v54  ;;  %744 = vmatmul.mubr.f32.gmra.mrb[28].mxu1 %v10100_v63  ;;  %v903_v63 = vld [vmem:[#allocation10 + $0x258] sm:$0xff]  ;;  %12595 = vst [vmem:[#allocation22_spill] sm:$0xff] %v10273_v25  ;;  %12596 = vst [vmem:[#allocation23_spill] sm:$0xff] %v10275_v26  ;;  %v940_v17 = vld [vmem:[#allocation10 + $0x380] sm:$0xff] }
  0xdc   :  { %6675 = vmatpush1.bf16.msra.mxu1 %v10215_v55  ;;  %6613 = vmatprep.subr.bf16.mxu0 %v10217_v60  ;;  %v10252_v47 = vpack.c.bf16 %v907_v29, %v903_v63  ;;  %v916_v63 = vld [vmem:[#allocation10 + $0x2c0] sm:$0xff]  ;;  %12603 = vst [vmem:[#allocation30_spill] sm:$0xff] %v10297_v36 }
  0xdd   :  { %6677 = vmatprep.subr.bf16.mxu1 %v10220_v3  ;;  %636 = vmatprep.mubr.f32.mxu0 %v12396_v0  ;;  %v920_v29 = vld [vmem:[#allocation10 + $0x2e0] sm:$0xff] }
  0xde   :  { %749 = vmatprep.mubr.f32.mxu1 %v12396_v0  ;;  %637 = vmatmul.mubr.f32.gmra.mrb[30].mxu0 %v10106_v14 }
  0xdf   :  { %6615 = vmatpush1.bf16.msra.mxu0 %v10226_v11  ;;  %750 = vmatmul.mubr.f32.gmra.mrb[30].mxu1 %v10106_v14  ;;  %v911_v14 = vld [vmem:[#allocation10 + $0x298] sm:$0xff] }
  0xe0   :  { %6679 = vmatpush1.bf16.msra.mxu1 %v10231_v12  ;;  %6617 = vmatprep.subr.bf16.mxu0 %v10233_v15  ;;  %v10266_v5 = vpack.c.bf16 %v915_v35, %v911_v14  ;;  %v931_v14 = vld [vmem:[#allocation10 + $0x338] sm:$0xff]  ;;  %v10281_v35 = vpack.c.bf16 %v920_v29, %v916_v63 }
  0xe1   :  { %6681 = vmatprep.subr.bf16.mxu1 %v10236_v18  ;;  %1020 = vmatprep.mubr.f32.mxu0 %v12396_v0  ;;  %v10290_v16 = vpack.c.bf16 %v931_v14, %v927_v52  ;;  %v935_v63 = vld [vmem:[#allocation10 + $0x358] sm:$0xff]  ;;  %v934_v52 = vld [vmem:[#allocation10 + $0x350] sm:$0xff] }
  0xe2   :  { %1097 = vmatprep.mubr.f32.mxu1 %v12396_v0  ;;  %12598 = vst [vmem:[#allocation25_spill] sm:$0xff] %v10281_v35  ;;  %v937_v0 = vld [vmem:[#allocation10 + $0x368] sm:$0xff]  ;;  %v939_v29 = vld [vmem:[#allocation10 + $0x378] sm:$0xff] }
  0xe3   :  { %6619 = vmatpush1.bf16.msra.mxu0 %v10242_v33  ;;  %12601 = vst [vmem:[#allocation28_spill] sm:$0xff] %v10290_v16  ;;  %v10299_v42 = vpack.c.bf16 %v937_v0, %v933_v9  ;;  %v10302_v14 = vpack.c.bf16 %v939_v29, %v935_v63  ;;  %v944_v9 = vld [vmem:[#allocation10 + $0x3a0] sm:$0xff]  ;;  %v942_v63 = vld [vmem:[#allocation10 + $0x390] sm:$0xff] }
  0xe4   :  { %6683 = vmatpush1.bf16.msra.mxu1 %v10247_v34  ;;  %6621 = vmatprep.subr.bf16.mxu0 %v10249_v22 }
  0xe5   :  { %6685 = vmatprep.subr.bf16.mxu1 %v10252_v47  ;;  %12604 = vst [vmem:[#allocation31_spill] sm:$0xff] %v10302_v14 }
  0xe7   :  { %6623 = vmatpush1.bf16.msra.mxu0 %v10257_v53 }
  0xe8   :  { %6687 = vmatpush1.bf16.msra.mxu1 %v10261_v61  ;;  %6625 = vmatprep.subr.bf16.mxu0 %v10263_v62 }
  0xe9   :  { %6689 = vmatprep.subr.bf16.mxu1 %v10266_v5 }
  0xeb   :  { %6627 = vmatpush1.bf16.msra.mxu0 %v10269_v24 }
  0xec   :  { %6691 = vmatpush1.bf16.msra.mxu1 %v10273_v25  ;;  %6629 = vmatprep.subr.bf16.mxu0 %v10275_v26  ;;  %v10293_v25 = vpack.c.bf16 %v928_v49, %v924_v59  ;;  %v941_v26 = vld [vmem:[#allocation10 + $0x388] sm:$0xff]  ;;  %v943_v59 = vld [vmem:[#allocation10 + $0x398] sm:$0xff] }
  0xed   :  { %6693 = vmatprep.subr.bf16.mxu1 %v10278_v41  ;;  %v938_v41 = vld [vmem:[#allocation10 + $0x370] sm:$0xff]  ;;  %v947_v49 = vld [vmem:[#allocation10 + $0x3b8] sm:$0xff] }
  0xee   :  { %12602 = vst [vmem:[#allocation29_spill] sm:$0xff] %v10293_v25  ;;  %v10309_v0 = vpack.c.bf16 %v938_v41, %v934_v52  ;;  %v10314_v29 = vpack.c.bf16 %v947_v49, %v943_v59  ;;  %v952_v52 = vld [vmem:[#allocation10 + $0x3e0] sm:$0xff]  ;;  %v950_v49 = vld [vmem:[#allocation10 + $0x3d0] sm:$0xff] }
  0xef   :  { %6631 = vmatpush1.bf16.msra.mxu0 %v10281_v35  ;;  %v945_v35 = vld [vmem:[#allocation10 + $0x3a8] sm:$0xff] }
  0xf0   :  { %6695 = vmatpush1.bf16.msra.mxu1 %v10285_v2  ;;  %6633 = vmatprep.subr.bf16.mxu0 %v10287_v4  ;;  %v10305_v2 = vpack.c.bf16 %v936_v46, %v932_v50  ;;  %v10311_v10 = vpack.c.bf16 %v945_v35, %v941_v26  ;;  %v949_v4 = vld [vmem:[#allocation10 + $0x3c8] sm:$0xff]  ;;  %v951_v50 = vld [vmem:[#allocation10 + $0x3d8] sm:$0xff]  ;;  %v948_v35 = vld [vmem:[#allocation10 + $0x3c0] sm:$0xff] }
  0xf1   :  { %6697 = vmatprep.subr.bf16.mxu1 %v10290_v16  ;;  %v946_v16 = vld [vmem:[#allocation10 + $0x3b0] sm:$0xff]  ;;  %v955_v46 = vld [vmem:[#allocation10 + $0x3f8] sm:$0xff] }
  0xf2   :  { %v10321_v26 = vpack.c.bf16 %v946_v16, %v942_v63  ;;  %v10326_v59 = vpack.c.bf16 %v955_v46, %v951_v50 }
  0xf3   :  { %6635 = vmatpush1.bf16.msra.mxu0 %v10293_v25  ;;  %v953_v25 = vld [vmem:[#allocation10 + $0x3e8] sm:$0xff] }
  0xf4   :  { %6699 = vmatpush1.bf16.msra.mxu1 %v10297_v36  ;;  %6637 = vmatprep.subr.bf16.mxu0 %v10299_v42  ;;  %v10317_v36 = vpack.c.bf16 %v944_v9, %v940_v17  ;;  %v10323_v41 = vpack.c.bf16 %v953_v25, %v949_v4  ;;  %v10329_v17 = vpack.c.bf16 %v952_v52, %v948_v35  ;;  %v12605_v25 = vmov 0.0  }
  0xf5   :  { %6701 = vmatprep.subr.bf16.mxu1 %v10302_v14  ;;  %v954_v14 = vld [vmem:[#allocation10 + $0x3f0] sm:$0xff] }
  0xf6   :  { %v10333_v16 = vpack.c.bf16 %v954_v14, %v950_v49 }
  0xf7   :  { %6639 = vmatpush1.bf16.msra.mxu0 %v10305_v2 }
  0xf8   :  { %6703 = vmatpush1.bf16.msra.mxu1 %v10309_v0  ;;  %6641 = vmatprep.subr.bf16.mxu0 %v10311_v10 }
  0xf9   :  { %6705 = vmatprep.subr.bf16.mxu1 %v10314_v29 }
  0xfb   :  { %6643 = vmatpush1.bf16.msra.mxu0 %v10317_v36 }
  0xfc   :  { %6707 = vmatpush1.bf16.msra.mxu1 %v10321_v26  ;;  %6645 = vmatprep.subr.bf16.mxu0 %v10323_v41 }
  0xfd   :  { %6709 = vmatprep.subr.bf16.mxu1 %v10326_v59 }
  0xff   :  { %6647 = vmatpush1.bf16.msra.mxu0 %v10329_v17 }
 0x100   :  { %6711 = vmatpush1.bf16.msra.mxu1 %v10333_v16  ;;  %6713 = vmatprep.subr.bf16.mxu0 %v10110_v23  ;;  %v12606_v23 = vld [vmem:[#allocation22_spill] sm:$0xff] }
 0x101   :  { %6777 = vmatprep.subr.bf16.mxu1 %v10113_v27  ;;  %v12607_v27 = vld [vmem:[#allocation23_spill] sm:$0xff] }
 0x102   :  { %1021 = vmatmul.mubr.f32.vlgmr.msra.gmra.mrb[0].mxu0 %v12605_v25 }
 0x103   :  { %1098 = vmatmul.mubr.f32.vlgmr.msra.gmra.mrb[0].mxu1 %v12605_v25  ;;  %1026 = vmatprep.mubr.f32.mxu0 %v12605_v25 }
 0x104   :  { %1103 = vmatprep.mubr.f32.mxu1 %v12605_v25  ;;  %6715 = vmatpush1.bf16.msra.mxu0 %v10116_v30  ;;  %v12608_v30 = vld [vmem:[#allocation24_spill] sm:$0xff] }
 0x105   :  { %6779 = vmatpush1.bf16.msra.mxu1 %v10119_v31  ;;  %6717 = vmatprep.subr.bf16.mxu0 %v10121_v32  ;;  %v12609_v31 = vld [vmem:[#allocation25_spill] sm:$0xff]  ;;  %v12610_v32 = vld [vmem:[#allocation26_spill] sm:$0xff] }
 0x106   :  { %1027 = vmatmul.mubr.f32.gmra.mrb[30].mxu0 %v12605_v25  ;;  %6781 = vmatprep.subr.bf16.mxu1 %v10125_v37  ;;  %v12611_v37 = vld [vmem:[#allocation27_spill] sm:$0xff] }
 0x107   :  { %1104 = vmatmul.mubr.f32.gmra.mrb[30].mxu1 %v12605_v25  ;;  %1360 = vmatprep.mubr.f32.mxu0 %v12605_v25 }
 0x108   :  { %6719 = vmatpush1.bf16.msra.mxu0 %v10131_v43  ;;  %1437 = vmatprep.mubr.f32.mxu1 %v12605_v25  ;;  %v12612_v43 = vld [vmem:[#allocation28_spill] sm:$0xff] }
 0x109   :  { %6783 = vmatpush1.bf16.msra.mxu1 %v10135_v44  ;;  %6721 = vmatprep.subr.bf16.mxu0 %v10137_v45  ;;  %v12613_v44 = vld [vmem:[#allocation29_spill] sm:$0xff]  ;;  %v12614_v45 = vld [vmem:[#allocation30_spill] sm:$0xff] }
 0x10a   :  { %6785 = vmatprep.subr.bf16.mxu1 %v10140_v51  ;;  %v12615_v51 = vld [vmem:[#allocation31_spill] sm:$0xff] }
 0x10c   :  { %6723 = vmatpush1.bf16.msra.mxu0 %v10146_v56  ;;  %v1509_v56 = vld [vmem:[#allocation10 + $0x8] sm:$0xff] }
 0x10d   :  { %6787 = vmatpush1.bf16.msra.mxu1 %v10151_v57  ;;  %6725 = vmatprep.subr.bf16.mxu0 %v10153_v58  ;;  %v1513_v57 = vld [vmem:[#allocation10 + $0x28] sm:$0xff]  ;;  %v1511_v58 = vld [vmem:[#allocation10 + $0x18] sm:$0xff] }
 0x10e   :  { %6789 = vmatprep.subr.bf16.mxu1 %v10156_v1  ;;  %v10410_v1 = vpack.c.bf16 %v1513_v57, %v1509_v56 }
 0x110   :  { %6727 = vmatpush1.bf16.msra.mxu0 %v10162_v6  ;;  %v1515_v6 = vld [vmem:[#allocation10 + $0x38] sm:$0xff] }
 0x111   :  { %6791 = vmatpush1.bf16.msra.mxu1 %v10167_v7  ;;  %6729 = vmatprep.subr.bf16.mxu0 %v10169_v8  ;;  %v10412_v7 = vpack.c.bf16 %v1515_v6, %v1511_v58  ;;  %v264_v8 = vlaneseq }
 0x112   :  { %6793 = vmatprep.subr.bf16.mxu1 %v10172_v13 }
 0x113   :  { %v10416_v13 = vshrl.u32 %v264_v8, 7 }
 0x114   :  { %6731 = vmatpush1.bf16.msra.mxu0 %v10178_v19 }
 0x115   :  { %6795 = vmatpush1.bf16.msra.mxu1 %v10183_v20  ;;  %6733 = vmatprep.subr.bf16.mxu0 %v10185_v21  ;;  %12616 = vst [vmem:[#allocation22_spill] sm:$0xff] %v10416_v13  ;;  %v12415_v19 = vsub.s32 0, %v10416_v13  ;;  %v262_v20 = vld [vmem:[#allocation9] sm:$0xff]  ;;  %v12414_v21 = vsub.s32 1, %v10416_v13  ;;  %v12408_v9 = vsub.s32 6, %v10416_v13 }
 0x116   :  { %6797 = vmatprep.subr.bf16.mxu1 %v10188_v28 }
 0x117   :  { %v10422_v28 = vrot.slane %v262_v20, %v12415_v19  ;;  %v10463_v46 = vrot.slane %v262_v20, %v12408_v9 }
 0x118   :  { %6735 = vmatpush1.bf16.msra.mxu0 %v10194_v38  ;;  %v12413_v38 = vsub.s32 4, %v10416_v13 }
 0x119   :  { %6799 = vmatpush1.bf16.msra.mxu1 %v10199_v39  ;;  %6737 = vmatprep.subr.bf16.mxu0 %v10201_v40  ;;  %12617 = vst [vmem:[#allocation23_spill] sm:$0xff] %v10422_v28  ;;  %v10427_v39 = vrot.slane %v262_v20, %v12414_v21  ;;  %v12412_v40 = vsub.s32 5, %v10416_v13  ;;  %v1589_v21 = vld [vmem:[#allocation10 + $0x288] sm:$0xff] }
 0x11a   :  { %6801 = vmatprep.subr.bf16.mxu1 %v10204_v48 }
 0x11c   :  { %6739 = vmatpush1.bf16.msra.mxu0 %v10210_v54  ;;  %v12411_v54 = vsub.s32 3, %v10416_v13 }
 0x11d   :  { %6803 = vmatpush1.bf16.msra.mxu1 %v10215_v55  ;;  %6741 = vmatprep.subr.bf16.mxu0 %v10217_v60 }
 0x11e   :  { %6805 = vmatprep.subr.bf16.mxu1 %v10220_v3 }
 0x120   :  { %6743 = vmatpush1.bf16.msra.mxu0 %v10226_v11  ;;  %v10434_v11 = vrot.slane %v262_v20, %v12413_v38 }
 0x121   :  { %6807 = vmatpush1.bf16.msra.mxu1 %v10231_v12  ;;  %6745 = vmatprep.subr.bf16.mxu0 %v10233_v15 }
 0x122   :  { %6809 = vmatprep.subr.bf16.mxu1 %v10236_v18  ;;  %12618 = vst [vmem:[#allocation24_spill] sm:$0xff] %v10434_v11  ;;  %v10439_v18 = vrot.slane %v262_v20, %v12412_v40 }
 0x124   :  { %6747 = vmatpush1.bf16.msra.mxu0 %v10242_v33 }
 0x125   :  { %6811 = vmatpush1.bf16.msra.mxu1 %v10247_v34  ;;  %6749 = vmatprep.subr.bf16.mxu0 %v10249_v22  ;;  %v10443_v22 = vrot.slane %v262_v20, %v12411_v54 }
 0x126   :  { %6813 = vmatprep.subr.bf16.mxu1 %v10252_v47 }
 0x128   :  { %6751 = vmatpush1.bf16.msra.mxu0 %v10257_v53  ;;  %v12410_v53 = vsub.s32 7, %v10416_v13 }
 0x129   :  { %6815 = vmatpush1.bf16.msra.mxu1 %v10261_v61  ;;  %6753 = vmatprep.subr.bf16.mxu0 %v10263_v62  ;;  %v12409_v61 = vsub.s32 2, %v10416_v13 }
 0x12a   :  { %6817 = vmatprep.subr.bf16.mxu1 %v10266_v5 }
 0x12c   :  { %6755 = vmatpush1.bf16.msra.mxu0 %v10269_v24 }
 0x12d   :  { %6819 = vmatpush1.bf16.msra.mxu1 %v12606_v23  ;;  %6757 = vmatprep.subr.bf16.mxu0 %v12607_v27 }
 0x12e   :  { %6821 = vmatprep.subr.bf16.mxu1 %v12608_v30 }
 0x130   :  { %6759 = vmatpush1.bf16.msra.mxu0 %v12609_v31 }
 0x131   :  { %6823 = vmatpush1.bf16.msra.mxu1 %v12610_v32  ;;  %6761 = vmatprep.subr.bf16.mxu0 %v12611_v37 }
 0x132   :  { %6825 = vmatprep.subr.bf16.mxu1 %v12612_v43 }
 0x134   :  { %6763 = vmatpush1.bf16.msra.mxu0 %v12613_v44 }
 0x135   :  { %6827 = vmatpush1.bf16.msra.mxu1 %v12614_v45  ;;  %6765 = vmatprep.subr.bf16.mxu0 %v10299_v42 }
 0x136   :  { %6829 = vmatprep.subr.bf16.mxu1 %v12615_v51 }
 0x138   :  { %6767 = vmatpush1.bf16.msra.mxu0 %v10305_v2 }
 0x139   :  { %6831 = vmatpush1.bf16.msra.mxu1 %v10309_v0  ;;  %6769 = vmatprep.subr.bf16.mxu0 %v10311_v10  ;;  %v10452_v0 = vrot.slane %v262_v20, %v12410_v53  ;;  %v10456_v10 = vrot.slane %v262_v20, %v12409_v61  ;;  %v1581_v53 = vld [vmem:[#allocation10 + $0x248] sm:$0xff] }
 0x13a   :  { %6833 = vmatprep.subr.bf16.mxu1 %v10314_v29 }
 0x13c   :  { %6771 = vmatpush1.bf16.msra.mxu0 %v10317_v36 }
 0x13d   :  { %6835 = vmatpush1.bf16.msra.mxu1 %v10321_v26  ;;  %6773 = vmatprep.subr.bf16.mxu0 %v10323_v41 }
 0x13e   :  { %6837 = vmatprep.subr.bf16.mxu1 %v10326_v59 }
 0x140   :  { %6775 = vmatpush1.bf16.msra.mxu0 %v10329_v17 }
 0x141   :  { %6839 = vmatpush1.bf16.msra.mxu1 %v10333_v16  ;;  %6841 = vmatprep.subr.bf16.mxu0 %v10410_v1 }
 0x142   :  { %6905 = vmatprep.subr.bf16.mxu1 %v10412_v7 }
 0x1d5   :  { %v1022_v48 = vpop.f32.mrb[0].mxu0 }
 0x1d6   :  { %v8920_v55 = vadd.f32 %v1022_v48, %v10422_v28  ;;  %v1099_v60 = vpop.f32.mrb[0].mxu1  ;;  %v1024_v3 = vpop.f32.mrb[1].mxu0 }
 0x1d7   :  { %v8921_v12 = vadd.f32 %v1024_v3, %v10427_v39  ;;  %v1101_v15 = vpop.f32.mrb[1].mxu1  ;;  %v8936_v50 = vadd.f32 %v1099_v60, %v10456_v10  ;;  %v1508_v60 = vld [vmem:[#allocation10] sm:$0xff] }
 0x1d8   :  { %v6324_v33 = vmul.f32 -1.442695, %v8920_v55  ;;  %v8937_v42 = vadd.f32 %v1101_v15, %v10443_v22  ;;  %v1512_v3 = vld [vmem:[#allocation10 + $0x20] sm:$0xff]  ;;  %v1514_v15 = vld [vmem:[#allocation10 + $0x30] sm:$0xff] }
 0x1d9   :  { %v6326_v34 = vmul.f32 -1.442695, %v8921_v12  ;;  %v1028_v47 = vpop.f32.mrb[30].mxu0  ;;  %v1510_v12 = vld [vmem:[#allocation10 + $0x10] sm:$0xff] }
 0x1da   :  { %9191 = vpow2.f32 %v6324_v33  ;;  %v8966_v62 = vadd.f32 %v1028_v47, %v10434_v11  ;;  %v1030_v5 = vpop.f32.mrb[31].mxu0  ;;  %v1105_v24 = vpop.f32.mrb[30].mxu1  ;;  %v6328_v63 = vmul.f32 -1.442695, %v8937_v42  ;;  %v1517_v33 = vld [vmem:[#allocation10 + $0x48] sm:$0xff]  ;;  %v1519_v47 = vld [vmem:[#allocation10 + $0x58] sm:$0xff] }
 0x1db   :  { %9193 = vpow2.f32 %v6326_v34  ;;  %v8967_v2 = vadd.f32 %v1030_v5, %v10439_v18  ;;  %v1107_v4 = vpop.f32.mrb[31].mxu1  ;;  %v8982_v49 = vadd.f32 %v1105_v24, %v10463_v46  ;;  %v1521_v34 = vld [vmem:[#allocation10 + $0x68] sm:$0xff] }
 0x1dc   :  { %v6325_v36 = vmul.f32 -1.442695, %v8966_v62  ;;  %v8983_v29 = vadd.f32 %v1107_v4, %v10452_v0  ;;  %v1523_v62 = vld [vmem:[#allocation10 + $0x78] sm:$0xff]  ;;  %v10474_v4 = vpack.c.bf16 %v1514_v15, %v1510_v12  ;;  %v10478_v42 = vpack.c.bf16 %v1521_v34, %v1517_v33  ;;  %v1534_v12 = vld [vmem:[#allocation10 + $0xd0] sm:$0xff]  ;;  %v1541_v33 = vld [vmem:[#allocation10 + $0x108] sm:$0xff] }
 0x1dd   :  { %v6327_v14 = vmul.f32 -1.442695, %v8967_v2  ;;  %v10472_v2 = vpack.c.bf16 %v1512_v3, %v1508_v60  ;;  %v1538_v15 = vld [vmem:[#allocation10 + $0xf0] sm:$0xff]  ;;  %v1545_v34 = vld [vmem:[#allocation10 + $0x128] sm:$0xff] }
 0x1de   :  { %9195 = vpow2.f32 %v6325_v36  ;;  %v6329_v52 = vmul.f32 -1.442695, %v8983_v29  ;;  %v1520_v29 = vld [vmem:[#allocation10 + $0x60] sm:$0xff] }
 0x1df   :  { %9197 = vpow2.f32 %v6327_v14  ;;  %v10480_v14 = vpack.c.bf16 %v1523_v62, %v1519_v47  ;;  %v1543_v47 = vld [vmem:[#allocation10 + $0x118] sm:$0xff] }
 0x1e0   :  { %9199 = vpow2.f32 %v6328_v63  ;;  %v1516_v63 = vld [vmem:[#allocation10 + $0x40] sm:$0xff]  ;;  %v1547_v62 = vld [vmem:[#allocation10 + $0x138] sm:$0xff] }
 0x1e1   :  { %9201 = vtanh.f32 %v8936_v50  ;;  %v1518_v50 = vld [vmem:[#allocation10 + $0x50] sm:$0xff] }
 0x1e4   :  { %v9192_v26 = vpop.eup %9191 }
 0x1e5   :  { %v9194_v41 = vpop.eup %9193  ;;  %v1116_v35 = vadd.f32 1.0, %v9192_v26  ;;  %v1522_v26 = vld [vmem:[#allocation10 + $0x70] sm:$0xff] }
 0x1e6   :  { %v1128_v59 = vadd.f32 1.0, %v9194_v41  ;;  %v1525_v41 = vld [vmem:[#allocation10 + $0x88] sm:$0xff] }
 0x1e7   :  { %9203 = vrcp.f32 %v1116_v35 }
 0x1e8   :  { %v9196_v17 = vpop.eup %9195  ;;  %9205 = vrcp.f32 %v1128_v59  ;;  %v1527_v59 = vld [vmem:[#allocation10 + $0x98] sm:$0xff] }
 0x1e9   :  { %v9198_v16 = vpop.eup %9197  ;;  %v1117_v23 = vadd.f32 1.0, %v9196_v17  ;;  %9207 = vpow2.f32 %v6329_v52  ;;  %v1529_v52 = vld [vmem:[#allocation10 + $0xa8] sm:$0xff] }
 0x1ea   :  { %v1129_v27 = vadd.f32 1.0, %v9198_v16  ;;  %9209 = vtanh.f32 %v8982_v49  ;;  %v9200_v30 = vpop.eup %9199  ;;  %v1531_v49 = vld [vmem:[#allocation10 + $0xb8] sm:$0xff] }
 0x1eb   :  { %9211 = vrcp.f32 %v1117_v23  ;;  %v9202_v31 = vpop.eup %9201  ;;  %v1142_v44 = vadd.f32 1.0, %v9200_v30  ;;  %v10490_v23 = vpack.c.bf16 %v1520_v29, %v1516_v63  ;;  %v1524_v30 = vld [vmem:[#allocation10 + $0x80] sm:$0xff]  ;;  %v10524_v63 = vpack.c.bf16 %v1545_v34, %v1541_v33  ;;  %v1559_v33 = vld [vmem:[#allocation10 + $0x198] sm:$0xff] }
 0x1ec   :  { %9213 = vrcp.f32 %v1129_v27  ;;  %v10492_v27 = vpack.c.bf16 %v1522_v26, %v1518_v50  ;;  %v10526_v29 = vpack.c.bf16 %v1547_v62, %v1543_v47  ;;  %v1540_v50 = vld [vmem:[#allocation10 + $0x100] sm:$0xff]  ;;  %v1563_v47 = vld [vmem:[#allocation10 + $0x1b8] sm:$0xff] }
 0x1ed   :  { %9215 = vrcp.f32 %v1142_v44  ;;  %v1530_v44 = vld [vmem:[#allocation10 + $0xb0] sm:$0xff]  ;;  %v1544_v26 = vld [vmem:[#allocation10 + $0x120] sm:$0xff] }
 0x1ee   :  { %v1556_v62 = vld [vmem:[#allocation10 + $0x180] sm:$0xff] }
 0x1f1   :  { %v9204_v32 = vpop.eup %9203 }
 0x1f2   :  { %v9206_v37 = vpop.eup %9205  ;;  %v1150_v43 = vmul.f32 %v9204_v32, %v9202_v31  ;;  %v1528_v31 = vld [vmem:[#allocation10 + $0xa0] sm:$0xff]  ;;  %v10494_v32 = vpack.c.bf16 %v1529_v52, %v1525_v41  ;;  %v1542_v41 = vld [vmem:[#allocation10 + $0x110] sm:$0xff] }
 0x1f3   :  { %v9208_v45 = vpop.eup %9207  ;;  %v1148_v51 = vmul.f32 0.0, %v9206_v37  ;;  %v10496_v37 = vpack.c.bf16 %v1531_v49, %v1527_v59  ;;  %v1546_v52 = vld [vmem:[#allocation10 + $0x130] sm:$0xff]  ;;  %v1549_v49 = vld [vmem:[#allocation10 + $0x148] sm:$0xff] }
 0x1f4   :  { %v9210_v56 = vpop.eup %9209  ;;  %v1143_v20 = vadd.f32 1.0, %v9208_v45  ;;  %v1533_v45 = vld [vmem:[#allocation10 + $0xc8] sm:$0xff]  ;;  %v10534_v59 = vpack.c.bf16 %v1546_v52, %v1542_v41  ;;  %v1558_v52 = vld [vmem:[#allocation10 + $0x190] sm:$0xff] }
 0x1f5   :  { %v9212_v57 = vpop.eup %9211  ;;  %v10466_v58 = vadd.f32 %v1150_v43, %v1148_v51  ;;  %v1526_v43 = vld [vmem:[#allocation10 + $0x90] sm:$0xff]  ;;  %v1537_v51 = vld [vmem:[#allocation10 + $0xe8] sm:$0xff] }
 0x1f6   :  { %v9214_v6 = vpop.eup %9213  ;;  %v1151_v8 = vmul.f32 %v9212_v57, %v9210_v56  ;;  %v1535_v56 = vld [vmem:[#allocation10 + $0xd8] sm:$0xff]  ;;  %v10510_v60 = vpack.c.bf16 %v1537_v51, %v1533_v45  ;;  %v1552_v45 = vld [vmem:[#allocation10 + $0x160] sm:$0xff] }
 0x1f7   :  { %9217 = vtanh.f32 %v10466_v58  ;;  %v1149_v48 = vmul.f32 0.0, %v9214_v6  ;;  %v9216_v5 = vpop.eup %9215  ;;  %v1539_v57 = vld [vmem:[#allocation10 + $0xf8] sm:$0xff]  ;;  %v10504_v6 = vpack.c.bf16 %v1528_v31, %v1524_v30 }
 0x1f8   :  { %9219 = vrcp.f32 %v1143_v20  ;;  %v1532_v20 = vld [vmem:[#allocation10 + $0xc0] sm:$0xff]  ;;  %v10512_v3 = vpack.c.bf16 %v1539_v57, %v1535_v56  ;;  %v1551_v30 = vld [vmem:[#allocation10 + $0x158] sm:$0xff]  ;;  %v1550_v57 = vld [vmem:[#allocation10 + $0x150] sm:$0xff] }
 0x1f9   :  { %v10469_v55 = vadd.f32 %v1151_v8, %v1149_v48  ;;  %v10506_v8 = vpack.c.bf16 %v1530_v44, %v1526_v43  ;;  %v1536_v48 = vld [vmem:[#allocation10 + $0xe0] sm:$0xff]  ;;  %v1555_v43 = vld [vmem:[#allocation10 + $0x178] sm:$0xff] }
 0x1fa   :  { %v1548_v44 = vld [vmem:[#allocation10 + $0x140] sm:$0xff]  ;;  %v10540_v51 = vpack.c.bf16 %v1555_v43, %v1551_v30  ;;  %v1565_v30 = vld [vmem:[#allocation10 + $0x1c8] sm:$0xff] }
 0x1fb   :  { %9221 = vtanh.f32 %v10469_v55  ;;  %v10542_v56 = vpack.c.bf16 %v1552_v45, %v1548_v44  ;;  %v1569_v43 = vld [vmem:[#allocation10 + $0x1e8] sm:$0xff]  ;;  %v1567_v44 = vld [vmem:[#allocation10 + $0x1d8] sm:$0xff] }
 0x1fc   :  { %v10562_v45 = vpack.c.bf16 %v1569_v43, %v1565_v30  ;;  %v1575_v30 = vld [vmem:[#allocation10 + $0x218] sm:$0xff] }
 0x201   :  { %v9218_v24 = vpop.eup %9217 }
 0x202   :  { %v10476_v36 = vmul.f32 %v9218_v24, %v9216_v5  ;;  %v9220_v35 = vpop.eup %9219  ;;  %v10518_v5 = vpack.c.bf16 %v1536_v48, %v1532_v20  ;;  %v10520_v24 = vpack.c.bf16 %v1538_v15, %v1534_v12  ;;  %v1554_v20 = vld [vmem:[#allocation10 + $0x170] sm:$0xff]  ;;  %v1557_v12 = vld [vmem:[#allocation10 + $0x188] sm:$0xff] }
 0x203   :  { %v10545_v48 = vpack.c.bf16 %v1554_v20, %v1550_v57  ;;  %v1561_v15 = vld [vmem:[#allocation10 + $0x1a8] sm:$0xff]  ;;  %v1571_v57 = vld [vmem:[#allocation10 + $0x1f8] sm:$0xff]  ;;  %v1564_v20 = vld [vmem:[#allocation10 + $0x1c0] sm:$0xff] }
 0x204   :  { %12619 = vst [vmem:[#allocation25_spill] sm:$0xff] %v10476_v36  ;;  %1361 = vmatmul.mubr.f32.vlgmr.msra.gmra.mrb[2].mxu0 %v10476_v36  ;;  %1438 = vmatmul.mubr.f32.vlgmr.msra.gmra.mrb[2].mxu1 %v10476_v36  ;;  %v10550_v34 = vpack.c.bf16 %v1561_v15, %v1557_v12  ;;  %v1568_v12 = vld [vmem:[#allocation10 + $0x1e0] sm:$0xff]  ;;  %v10564_v15 = vpack.c.bf16 %v1571_v57, %v1567_v44  ;;  %v1579_v44 = vld [vmem:[#allocation10 + $0x238] sm:$0xff]  ;;  %v1597_v36 = vld [vmem:[#allocation10 + $0x2c8] sm:$0xff] }
 0x205   :  { %v9222_v17 = vpop.eup %9221  ;;  %6843 = vmatpush1.bf16.msra.mxu0 %v10472_v2  ;;  %6907 = vmatpush1.bf16.msra.mxu1 %v10474_v4  ;;  %v1572_v57 = vld [vmem:[#allocation10 + $0x200] sm:$0xff] }
 0x206   :  { %v10486_v16 = vmul.f32 %v9222_v17, %v9220_v35  ;;  %6845 = vmatprep.subr.bf16.mxu0 %v10478_v42  ;;  %6909 = vmatprep.subr.bf16.mxu1 %v10480_v14  ;;  %v10532_v35 = vpack.c.bf16 %v1544_v26, %v1540_v50  ;;  %v1553_v17 = vld [vmem:[#allocation10 + $0x168] sm:$0xff]  ;;  %v1560_v50 = vld [vmem:[#allocation10 + $0x1a0] sm:$0xff]  ;;  %v10552_v26 = vpack.c.bf16 %v1563_v47, %v1559_v33  ;;  %v1566_v47 = vld [vmem:[#allocation10 + $0x1d0] sm:$0xff] }
 0x207   :  { %v10538_v31 = vpack.c.bf16 %v1553_v17, %v1549_v49  ;;  %v10554_v41 = vpack.c.bf16 %v1560_v50, %v1556_v62  ;;  %v1562_v49 = vld [vmem:[#allocation10 + $0x1b0] sm:$0xff]  ;;  %v10566_v33 = vpack.c.bf16 %v1568_v12, %v1564_v20  ;;  %v1576_v20 = vld [vmem:[#allocation10 + $0x220] sm:$0xff]  ;;  %v10576_v12 = vpack.c.bf16 %v1579_v44, %v1575_v30  ;;  %v1587_v30 = vld [vmem:[#allocation10 + $0x278] sm:$0xff] }
 0x208   :  { %12620 = vst [vmem:[#allocation26_spill] sm:$0xff] %v10486_v16  ;;  %1366 = vmatprep.mubr.f32.mxu0 %v10486_v16  ;;  %1443 = vmatprep.mubr.f32.mxu1 %v10486_v16  ;;  %v10557_v17 = vpack.c.bf16 %v1562_v49, %v1558_v52  ;;  %v1570_v62 = vld [vmem:[#allocation10 + $0x1f0] sm:$0xff]  ;;  %v1573_v52 = vld [vmem:[#allocation10 + $0x208] sm:$0xff]  ;;  %v10578_v9 = vpack.c.bf16 %v1576_v20, %v1572_v57  ;;  %v1580_v44 = vld [vmem:[#allocation10 + $0x240] sm:$0xff] }
 0x209   :  { %1367 = vmatmul.mubr.f32.gmra.mrb[28].mxu0 %v12605_v25  ;;  %1444 = vmatmul.mubr.f32.gmra.mrb[28].mxu1 %v12605_v25  ;;  %v10569_v50 = vpack.c.bf16 %v1570_v62, %v1566_v47  ;;  %v1577_v49 = vld [vmem:[#allocation10 + $0x228] sm:$0xff]  ;;  %v1574_v47 = vld [vmem:[#allocation10 + $0x210] sm:$0xff]  ;;  %v1584_v57 = vld [vmem:[#allocation10 + $0x260] sm:$0xff] }
 0x20a   :  { %6847 = vmatpush1.bf16.msra.mxu0 %v10490_v23  ;;  %6911 = vmatpush1.bf16.msra.mxu1 %v10492_v27  ;;  %v10574_v43 = vpack.c.bf16 %v1577_v49, %v1573_v52  ;;  %v1578_v62 = vld [vmem:[#allocation10 + $0x230] sm:$0xff]  ;;  %v1585_v52 = vld [vmem:[#allocation10 + $0x268] sm:$0xff]  ;;  %v1583_v49 = vld [vmem:[#allocation10 + $0x258] sm:$0xff]  ;;  %v10590_v40 = vpack.c.bf16 %v1584_v57, %v1580_v44 }
 0x20b   :  { %6849 = vmatprep.subr.bf16.mxu0 %v10494_v32  ;;  %6913 = vmatprep.subr.bf16.mxu1 %v10496_v37  ;;  %v10581_v61 = vpack.c.bf16 %v1578_v62, %v1574_v47  ;;  %v10586_v54 = vpack.c.bf16 %v1585_v52, %v1581_v53  ;;  %v10588_v20 = vpack.c.bf16 %v1587_v30, %v1583_v49  ;;  %v1582_v47 = vld [vmem:[#allocation10 + $0x250] sm:$0xff]  ;;  %v1593_v53 = vld [vmem:[#allocation10 + $0x2a8] sm:$0xff]  ;;  %v1591_v52 = vld [vmem:[#allocation10 + $0x298] sm:$0xff] }
 0x20c   :  { %1700 = vmatprep.mubr.f32.mxu0 %v12605_v25  ;;  %1777 = vmatprep.mubr.f32.mxu1 %v12605_v25  ;;  %12621 = vst [vmem:[#allocation27_spill] sm:$0xff] %v10590_v40  ;;  %v1586_v62 = vld [vmem:[#allocation10 + $0x270] sm:$0xff]  ;;  %v10598_v19 = vpack.c.bf16 %v1593_v53, %v1589_v21  ;;  %v1595_v49 = vld [vmem:[#allocation10 + $0x2b8] sm:$0xff]  ;;  %v1588_v30 = vld [vmem:[#allocation10 + $0x280] sm:$0xff] }
 0x20d   :  { %v10593_v38 = vpack.c.bf16 %v1586_v62, %v1582_v47  ;;  %v1592_v44 = vld [vmem:[#allocation10 + $0x2a0] sm:$0xff]  ;;  %v10600_v57 = vpack.c.bf16 %v1595_v49, %v1591_v52  ;;  %v1590_v47 = vld [vmem:[#allocation10 + $0x290] sm:$0xff]  ;;  %v1601_v21 = vld [vmem:[#allocation10 + $0x2e8] sm:$0xff] }
 0x20e   :  { %6851 = vmatpush1.bf16.msra.mxu0 %v10504_v6  ;;  %6915 = vmatpush1.bf16.msra.mxu1 %v10506_v8  ;;  %12623 = vst [vmem:[#allocation29_spill] sm:$0xff] %v10598_v19  ;;  %v10602_v13 = vpack.c.bf16 %v1592_v44, %v1588_v30  ;;  %v1594_v62 = vld [vmem:[#allocation10 + $0x2b0] sm:$0xff]  ;;  %v1599_v53 = vld [vmem:[#allocation10 + $0x2d8] sm:$0xff]  ;;  %v1596_v49 = vld [vmem:[#allocation10 + $0x2c0] sm:$0xff] }
 0x20f   :  { %6853 = vmatprep.subr.bf16.mxu0 %v10510_v60  ;;  %6917 = vmatprep.subr.bf16.mxu1 %v10512_v3  ;;  %12622 = vst [vmem:[#allocation28_spill] sm:$0xff] %v10593_v38  ;;  %12624 = vst [vmem:[#allocation30_spill] sm:$0xff] %v10600_v57  ;;  %v10605_v16 = vpack.c.bf16 %v1594_v62, %v1590_v47  ;;  %v1603_v52 = vld [vmem:[#allocation10 + $0x2f8] sm:$0xff]  ;;  %v1600_v30 = vld [vmem:[#allocation10 + $0x2e0] sm:$0xff] }
 0x210   :  { %12625 = vst [vmem:[#allocation31_spill] sm:$0xff] %v10602_v13  ;;  %v10612_v44 = vpack.c.bf16 %v1603_v52, %v1599_v53  ;;  %v1598_v47 = vld [vmem:[#allocation10 + $0x2d0] sm:$0xff]  ;;  %v1611_v53 = vld [vmem:[#allocation10 + $0x338] sm:$0xff]  ;;  %v1604_v52 = vld [vmem:[#allocation10 + $0x300] sm:$0xff] }
 0x211   :  { %12626 = vst [vmem:[#allocation32_spill] sm:$0xff] %v10605_v16  ;;  %v1602_v62 = vld [vmem:[#allocation10 + $0x2f0] sm:$0xff] }
 0x212   :  { %6855 = vmatpush1.bf16.msra.mxu0 %v10518_v5  ;;  %6919 = vmatpush1.bf16.msra.mxu1 %v10520_v24  ;;  %12628 = vst [vmem:[#allocation34_spill] sm:$0xff] %v10612_v44 }
 0x213   :  { %6857 = vmatprep.subr.bf16.mxu0 %v10524_v63  ;;  %6921 = vmatprep.subr.bf16.mxu1 %v10526_v29 }
 0x216   :  { %6859 = vmatpush1.bf16.msra.mxu0 %v10532_v35  ;;  %6923 = vmatpush1.bf16.msra.mxu1 %v10534_v59 }
 0x217   :  { %6861 = vmatprep.subr.bf16.mxu0 %v10538_v31  ;;  %6925 = vmatprep.subr.bf16.mxu1 %v10540_v51 }
 0x21a   :  { %6863 = vmatpush1.bf16.msra.mxu0 %v10542_v56  ;;  %6927 = vmatpush1.bf16.msra.mxu1 %v10545_v48 }
 0x21b   :  { %6865 = vmatprep.subr.bf16.mxu0 %v10550_v34  ;;  %6929 = vmatprep.subr.bf16.mxu1 %v10552_v26 }
 0x21e   :  { %6867 = vmatpush1.bf16.msra.mxu0 %v10554_v41  ;;  %6931 = vmatpush1.bf16.msra.mxu1 %v10557_v17 }
 0x21f   :  { %6869 = vmatprep.subr.bf16.mxu0 %v10562_v45  ;;  %6933 = vmatprep.subr.bf16.mxu1 %v10564_v15 }
 0x222   :  { %6871 = vmatpush1.bf16.msra.mxu0 %v10566_v33  ;;  %6935 = vmatpush1.bf16.msra.mxu1 %v10569_v50 }
 0x223   :  { %6873 = vmatprep.subr.bf16.mxu0 %v10574_v43  ;;  %6937 = vmatprep.subr.bf16.mxu1 %v10576_v12 }
 0x226   :  { %6875 = vmatpush1.bf16.msra.mxu0 %v10578_v9  ;;  %6939 = vmatpush1.bf16.msra.mxu1 %v10581_v61 }
 0x227   :  { %6877 = vmatprep.subr.bf16.mxu0 %v10586_v54  ;;  %6941 = vmatprep.subr.bf16.mxu1 %v10588_v20 }
 0x22a   :  { %6879 = vmatpush1.bf16.msra.mxu0 %v10590_v40  ;;  %6943 = vmatpush1.bf16.msra.mxu1 %v10593_v38  ;;  %v10610_v38 = vpack.c.bf16 %v1601_v21, %v1597_v36  ;;  %v10614_v40 = vpack.c.bf16 %v1600_v30, %v1596_v49  ;;  %v1609_v36 = vld [vmem:[#allocation10 + $0x328] sm:$0xff]  ;;  %v1607_v21 = vld [vmem:[#allocation10 + $0x318] sm:$0xff]  ;;  %v1608_v49 = vld [vmem:[#allocation10 + $0x320] sm:$0xff] }
 0x22b   :  { %6881 = vmatprep.subr.bf16.mxu0 %v10598_v19  ;;  %6945 = vmatprep.subr.bf16.mxu1 %v10600_v57  ;;  %v10617_v57 = vpack.c.bf16 %v1602_v62, %v1598_v47  ;;  %v10624_v30 = vpack.c.bf16 %v1611_v53, %v1607_v21  ;;  %v10626_v19 = vpack.c.bf16 %v1608_v49, %v1604_v52  ;;  %v1606_v47 = vld [vmem:[#allocation10 + $0x310] sm:$0xff]  ;;  %v1619_v21 = vld [vmem:[#allocation10 + $0x378] sm:$0xff]  ;;  %v1612_v53 = vld [vmem:[#allocation10 + $0x340] sm:$0xff] }
 0x22c   :  { %12627 = vst [vmem:[#allocation33_spill] sm:$0xff] %v10610_v38  ;;  %12629 = vst [vmem:[#allocation35_spill] sm:$0xff] %v10614_v40  ;;  %v1610_v62 = vld [vmem:[#allocation10 + $0x330] sm:$0xff]  ;;  %v1616_v52 = vld [vmem:[#allocation10 + $0x360] sm:$0xff] }
 0x22d   :  { %12630 = vst [vmem:[#allocation36_spill] sm:$0xff] %v10617_v57  ;;  %12632 = vst [vmem:[#allocation38_spill] sm:$0xff] %v10624_v30 }
 0x22e   :  { %6883 = vmatpush1.bf16.msra.mxu0 %v10602_v13  ;;  %6947 = vmatpush1.bf16.msra.mxu1 %v10605_v16  ;;  %v1605_v16 = vld [vmem:[#allocation10 + $0x308] sm:$0xff]  ;;  %12633 = vst [vmem:[#allocation39_spill] sm:$0xff] %v10626_v19 }
 0x22f   :  { %6885 = vmatprep.subr.bf16.mxu0 %v10610_v38  ;;  %6949 = vmatprep.subr.bf16.mxu1 %v10612_v44  ;;  %v10622_v13 = vpack.c.bf16 %v1609_v36, %v1605_v16  ;;  %v10629_v44 = vpack.c.bf16 %v1610_v62, %v1606_v47  ;;  %v1617_v16 = vld [vmem:[#allocation10 + $0x368] sm:$0xff]  ;;  %v1615_v36 = vld [vmem:[#allocation10 + $0x358] sm:$0xff]  ;;  %v10638_v38 = vpack.c.bf16 %v1616_v52, %v1612_v53  ;;  %v1614_v47 = vld [vmem:[#allocation10 + $0x350] sm:$0xff] }
 0x230   :  { %v10636_v49 = vpack.c.bf16 %v1619_v21, %v1615_v36  ;;  %v1618_v62 = vld [vmem:[#allocation10 + $0x370] sm:$0xff]  ;;  %v1627_v36 = vld [vmem:[#allocation10 + $0x3b8] sm:$0xff]  ;;  %v1620_v21 = vld [vmem:[#allocation10 + $0x380] sm:$0xff] }
 0x231   :  { %12631 = vst [vmem:[#allocation37_spill] sm:$0xff] %v10622_v13  ;;  %12634 = vst [vmem:[#allocation40_spill] sm:$0xff] %v10629_v44  ;;  %v1624_v53 = vld [vmem:[#allocation10 + $0x3a0] sm:$0xff] }
 0x232   :  { %6887 = vmatpush1.bf16.msra.mxu0 %v10614_v40  ;;  %6951 = vmatpush1.bf16.msra.mxu1 %v10617_v57  ;;  %v1613_v57 = vld [vmem:[#allocation10 + $0x348] sm:$0xff]  ;;  %12636 = vst [vmem:[#allocation42_spill] sm:$0xff] %v10636_v49  ;;  %12637 = vst [vmem:[#allocation43_spill] sm:$0xff] %v10638_v38 }
 0x233   :  { %6889 = vmatprep.subr.bf16.mxu0 %v10622_v13  ;;  %6953 = vmatprep.subr.bf16.mxu1 %v10624_v30  ;;  %v10634_v40 = vpack.c.bf16 %v1617_v16, %v1613_v57  ;;  %v10641_v30 = vpack.c.bf16 %v1618_v62, %v1614_v47  ;;  %v1625_v57 = vld [vmem:[#allocation10 + $0x3a8] sm:$0xff]  ;;  %v1623_v16 = vld [vmem:[#allocation10 + $0x398] sm:$0xff]  ;;  %v10650_v13 = vpack.c.bf16 %v1624_v53, %v1620_v21  ;;  %v1622_v47 = vld [vmem:[#allocation10 + $0x390] sm:$0xff] }
 0x234   :  { %v10648_v52 = vpack.c.bf16 %v1627_v36, %v1623_v16  ;;  %v1626_v62 = vld [vmem:[#allocation10 + $0x3b0] sm:$0xff]  ;;  %v1635_v16 = vld [vmem:[#allocation10 + $0x3f8] sm:$0xff]  ;;  %v1628_v36 = vld [vmem:[#allocation10 + $0x3c0] sm:$0xff] }
 0x235   :  { %12635 = vst [vmem:[#allocation41_spill] sm:$0xff] %v10634_v40  ;;  %12638 = vst [vmem:[#allocation44_spill] sm:$0xff] %v10641_v30  ;;  %v1632_v21 = vld [vmem:[#allocation10 + $0x3e0] sm:$0xff] }
 0x236   :  { %6891 = vmatpush1.bf16.msra.mxu0 %v10626_v19  ;;  %6955 = vmatpush1.bf16.msra.mxu1 %v10629_v44  ;;  %v1621_v44 = vld [vmem:[#allocation10 + $0x388] sm:$0xff]  ;;  %12639 = vst [vmem:[#allocation45_spill] sm:$0xff] %v10648_v52  ;;  %12640 = vst [vmem:[#allocation46_spill] sm:$0xff] %v10650_v13 }
 0x237   :  { %6893 = vmatprep.subr.bf16.mxu0 %v10634_v40  ;;  %6957 = vmatprep.subr.bf16.mxu1 %v10636_v49  ;;  %v10646_v19 = vpack.c.bf16 %v1625_v57, %v1621_v44  ;;  %v10653_v49 = vpack.c.bf16 %v1626_v62, %v1622_v47  ;;  %v1633_v44 = vld [vmem:[#allocation10 + $0x3e8] sm:$0xff]  ;;  %v1631_v57 = vld [vmem:[#allocation10 + $0x3d8] sm:$0xff]  ;;  %v10662_v40 = vpack.c.bf16 %v1632_v21, %v1628_v36  ;;  %v1630_v47 = vld [vmem:[#allocation10 + $0x3d0] sm:$0xff] }
 0x238   :  { %v10660_v53 = vpack.c.bf16 %v1635_v16, %v1631_v57  ;;  %v1634_v62 = vld [vmem:[#allocation10 + $0x3f0] sm:$0xff] }
 0x239   :  { %12641 = vst [vmem:[#allocation47_spill] sm:$0xff] %v10653_v49  ;;  %12644 = vst [vmem:[#allocation50_spill] sm:$0xff] %v10662_v40 }
 0x23a   :  { %6895 = vmatpush1.bf16.msra.mxu0 %v10638_v38  ;;  %6959 = vmatpush1.bf16.msra.mxu1 %v10641_v30  ;;  %v1629_v30 = vld [vmem:[#allocation10 + $0x3c8] sm:$0xff]  ;;  %12643 = vst [vmem:[#allocation49_spill] sm:$0xff] %v10660_v53 }
 0x23b   :  { %6897 = vmatprep.subr.bf16.mxu0 %v10646_v19  ;;  %6961 = vmatprep.subr.bf16.mxu1 %v10648_v52  ;;  %v10658_v38 = vpack.c.bf16 %v1633_v44, %v1629_v30  ;;  %v10665_v52 = vpack.c.bf16 %v1634_v62, %v1630_v47 }
 0x23d   :  { %12642 = vst [vmem:[#allocation48_spill] sm:$0xff] %v10658_v38  ;;  %12645 = vst [vmem:[#allocation51_spill] sm:$0xff] %v10665_v52 }
 0x23e   :  { %6899 = vmatpush1.bf16.msra.mxu0 %v10650_v13  ;;  %6963 = vmatpush1.bf16.msra.mxu1 %v10653_v49 }
 0x23f   :  { %6901 = vmatprep.subr.bf16.mxu0 %v10658_v38  ;;  %6965 = vmatprep.subr.bf16.mxu1 %v10660_v53 }
 0x242   :  { %6903 = vmatpush1.bf16.msra.mxu0 %v10662_v40  ;;  %6967 = vmatpush1.bf16.msra.mxu1 %v10665_v52 }
 0x243   :  { %6969 = vmatprep.subr.bf16.mxu0 %v10410_v1  ;;  %7033 = vmatprep.subr.bf16.mxu1 %v10412_v7 }
 0x2d7   :  { %v1362_v30 = vpop.f32.mrb[2].mxu0  ;;  %v1439_v44 = vpop.f32.mrb[2].mxu1 }
 0x2d8   :  { %v8922_v57 = vadd.f32 %v1362_v30, %v10422_v28  ;;  %v1364_v16 = vpop.f32.mrb[3].mxu0  ;;  %v1441_v36 = vpop.f32.mrb[3].mxu1 }
 0x2d9   :  { %v8923_v21 = vadd.f32 %v1364_v16, %v10427_v39  ;;  %v8939_v49 = vadd.f32 %v1441_v36, %v10443_v22 }
 0x2da   :  { %v6330_v47 = vmul.f32 -1.442695, %v8922_v57  ;;  %v8938_v57 = vadd.f32 %v1439_v44, %v10456_v10 }
 0x2db   :  { %v6332_v62 = vmul.f32 -1.442695, %v8923_v21  ;;  %v6334_v28 = vmul.f32 -1.442695, %v8939_v49 }
 0x2dc   :  { %9223 = vpow2.f32 %v6330_v47  ;;  %v1368_v53 = vpop.f32.mrb[28].mxu0  ;;  %v1445_v38 = vpop.f32.mrb[28].mxu1 }
 0x2dd   :  { %9225 = vpow2.f32 %v6332_v62  ;;  %v8964_v52 = vadd.f32 %v1368_v53, %v10434_v11  ;;  %v1370_v40 = vpop.f32.mrb[29].mxu0  ;;  %v1447_v1 = vpop.f32.mrb[29].mxu1 }
 0x2de   :  { %v8965_v7 = vadd.f32 %v1370_v40, %v10439_v18  ;;  %v8981_v16 = vadd.f32 %v1447_v1, %v10452_v0  ;;  %v8980_v40 = vadd.f32 %v1445_v38, %v10463_v46 }
 0x2df   :  { %v6331_v13 = vmul.f32 -1.442695, %v8964_v52 }
 0x2e0   :  { %v6333_v30 = vmul.f32 -1.442695, %v8965_v7  ;;  %v6335_v11 = vmul.f32 -1.442695, %v8981_v16 }
 0x2e1   :  { %9227 = vpow2.f32 %v6331_v13 }
 0x2e2   :  { %9229 = vpow2.f32 %v6333_v30 }
 0x2e3   :  { %9231 = vpow2.f32 %v6334_v28 }
 0x2e4   :  { %9233 = vtanh.f32 %v8938_v57 }
 0x2e6   :  { %v9224_v21 = vpop.eup %9223 }
 0x2e7   :  { %v9226_v47 = vpop.eup %9225  ;;  %v1456_v62 = vadd.f32 1.0, %v9224_v21 }
 0x2e8   :  { %v1468_v53 = vadd.f32 1.0, %v9226_v47 }
 0x2e9   :  { %9235 = vrcp.f32 %v1456_v62 }
 0x2ea   :  { %9237 = vrcp.f32 %v1468_v53 }
 0x2eb   :  { %v9228_v52 = vpop.eup %9227  ;;  %9239 = vpow2.f32 %v6335_v11 }
 0x2ec   :  { %v9230_v36 = vpop.eup %9229  ;;  %v1457_v13 = vadd.f32 1.0, %v9228_v52  ;;  %9241 = vtanh.f32 %v8980_v40 }
 0x2ed   :  { %v1469_v49 = vadd.f32 1.0, %v9230_v36  ;;  %v9232_v44 = vpop.eup %9231 }
 0x2ee   :  { %9243 = vrcp.f32 %v1457_v13  ;;  %v9234_v1 = vpop.eup %9233  ;;  %v1482_v57 = vadd.f32 1.0, %v9232_v44 }
 0x2ef   :  { %9245 = vrcp.f32 %v1469_v49 }
 0x2f0   :  { %9247 = vrcp.f32 %v1482_v57 }
 0x2f3   :  { %v9236_v7 = vpop.eup %9235 }
 0x2f4   :  { %v9238_v30 = vpop.eup %9237  ;;  %v1490_v28 = vmul.f32 %v9236_v7, %v9234_v1 }
 0x2f5   :  { %v1488_v16 = vmul.f32 %v9238_v30, %v10466_v58  ;;  %v9240_v21 = vpop.eup %9239 }
 0x2f6   :  { %v9242_v47 = vpop.eup %9241  ;;  %v1483_v40 = vadd.f32 1.0, %v9240_v21  ;;  %v12674_v21 = vld [vmem:[#allocation24_spill] sm:$0xff] }
 0x2f7   :  { %v10681_v38 = vadd.f32 %v1490_v28, %v1488_v16 }
 0x2f8   :  { %v9244_v62 = vpop.eup %9243 }
 0x2f9   :  { %v9246_v53 = vpop.eup %9245  ;;  %9249 = vtanh.f32 %v10681_v38  ;;  %v1491_v11 = vmul.f32 %v9244_v62, %v9242_v47 }
 0x2fa   :  { %v1489_v52 = vmul.f32 %v9246_v53, %v10469_v55  ;;  %9251 = vrcp.f32 %v1483_v40  ;;  %v9248_v13 = vpop.eup %9247 }
 0x2fc   :  { %v10685_v36 = vadd.f32 %v1491_v11, %v1489_v52 }
 0x2fe   :  { %9253 = vtanh.f32 %v10685_v36 }
 0x303   :  { %v9250_v58 = vpop.eup %9249 }
 0x304   :  { %v10688_v49 = vmul.f32 %v9250_v58, %v9248_v13  ;;  %v9252_v44 = vpop.eup %9251 }
 0x306   :  { %12646 = vst [vmem:[#allocation52_spill] sm:$0xff] %v10688_v49  ;;  %1701 = vmatmul.mubr.f32.vlgmr.msra.gmra.mrb[4].mxu0 %v10688_v49  ;;  %1778 = vmatmul.mubr.f32.vlgmr.msra.gmra.mrb[4].mxu1 %v10688_v49  ;;  %v2277_v49 = vld [vmem:[#allocation10 + $0x2c8] sm:$0xff] }
 0x307   :  { %6971 = vmatpush1.bf16.msra.mxu0 %v10472_v2  ;;  %7035 = vmatpush1.bf16.msra.mxu1 %v10474_v4  ;;  %v12648_v2 = vld [vmem:[#allocation27_spill] sm:$0xff]  ;;  %v12649_v4 = vld [vmem:[#allocation28_spill] sm:$0xff] }
 0x308   :  { %v9254_v1 = vpop.eup %9253  ;;  %6973 = vmatprep.subr.bf16.mxu0 %v10478_v42  ;;  %7037 = vmatprep.subr.bf16.mxu1 %v10480_v14  ;;  %v12650_v42 = vld [vmem:[#allocation29_spill] sm:$0xff]  ;;  %v12651_v14 = vld [vmem:[#allocation30_spill] sm:$0xff] }
 0x309   :  { %v10696_v55 = vmul.f32 %v9254_v1, %v9252_v44 }
 0x30b   :  { %12647 = vst [vmem:[#allocation53_spill] sm:$0xff] %v10696_v55  ;;  %1706 = vmatprep.mubr.f32.mxu0 %v10696_v55  ;;  %1783 = vmatprep.mubr.f32.mxu1 %v10696_v55 }
 0x30c   :  { %1707 = vmatmul.mubr.f32.gmra.mrb[26].mxu0 %v12605_v25  ;;  %1784 = vmatmul.mubr.f32.gmra.mrb[26].mxu1 %v12605_v25 }
 0x30d   :  { %6975 = vmatpush1.bf16.msra.mxu0 %v10490_v23  ;;  %7039 = vmatpush1.bf16.msra.mxu1 %v10492_v27  ;;  %v12652_v23 = vld [vmem:[#allocation31_spill] sm:$0xff]  ;;  %v12653_v27 = vld [vmem:[#allocation32_spill] sm:$0xff] }
 0x30e   :  { %6977 = vmatprep.subr.bf16.mxu0 %v10494_v32  ;;  %7041 = vmatprep.subr.bf16.mxu1 %v10496_v37  ;;  %v12654_v32 = vld [vmem:[#allocation33_spill] sm:$0xff] }
 0x30f   :  { %2040 = vmatprep.mubr.f32.mxu0 %v12605_v25  ;;  %2117 = vmatprep.mubr.f32.mxu1 %v12605_v25  ;;  %v12658_v37 = vld [vmem:[#allocation37_spill] sm:$0xff] }
 0x311   :  { %6979 = vmatpush1.bf16.msra.mxu0 %v10504_v6  ;;  %7043 = vmatpush1.bf16.msra.mxu1 %v10506_v8  ;;  %v12659_v6 = vld [vmem:[#allocation38_spill] sm:$0xff]  ;;  %v12660_v8 = vld [vmem:[#allocation39_spill] sm:$0xff] }
 0x312   :  { %6981 = vmatprep.subr.bf16.mxu0 %v10510_v60  ;;  %7045 = vmatprep.subr.bf16.mxu1 %v10512_v3  ;;  %v12661_v60 = vld [vmem:[#allocation40_spill] sm:$0xff]  ;;  %v12662_v3 = vld [vmem:[#allocation41_spill] sm:$0xff] }
 0x315   :  { %6983 = vmatpush1.bf16.msra.mxu0 %v10518_v5  ;;  %7047 = vmatpush1.bf16.msra.mxu1 %v10520_v24  ;;  %v12663_v5 = vld [vmem:[#allocation42_spill] sm:$0xff]  ;;  %v12664_v24 = vld [vmem:[#allocation43_spill] sm:$0xff] }
 0x316   :  { %6985 = vmatprep.subr.bf16.mxu0 %v10524_v63  ;;  %7049 = vmatprep.subr.bf16.mxu1 %v10526_v29  ;;  %v12665_v63 = vld [vmem:[#allocation44_spill] sm:$0xff]  ;;  %v12666_v29 = vld [vmem:[#allocation45_spill] sm:$0xff] }
 0x319   :  { %6987 = vmatpush1.bf16.msra.mxu0 %v10532_v35  ;;  %7051 = vmatpush1.bf16.msra.mxu1 %v10534_v59  ;;  %v12667_v35 = vld [vmem:[#allocation46_spill] sm:$0xff]  ;;  %v12668_v59 = vld [vmem:[#allocation47_spill] sm:$0xff] }
 0x31a   :  { %6989 = vmatprep.subr.bf16.mxu0 %v10538_v31  ;;  %7053 = vmatprep.subr.bf16.mxu1 %v10540_v51  ;;  %v12669_v31 = vld [vmem:[#allocation48_spill] sm:$0xff]  ;;  %v12670_v51 = vld [vmem:[#allocation49_spill] sm:$0xff] }
 0x31d   :  { %6991 = vmatpush1.bf16.msra.mxu0 %v10542_v56  ;;  %7055 = vmatpush1.bf16.msra.mxu1 %v10545_v48  ;;  %v12671_v56 = vld [vmem:[#allocation50_spill] sm:$0xff]  ;;  %v12672_v48 = vld [vmem:[#allocation51_spill] sm:$0xff] }
 0x31e   :  { %6993 = vmatprep.subr.bf16.mxu0 %v10550_v34  ;;  %7057 = vmatprep.subr.bf16.mxu1 %v10552_v26  ;;  %v2189_v34 = vld [vmem:[#allocation10 + $0x8] sm:$0xff] }
 0x31f   :  { %v2193_v26 = vld [vmem:[#allocation10 + $0x28] sm:$0xff] }
 0x321   :  { %6995 = vmatpush1.bf16.msra.mxu0 %v10554_v41  ;;  %7059 = vmatpush1.bf16.msra.mxu1 %v10557_v17  ;;  %v2191_v41 = vld [vmem:[#allocation10 + $0x18] sm:$0xff]  ;;  %v10762_v17 = vpack.c.bf16 %v2193_v26, %v2189_v34  ;;  %v2188_v26 = vld [vmem:[#allocation10] sm:$0xff] }
 0x322   :  { %6997 = vmatprep.subr.bf16.mxu0 %v10562_v45  ;;  %7061 = vmatprep.subr.bf16.mxu1 %v10564_v15 }
 0x325   :  { %6999 = vmatpush1.bf16.msra.mxu0 %v10566_v33  ;;  %7063 = vmatpush1.bf16.msra.mxu1 %v10569_v50  ;;  %v12673_v50 = vld [vmem:[#allocation23_spill] sm:$0xff] }
 0x326   :  { %7001 = vmatprep.subr.bf16.mxu0 %v10574_v43  ;;  %7065 = vmatprep.subr.bf16.mxu1 %v10576_v12 }
 0x329   :  { %7003 = vmatpush1.bf16.msra.mxu0 %v10578_v9  ;;  %7067 = vmatpush1.bf16.msra.mxu1 %v10581_v61  ;;  %v12655_v9 = vld [vmem:[#allocation34_spill] sm:$0xff]  ;;  %v12656_v61 = vld [vmem:[#allocation35_spill] sm:$0xff] }
 0x32a   :  { %7005 = vmatprep.subr.bf16.mxu0 %v10586_v54  ;;  %7069 = vmatprep.subr.bf16.mxu1 %v10588_v20  ;;  %v12657_v54 = vld [vmem:[#allocation36_spill] sm:$0xff] }
 0x32d   :  { %7007 = vmatpush1.bf16.msra.mxu0 %v12648_v2  ;;  %7071 = vmatpush1.bf16.msra.mxu1 %v12649_v4 }
 0x32e   :  { %7009 = vmatprep.subr.bf16.mxu0 %v12650_v42  ;;  %7073 = vmatprep.subr.bf16.mxu1 %v12651_v14 }
 0x331   :  { %7011 = vmatpush1.bf16.msra.mxu0 %v12652_v23  ;;  %7075 = vmatpush1.bf16.msra.mxu1 %v12653_v27 }
 0x332   :  { %7013 = vmatprep.subr.bf16.mxu0 %v12654_v32  ;;  %7077 = vmatprep.subr.bf16.mxu1 %v12655_v9 }
 0x335   :  { %7015 = vmatpush1.bf16.msra.mxu0 %v12656_v61  ;;  %7079 = vmatpush1.bf16.msra.mxu1 %v12657_v54 }
 0x336   :  { %7017 = vmatprep.subr.bf16.mxu0 %v12658_v37  ;;  %7081 = vmatprep.subr.bf16.mxu1 %v12659_v6 }
 0x339   :  { %7019 = vmatpush1.bf16.msra.mxu0 %v12660_v8  ;;  %7083 = vmatpush1.bf16.msra.mxu1 %v12661_v60 }
 0x33a   :  { %7021 = vmatprep.subr.bf16.mxu0 %v12662_v3  ;;  %7085 = vmatprep.subr.bf16.mxu1 %v12663_v5 }
 0x33d   :  { %7023 = vmatpush1.bf16.msra.mxu0 %v12664_v24  ;;  %7087 = vmatpush1.bf16.msra.mxu1 %v12665_v63 }
 0x33e   :  { %7025 = vmatprep.subr.bf16.mxu0 %v10646_v19  ;;  %7089 = vmatprep.subr.bf16.mxu1 %v12666_v29  ;;  %v2195_v19 = vld [vmem:[#allocation10 + $0x38] sm:$0xff] }
 0x33f   :  { %v10764_v45 = vpack.c.bf16 %v2195_v19, %v2191_v41  ;;  %v2190_v41 = vld [vmem:[#allocation10 + $0x10] sm:$0xff] }
 0x340   :  { %v2194_v19 = vld [vmem:[#allocation10 + $0x30] sm:$0xff] }
 0x341   :  { %7027 = vmatpush1.bf16.msra.mxu0 %v12667_v35  ;;  %7091 = vmatpush1.bf16.msra.mxu1 %v12668_v59 }
 0x342   :  { %7029 = vmatprep.subr.bf16.mxu0 %v12669_v31  ;;  %7093 = vmatprep.subr.bf16.mxu1 %v12670_v51 }
 0x345   :  { %7031 = vmatpush1.bf16.msra.mxu0 %v12671_v56  ;;  %7095 = vmatpush1.bf16.msra.mxu1 %v12672_v48 }
 0x346   :  { %7097 = vmatprep.subr.bf16.mxu0 %v10762_v17  ;;  %7161 = vmatprep.subr.bf16.mxu1 %v10764_v45 }
 0x3d9   :  { %v1702_v15 = vpop.f32.mrb[4].mxu0  ;;  %v1779_v33 = vpop.f32.mrb[4].mxu1 }
 0x3da   :  { %v8924_v43 = vadd.f32 %v1702_v15, %v12673_v50  ;;  %v1704_v12 = vpop.f32.mrb[5].mxu0  ;;  %v1781_v20 = vpop.f32.mrb[5].mxu1  ;;  %v8940_v44 = vadd.f32 %v1779_v33, %v10456_v10  ;;  %v2197_v15 = vld [vmem:[#allocation10 + $0x48] sm:$0xff] }
 0x3db   :  { %v8925_v7 = vadd.f32 %v1704_v12, %v10427_v39  ;;  %v8941_v11 = vadd.f32 %v1781_v20, %v10443_v22  ;;  %v2201_v33 = vld [vmem:[#allocation10 + $0x68] sm:$0xff]  ;;  %v2203_v12 = vld [vmem:[#allocation10 + $0x78] sm:$0xff] }
 0x3dc   :  { %v6336_v30 = vmul.f32 -1.442695, %v8924_v43  ;;  %v2199_v43 = vld [vmem:[#allocation10 + $0x58] sm:$0xff] }
 0x3dd   :  { %v6338_v28 = vmul.f32 -1.442695, %v8925_v7  ;;  %v6340_v58 = vmul.f32 -1.442695, %v8941_v11  ;;  %v2202_v11 = vld [vmem:[#allocation10 + $0x70] sm:$0xff] }
 0x3de   :  { %9255 = vpow2.f32 %v6336_v30 }
 0x3df   :  { %9257 = vpow2.f32 %v6338_v28  ;;  %v1708_v57 = vpop.f32.mrb[26].mxu0  ;;  %v1785_v16 = vpop.f32.mrb[26].mxu1  ;;  %v10786_v28 = vpack.c.bf16 %v2194_v19, %v2190_v41 }
 0x3e0   :  { %v8962_v47 = vadd.f32 %v1708_v57, %v12674_v21  ;;  %v1710_v62 = vpop.f32.mrb[27].mxu0  ;;  %v1787_v53 = vpop.f32.mrb[27].mxu1  ;;  %v8978_v27 = vadd.f32 %v1785_v16, %v10463_v46  ;;  %v10790_v16 = vpack.c.bf16 %v2201_v33, %v2197_v15  ;;  %v2220_v33 = vld [vmem:[#allocation10 + $0x100] sm:$0xff] }
 0x3e1   :  { %v8963_v40 = vadd.f32 %v1710_v62, %v10439_v18  ;;  %v8979_v1 = vadd.f32 %v1787_v53, %v10452_v0  ;;  %v2200_v62 = vld [vmem:[#allocation10 + $0x60] sm:$0xff]  ;;  %v2198_v53 = vld [vmem:[#allocation10 + $0x50] sm:$0xff] }
 0x3e2   :  { %v6337_v52 = vmul.f32 -1.442695, %v8962_v47  ;;  %v10792_v47 = vpack.c.bf16 %v2203_v12, %v2199_v43  ;;  %v2224_v43 = vld [vmem:[#allocation10 + $0x120] sm:$0xff]  ;;  %v2222_v12 = vld [vmem:[#allocation10 + $0x110] sm:$0xff] }
 0x3e3   :  { %v6339_v13 = vmul.f32 -1.442695, %v8963_v40  ;;  %v6341_v23 = vmul.f32 -1.442695, %v8979_v1  ;;  %v2205_v40 = vld [vmem:[#allocation10 + $0x88] sm:$0xff]  ;;  %v2211_v1 = vld [vmem:[#allocation10 + $0xb8] sm:$0xff] }
 0x3e4   :  { %9259 = vpow2.f32 %v6337_v52  ;;  %v2209_v52 = vld [vmem:[#allocation10 + $0xa8] sm:$0xff] }
 0x3e5   :  { %9261 = vpow2.f32 %v6339_v13  ;;  %v2207_v13 = vld [vmem:[#allocation10 + $0x98] sm:$0xff] }
 0x3e6   :  { %9263 = vpow2.f32 %v6340_v58 }
 0x3e7   :  { %9265 = vtanh.f32 %v8940_v44  ;;  %v10800_v44 = vpack.c.bf16 %v2202_v11, %v2198_v53  ;;  %v2233_v53 = vld [vmem:[#allocation10 + $0x168] sm:$0xff]  ;;  %v2231_v11 = vld [vmem:[#allocation10 + $0x158] sm:$0xff] }
 0x3e8   :  { %v9256_v2 = vpop.eup %9255 }
 0x3e9   :  { %v9258_v4 = vpop.eup %9257  ;;  %v1796_v42 = vadd.f32 1.0, %v9256_v2  ;;  %v2204_v2 = vld [vmem:[#allocation10 + $0x80] sm:$0xff] }
 0x3ea   :  { %v1808_v14 = vadd.f32 1.0, %v9258_v4  ;;  %v2208_v4 = vld [vmem:[#allocation10 + $0xa0] sm:$0xff] }
 0x3eb   :  { %9267 = vrcp.f32 %v1796_v42 }
 0x3ec   :  { %9269 = vrcp.f32 %v1808_v14  ;;  %v2206_v14 = vld [vmem:[#allocation10 + $0x90] sm:$0xff] }
 0x3ed   :  { %9271 = vpow2.f32 %v6341_v23  ;;  %v2210_v23 = vld [vmem:[#allocation10 + $0xb0] sm:$0xff] }
 0x3ee   :  { %v9260_v32 = vpop.eup %9259  ;;  %9273 = vtanh.f32 %v8978_v27  ;;  %v2213_v27 = vld [vmem:[#allocation10 + $0xc8] sm:$0xff] }
 0x3ef   :  { %v9262_v9 = vpop.eup %9261  ;;  %v1797_v61 = vadd.f32 1.0, %v9260_v32 }
 0x3f0   :  { %v1809_v54 = vadd.f32 1.0, %v9262_v9  ;;  %v9264_v37 = vpop.eup %9263  ;;  %v2217_v9 = vld [vmem:[#allocation10 + $0xe8] sm:$0xff] }
 0x3f1   :  { %9275 = vrcp.f32 %v1797_v61  ;;  %v9266_v6 = vpop.eup %9265  ;;  %v1822_v5 = vadd.f32 1.0, %v9264_v37  ;;  %v2215_v61 = vld [vmem:[#allocation10 + $0xd8] sm:$0xff] }
 0x3f2   :  { %9277 = vrcp.f32 %v1809_v54  ;;  %v2219_v54 = vld [vmem:[#allocation10 + $0xf8] sm:$0xff] }
 0x3f3   :  { %9279 = vrcp.f32 %v1822_v5  ;;  %v2212_v5 = vld [vmem:[#allocation10 + $0xc0] sm:$0xff] }
 0x3f5   :  { %v9268_v8 = vpop.eup %9267 }
 0x3f6   :  { %v9270_v60 = vpop.eup %9269  ;;  %v1830_v3 = vmul.f32 %v9268_v8, %v9266_v6  ;;  %v10806_v6 = vpack.c.bf16 %v2209_v52, %v2205_v40  ;;  %v10808_v8 = vpack.c.bf16 %v2211_v1, %v2207_v13  ;;  %v2235_v52 = vld [vmem:[#allocation10 + $0x178] sm:$0xff]  ;;  %v2228_v13 = vld [vmem:[#allocation10 + $0x140] sm:$0xff] }
 0x3f7   :  { %v1828_v24 = vmul.f32 %v9270_v60, %v10681_v38  ;;  %v9272_v63 = vpop.eup %9271  ;;  %v2192_v38 = vld [vmem:[#allocation10 + $0x20] sm:$0xff]  ;;  %v10812_v60 = vpack.c.bf16 %v2208_v4, %v2204_v2  ;;  %v10852_v2 = vpack.c.bf16 %v2235_v52, %v2231_v11 }
 0x3f8   :  { %v9274_v35 = vpop.eup %9273  ;;  %v1823_v56 = vadd.f32 1.0, %v9272_v63  ;;  %v10784_v30 = vpack.c.bf16 %v2192_v38, %v2188_v26  ;;  %v10818_v63 = vpack.c.bf16 %v2217_v9, %v2213_v27  ;;  %v2227_v26 = vld [vmem:[#allocation10 + $0x138] sm:$0xff]  ;;  %v2232_v1 = vld [vmem:[#allocation10 + $0x160] sm:$0xff]  ;;  %v2237_v27 = vld [vmem:[#allocation10 + $0x188] sm:$0xff] }
 0x3f9   :  { %v10777_v29 = vadd.f32 %v1830_v3, %v1828_v24  ;;  %v10814_v3 = vpack.c.bf16 %v2210_v23, %v2206_v14  ;;  %v2216_v24 = vld [vmem:[#allocation10 + $0xe0] sm:$0xff]  ;;  %v10854_v4 = vpack.c.bf16 %v2232_v1, %v2228_v13  ;;  %v2234_v14 = vld [vmem:[#allocation10 + $0x170] sm:$0xff]  ;;  %v2239_v9 = vld [vmem:[#allocation10 + $0x198] sm:$0xff] }
 0x3fa   :  { %v10828_v38 = vpack.c.bf16 %v2216_v24, %v2212_v5  ;;  %v2236_v5 = vld [vmem:[#allocation10 + $0x180] sm:$0xff]  ;;  %v2246_v13 = vld [vmem:[#allocation10 + $0x1d0] sm:$0xff] }
 0x3fb   :  { %v9276_v59 = vpop.eup %9275  ;;  %9281 = vtanh.f32 %v10777_v29  ;;  %v2240_v24 = vld [vmem:[#allocation10 + $0x1a0] sm:$0xff]  ;;  %v2250_v1 = vld [vmem:[#allocation10 + $0x1f0] sm:$0xff] }
 0x3fc   :  { %v9278_v31 = vpop.eup %9277  ;;  %v1831_v51 = vmul.f32 %v9276_v59, %v9274_v35  ;;  %9283 = vrcp.f32 %v1823_v56  ;;  %v10820_v35 = vpack.c.bf16 %v2219_v54, %v2215_v61  ;;  %v2214_v59 = vld [vmem:[#allocation10 + $0xd0] sm:$0xff]  ;;  %v2225_v56 = vld [vmem:[#allocation10 + $0x128] sm:$0xff]  ;;  %v2243_v54 = vld [vmem:[#allocation10 + $0x1b8] sm:$0xff] }
 0x3fd   :  { %v1829_v48 = vmul.f32 %v9278_v31, %v10685_v36  ;;  %v9280_v20 = vpop.eup %9279  ;;  %v2196_v36 = vld [vmem:[#allocation10 + $0x40] sm:$0xff]  ;;  %v2218_v31 = vld [vmem:[#allocation10 + $0xf0] sm:$0xff] }
 0x3fe   :  { %v10798_v58 = vpack.c.bf16 %v2200_v62, %v2196_v36  ;;  %v10830_v41 = vpack.c.bf16 %v2218_v31, %v2214_v59  ;;  %v2229_v62 = vld [vmem:[#allocation10 + $0x148] sm:$0xff]  ;;  %v10864_v59 = vpack.c.bf16 %v2243_v54, %v2239_v9  ;;  %v10866_v31 = vpack.c.bf16 %v2240_v24, %v2236_v5  ;;  %v2259_v54 = vld [vmem:[#allocation10 + $0x238] sm:$0xff]  ;;  %v2252_v5 = vld [vmem:[#allocation10 + $0x200] sm:$0xff] }
 0x3ff   :  { %v10781_v34 = vadd.f32 %v1831_v51, %v1829_v48  ;;  %v2221_v51 = vld [vmem:[#allocation10 + $0x108] sm:$0xff]  ;;  %v2223_v48 = vld [vmem:[#allocation10 + $0x118] sm:$0xff]  ;;  %v10850_v40 = vpack.c.bf16 %v2233_v53, %v2229_v62  ;;  %v2244_v62 = vld [vmem:[#allocation10 + $0x1c0] sm:$0xff] }
 0x400   :  { %v10834_v19 = vpack.c.bf16 %v2225_v56, %v2221_v51  ;;  %v10836_v15 = vpack.c.bf16 %v2227_v26, %v2223_v48  ;;  %v2238_v51 = vld [vmem:[#allocation10 + $0x190] sm:$0xff]  ;;  %v2245_v26 = vld [vmem:[#allocation10 + $0x1c8] sm:$0xff]  ;;  %v2248_v53 = vld [vmem:[#allocation10 + $0x1e0] sm:$0xff] }
 0x401   :  { %9285 = vtanh.f32 %v10781_v34  ;;  %v2242_v56 = vld [vmem:[#allocation10 + $0x1b0] sm:$0xff]  ;;  %v10878_v52 = vpack.c.bf16 %v2248_v53, %v2244_v62  ;;  %v2256_v24 = vld [vmem:[#allocation10 + $0x220] sm:$0xff]  ;;  %v2265_v62 = vld [vmem:[#allocation10 + $0x268] sm:$0xff] }
 0x402   :  { %v10869_v48 = vpack.c.bf16 %v2242_v56, %v2238_v51  ;;  %v10890_v56 = vpack.c.bf16 %v2256_v24, %v2252_v5  ;;  %v2263_v53 = vld [vmem:[#allocation10 + $0x258] sm:$0xff]  ;;  %v2262_v5 = vld [vmem:[#allocation10 + $0x250] sm:$0xff] }
 0x403   :  { %v2266_v24 = vld [vmem:[#allocation10 + $0x270] sm:$0xff] }
 0x405   :  { %v9282_v7 = vpop.eup %9281 }
 0x406   :  { %v10788_v57 = vmul.f32 %v9282_v7, %v9280_v20  ;;  %v9284_v42 = vpop.eup %9283  ;;  %v10844_v20 = vpack.c.bf16 %v2224_v43, %v2220_v33  ;;  %v2226_v7 = vld [vmem:[#allocation10 + $0x130] sm:$0xff]  ;;  %v2249_v33 = vld [vmem:[#allocation10 + $0x1e8] sm:$0xff]  ;;  %v2247_v43 = vld [vmem:[#allocation10 + $0x1d8] sm:$0xff] }
 0x407   :  { %v10846_v36 = vpack.c.bf16 %v2226_v7, %v2222_v12  ;;  %v10874_v12 = vpack.c.bf16 %v2249_v33, %v2245_v26  ;;  %v2251_v7 = vld [vmem:[#allocation10 + $0x1f8] sm:$0xff]  ;;  %v2254_v26 = vld [vmem:[#allocation10 + $0x210] sm:$0xff] }
 0x408   :  { %12675 = vst [vmem:[#allocation27_spill] sm:$0xff] %v10788_v57  ;;  %2041 = vmatmul.mubr.f32.vlgmr.msra.gmra.mrb[6].mxu0 %v10788_v57  ;;  %2118 = vmatmul.mubr.f32.vlgmr.msra.gmra.mrb[6].mxu1 %v10788_v57  ;;  %v10876_v11 = vpack.c.bf16 %v2251_v7, %v2247_v43  ;;  %v2258_v33 = vld [vmem:[#allocation10 + $0x230] sm:$0xff]  ;;  %v2261_v7 = vld [vmem:[#allocation10 + $0x248] sm:$0xff] }
 0x409   :  { %7099 = vmatpush1.bf16.msra.mxu0 %v10784_v30  ;;  %7163 = vmatpush1.bf16.msra.mxu1 %v10786_v28  ;;  %v10893_v43 = vpack.c.bf16 %v2258_v33, %v2254_v26  ;;  %v10905_v26 = vpack.c.bf16 %v2266_v24, %v2262_v5  ;;  %v2269_v33 = vld [vmem:[#allocation10 + $0x288] sm:$0xff]  ;;  %v2270_v5 = vld [vmem:[#allocation10 + $0x290] sm:$0xff] }
 0x40a   :  { %7101 = vmatprep.subr.bf16.mxu0 %v10790_v16  ;;  %7165 = vmatprep.subr.bf16.mxu1 %v10792_v47  ;;  %v2274_v24 = vld [vmem:[#allocation10 + $0x2b0] sm:$0xff] }
 0x40b   :  { %v9286_v32 = vpop.eup %9285  ;;  %12678 = vst [vmem:[#allocation30_spill] sm:$0xff] %v10905_v26  ;;  %v10917_v57 = vpack.c.bf16 %v2274_v24, %v2270_v5  ;;  %v2278_v5 = vld [vmem:[#allocation10 + $0x2d0] sm:$0xff] }
 0x40c   :  { %v10804_v37 = vmul.f32 %v9286_v32, %v9284_v42  ;;  %v2230_v42 = vld [vmem:[#allocation10 + $0x150] sm:$0xff]  ;;  %v2241_v32 = vld [vmem:[#allocation10 + $0x1a8] sm:$0xff] }
 0x40d   :  { %7103 = vmatpush1.bf16.msra.mxu0 %v10798_v58  ;;  %7167 = vmatpush1.bf16.msra.mxu1 %v10800_v44  ;;  %v10857_v23 = vpack.c.bf16 %v2234_v14, %v2230_v42  ;;  %v10862_v61 = vpack.c.bf16 %v2241_v32, %v2237_v27  ;;  %v10881_v42 = vpack.c.bf16 %v2250_v1, %v2246_v13  ;;  %v2253_v14 = vld [vmem:[#allocation10 + $0x208] sm:$0xff]  ;;  %v2255_v32 = vld [vmem:[#allocation10 + $0x218] sm:$0xff]  ;;  %v2282_v24 = vld [vmem:[#allocation10 + $0x2f0] sm:$0xff] }
 0x40e   :  { %12676 = vst [vmem:[#allocation28_spill] sm:$0xff] %v10804_v37  ;;  %2046 = vmatprep.mubr.f32.mxu0 %v10804_v37  ;;  %2123 = vmatprep.mubr.f32.mxu1 %v10804_v37  ;;  %v2257_v27 = vld [vmem:[#allocation10 + $0x228] sm:$0xff]  ;;  %v10888_v51 = vpack.c.bf16 %v2259_v54, %v2255_v32  ;;  %v10898_v13 = vpack.c.bf16 %v2265_v62, %v2261_v7  ;;  %v2267_v1 = vld [vmem:[#allocation10 + $0x278] sm:$0xff]  ;;  %12682 = vst [vmem:[#allocation34_spill] sm:$0xff] %v10917_v57 }
 0x40f   :  { %2047 = vmatmul.mubr.f32.gmra.mrb[24].mxu0 %v12605_v25  ;;  %2124 = vmatmul.mubr.f32.gmra.mrb[24].mxu1 %v12605_v25  ;;  %v10886_v9 = vpack.c.bf16 %v2257_v27, %v2253_v14  ;;  %v2260_v14 = vld [vmem:[#allocation10 + $0x240] sm:$0xff]  ;;  %v10900_v32 = vpack.c.bf16 %v2267_v1, %v2263_v53  ;;  %v2273_v7 = vld [vmem:[#allocation10 + $0x2a8] sm:$0xff]  ;;  %v2271_v62 = vld [vmem:[#allocation10 + $0x298] sm:$0xff] }
 0x410   :  { %7105 = vmatprep.subr.bf16.mxu0 %v10806_v6  ;;  %7169 = vmatprep.subr.bf16.mxu1 %v10808_v8  ;;  %v2264_v27 = vld [vmem:[#allocation10 + $0x260] sm:$0xff]  ;;  %v10910_v55 = vpack.c.bf16 %v2273_v7, %v2269_v33  ;;  %v2275_v53 = vld [vmem:[#allocation10 + $0x2b8] sm:$0xff]  ;;  %v2281_v33 = vld [vmem:[#allocation10 + $0x2e8] sm:$0xff] }
 0x411   :  { %7107 = vmatpush1.bf16.msra.mxu0 %v10812_v60  ;;  %7171 = vmatpush1.bf16.msra.mxu1 %v10814_v3  ;;  %v10902_v54 = vpack.c.bf16 %v2264_v27, %v2260_v14  ;;  %v2268_v1 = vld [vmem:[#allocation10 + $0x280] sm:$0xff]  ;;  %v10912_v27 = vpack.c.bf16 %v2275_v53, %v2271_v62  ;;  %v2279_v7 = vld [vmem:[#allocation10 + $0x2d8] sm:$0xff] }
 0x412   :  { %7109 = vmatprep.subr.bf16.mxu0 %v10818_v63  ;;  %7173 = vmatprep.subr.bf16.mxu1 %v10820_v35  ;;  %12679 = vst [vmem:[#allocation31_spill] sm:$0xff] %v10910_v55  ;;  %v2272_v14 = vld [vmem:[#allocation10 + $0x2a0] sm:$0xff]  ;;  %v2283_v62 = vld [vmem:[#allocation10 + $0x2f8] sm:$0xff] }
 0x413   :  { %2380 = vmatprep.mubr.f32.mxu0 %v12605_v25  ;;  %2457 = vmatprep.mubr.f32.mxu1 %v12605_v25  ;;  %12677 = vst [vmem:[#allocation29_spill] sm:$0xff] %v10902_v54  ;;  %12680 = vst [vmem:[#allocation32_spill] sm:$0xff] %v10912_v27  ;;  %v10914_v37 = vpack.c.bf16 %v2272_v14, %v2268_v1  ;;  %v2276_v53 = vld [vmem:[#allocation10 + $0x2c0] sm:$0xff]  ;;  %v10924_v14 = vpack.c.bf16 %v2283_v62, %v2279_v7  ;;  %v2291_v7 = vld [vmem:[#allocation10 + $0x338] sm:$0xff] }
 0x414   :  { %v2280_v1 = vld [vmem:[#allocation10 + $0x2e0] sm:$0xff] }
 0x415   :  { %7111 = vmatpush1.bf16.msra.mxu0 %v10828_v38  ;;  %7175 = vmatpush1.bf16.msra.mxu1 %v10830_v41  ;;  %12681 = vst [vmem:[#allocation33_spill] sm:$0xff] %v10914_v37  ;;  %12684 = vst [vmem:[#allocation36_spill] sm:$0xff] %v10924_v14  ;;  %v2284_v62 = vld [vmem:[#allocation10 + $0x300] sm:$0xff] }
 0x416   :  { %7113 = vmatprep.subr.bf16.mxu0 %v10834_v19  ;;  %7177 = vmatprep.subr.bf16.mxu1 %v10836_v15 }
 0x419   :  { %7115 = vmatpush1.bf16.msra.mxu0 %v10844_v20  ;;  %7179 = vmatpush1.bf16.msra.mxu1 %v10846_v36 }
 0x41a   :  { %7117 = vmatprep.subr.bf16.mxu0 %v10850_v40  ;;  %7181 = vmatprep.subr.bf16.mxu1 %v10852_v2 }
 0x41d   :  { %7119 = vmatpush1.bf16.msra.mxu0 %v10854_v4  ;;  %7183 = vmatpush1.bf16.msra.mxu1 %v10857_v23 }
 0x41e   :  { %7121 = vmatprep.subr.bf16.mxu0 %v10862_v61  ;;  %7185 = vmatprep.subr.bf16.mxu1 %v10864_v59 }
 0x421   :  { %7123 = vmatpush1.bf16.msra.mxu0 %v10866_v31  ;;  %7187 = vmatpush1.bf16.msra.mxu1 %v10869_v48 }
 0x422   :  { %7125 = vmatprep.subr.bf16.mxu0 %v10874_v12  ;;  %7189 = vmatprep.subr.bf16.mxu1 %v10876_v11 }
 0x425   :  { %7127 = vmatpush1.bf16.msra.mxu0 %v10878_v52  ;;  %7191 = vmatpush1.bf16.msra.mxu1 %v10881_v42 }
 0x426   :  { %7129 = vmatprep.subr.bf16.mxu0 %v10886_v9  ;;  %7193 = vmatprep.subr.bf16.mxu1 %v10888_v51 }
 0x429   :  { %7131 = vmatpush1.bf16.msra.mxu0 %v10890_v56  ;;  %7195 = vmatpush1.bf16.msra.mxu1 %v10893_v43 }
 0x42a   :  { %7133 = vmatprep.subr.bf16.mxu0 %v10898_v13  ;;  %7197 = vmatprep.subr.bf16.mxu1 %v10900_v32 }
 0x42d   :  { %7135 = vmatpush1.bf16.msra.mxu0 %v10902_v54  ;;  %7199 = vmatpush1.bf16.msra.mxu1 %v10905_v26  ;;  %v10922_v26 = vpack.c.bf16 %v2281_v33, %v2277_v49  ;;  %v10926_v54 = vpack.c.bf16 %v2280_v1, %v2276_v53  ;;  %v2289_v49 = vld [vmem:[#allocation10 + $0x328] sm:$0xff]  ;;  %v2287_v33 = vld [vmem:[#allocation10 + $0x318] sm:$0xff]  ;;  %v2288_v53 = vld [vmem:[#allocation10 + $0x320] sm:$0xff] }
 0x42e   :  { %7137 = vmatprep.subr.bf16.mxu0 %v10910_v55  ;;  %7201 = vmatprep.subr.bf16.mxu1 %v10912_v27  ;;  %v10929_v27 = vpack.c.bf16 %v2282_v24, %v2278_v5  ;;  %v10936_v1 = vpack.c.bf16 %v2291_v7, %v2287_v33  ;;  %v10938_v55 = vpack.c.bf16 %v2288_v53, %v2284_v62  ;;  %v2286_v5 = vld [vmem:[#allocation10 + $0x310] sm:$0xff]  ;;  %v2299_v33 = vld [vmem:[#allocation10 + $0x378] sm:$0xff]  ;;  %v2292_v7 = vld [vmem:[#allocation10 + $0x340] sm:$0xff] }
 0x42f   :  { %12683 = vst [vmem:[#allocation35_spill] sm:$0xff] %v10922_v26  ;;  %12685 = vst [vmem:[#allocation37_spill] sm:$0xff] %v10926_v54  ;;  %v2290_v24 = vld [vmem:[#allocation10 + $0x330] sm:$0xff]  ;;  %v2296_v62 = vld [vmem:[#allocation10 + $0x360] sm:$0xff] }
 0x430   :  { %12686 = vst [vmem:[#allocation38_spill] sm:$0xff] %v10929_v27  ;;  %12688 = vst [vmem:[#allocation40_spill] sm:$0xff] %v10936_v1 }
 0x431   :  { %7139 = vmatpush1.bf16.msra.mxu0 %v10914_v37  ;;  %7203 = vmatpush1.bf16.msra.mxu1 %v10917_v57  ;;  %v2285_v57 = vld [vmem:[#allocation10 + $0x308] sm:$0xff]  ;;  %12689 = vst [vmem:[#allocation41_spill] sm:$0xff] %v10938_v55 }
 0x432   :  { %7141 = vmatprep.subr.bf16.mxu0 %v10922_v26  ;;  %7205 = vmatprep.subr.bf16.mxu1 %v10924_v14  ;;  %v10934_v37 = vpack.c.bf16 %v2289_v49, %v2285_v57  ;;  %v10941_v14 = vpack.c.bf16 %v2290_v24, %v2286_v5  ;;  %v2297_v57 = vld [vmem:[#allocation10 + $0x368] sm:$0xff]  ;;  %v2295_v49 = vld [vmem:[#allocation10 + $0x358] sm:$0xff]  ;;  %v10950_v26 = vpack.c.bf16 %v2296_v62, %v2292_v7  ;;  %v2294_v5 = vld [vmem:[#allocation10 + $0x350] sm:$0xff] }
 0x433   :  { %v10948_v53 = vpack.c.bf16 %v2299_v33, %v2295_v49  ;;  %v2298_v24 = vld [vmem:[#allocation10 + $0x370] sm:$0xff]  ;;  %v2307_v49 = vld [vmem:[#allocation10 + $0x3b8] sm:$0xff]  ;;  %v2300_v33 = vld [vmem:[#allocation10 + $0x380] sm:$0xff] }
 0x434   :  { %12687 = vst [vmem:[#allocation39_spill] sm:$0xff] %v10934_v37  ;;  %12690 = vst [vmem:[#allocation42_spill] sm:$0xff] %v10941_v14  ;;  %v2304_v7 = vld [vmem:[#allocation10 + $0x3a0] sm:$0xff] }
 0x435   :  { %7143 = vmatpush1.bf16.msra.mxu0 %v10926_v54  ;;  %7207 = vmatpush1.bf16.msra.mxu1 %v10929_v27  ;;  %v2293_v27 = vld [vmem:[#allocation10 + $0x348] sm:$0xff]  ;;  %12692 = vst [vmem:[#allocation44_spill] sm:$0xff] %v10948_v53  ;;  %12693 = vst [vmem:[#allocation45_spill] sm:$0xff] %v10950_v26 }
 0x436   :  { %7145 = vmatprep.subr.bf16.mxu0 %v10934_v37  ;;  %7209 = vmatprep.subr.bf16.mxu1 %v10936_v1  ;;  %v10946_v54 = vpack.c.bf16 %v2297_v57, %v2293_v27  ;;  %v10953_v1 = vpack.c.bf16 %v2298_v24, %v2294_v5  ;;  %v2305_v27 = vld [vmem:[#allocation10 + $0x3a8] sm:$0xff]  ;;  %v2303_v57 = vld [vmem:[#allocation10 + $0x398] sm:$0xff]  ;;  %v10962_v37 = vpack.c.bf16 %v2304_v7, %v2300_v33  ;;  %v2302_v5 = vld [vmem:[#allocation10 + $0x390] sm:$0xff] }
 0x437   :  { %v10960_v62 = vpack.c.bf16 %v2307_v49, %v2303_v57  ;;  %v2306_v24 = vld [vmem:[#allocation10 + $0x3b0] sm:$0xff]  ;;  %v2315_v57 = vld [vmem:[#allocation10 + $0x3f8] sm:$0xff]  ;;  %v2308_v49 = vld [vmem:[#allocation10 + $0x3c0] sm:$0xff] }
 0x438   :  { %12691 = vst [vmem:[#allocation43_spill] sm:$0xff] %v10946_v54  ;;  %12694 = vst [vmem:[#allocation46_spill] sm:$0xff] %v10953_v1  ;;  %v2312_v33 = vld [vmem:[#allocation10 + $0x3e0] sm:$0xff] }
 0x439   :  { %7147 = vmatpush1.bf16.msra.mxu0 %v10938_v55  ;;  %7211 = vmatpush1.bf16.msra.mxu1 %v10941_v14  ;;  %v2301_v14 = vld [vmem:[#allocation10 + $0x388] sm:$0xff]  ;;  %12695 = vst [vmem:[#allocation47_spill] sm:$0xff] %v10960_v62  ;;  %12696 = vst [vmem:[#allocation48_spill] sm:$0xff] %v10962_v37 }
 0x43a   :  { %7149 = vmatprep.subr.bf16.mxu0 %v10946_v54  ;;  %7213 = vmatprep.subr.bf16.mxu1 %v10948_v53  ;;  %v10958_v55 = vpack.c.bf16 %v2305_v27, %v2301_v14  ;;  %v10965_v53 = vpack.c.bf16 %v2306_v24, %v2302_v5  ;;  %v2313_v14 = vld [vmem:[#allocation10 + $0x3e8] sm:$0xff]  ;;  %v2311_v27 = vld [vmem:[#allocation10 + $0x3d8] sm:$0xff]  ;;  %v10974_v54 = vpack.c.bf16 %v2312_v33, %v2308_v49  ;;  %v2310_v5 = vld [vmem:[#allocation10 + $0x3d0] sm:$0xff] }
 0x43b   :  { %v10972_v7 = vpack.c.bf16 %v2315_v57, %v2311_v27  ;;  %v2314_v24 = vld [vmem:[#allocation10 + $0x3f0] sm:$0xff] }
 0x43c   :  { %12697 = vst [vmem:[#allocation49_spill] sm:$0xff] %v10965_v53  ;;  %12700 = vst [vmem:[#allocation24_spill] sm:$0xff] %v10974_v54 }
 0x43d   :  { %7151 = vmatpush1.bf16.msra.mxu0 %v10950_v26  ;;  %7215 = vmatpush1.bf16.msra.mxu1 %v10953_v1  ;;  %v2309_v1 = vld [vmem:[#allocation10 + $0x3c8] sm:$0xff]  ;;  %12699 = vst [vmem:[#allocation51_spill] sm:$0xff] %v10972_v7 }
 0x43e   :  { %7153 = vmatprep.subr.bf16.mxu0 %v10958_v55  ;;  %7217 = vmatprep.subr.bf16.mxu1 %v10960_v62  ;;  %v10970_v26 = vpack.c.bf16 %v2313_v14, %v2309_v1  ;;  %v10977_v62 = vpack.c.bf16 %v2314_v24, %v2310_v5 }
 0x440   :  { %12698 = vst [vmem:[#allocation50_spill] sm:$0xff] %v10970_v26  ;;  %12701 = vst [vmem:[#allocation54_spill] sm:$0xff] %v10977_v62 }
 0x441   :  { %7155 = vmatpush1.bf16.msra.mxu0 %v10962_v37  ;;  %7219 = vmatpush1.bf16.msra.mxu1 %v10965_v53 }
 0x442   :  { %7157 = vmatprep.subr.bf16.mxu0 %v10970_v26  ;;  %7221 = vmatprep.subr.bf16.mxu1 %v10972_v7 }
 0x445   :  { %7159 = vmatpush1.bf16.msra.mxu0 %v10974_v54  ;;  %7223 = vmatpush1.bf16.msra.mxu1 %v10977_v62 }
 0x446   :  { %7225 = vmatprep.subr.bf16.mxu0 %v10762_v17  ;;  %7289 = vmatprep.subr.bf16.mxu1 %v10764_v45 }
 0x4db   :  { %v2042_v1 = vpop.f32.mrb[6].mxu0  ;;  %v2119_v14 = vpop.f32.mrb[6].mxu1 }
 0x4dc   :  { %v8926_v27 = vadd.f32 %v2042_v1, %v12673_v50  ;;  %v2044_v57 = vpop.f32.mrb[7].mxu0  ;;  %v2121_v49 = vpop.f32.mrb[7].mxu1 }
 0x4dd   :  { %v8927_v33 = vadd.f32 %v2044_v57, %v10427_v39  ;;  %v8943_v62 = vadd.f32 %v2121_v49, %v10443_v22  ;;  %v8942_v57 = vadd.f32 %v2119_v14, %v10456_v10 }
 0x4de   :  { %v6342_v5 = vmul.f32 -1.442695, %v8926_v27 }
 0x4df   :  { %v6344_v24 = vmul.f32 -1.442695, %v8927_v33  ;;  %v6346_v50 = vmul.f32 -1.442695, %v8943_v62 }
 0x4e0   :  { %9287 = vpow2.f32 %v6342_v5 }
 0x4e1   :  { %9289 = vpow2.f32 %v6344_v24 }
 0x4e2   :  { %v2048_v7 = vpop.f32.mrb[24].mxu0  ;;  %v2125_v54 = vpop.f32.mrb[24].mxu1 }
 0x4e3   :  { %v8960_v17 = vadd.f32 %v2048_v7, %v12674_v21  ;;  %v2050_v26 = vpop.f32.mrb[25].mxu0  ;;  %v2127_v45 = vpop.f32.mrb[25].mxu1 }
 0x4e4   :  { %v8961_v53 = vadd.f32 %v2050_v26, %v10439_v18  ;;  %v8977_v33 = vadd.f32 %v2127_v45, %v10452_v0  ;;  %v8976_v26 = vadd.f32 %v2125_v54, %v10463_v46 }
 0x4e5   :  { %v6343_v37 = vmul.f32 -1.442695, %v8960_v17 }
 0x4e6   :  { %v6345_v1 = vmul.f32 -1.442695, %v8961_v53  ;;  %v6347_v7 = vmul.f32 -1.442695, %v8977_v33 }
 0x4e7   :  { %9291 = vpow2.f32 %v6343_v37 }
 0x4e8   :  { %9293 = vpow2.f32 %v6345_v1 }
 0x4e9   :  { %9295 = vpow2.f32 %v6346_v50 }
 0x4ea   :  { %v9288_v27 = vpop.eup %9287  ;;  %9297 = vtanh.f32 %v8942_v57 }
 0x4eb   :  { %v9290_v5 = vpop.eup %9289  ;;  %v2136_v24 = vadd.f32 1.0, %v9288_v27 }
 0x4ec   :  { %v2148_v49 = vadd.f32 1.0, %v9290_v5 }
 0x4ed   :  { %9299 = vrcp.f32 %v2136_v24 }
 0x4ee   :  { %9301 = vrcp.f32 %v2148_v49 }
 0x4ef   :  { %9303 = vpow2.f32 %v6347_v7 }
 0x4f0   :  { %9305 = vtanh.f32 %v8976_v26 }
 0x4f1   :  { %v9292_v17 = vpop.eup %9291 }
 0x4f2   :  { %v9294_v53 = vpop.eup %9293  ;;  %v2137_v62 = vadd.f32 1.0, %v9292_v17 }
 0x4f3   :  { %v2149_v37 = vadd.f32 1.0, %v9294_v53  ;;  %v9296_v14 = vpop.eup %9295 }
 0x4f4   :  { %9307 = vrcp.f32 %v2137_v62  ;;  %v9298_v45 = vpop.eup %9297  ;;  %v2162_v57 = vadd.f32 1.0, %v9296_v14 }
 0x4f5   :  { %9309 = vrcp.f32 %v2149_v37 }
 0x4f6   :  { %9311 = vrcp.f32 %v2162_v57 }
 0x4f7   :  { %v9300_v1 = vpop.eup %9299 }
 0x4f8   :  { %v9302_v27 = vpop.eup %9301  ;;  %v2170_v50 = vmul.f32 %v9300_v1, %v9298_v45 }
 0x4f9   :  { %v2168_v5 = vmul.f32 %v9302_v27, %v10777_v29  ;;  %v9304_v33 = vpop.eup %9303 }
 0x4fa   :  { %v9306_v54 = vpop.eup %9305  ;;  %v2163_v17 = vadd.f32 1.0, %v9304_v33 }
 0x4fb   :  { %v10993_v24 = vadd.f32 %v2170_v50, %v2168_v5 }
 0x4fd   :  { %9313 = vtanh.f32 %v10993_v24 }
 0x4fe   :  { %v9308_v49 = vpop.eup %9307  ;;  %9315 = vrcp.f32 %v2163_v17 }
 0x4ff   :  { %v9310_v7 = vpop.eup %9309  ;;  %v2171_v26 = vmul.f32 %v9308_v49, %v9306_v54 }
 0x500   :  { %v2169_v53 = vmul.f32 %v9310_v7, %v10781_v34  ;;  %v9312_v37 = vpop.eup %9311 }
 0x502   :  { %v10997_v62 = vadd.f32 %v2171_v26, %v2169_v53 }
 0x504   :  { %9317 = vtanh.f32 %v10997_v62 }
 0x507   :  { %v9314_v29 = vpop.eup %9313 }
 0x508   :  { %v11000_v14 = vmul.f32 %v9314_v29, %v9312_v37  ;;  %v9316_v34 = vpop.eup %9315 }
 0x50a   :  { %12702 = vst [vmem:[#allocation55_spill] sm:$0xff] %v11000_v14  ;;  %2381 = vmatmul.mubr.f32.vlgmr.msra.gmra.mrb[8].mxu0 %v11000_v14  ;;  %2458 = vmatmul.mubr.f32.vlgmr.msra.gmra.mrb[8].mxu1 %v11000_v14 }
 0x50b   :  { %7227 = vmatpush1.bf16.msra.mxu0 %v10784_v30  ;;  %7291 = vmatpush1.bf16.msra.mxu1 %v10786_v28  ;;  %v12704_v30 = vld [vmem:[#allocation29_spill] sm:$0xff]  ;;  %v12705_v28 = vld [vmem:[#allocation30_spill] sm:$0xff] }
 0x50c   :  { %7229 = vmatprep.subr.bf16.mxu0 %v10790_v16  ;;  %7293 = vmatprep.subr.bf16.mxu1 %v10792_v47  ;;  %v12706_v16 = vld [vmem:[#allocation31_spill] sm:$0xff]  ;;  %v12707_v47 = vld [vmem:[#allocation32_spill] sm:$0xff] }
 0x50e   :  { %v9318_v45 = vpop.eup %9317 }
 0x50f   :  { %v11008_v1 = vmul.f32 %v9318_v45, %v9316_v34  ;;  %7231 = vmatpush1.bf16.msra.mxu0 %v10798_v58  ;;  %7295 = vmatpush1.bf16.msra.mxu1 %v10800_v44  ;;  %v12708_v58 = vld [vmem:[#allocation33_spill] sm:$0xff]  ;;  %v12709_v44 = vld [vmem:[#allocation34_spill] sm:$0xff] }
 0x510   :  { %7233 = vmatprep.subr.bf16.mxu0 %v10806_v6  ;;  %7297 = vmatprep.subr.bf16.mxu1 %v10808_v8  ;;  %v12710_v6 = vld [vmem:[#allocation35_spill] sm:$0xff]  ;;  %v12711_v8 = vld [vmem:[#allocation36_spill] sm:$0xff] }
 0x511   :  { %12703 = vst [vmem:[#allocation56_spill] sm:$0xff] %v11008_v1  ;;  %2386 = vmatprep.mubr.f32.mxu0 %v11008_v1  ;;  %2463 = vmatprep.mubr.f32.mxu1 %v11008_v1 }
 0x512   :  { %2387 = vmatmul.mubr.f32.gmra.mrb[22].mxu0 %v12605_v25  ;;  %2464 = vmatmul.mubr.f32.gmra.mrb[22].mxu1 %v12605_v25 }
 0x513   :  { %7235 = vmatpush1.bf16.msra.mxu0 %v10812_v60  ;;  %7299 = vmatpush1.bf16.msra.mxu1 %v10814_v3  ;;  %v12712_v60 = vld [vmem:[#allocation37_spill] sm:$0xff]  ;;  %v12713_v3 = vld [vmem:[#allocation38_spill] sm:$0xff] }
 0x514   :  { %7237 = vmatprep.subr.bf16.mxu0 %v10818_v63  ;;  %7301 = vmatprep.subr.bf16.mxu1 %v10820_v35  ;;  %v12714_v63 = vld [vmem:[#allocation39_spill] sm:$0xff]  ;;  %v12715_v35 = vld [vmem:[#allocation40_spill] sm:$0xff] }
 0x515   :  { %2720 = vmatprep.mubr.f32.mxu0 %v12605_v25  ;;  %2797 = vmatprep.mubr.f32.mxu1 %v12605_v25 }
 0x517   :  { %7239 = vmatpush1.bf16.msra.mxu0 %v10828_v38  ;;  %7303 = vmatpush1.bf16.msra.mxu1 %v10830_v41  ;;  %v12716_v38 = vld [vmem:[#allocation41_spill] sm:$0xff]  ;;  %v12717_v41 = vld [vmem:[#allocation42_spill] sm:$0xff] }
 0x518   :  { %7241 = vmatprep.subr.bf16.mxu0 %v10834_v19  ;;  %7305 = vmatprep.subr.bf16.mxu1 %v10836_v15  ;;  %v12718_v19 = vld [vmem:[#allocation43_spill] sm:$0xff]  ;;  %v12719_v15 = vld [vmem:[#allocation44_spill] sm:$0xff] }
 0x51b   :  { %7243 = vmatpush1.bf16.msra.mxu0 %v10844_v20  ;;  %7307 = vmatpush1.bf16.msra.mxu1 %v10846_v36  ;;  %v12720_v20 = vld [vmem:[#allocation45_spill] sm:$0xff]  ;;  %v12721_v36 = vld [vmem:[#allocation46_spill] sm:$0xff] }
 0x51c   :  { %7245 = vmatprep.subr.bf16.mxu0 %v10850_v40  ;;  %7309 = vmatprep.subr.bf16.mxu1 %v10852_v2  ;;  %v12722_v40 = vld [vmem:[#allocation47_spill] sm:$0xff]  ;;  %v12723_v2 = vld [vmem:[#allocation48_spill] sm:$0xff] }
 0x51f   :  { %7247 = vmatpush1.bf16.msra.mxu0 %v10854_v4  ;;  %7311 = vmatpush1.bf16.msra.mxu1 %v10857_v23  ;;  %v12724_v4 = vld [vmem:[#allocation49_spill] sm:$0xff]  ;;  %v12725_v23 = vld [vmem:[#allocation50_spill] sm:$0xff] }
 0x520   :  { %7249 = vmatprep.subr.bf16.mxu0 %v10862_v61  ;;  %7313 = vmatprep.subr.bf16.mxu1 %v10864_v59  ;;  %v12726_v61 = vld [vmem:[#allocation51_spill] sm:$0xff]  ;;  %v12727_v59 = vld [vmem:[#allocation24_spill] sm:$0xff] }
 0x523   :  { %7251 = vmatpush1.bf16.msra.mxu0 %v10866_v31  ;;  %7315 = vmatpush1.bf16.msra.mxu1 %v10869_v48  ;;  %v12728_v31 = vld [vmem:[#allocation54_spill] sm:$0xff] }
 0x524   :  { %7253 = vmatprep.subr.bf16.mxu0 %v10874_v12  ;;  %7317 = vmatprep.subr.bf16.mxu1 %v10876_v11  ;;  %v2869_v48 = vld [vmem:[#allocation10 + $0x8] sm:$0xff]  ;;  %v2871_v11 = vld [vmem:[#allocation10 + $0x18] sm:$0xff] }
 0x525   :  { %v2873_v12 = vld [vmem:[#allocation10 + $0x28] sm:$0xff] }
 0x527   :  { %7255 = vmatpush1.bf16.msra.mxu0 %v10878_v52  ;;  %7319 = vmatpush1.bf16.msra.mxu1 %v10881_v42  ;;  %v11074_v52 = vpack.c.bf16 %v2873_v12, %v2869_v48  ;;  %v2868_v12 = vld [vmem:[#allocation10] sm:$0xff] }
 0x528   :  { %7257 = vmatprep.subr.bf16.mxu0 %v10886_v9  ;;  %7321 = vmatprep.subr.bf16.mxu1 %v10888_v51 }
 0x52b   :  { %7259 = vmatpush1.bf16.msra.mxu0 %v10890_v56  ;;  %7323 = vmatpush1.bf16.msra.mxu1 %v10893_v43  ;;  %v12729_v56 = vld [vmem:[#allocation23_spill] sm:$0xff] }
 0x52c   :  { %7261 = vmatprep.subr.bf16.mxu0 %v10898_v13  ;;  %7325 = vmatprep.subr.bf16.mxu1 %v10900_v32 }
 0x52f   :  { %7263 = vmatpush1.bf16.msra.mxu0 %v12704_v30  ;;  %7327 = vmatpush1.bf16.msra.mxu1 %v12705_v28 }
 0x530   :  { %7265 = vmatprep.subr.bf16.mxu0 %v12706_v16  ;;  %7329 = vmatprep.subr.bf16.mxu1 %v12707_v47 }
 0x533   :  { %7267 = vmatpush1.bf16.msra.mxu0 %v12708_v58  ;;  %7331 = vmatpush1.bf16.msra.mxu1 %v12709_v44 }
 0x534   :  { %7269 = vmatprep.subr.bf16.mxu0 %v12710_v6  ;;  %7333 = vmatprep.subr.bf16.mxu1 %v12711_v8 }
 0x537   :  { %7271 = vmatpush1.bf16.msra.mxu0 %v12712_v60  ;;  %7335 = vmatpush1.bf16.msra.mxu1 %v12713_v3 }
 0x538   :  { %7273 = vmatprep.subr.bf16.mxu0 %v12714_v63  ;;  %7337 = vmatprep.subr.bf16.mxu1 %v12715_v35 }
 0x53b   :  { %7275 = vmatpush1.bf16.msra.mxu0 %v12716_v38  ;;  %7339 = vmatpush1.bf16.msra.mxu1 %v12717_v41 }
 0x53c   :  { %7277 = vmatprep.subr.bf16.mxu0 %v12718_v19  ;;  %7341 = vmatprep.subr.bf16.mxu1 %v12719_v15 }
 0x53f   :  { %7279 = vmatpush1.bf16.msra.mxu0 %v12720_v20  ;;  %7343 = vmatpush1.bf16.msra.mxu1 %v12721_v36 }
 0x540   :  { %7281 = vmatprep.subr.bf16.mxu0 %v10958_v55  ;;  %7345 = vmatprep.subr.bf16.mxu1 %v12722_v40  ;;  %v2875_v55 = vld [vmem:[#allocation10 + $0x38] sm:$0xff] }
 0x541   :  { %v11076_v42 = vpack.c.bf16 %v2875_v55, %v2871_v11  ;;  %v2872_v11 = vld [vmem:[#allocation10 + $0x20] sm:$0xff]  ;;  %v2870_v55 = vld [vmem:[#allocation10 + $0x10] sm:$0xff] }
 0x543   :  { %7283 = vmatpush1.bf16.msra.mxu0 %v12723_v2  ;;  %7347 = vmatpush1.bf16.msra.mxu1 %v12724_v4 }
 0x544   :  { %7285 = vmatprep.subr.bf16.mxu0 %v12725_v23  ;;  %7349 = vmatprep.subr.bf16.mxu1 %v12726_v61 }
 0x547   :  { %7287 = vmatpush1.bf16.msra.mxu0 %v12727_v59  ;;  %7351 = vmatpush1.bf16.msra.mxu1 %v12728_v31 }
 0x548   :  { %7353 = vmatprep.subr.bf16.mxu0 %v11074_v52  ;;  %7417 = vmatprep.subr.bf16.mxu1 %v11076_v42 }
 0x5dd   :  { %v2382_v9 = vpop.f32.mrb[8].mxu0  ;;  %v2459_v51 = vpop.f32.mrb[8].mxu1 }
 0x5de   :  { %v8928_v43 = vadd.f32 %v2382_v9, %v12729_v56  ;;  %v2384_v13 = vpop.f32.mrb[9].mxu0  ;;  %v2461_v32 = vpop.f32.mrb[9].mxu1  ;;  %v8944_v34 = vadd.f32 %v2459_v51, %v10456_v10  ;;  %v2877_v9 = vld [vmem:[#allocation10 + $0x48] sm:$0xff] }
 0x5df   :  { %v8929_v27 = vadd.f32 %v2384_v13, %v10427_v39  ;;  %v8945_v5 = vadd.f32 %v2461_v32, %v10443_v22  ;;  %v2881_v51 = vld [vmem:[#allocation10 + $0x68] sm:$0xff]  ;;  %v2883_v13 = vld [vmem:[#allocation10 + $0x78] sm:$0xff] }
 0x5e0   :  { %v6348_v50 = vmul.f32 -1.442695, %v8928_v43  ;;  %v2879_v43 = vld [vmem:[#allocation10 + $0x58] sm:$0xff] }
 0x5e1   :  { %v6350_v57 = vmul.f32 -1.442695, %v8929_v27  ;;  %v6352_v37 = vmul.f32 -1.442695, %v8945_v5  ;;  %v2880_v5 = vld [vmem:[#allocation10 + $0x60] sm:$0xff] }
 0x5e2   :  { %9319 = vpow2.f32 %v6348_v50  ;;  %v11096_v50 = vpack.c.bf16 %v2872_v11, %v2868_v12  ;;  %v2907_v12 = vld [vmem:[#allocation10 + $0x138] sm:$0xff] }
 0x5e3   :  { %9321 = vpow2.f32 %v6350_v57 }
 0x5e5   :  { %v2388_v33 = vpop.f32.mrb[22].mxu0  ;;  %v2465_v54 = vpop.f32.mrb[22].mxu1 }
 0x5e6   :  { %v8958_v49 = vadd.f32 %v2388_v33, %v12674_v21  ;;  %v2390_v7 = vpop.f32.mrb[23].mxu0  ;;  %v2467_v26 = vpop.f32.mrb[23].mxu1  ;;  %v8974_v44 = vadd.f32 %v2465_v54, %v10463_v46  ;;  %v11102_v54 = vpack.c.bf16 %v2881_v51, %v2877_v9  ;;  %v2900_v51 = vld [vmem:[#allocation10 + $0x100] sm:$0xff] }
 0x5e7   :  { %v8959_v17 = vadd.f32 %v2390_v7, %v10439_v18  ;;  %v8975_v16 = vadd.f32 %v2467_v26, %v10452_v0  ;;  %v2878_v7 = vld [vmem:[#allocation10 + $0x50] sm:$0xff] }
 0x5e8   :  { %v6349_v53 = vmul.f32 -1.442695, %v8958_v49  ;;  %v11104_v49 = vpack.c.bf16 %v2883_v13, %v2879_v43  ;;  %v2882_v26 = vld [vmem:[#allocation10 + $0x70] sm:$0xff]  ;;  %v2904_v43 = vld [vmem:[#allocation10 + $0x120] sm:$0xff] }
 0x5e9   :  { %v6351_v29 = vmul.f32 -1.442695, %v8959_v17  ;;  %v6353_v58 = vmul.f32 -1.442695, %v8975_v16  ;;  %v2885_v17 = vld [vmem:[#allocation10 + $0x88] sm:$0xff]  ;;  %v2884_v16 = vld [vmem:[#allocation10 + $0x80] sm:$0xff] }
 0x5ea   :  { %9323 = vpow2.f32 %v6349_v53  ;;  %v2889_v53 = vld [vmem:[#allocation10 + $0xa8] sm:$0xff]  ;;  %v2902_v13 = vld [vmem:[#allocation10 + $0x110] sm:$0xff] }
 0x5eb   :  { %9325 = vpow2.f32 %v6351_v29  ;;  %v2891_v29 = vld [vmem:[#allocation10 + $0xb8] sm:$0xff] }
 0x5ec   :  { %v9320_v45 = vpop.eup %9319  ;;  %9327 = vpow2.f32 %v6352_v37  ;;  %v2887_v37 = vld [vmem:[#allocation10 + $0x98] sm:$0xff] }
 0x5ed   :  { %v9322_v30 = vpop.eup %9321  ;;  %v2476_v28 = vadd.f32 1.0, %v9320_v45  ;;  %9329 = vtanh.f32 %v8944_v34  ;;  %v11112_v45 = vpack.c.bf16 %v2882_v26, %v2878_v7  ;;  %v2913_v7 = vld [vmem:[#allocation10 + $0x168] sm:$0xff]  ;;  %v2911_v26 = vld [vmem:[#allocation10 + $0x158] sm:$0xff] }
 0x5ee   :  { %v2488_v47 = vadd.f32 1.0, %v9322_v30  ;;  %v11116_v30 = vpack.c.bf16 %v2889_v53, %v2885_v17  ;;  %v2915_v53 = vld [vmem:[#allocation10 + $0x178] sm:$0xff] }
 0x5ef   :  { %9331 = vrcp.f32 %v2476_v28  ;;  %v11118_v28 = vpack.c.bf16 %v2891_v29, %v2887_v37  ;;  %v2908_v37 = vld [vmem:[#allocation10 + $0x140] sm:$0xff] }
 0x5f0   :  { %9333 = vrcp.f32 %v2488_v47  ;;  %v2888_v47 = vld [vmem:[#allocation10 + $0xa0] sm:$0xff] }
 0x5f1   :  { %9335 = vpow2.f32 %v6353_v58  ;;  %v2886_v58 = vld [vmem:[#allocation10 + $0x90] sm:$0xff]  ;;  %v2912_v29 = vld [vmem:[#allocation10 + $0x160] sm:$0xff] }
 0x5f2   :  { %9337 = vtanh.f32 %v8974_v44  ;;  %v2890_v44 = vld [vmem:[#allocation10 + $0xb0] sm:$0xff] }
 0x5f4   :  { %v9324_v6 = vpop.eup %9323 }
 0x5f5   :  { %v9326_v8 = vpop.eup %9325  ;;  %v2477_v60 = vadd.f32 1.0, %v9324_v6  ;;  %v2893_v6 = vld [vmem:[#allocation10 + $0xc8] sm:$0xff] }
 0x5f6   :  { %v2489_v3 = vadd.f32 1.0, %v9326_v8  ;;  %v9328_v63 = vpop.eup %9327 }
 0x5f7   :  { %9339 = vrcp.f32 %v2477_v60  ;;  %v9330_v35 = vpop.eup %9329  ;;  %v2502_v15 = vadd.f32 1.0, %v9328_v63  ;;  %v2897_v60 = vld [vmem:[#allocation10 + $0xe8] sm:$0xff]  ;;  %v2899_v63 = vld [vmem:[#allocation10 + $0xf8] sm:$0xff] }
 0x5f8   :  { %9341 = vrcp.f32 %v2489_v3  ;;  %v2895_v3 = vld [vmem:[#allocation10 + $0xd8] sm:$0xff] }
 0x5f9   :  { %v9332_v38 = vpop.eup %9331  ;;  %9343 = vrcp.f32 %v2502_v15  ;;  %v2892_v15 = vld [vmem:[#allocation10 + $0xc0] sm:$0xff] }
 0x5fa   :  { %v9334_v41 = vpop.eup %9333  ;;  %v2510_v19 = vmul.f32 %v9332_v38, %v9330_v35 }
 0x5fb   :  { %v2508_v20 = vmul.f32 %v9334_v41, %v10993_v24  ;;  %v9336_v40 = vpop.eup %9335  ;;  %v2874_v24 = vld [vmem:[#allocation10 + $0x30] sm:$0xff]  ;;  %v11126_v41 = vpack.c.bf16 %v2888_v47, %v2884_v16  ;;  %v11164_v16 = vpack.c.bf16 %v2915_v53, %v2911_v26  ;;  %v11166_v47 = vpack.c.bf16 %v2912_v29, %v2908_v37 }
 0x5fc   :  { %v9338_v2 = vpop.eup %9337  ;;  %v2503_v59 = vadd.f32 1.0, %v9336_v40  ;;  %v11098_v57 = vpack.c.bf16 %v2874_v24, %v2870_v55  ;;  %v11130_v40 = vpack.c.bf16 %v2897_v60, %v2893_v6  ;;  %v2921_v60 = vld [vmem:[#allocation10 + $0x1a8] sm:$0xff]  ;;  %v2926_v37 = vld [vmem:[#allocation10 + $0x1d0] sm:$0xff] }
 0x5fd   :  { %v11089_v36 = vadd.f32 %v2510_v19, %v2508_v20  ;;  %v11128_v19 = vpack.c.bf16 %v2890_v44, %v2886_v58  ;;  %v2896_v20 = vld [vmem:[#allocation10 + $0xe0] sm:$0xff]  ;;  %v2910_v58 = vld [vmem:[#allocation10 + $0x150] sm:$0xff] }
 0x5fe   :  { %v11140_v11 = vpack.c.bf16 %v2896_v20, %v2892_v15  ;;  %v2914_v44 = vld [vmem:[#allocation10 + $0x170] sm:$0xff]  ;;  %v2916_v15 = vld [vmem:[#allocation10 + $0x180] sm:$0xff] }
 0x5ff   :  { %9345 = vtanh.f32 %v11089_v36  ;;  %v11169_v6 = vpack.c.bf16 %v2914_v44, %v2910_v58  ;;  %v2920_v20 = vld [vmem:[#allocation10 + $0x1a0] sm:$0xff]  ;;  %v2930_v29 = vld [vmem:[#allocation10 + $0x1f0] sm:$0xff]  ;;  %v2933_v44 = vld [vmem:[#allocation10 + $0x208] sm:$0xff] }
 0x600   :  { %9347 = vrcp.f32 %v2503_v59  ;;  %v2905_v59 = vld [vmem:[#allocation10 + $0x128] sm:$0xff]  ;;  %v11193_v58 = vpack.c.bf16 %v2930_v29, %v2926_v37  ;;  %v2947_v29 = vld [vmem:[#allocation10 + $0x278] sm:$0xff] }
 0x601   :  { %v9340_v4 = vpop.eup %9339 }
 0x602   :  { %v9342_v23 = vpop.eup %9341  ;;  %v2511_v61 = vmul.f32 %v9340_v4, %v9338_v2  ;;  %v11132_v2 = vpack.c.bf16 %v2899_v63, %v2895_v3  ;;  %v2894_v4 = vld [vmem:[#allocation10 + $0xd0] sm:$0xff]  ;;  %v2919_v3 = vld [vmem:[#allocation10 + $0x198] sm:$0xff] }
 0x603   :  { %v2509_v31 = vmul.f32 %v9342_v23, %v10997_v62  ;;  %v9344_v32 = vpop.eup %9343  ;;  %v2876_v62 = vld [vmem:[#allocation10 + $0x40] sm:$0xff]  ;;  %v2898_v23 = vld [vmem:[#allocation10 + $0xf0] sm:$0xff] }
 0x604   :  { %v11110_v34 = vpack.c.bf16 %v2880_v5, %v2876_v62  ;;  %v11142_v55 = vpack.c.bf16 %v2898_v23, %v2894_v4  ;;  %v2909_v5 = vld [vmem:[#allocation10 + $0x148] sm:$0xff]  ;;  %v11178_v23 = vpack.c.bf16 %v2920_v20, %v2916_v15  ;;  %v2932_v15 = vld [vmem:[#allocation10 + $0x200] sm:$0xff] }
 0x605   :  { %v11093_v48 = vadd.f32 %v2511_v61, %v2509_v31  ;;  %v2901_v61 = vld [vmem:[#allocation10 + $0x108] sm:$0xff]  ;;  %v2903_v31 = vld [vmem:[#allocation10 + $0x118] sm:$0xff]  ;;  %v11162_v17 = vpack.c.bf16 %v2913_v7, %v2909_v5  ;;  %v2924_v5 = vld [vmem:[#allocation10 + $0x1c0] sm:$0xff] }
 0x606   :  { %v11146_v24 = vpack.c.bf16 %v2905_v59, %v2901_v61  ;;  %v11148_v9 = vpack.c.bf16 %v2907_v12, %v2903_v31  ;;  %v2918_v61 = vld [vmem:[#allocation10 + $0x190] sm:$0xff]  ;;  %v2925_v12 = vld [vmem:[#allocation10 + $0x1c8] sm:$0xff]  ;;  %v2928_v7 = vld [vmem:[#allocation10 + $0x1e0] sm:$0xff] }
 0x607   :  { %9349 = vtanh.f32 %v11093_v48  ;;  %v2922_v59 = vld [vmem:[#allocation10 + $0x1b0] sm:$0xff]  ;;  %v11190_v53 = vpack.c.bf16 %v2928_v7, %v2924_v5  ;;  %v2936_v20 = vld [vmem:[#allocation10 + $0x220] sm:$0xff]  ;;  %v2945_v5 = vld [vmem:[#allocation10 + $0x268] sm:$0xff] }
 0x608   :  { %v11181_v31 = vpack.c.bf16 %v2922_v59, %v2918_v61  ;;  %v11202_v59 = vpack.c.bf16 %v2936_v20, %v2932_v15  ;;  %v2943_v7 = vld [vmem:[#allocation10 + $0x258] sm:$0xff]  ;;  %v2942_v15 = vld [vmem:[#allocation10 + $0x250] sm:$0xff] }
 0x609   :  { %v9346_v27 = vpop.eup %9345  ;;  %v2946_v20 = vld [vmem:[#allocation10 + $0x270] sm:$0xff] }
 0x60a   :  { %v11100_v33 = vmul.f32 %v9346_v27, %v9344_v32  ;;  %v9348_v8 = vpop.eup %9347  ;;  %v11156_v32 = vpack.c.bf16 %v2904_v43, %v2900_v51  ;;  %v2906_v27 = vld [vmem:[#allocation10 + $0x130] sm:$0xff]  ;;  %v2929_v51 = vld [vmem:[#allocation10 + $0x1e8] sm:$0xff]  ;;  %v2927_v43 = vld [vmem:[#allocation10 + $0x1d8] sm:$0xff] }
 0x60b   :  { %v11158_v62 = vpack.c.bf16 %v2906_v27, %v2902_v13  ;;  %v11186_v13 = vpack.c.bf16 %v2929_v51, %v2925_v12  ;;  %v2931_v27 = vld [vmem:[#allocation10 + $0x1f8] sm:$0xff]  ;;  %v2934_v12 = vld [vmem:[#allocation10 + $0x210] sm:$0xff] }
 0x60c   :  { %12730 = vst [vmem:[#allocation29_spill] sm:$0xff] %v11100_v33  ;;  %2721 = vmatmul.mubr.f32.vlgmr.msra.gmra.mrb[10].mxu0 %v11100_v33  ;;  %2798 = vmatmul.mubr.f32.vlgmr.msra.gmra.mrb[10].mxu1 %v11100_v33  ;;  %v11188_v26 = vpack.c.bf16 %v2931_v27, %v2927_v43  ;;  %v2938_v51 = vld [vmem:[#allocation10 + $0x230] sm:$0xff]  ;;  %v2941_v27 = vld [vmem:[#allocation10 + $0x248] sm:$0xff] }
 0x60d   :  { %7355 = vmatpush1.bf16.msra.mxu0 %v11096_v50  ;;  %7419 = vmatpush1.bf16.msra.mxu1 %v11098_v57  ;;  %v11205_v43 = vpack.c.bf16 %v2938_v51, %v2934_v12  ;;  %v11210_v37 = vpack.c.bf16 %v2945_v5, %v2941_v27  ;;  %v11217_v12 = vpack.c.bf16 %v2946_v20, %v2942_v15  ;;  %v2949_v51 = vld [vmem:[#allocation10 + $0x288] sm:$0xff]  ;;  %v2951_v5 = vld [vmem:[#allocation10 + $0x298] sm:$0xff]  ;;  %v2950_v15 = vld [vmem:[#allocation10 + $0x290] sm:$0xff] }
 0x60e   :  { %7357 = vmatprep.subr.bf16.mxu0 %v11102_v54  ;;  %7421 = vmatprep.subr.bf16.mxu1 %v11104_v49  ;;  %v2953_v27 = vld [vmem:[#allocation10 + $0x2a8] sm:$0xff]  ;;  %v2954_v20 = vld [vmem:[#allocation10 + $0x2b0] sm:$0xff] }
 0x60f   :  { %12733 = vst [vmem:[#allocation32_spill] sm:$0xff] %v11217_v12  ;;  %v11222_v33 = vpack.c.bf16 %v2953_v27, %v2949_v51  ;;  %v11229_v14 = vpack.c.bf16 %v2954_v20, %v2950_v15  ;;  %v2961_v51 = vld [vmem:[#allocation10 + $0x2e8] sm:$0xff]  ;;  %v2959_v27 = vld [vmem:[#allocation10 + $0x2d8] sm:$0xff]  ;;  %v2958_v15 = vld [vmem:[#allocation10 + $0x2d0] sm:$0xff] }
 0x610   :  { %v2962_v20 = vld [vmem:[#allocation10 + $0x2f0] sm:$0xff] }
 0x611   :  { %v9350_v35 = vpop.eup %9349  ;;  %7359 = vmatpush1.bf16.msra.mxu0 %v11110_v34  ;;  %7423 = vmatpush1.bf16.msra.mxu1 %v11112_v45  ;;  %12734 = vst [vmem:[#allocation33_spill] sm:$0xff] %v11222_v33  ;;  %12737 = vst [vmem:[#allocation36_spill] sm:$0xff] %v11229_v14 }
 0x612   :  { %v11122_v38 = vmul.f32 %v9350_v35, %v9348_v8  ;;  %7361 = vmatprep.subr.bf16.mxu0 %v11116_v30  ;;  %7425 = vmatprep.subr.bf16.mxu1 %v11118_v28  ;;  %v2917_v8 = vld [vmem:[#allocation10 + $0x188] sm:$0xff]  ;;  %v2923_v35 = vld [vmem:[#allocation10 + $0x1b8] sm:$0xff] }
 0x613   :  { %v11174_v63 = vpack.c.bf16 %v2921_v60, %v2917_v8  ;;  %v11176_v4 = vpack.c.bf16 %v2923_v35, %v2919_v3  ;;  %v2937_v8 = vld [vmem:[#allocation10 + $0x228] sm:$0xff]  ;;  %v2935_v60 = vld [vmem:[#allocation10 + $0x218] sm:$0xff] }
 0x614   :  { %12731 = vst [vmem:[#allocation30_spill] sm:$0xff] %v11122_v38  ;;  %2726 = vmatprep.mubr.f32.mxu0 %v11122_v38  ;;  %2803 = vmatprep.mubr.f32.mxu1 %v11122_v38  ;;  %v11198_v3 = vpack.c.bf16 %v2937_v8, %v2933_v44  ;;  %v2939_v35 = vld [vmem:[#allocation10 + $0x238] sm:$0xff]  ;;  %v2940_v44 = vld [vmem:[#allocation10 + $0x240] sm:$0xff]  ;;  %v2957_v38 = vld [vmem:[#allocation10 + $0x2c8] sm:$0xff] }
 0x615   :  { %2727 = vmatmul.mubr.f32.gmra.mrb[20].mxu0 %v12605_v25  ;;  %2804 = vmatmul.mubr.f32.gmra.mrb[20].mxu1 %v12605_v25  ;;  %v11200_v61 = vpack.c.bf16 %v2939_v35, %v2935_v60  ;;  %v2944_v8 = vld [vmem:[#allocation10 + $0x260] sm:$0xff]  ;;  %v11212_v60 = vpack.c.bf16 %v2947_v29, %v2943_v7  ;;  %v2955_v7 = vld [vmem:[#allocation10 + $0x2b8] sm:$0xff] }
 0x616   :  { %7363 = vmatpush1.bf16.msra.mxu0 %v11126_v41  ;;  %7427 = vmatpush1.bf16.msra.mxu1 %v11128_v19  ;;  %v11214_v35 = vpack.c.bf16 %v2944_v8, %v2940_v44  ;;  %v2948_v29 = vld [vmem:[#allocation10 + $0x280] sm:$0xff]  ;;  %v11224_v8 = vpack.c.bf16 %v2955_v7, %v2951_v5  ;;  %v2963_v5 = vld [vmem:[#allocation10 + $0x2f8] sm:$0xff] }
 0x617   :  { %7365 = vmatprep.subr.bf16.mxu0 %v11130_v40  ;;  %7429 = vmatprep.subr.bf16.mxu1 %v11132_v2  ;;  %v2952_v44 = vld [vmem:[#allocation10 + $0x2a0] sm:$0xff] }
 0x618   :  { %3060 = vmatprep.mubr.f32.mxu0 %v12605_v25  ;;  %3137 = vmatprep.mubr.f32.mxu1 %v12605_v25  ;;  %12732 = vst [vmem:[#allocation31_spill] sm:$0xff] %v11214_v35  ;;  %12735 = vst [vmem:[#allocation34_spill] sm:$0xff] %v11224_v8  ;;  %v11226_v1 = vpack.c.bf16 %v2952_v44, %v2948_v29  ;;  %v2956_v7 = vld [vmem:[#allocation10 + $0x2c0] sm:$0xff]  ;;  %v11236_v44 = vpack.c.bf16 %v2963_v5, %v2959_v27  ;;  %v2971_v27 = vld [vmem:[#allocation10 + $0x338] sm:$0xff] }
 0x619   :  { %v2960_v29 = vld [vmem:[#allocation10 + $0x2e0] sm:$0xff] }
 0x61a   :  { %7367 = vmatpush1.bf16.msra.mxu0 %v11140_v11  ;;  %7431 = vmatpush1.bf16.msra.mxu1 %v11142_v55  ;;  %12736 = vst [vmem:[#allocation35_spill] sm:$0xff] %v11226_v1  ;;  %12739 = vst [vmem:[#allocation38_spill] sm:$0xff] %v11236_v44  ;;  %v2964_v5 = vld [vmem:[#allocation10 + $0x300] sm:$0xff] }
 0x61b   :  { %7369 = vmatprep.subr.bf16.mxu0 %v11146_v24  ;;  %7433 = vmatprep.subr.bf16.mxu1 %v11148_v9 }
 0x61e   :  { %7371 = vmatpush1.bf16.msra.mxu0 %v11156_v32  ;;  %7435 = vmatpush1.bf16.msra.mxu1 %v11158_v62 }
 0x61f   :  { %7373 = vmatprep.subr.bf16.mxu0 %v11162_v17  ;;  %7437 = vmatprep.subr.bf16.mxu1 %v11164_v16 }
 0x622   :  { %7375 = vmatpush1.bf16.msra.mxu0 %v11166_v47  ;;  %7439 = vmatpush1.bf16.msra.mxu1 %v11169_v6 }
 0x623   :  { %7377 = vmatprep.subr.bf16.mxu0 %v11174_v63  ;;  %7441 = vmatprep.subr.bf16.mxu1 %v11176_v4 }
 0x626   :  { %7379 = vmatpush1.bf16.msra.mxu0 %v11178_v23  ;;  %7443 = vmatpush1.bf16.msra.mxu1 %v11181_v31 }
 0x627   :  { %7381 = vmatprep.subr.bf16.mxu0 %v11186_v13  ;;  %7445 = vmatprep.subr.bf16.mxu1 %v11188_v26 }
 0x62a   :  { %7383 = vmatpush1.bf16.msra.mxu0 %v11190_v53  ;;  %7447 = vmatpush1.bf16.msra.mxu1 %v11193_v58 }
 0x62b   :  { %7385 = vmatprep.subr.bf16.mxu0 %v11198_v3  ;;  %7449 = vmatprep.subr.bf16.mxu1 %v11200_v61 }
 0x62e   :  { %7387 = vmatpush1.bf16.msra.mxu0 %v11202_v59  ;;  %7451 = vmatpush1.bf16.msra.mxu1 %v11205_v43 }
 0x62f   :  { %7389 = vmatprep.subr.bf16.mxu0 %v11210_v37  ;;  %7453 = vmatprep.subr.bf16.mxu1 %v11212_v60 }
 0x632   :  { %7391 = vmatpush1.bf16.msra.mxu0 %v11214_v35  ;;  %7455 = vmatpush1.bf16.msra.mxu1 %v11217_v12  ;;  %v11234_v12 = vpack.c.bf16 %v2961_v51, %v2957_v38  ;;  %v11238_v35 = vpack.c.bf16 %v2960_v29, %v2956_v7  ;;  %v2969_v38 = vld [vmem:[#allocation10 + $0x328] sm:$0xff]  ;;  %v2967_v51 = vld [vmem:[#allocation10 + $0x318] sm:$0xff]  ;;  %v2968_v7 = vld [vmem:[#allocation10 + $0x320] sm:$0xff] }
 0x633   :  { %7393 = vmatprep.subr.bf16.mxu0 %v11222_v33  ;;  %7457 = vmatprep.subr.bf16.mxu1 %v11224_v8  ;;  %v11241_v8 = vpack.c.bf16 %v2962_v20, %v2958_v15  ;;  %v11248_v29 = vpack.c.bf16 %v2971_v27, %v2967_v51  ;;  %v11250_v33 = vpack.c.bf16 %v2968_v7, %v2964_v5  ;;  %v2966_v15 = vld [vmem:[#allocation10 + $0x310] sm:$0xff]  ;;  %v2979_v51 = vld [vmem:[#allocation10 + $0x378] sm:$0xff]  ;;  %v2972_v27 = vld [vmem:[#allocation10 + $0x340] sm:$0xff] }
 0x634   :  { %12738 = vst [vmem:[#allocation37_spill] sm:$0xff] %v11234_v12  ;;  %12740 = vst [vmem:[#allocation39_spill] sm:$0xff] %v11238_v35  ;;  %v2970_v20 = vld [vmem:[#allocation10 + $0x330] sm:$0xff]  ;;  %v2976_v5 = vld [vmem:[#allocation10 + $0x360] sm:$0xff] }
 0x635   :  { %12741 = vst [vmem:[#allocation40_spill] sm:$0xff] %v11241_v8  ;;  %12743 = vst [vmem:[#allocation42_spill] sm:$0xff] %v11248_v29 }
 0x636   :  { %7395 = vmatpush1.bf16.msra.mxu0 %v11226_v1  ;;  %7459 = vmatpush1.bf16.msra.mxu1 %v11229_v14  ;;  %v2965_v14 = vld [vmem:[#allocation10 + $0x308] sm:$0xff]  ;;  %12744 = vst [vmem:[#allocation43_spill] sm:$0xff] %v11250_v33 }
 0x637   :  { %7397 = vmatprep.subr.bf16.mxu0 %v11234_v12  ;;  %7461 = vmatprep.subr.bf16.mxu1 %v11236_v44  ;;  %v11246_v1 = vpack.c.bf16 %v2969_v38, %v2965_v14  ;;  %v11253_v44 = vpack.c.bf16 %v2970_v20, %v2966_v15  ;;  %v2977_v14 = vld [vmem:[#allocation10 + $0x368] sm:$0xff]  ;;  %v2975_v38 = vld [vmem:[#allocation10 + $0x358] sm:$0xff]  ;;  %v11262_v12 = vpack.c.bf16 %v2976_v5, %v2972_v27  ;;  %v2974_v15 = vld [vmem:[#allocation10 + $0x350] sm:$0xff] }
 0x638   :  { %v11260_v7 = vpack.c.bf16 %v2979_v51, %v2975_v38  ;;  %v2978_v20 = vld [vmem:[#allocation10 + $0x370] sm:$0xff]  ;;  %v2987_v38 = vld [vmem:[#allocation10 + $0x3b8] sm:$0xff]  ;;  %v2980_v51 = vld [vmem:[#allocation10 + $0x380] sm:$0xff] }
 0x639   :  { %12742 = vst [vmem:[#allocation41_spill] sm:$0xff] %v11246_v1  ;;  %12745 = vst [vmem:[#allocation44_spill] sm:$0xff] %v11253_v44  ;;  %v2984_v27 = vld [vmem:[#allocation10 + $0x3a0] sm:$0xff] }
 0x63a   :  { %7399 = vmatpush1.bf16.msra.mxu0 %v11238_v35  ;;  %7463 = vmatpush1.bf16.msra.mxu1 %v11241_v8  ;;  %v2973_v8 = vld [vmem:[#allocation10 + $0x348] sm:$0xff]  ;;  %12747 = vst [vmem:[#allocation46_spill] sm:$0xff] %v11260_v7  ;;  %12748 = vst [vmem:[#allocation47_spill] sm:$0xff] %v11262_v12 }
 0x63b   :  { %7401 = vmatprep.subr.bf16.mxu0 %v11246_v1  ;;  %7465 = vmatprep.subr.bf16.mxu1 %v11248_v29  ;;  %v11258_v35 = vpack.c.bf16 %v2977_v14, %v2973_v8  ;;  %v11265_v29 = vpack.c.bf16 %v2978_v20, %v2974_v15  ;;  %v2985_v8 = vld [vmem:[#allocation10 + $0x3a8] sm:$0xff]  ;;  %v2983_v14 = vld [vmem:[#allocation10 + $0x398] sm:$0xff]  ;;  %v11274_v1 = vpack.c.bf16 %v2984_v27, %v2980_v51  ;;  %v2982_v15 = vld [vmem:[#allocation10 + $0x390] sm:$0xff] }
 0x63c   :  { %v11272_v5 = vpack.c.bf16 %v2987_v38, %v2983_v14  ;;  %v2986_v20 = vld [vmem:[#allocation10 + $0x3b0] sm:$0xff]  ;;  %v2995_v14 = vld [vmem:[#allocation10 + $0x3f8] sm:$0xff]  ;;  %v2988_v38 = vld [vmem:[#allocation10 + $0x3c0] sm:$0xff] }
 0x63d   :  { %12746 = vst [vmem:[#allocation45_spill] sm:$0xff] %v11258_v35  ;;  %12749 = vst [vmem:[#allocation48_spill] sm:$0xff] %v11265_v29  ;;  %v2992_v51 = vld [vmem:[#allocation10 + $0x3e0] sm:$0xff] }
 0x63e   :  { %7403 = vmatpush1.bf16.msra.mxu0 %v11250_v33  ;;  %7467 = vmatpush1.bf16.msra.mxu1 %v11253_v44  ;;  %v2981_v44 = vld [vmem:[#allocation10 + $0x388] sm:$0xff]  ;;  %12751 = vst [vmem:[#allocation50_spill] sm:$0xff] %v11272_v5  ;;  %12752 = vst [vmem:[#allocation51_spill] sm:$0xff] %v11274_v1 }
 0x63f   :  { %7405 = vmatprep.subr.bf16.mxu0 %v11258_v35  ;;  %7469 = vmatprep.subr.bf16.mxu1 %v11260_v7  ;;  %v11270_v33 = vpack.c.bf16 %v2985_v8, %v2981_v44  ;;  %v11277_v7 = vpack.c.bf16 %v2986_v20, %v2982_v15  ;;  %v2993_v44 = vld [vmem:[#allocation10 + $0x3e8] sm:$0xff]  ;;  %v2991_v8 = vld [vmem:[#allocation10 + $0x3d8] sm:$0xff]  ;;  %v11286_v35 = vpack.c.bf16 %v2992_v51, %v2988_v38  ;;  %v2990_v15 = vld [vmem:[#allocation10 + $0x3d0] sm:$0xff] }
 0x640   :  { %v11284_v27 = vpack.c.bf16 %v2995_v14, %v2991_v8  ;;  %v2994_v20 = vld [vmem:[#allocation10 + $0x3f0] sm:$0xff] }
 0x641   :  { %12750 = vst [vmem:[#allocation49_spill] sm:$0xff] %v11270_v33  ;;  %12753 = vst [vmem:[#allocation24_spill] sm:$0xff] %v11277_v7 }
 0x642   :  { %7407 = vmatpush1.bf16.msra.mxu0 %v11262_v12  ;;  %7471 = vmatpush1.bf16.msra.mxu1 %v11265_v29  ;;  %v2989_v29 = vld [vmem:[#allocation10 + $0x3c8] sm:$0xff]  ;;  %12755 = vst [vmem:[#allocation57_spill] sm:$0xff] %v11284_v27  ;;  %12756 = vst [vmem:[#allocation58_spill] sm:$0xff] %v11286_v35 }
 0x643   :  { %7409 = vmatprep.subr.bf16.mxu0 %v11270_v33  ;;  %7473 = vmatprep.subr.bf16.mxu1 %v11272_v5  ;;  %v11282_v12 = vpack.c.bf16 %v2993_v44, %v2989_v29  ;;  %v11289_v5 = vpack.c.bf16 %v2994_v20, %v2990_v15 }
 0x645   :  { %12754 = vst [vmem:[#allocation54_spill] sm:$0xff] %v11282_v12  ;;  %12757 = vst [vmem:[#allocation59_spill] sm:$0xff] %v11289_v5 }
 0x646   :  { %7411 = vmatpush1.bf16.msra.mxu0 %v11274_v1  ;;  %7475 = vmatpush1.bf16.msra.mxu1 %v11277_v7 }
 0x647   :  { %7413 = vmatprep.subr.bf16.mxu0 %v11282_v12  ;;  %7477 = vmatprep.subr.bf16.mxu1 %v11284_v27 }
 0x64a   :  { %7415 = vmatpush1.bf16.msra.mxu0 %v11286_v35  ;;  %7479 = vmatpush1.bf16.msra.mxu1 %v11289_v5 }
 0x64b   :  { %7481 = vmatprep.subr.bf16.mxu0 %v11074_v52  ;;  %7545 = vmatprep.subr.bf16.mxu1 %v11076_v42 }
 0x6df   :  { %v2722_v29 = vpop.f32.mrb[10].mxu0  ;;  %v2799_v44 = vpop.f32.mrb[10].mxu1 }
 0x6e0   :  { %v8930_v8 = vadd.f32 %v2722_v29, %v12729_v56  ;;  %v2724_v14 = vpop.f32.mrb[11].mxu0  ;;  %v2801_v38 = vpop.f32.mrb[11].mxu1  ;;  %v8946_v56 = vadd.f32 %v2799_v44, %v10456_v10 }
 0x6e1   :  { %v8931_v51 = vadd.f32 %v2724_v14, %v10427_v39  ;;  %v8947_v35 = vadd.f32 %v2801_v38, %v10443_v22 }
 0x6e2   :  { %v6354_v15 = vmul.f32 -1.442695, %v8930_v8 }
 0x6e3   :  { %v6356_v20 = vmul.f32 -1.442695, %v8931_v51  ;;  %v6358_v1 = vmul.f32 -1.442695, %v8947_v35 }
 0x6e4   :  { %9351 = vpow2.f32 %v6354_v15 }
 0x6e5   :  { %9353 = vpow2.f32 %v6356_v20 }
 0x6e8   :  { %v2728_v27 = vpop.f32.mrb[20].mxu0  ;;  %v2805_v5 = vpop.f32.mrb[20].mxu1 }
 0x6e9   :  { %v8956_v52 = vadd.f32 %v2728_v27, %v12674_v21  ;;  %v2730_v12 = vpop.f32.mrb[21].mxu0  ;;  %v2807_v42 = vpop.f32.mrb[21].mxu1 }
 0x6ea   :  { %v8957_v7 = vadd.f32 %v2730_v12, %v10439_v18  ;;  %v8973_v15 = vadd.f32 %v2807_v42, %v10452_v0  ;;  %v8972_v12 = vadd.f32 %v2805_v5, %v10463_v46 }
 0x6eb   :  { %v6355_v29 = vmul.f32 -1.442695, %v8956_v52 }
 0x6ec   :  { %v6357_v33 = vmul.f32 -1.442695, %v8957_v7  ;;  %v6359_v27 = vmul.f32 -1.442695, %v8973_v15 }
 0x6ed   :  { %9355 = vpow2.f32 %v6355_v29 }
 0x6ee   :  { %v9352_v8 = vpop.eup %9351  ;;  %9357 = vpow2.f32 %v6357_v33 }
 0x6ef   :  { %v9354_v14 = vpop.eup %9353  ;;  %v2816_v51 = vadd.f32 1.0, %v9352_v8  ;;  %9359 = vpow2.f32 %v6358_v1 }
 0x6f0   :  { %9361 = vtanh.f32 %v8946_v56  ;;  %v2828_v38 = vadd.f32 1.0, %v9354_v14 }
 0x6f1   :  { %9363 = vrcp.f32 %v2816_v51 }
 0x6f2   :  { %9365 = vrcp.f32 %v2828_v38 }
 0x6f3   :  { %9367 = vpow2.f32 %v6359_v27 }
 0x6f4   :  { %9369 = vtanh.f32 %v8972_v12 }
 0x6f7   :  { %v9356_v35 = vpop.eup %9355 }
 0x6f8   :  { %v9358_v20 = vpop.eup %9357  ;;  %v2817_v52 = vadd.f32 1.0, %v9356_v35 }
 0x6f9   :  { %v9360_v7 = vpop.eup %9359  ;;  %v2829_v44 = vadd.f32 1.0, %v9358_v20 }
 0x6fa   :  { %v9362_v33 = vpop.eup %9361  ;;  %9371 = vrcp.f32 %v2817_v52  ;;  %v2842_v8 = vadd.f32 1.0, %v9360_v7 }
 0x6fb   :  { %v9364_v29 = vpop.eup %9363  ;;  %9373 = vrcp.f32 %v2829_v44 }
 0x6fc   :  { %v9366_v1 = vpop.eup %9365  ;;  %v2850_v56 = vmul.f32 %v9364_v29, %v9362_v33  ;;  %9375 = vrcp.f32 %v2842_v8 }
 0x6fd   :  { %v2848_v42 = vmul.f32 %v9366_v1, %v11089_v36  ;;  %v9368_v5 = vpop.eup %9367 }
 0x6fe   :  { %v9370_v51 = vpop.eup %9369  ;;  %v2843_v12 = vadd.f32 1.0, %v9368_v5 }
 0x6ff   :  { %v11305_v14 = vadd.f32 %v2850_v56, %v2848_v42 }
 0x701   :  { %9377 = vtanh.f32 %v11305_v14 }
 0x702   :  { %9379 = vrcp.f32 %v2843_v12 }
 0x704   :  { %v9372_v38 = vpop.eup %9371 }
 0x705   :  { %v9374_v15 = vpop.eup %9373  ;;  %v2851_v27 = vmul.f32 %v9372_v38, %v9370_v51 }
 0x706   :  { %v2849_v35 = vmul.f32 %v9374_v15, %v11093_v48  ;;  %v9376_v52 = vpop.eup %9375 }
 0x708   :  { %v11309_v20 = vadd.f32 %v2851_v27, %v2849_v35 }
 0x70a   :  { %9381 = vtanh.f32 %v11309_v20 }
 0x70b   :  { %v9378_v36 = vpop.eup %9377 }
 0x70c   :  { %v11312_v7 = vmul.f32 %v9378_v36, %v9376_v52  ;;  %v9380_v48 = vpop.eup %9379 }
 0x70e   :  { %3061 = vmatmul.mubr.f32.vlgmr.msra.gmra.mrb[12].mxu0 %v11312_v7  ;;  %3138 = vmatmul.mubr.f32.vlgmr.msra.gmra.mrb[12].mxu1 %v11312_v7 }
 0x70f   :  { %7483 = vmatpush1.bf16.msra.mxu0 %v11096_v50  ;;  %7547 = vmatpush1.bf16.msra.mxu1 %v11098_v57  ;;  %v12758_v50 = vld [vmem:[#allocation31_spill] sm:$0xff]  ;;  %v12759_v57 = vld [vmem:[#allocation32_spill] sm:$0xff] }
 0x710   :  { %7485 = vmatprep.subr.bf16.mxu0 %v11102_v54  ;;  %7549 = vmatprep.subr.bf16.mxu1 %v11104_v49  ;;  %v12760_v54 = vld [vmem:[#allocation33_spill] sm:$0xff]  ;;  %v12761_v49 = vld [vmem:[#allocation34_spill] sm:$0xff] }
 0x713   :  { %7487 = vmatpush1.bf16.msra.mxu0 %v11110_v34  ;;  %7551 = vmatpush1.bf16.msra.mxu1 %v11112_v45  ;;  %v12762_v34 = vld [vmem:[#allocation35_spill] sm:$0xff]  ;;  %v12763_v45 = vld [vmem:[#allocation36_spill] sm:$0xff] }
 0x714   :  { %v9382_v44 = vpop.eup %9381  ;;  %7489 = vmatprep.subr.bf16.mxu0 %v11116_v30  ;;  %7553 = vmatprep.subr.bf16.mxu1 %v11118_v28  ;;  %v12764_v30 = vld [vmem:[#allocation37_spill] sm:$0xff]  ;;  %v12765_v28 = vld [vmem:[#allocation38_spill] sm:$0xff] }
 0x715   :  { %v11324_v33 = vmul.f32 %v9382_v44, %v9380_v48 }
 0x717   :  { %3066 = vmatprep.mubr.f32.mxu0 %v11324_v33  ;;  %3143 = vmatprep.mubr.f32.mxu1 %v11324_v33 }
 0x718   :  { %3067 = vmatmul.mubr.f32.gmra.mrb[18].mxu0 %v12605_v25  ;;  %3144 = vmatmul.mubr.f32.gmra.mrb[18].mxu1 %v12605_v25 }
 0x719   :  { %7491 = vmatpush1.bf16.msra.mxu0 %v11126_v41  ;;  %7555 = vmatpush1.bf16.msra.mxu1 %v11128_v19  ;;  %v12766_v41 = vld [vmem:[#allocation39_spill] sm:$0xff]  ;;  %v12767_v19 = vld [vmem:[#allocation40_spill] sm:$0xff] }
 0x71a   :  { %7493 = vmatprep.subr.bf16.mxu0 %v11130_v40  ;;  %7557 = vmatprep.subr.bf16.mxu1 %v11132_v2  ;;  %v12768_v40 = vld [vmem:[#allocation41_spill] sm:$0xff]  ;;  %v12769_v2 = vld [vmem:[#allocation42_spill] sm:$0xff] }
 0x71b   :  { %3400 = vmatprep.mubr.f32.mxu0 %v12605_v25  ;;  %3477 = vmatprep.mubr.f32.mxu1 %v12605_v25 }
 0x71d   :  { %7495 = vmatpush1.bf16.msra.mxu0 %v11140_v11  ;;  %7559 = vmatpush1.bf16.msra.mxu1 %v11142_v55  ;;  %v12770_v11 = vld [vmem:[#allocation43_spill] sm:$0xff]  ;;  %v12771_v55 = vld [vmem:[#allocation44_spill] sm:$0xff] }
 0x71e   :  { %7497 = vmatprep.subr.bf16.mxu0 %v11146_v24  ;;  %7561 = vmatprep.subr.bf16.mxu1 %v11148_v9  ;;  %v12772_v24 = vld [vmem:[#allocation45_spill] sm:$0xff]  ;;  %v12773_v9 = vld [vmem:[#allocation46_spill] sm:$0xff] }
 0x721   :  { %7499 = vmatpush1.bf16.msra.mxu0 %v11156_v32  ;;  %7563 = vmatpush1.bf16.msra.mxu1 %v11158_v62  ;;  %v12774_v32 = vld [vmem:[#allocation47_spill] sm:$0xff]  ;;  %v12775_v62 = vld [vmem:[#allocation48_spill] sm:$0xff] }
 0x722   :  { %7501 = vmatprep.subr.bf16.mxu0 %v11162_v17  ;;  %7565 = vmatprep.subr.bf16.mxu1 %v11164_v16  ;;  %v12776_v17 = vld [vmem:[#allocation49_spill] sm:$0xff]  ;;  %v12777_v16 = vld [vmem:[#allocation50_spill] sm:$0xff] }
 0x725   :  { %7503 = vmatpush1.bf16.msra.mxu0 %v11166_v47  ;;  %7567 = vmatpush1.bf16.msra.mxu1 %v11169_v6  ;;  %v12778_v47 = vld [vmem:[#allocation51_spill] sm:$0xff]  ;;  %v12779_v6 = vld [vmem:[#allocation24_spill] sm:$0xff] }
 0x726   :  { %7505 = vmatprep.subr.bf16.mxu0 %v11174_v63  ;;  %7569 = vmatprep.subr.bf16.mxu1 %v11176_v4  ;;  %v12780_v63 = vld [vmem:[#allocation54_spill] sm:$0xff]  ;;  %v12781_v4 = vld [vmem:[#allocation57_spill] sm:$0xff] }
 0x729   :  { %7507 = vmatpush1.bf16.msra.mxu0 %v11178_v23  ;;  %7571 = vmatpush1.bf16.msra.mxu1 %v11181_v31  ;;  %v12782_v23 = vld [vmem:[#allocation58_spill] sm:$0xff]  ;;  %v12783_v31 = vld [vmem:[#allocation59_spill] sm:$0xff] }
 0x72a   :  { %7509 = vmatprep.subr.bf16.mxu0 %v11186_v13  ;;  %7573 = vmatprep.subr.bf16.mxu1 %v11188_v26  ;;  %v3557_v13 = vld [vmem:[#allocation12 + $0x8] sm:$0xff] }
 0x72b   :  { %v3565_v26 = vld [vmem:[#allocation12 + $0x48] sm:$0xff] }
 0x72d   :  { %7511 = vmatpush1.bf16.msra.mxu0 %v11190_v53  ;;  %7575 = vmatpush1.bf16.msra.mxu1 %v11193_v58  ;;  %v3559_v53 = vld [vmem:[#allocation12 + $0x18] sm:$0xff]  ;;  %v7608_v58 = vpack.c.bf16 %v3565_v26, %v3557_v13  ;;  %v3556_v13 = vld [vmem:[#allocation12] sm:$0xff] }
 0x72e   :  { %7513 = vmatprep.subr.bf16.mxu0 %v11198_v3  ;;  %7577 = vmatprep.subr.bf16.mxu1 %v11200_v61  ;;  %v3567_v3 = vld [vmem:[#allocation12 + $0x58] sm:$0xff]  ;;  %v3564_v26 = vld [vmem:[#allocation12 + $0x40] sm:$0xff] }
 0x72f   :  { %v7672_v61 = vpack.c.bf16 %v3567_v3, %v3559_v53  ;;  %v3558_v53 = vld [vmem:[#allocation12 + $0x10] sm:$0xff]  ;;  %v3573_v3 = vld [vmem:[#allocation12 + $0x88] sm:$0xff] }
 0x731   :  { %7515 = vmatpush1.bf16.msra.mxu0 %v11202_v59  ;;  %7579 = vmatpush1.bf16.msra.mxu1 %v11205_v43 }
 0x732   :  { %7517 = vmatprep.subr.bf16.mxu0 %v11210_v37  ;;  %7581 = vmatprep.subr.bf16.mxu1 %v11212_v60  ;;  %v12784_v37 = vld [vmem:[#allocation23_spill] sm:$0xff] }
 0x735   :  { %7519 = vmatpush1.bf16.msra.mxu0 %v12758_v50  ;;  %7583 = vmatpush1.bf16.msra.mxu1 %v12759_v57 }
 0x736   :  { %7521 = vmatprep.subr.bf16.mxu0 %v12760_v54  ;;  %7585 = vmatprep.subr.bf16.mxu1 %v12761_v49 }
 0x739   :  { %7523 = vmatpush1.bf16.msra.mxu0 %v12762_v34  ;;  %7587 = vmatpush1.bf16.msra.mxu1 %v12763_v45 }
 0x73a   :  { %7525 = vmatprep.subr.bf16.mxu0 %v12764_v30  ;;  %7589 = vmatprep.subr.bf16.mxu1 %v12765_v28 }
 0x73d   :  { %7527 = vmatpush1.bf16.msra.mxu0 %v12766_v41  ;;  %7591 = vmatpush1.bf16.msra.mxu1 %v12767_v19 }
 0x73e   :  { %7529 = vmatprep.subr.bf16.mxu0 %v12768_v40  ;;  %7593 = vmatprep.subr.bf16.mxu1 %v12769_v2 }
 0x741   :  { %7531 = vmatpush1.bf16.msra.mxu0 %v12770_v11  ;;  %7595 = vmatpush1.bf16.msra.mxu1 %v12771_v55 }
 0x742   :  { %7533 = vmatprep.subr.bf16.mxu0 %v12772_v24  ;;  %7597 = vmatprep.subr.bf16.mxu1 %v12773_v9 }
 0x745   :  { %7535 = vmatpush1.bf16.msra.mxu0 %v12774_v32  ;;  %7599 = vmatpush1.bf16.msra.mxu1 %v12775_v62 }
 0x746   :  { %7537 = vmatprep.subr.bf16.mxu0 %v12776_v17  ;;  %7601 = vmatprep.subr.bf16.mxu1 %v12777_v16 }
 0x749   :  { %7539 = vmatpush1.bf16.msra.mxu0 %v12778_v47  ;;  %7603 = vmatpush1.bf16.msra.mxu1 %v12779_v6 }
 0x74a   :  { %7541 = vmatprep.subr.bf16.mxu0 %v12780_v63  ;;  %7605 = vmatprep.subr.bf16.mxu1 %v12781_v4 }
 0x74d   :  { %7543 = vmatpush1.bf16.msra.mxu0 %v12782_v23  ;;  %7607 = vmatpush1.bf16.msra.mxu1 %v12783_v31 }
 0x74e   :  { %7609 = vmatprep.subr.bf16.mxu0 %v7608_v58  ;;  %7673 = vmatprep.subr.bf16.mxu1 %v7672_v61  ;;  %v3566_v58 = vld [vmem:[#allocation12 + $0x50] sm:$0xff] }
 0x7e1   :  { %v3062_v59 = vpop.f32.mrb[12].mxu0  ;;  %v3139_v43 = vpop.f32.mrb[12].mxu1 }
 0x7e2   :  { %v8932_v60 = vadd.f32 %v3062_v59, %v12784_v37  ;;  %v3064_v29 = vpop.f32.mrb[13].mxu0  ;;  %v3141_v1 = vpop.f32.mrb[13].mxu1  ;;  %v8948_v36 = vadd.f32 %v3139_v43, %v10456_v10  ;;  %v3575_v59 = vld [vmem:[#allocation12 + $0x98] sm:$0xff] }
 0x7e3   :  { %v8933_v56 = vadd.f32 %v3064_v29, %v10427_v39  ;;  %v8949_v5 = vadd.f32 %v3141_v1, %v10443_v22  ;;  %v3583_v43 = vld [vmem:[#allocation12 + $0xd8] sm:$0xff]  ;;  %v7610_v1 = vpack.c.bf16 %v3564_v26, %v3556_v13 }
 0x7e4   :  { %v6360_v8 = vmul.f32 -1.442695, %v8932_v60  ;;  %v3631_v26 = vld [vmem:[#allocation12 + $0x258] sm:$0xff] }
 0x7e5   :  { %v6362_v42 = vmul.f32 -1.442695, %v8933_v56  ;;  %v6364_v51 = vmul.f32 -1.442695, %v8949_v5  ;;  %v7674_v56 = vpack.c.bf16 %v3566_v58, %v3558_v53  ;;  %v7676_v5 = vpack.c.bf16 %v3583_v43, %v3575_v59  ;;  %v3620_v53 = vld [vmem:[#allocation12 + $0x200] sm:$0xff]  ;;  %v3622_v59 = vld [vmem:[#allocation12 + $0x210] sm:$0xff] }
 0x7e6   :  { %9383 = vpow2.f32 %v6360_v8  ;;  %v3572_v8 = vld [vmem:[#allocation12 + $0x80] sm:$0xff]  ;;  %v3630_v43 = vld [vmem:[#allocation12 + $0x250] sm:$0xff] }
 0x7e7   :  { %9385 = vpow2.f32 %v6362_v42  ;;  %v3628_v58 = vld [vmem:[#allocation12 + $0x240] sm:$0xff] }
 0x7e8   :  { %9387 = vpow2.f32 %v6364_v51  ;;  %v3580_v51 = vld [vmem:[#allocation12 + $0xc0] sm:$0xff] }
 0x7eb   :  { %v3068_v38 = vpop.f32.mrb[18].mxu0  ;;  %v3145_v15 = vpop.f32.mrb[18].mxu1 }
 0x7ec   :  { %v8954_v27 = vadd.f32 %v3068_v38, %v12674_v21  ;;  %v3070_v12 = vpop.f32.mrb[19].mxu0  ;;  %v3147_v35 = vpop.f32.mrb[19].mxu1  ;;  %v8970_v30 = vadd.f32 %v3145_v15, %v10463_v46  ;;  %v3574_v38 = vld [vmem:[#allocation12 + $0x90] sm:$0xff] }
 0x7ed   :  { %v8955_v52 = vadd.f32 %v3070_v12, %v10439_v18  ;;  %v8971_v34 = vadd.f32 %v3147_v35, %v10452_v0  ;;  %v3582_v15 = vld [vmem:[#allocation12 + $0xd0] sm:$0xff] }
 0x7ee   :  { %v6361_v48 = vmul.f32 -1.442695, %v8954_v27  ;;  %v7614_v27 = vpack.c.bf16 %v3580_v51, %v3572_v8  ;;  %v7678_v12 = vpack.c.bf16 %v3582_v15, %v3574_v38  ;;  %v3644_v51 = vld [vmem:[#allocation12 + $0x2c0] sm:$0xff] }
 0x7ef   :  { %v6363_v44 = vmul.f32 -1.442695, %v8955_v52  ;;  %v6365_v45 = vmul.f32 -1.442695, %v8971_v34  ;;  %v3596_v34 = vld [vmem:[#allocation12 + $0x140] sm:$0xff] }
 0x7f0   :  { %v9384_v50 = vpop.eup %9383  ;;  %9389 = vpow2.f32 %v6361_v48  ;;  %v3589_v48 = vld [vmem:[#allocation12 + $0x108] sm:$0xff] }
 0x7f1   :  { %v9386_v57 = vpop.eup %9385  ;;  %v3156_v54 = vadd.f32 1.0, %v9384_v50  ;;  %9391 = vpow2.f32 %v6363_v44  ;;  %v3597_v44 = vld [vmem:[#allocation12 + $0x148] sm:$0xff]  ;;  %v3591_v50 = vld [vmem:[#allocation12 + $0x118] sm:$0xff] }
 0x7f2   :  { %9393 = vtanh.f32 %v8948_v36  ;;  %v3168_v49 = vadd.f32 1.0, %v9386_v57  ;;  %v9388_v28 = vpop.eup %9387  ;;  %v7616_v57 = vpack.c.bf16 %v3597_v44, %v3589_v48  ;;  %v3661_v48 = vld [vmem:[#allocation12 + $0x348] sm:$0xff]  ;;  %v3655_v44 = vld [vmem:[#allocation12 + $0x318] sm:$0xff] }
 0x7f3   :  { %9395 = vrcp.f32 %v3156_v54  ;;  %v3182_v32 = vadd.f32 1.0, %v9388_v28  ;;  %v3599_v54 = vld [vmem:[#allocation12 + $0x158] sm:$0xff]  ;;  %v3590_v28 = vld [vmem:[#allocation12 + $0x110] sm:$0xff] }
 0x7f4   :  { %9397 = vrcp.f32 %v3168_v49  ;;  %v3588_v49 = vld [vmem:[#allocation12 + $0x100] sm:$0xff] }
 0x7f5   :  { %9399 = vpow2.f32 %v6365_v45  ;;  %v7680_v45 = vpack.c.bf16 %v3599_v54, %v3591_v50  ;;  %v3652_v54 = vld [vmem:[#allocation12 + $0x300] sm:$0xff] }
 0x7f6   :  { %9401 = vtanh.f32 %v8970_v30  ;;  %v7618_v30 = vpack.c.bf16 %v3596_v34, %v3588_v49  ;;  %v3660_v49 = vld [vmem:[#allocation12 + $0x340] sm:$0xff] }
 0x7fa   :  { %v9390_v41 = vpop.eup %9389 }
 0x7fb   :  { %v9392_v19 = vpop.eup %9391  ;;  %v3157_v40 = vadd.f32 1.0, %v9390_v41  ;;  %v3598_v41 = vld [vmem:[#allocation12 + $0x150] sm:$0xff] }
 0x7fc   :  { %v9394_v2 = vpop.eup %9393  ;;  %v3169_v11 = vadd.f32 1.0, %v9392_v19  ;;  %v7682_v19 = vpack.c.bf16 %v3598_v41, %v3590_v28  ;;  %v3662_v28 = vld [vmem:[#allocation12 + $0x350] sm:$0xff] }
 0x7fd   :  { %v9396_v55 = vpop.eup %9395  ;;  %9403 = vrcp.f32 %v3157_v40  ;;  %v3605_v40 = vld [vmem:[#allocation12 + $0x188] sm:$0xff] }
 0x7fe   :  { %v9398_v24 = vpop.eup %9397  ;;  %v3190_v9 = vmul.f32 %v9396_v55, %v9394_v2  ;;  %9405 = vrcp.f32 %v3169_v11  ;;  %v3613_v2 = vld [vmem:[#allocation12 + $0x1c8] sm:$0xff]  ;;  %v3607_v11 = vld [vmem:[#allocation12 + $0x198] sm:$0xff] }
 0x7ff   :  { %v3188_v62 = vmul.f32 %v9398_v24, %v11305_v14  ;;  %9407 = vrcp.f32 %v3182_v32  ;;  %v9400_v16 = vpop.eup %9399  ;;  %v3581_v14 = vld [vmem:[#allocation12 + $0xc8] sm:$0xff]  ;;  %v7620_v55 = vpack.c.bf16 %v3613_v2, %v3605_v40  ;;  %v3615_v24 = vld [vmem:[#allocation12 + $0x1d8] sm:$0xff]  ;;  %v3612_v32 = vld [vmem:[#allocation12 + $0x1c0] sm:$0xff] }
 0x800   :  { %v9402_v47 = vpop.eup %9401  ;;  %v3183_v23 = vadd.f32 1.0, %v9400_v16  ;;  %v3677_v40 = vld [vmem:[#allocation12 + $0x3c8] sm:$0xff]  ;;  %v3671_v2 = vld [vmem:[#allocation12 + $0x398] sm:$0xff] }
 0x801   :  { %v11395_v17 = vadd.f32 %v3190_v9, %v3188_v62  ;;  %v3604_v9 = vld [vmem:[#allocation12 + $0x180] sm:$0xff]  ;;  %v7684_v62 = vpack.c.bf16 %v3615_v24, %v3607_v11 }
 0x802   :  { %v7622_v16 = vpack.c.bf16 %v3612_v32, %v3604_v9  ;;  %v3668_v24 = vld [vmem:[#allocation12 + $0x380] sm:$0xff] }
 0x803   :  { %9409 = vtanh.f32 %v11395_v17  ;;  %v3676_v9 = vld [vmem:[#allocation12 + $0x3c0] sm:$0xff] }
 0x804   :  { %9411 = vrcp.f32 %v3183_v23  ;;  %v3629_v23 = vld [vmem:[#allocation12 + $0x248] sm:$0xff] }
 0x807   :  { %v9404_v6 = vpop.eup %9403 }
 0x808   :  { %v9406_v63 = vpop.eup %9405  ;;  %v3191_v4 = vmul.f32 %v9404_v6, %v9402_v47  ;;  %v3606_v47 = vld [vmem:[#allocation12 + $0x190] sm:$0xff] }
 0x809   :  { %v3189_v31 = vmul.f32 %v9406_v63, %v11309_v20  ;;  %v9408_v60 = vpop.eup %9407  ;;  %v7612_v20 = vpack.c.bf16 %v3581_v14, %v3573_v3  ;;  %v3614_v6 = vld [vmem:[#allocation12 + $0x1d0] sm:$0xff]  ;;  %v7626_v14 = vpack.c.bf16 %v3628_v58, %v3620_v53  ;;  %v3692_v53 = vld [vmem:[#allocation12 + $0x440] sm:$0xff] }
 0x80a   :  { %v7686_v63 = vpack.c.bf16 %v3614_v6, %v3606_v47  ;;  %v3678_v47 = vld [vmem:[#allocation12 + $0x3d0] sm:$0xff] }
 0x80b   :  { %v11399_v61 = vadd.f32 %v3191_v4, %v3189_v31  ;;  %v3621_v4 = vld [vmem:[#allocation12 + $0x208] sm:$0xff]  ;;  %v3623_v31 = vld [vmem:[#allocation12 + $0x218] sm:$0xff] }
 0x80c   :  { %v7624_v13 = vpack.c.bf16 %v3629_v23, %v3621_v4  ;;  %v7688_v3 = vpack.c.bf16 %v3631_v26, %v3623_v31  ;;  %v3693_v4 = vld [vmem:[#allocation12 + $0x448] sm:$0xff]  ;;  %v3687_v23 = vld [vmem:[#allocation12 + $0x418] sm:$0xff]  ;;  %v3684_v26 = vld [vmem:[#allocation12 + $0x400] sm:$0xff] }
 0x80d   :  { %v9410_v29 = vpop.eup %9409  ;;  %9413 = vtanh.f32 %v11399_v61 }
 0x80e   :  { %v11402_v42 = vmul.f32 %v9410_v29, %v9408_v60  ;;  %v9412_v35 = vpop.eup %9411  ;;  %v7690_v60 = vpack.c.bf16 %v3630_v43, %v3622_v59  ;;  %v3637_v29 = vld [vmem:[#allocation12 + $0x288] sm:$0xff]  ;;  %v3694_v59 = vld [vmem:[#allocation12 + $0x450] sm:$0xff] }
 0x810   :  { %3401 = vmatmul.mubr.f32.vlgmr.msra.gmra.mrb[14].mxu0 %v11402_v42  ;;  %3478 = vmatmul.mubr.f32.vlgmr.msra.gmra.mrb[14].mxu1 %v11402_v42 }
 0x811   :  { %7611 = vmatpush1.bf16.msra.mxu0 %v7610_v1  ;;  %7675 = vmatpush1.bf16.msra.mxu1 %v7674_v56  ;;  %v3645_v1 = vld [vmem:[#allocation12 + $0x2c8] sm:$0xff]  ;;  %v3639_v56 = vld [vmem:[#allocation12 + $0x298] sm:$0xff] }
 0x812   :  { %7613 = vmatprep.subr.bf16.mxu0 %v7612_v20  ;;  %7677 = vmatprep.subr.bf16.mxu1 %v7676_v5  ;;  %v7628_v8 = vpack.c.bf16 %v3645_v1, %v3637_v29  ;;  %v3647_v20 = vld [vmem:[#allocation12 + $0x2d8] sm:$0xff]  ;;  %v3636_v5 = vld [vmem:[#allocation12 + $0x280] sm:$0xff]  ;;  %v3709_v29 = vld [vmem:[#allocation12 + $0x4c8] sm:$0xff] }
 0x813   :  { %v7692_v38 = vpack.c.bf16 %v3647_v20, %v3639_v56  ;;  %v7630_v15 = vpack.c.bf16 %v3644_v51, %v3636_v5  ;;  %v3703_v1 = vld [vmem:[#allocation12 + $0x498] sm:$0xff]  ;;  %v3700_v20 = vld [vmem:[#allocation12 + $0x480] sm:$0xff] }
 0x814   :  { %v3708_v5 = vld [vmem:[#allocation12 + $0x4c0] sm:$0xff] }
 0x815   :  { %7615 = vmatpush1.bf16.msra.mxu0 %v7614_v27  ;;  %7679 = vmatpush1.bf16.msra.mxu1 %v7678_v12  ;;  %v3638_v27 = vld [vmem:[#allocation12 + $0x290] sm:$0xff] }
 0x816   :  { %7617 = vmatprep.subr.bf16.mxu0 %v7616_v57  ;;  %7681 = vmatprep.subr.bf16.mxu1 %v7680_v45  ;;  %v3646_v12 = vld [vmem:[#allocation12 + $0x2d0] sm:$0xff]  ;;  %v3663_v57 = vld [vmem:[#allocation12 + $0x358] sm:$0xff]  ;;  %v7634_v45 = vpack.c.bf16 %v3660_v49, %v3652_v54  ;;  %v3724_v54 = vld [vmem:[#allocation12 + $0x540] sm:$0xff] }
 0x817   :  { %v9414_v52 = vpop.eup %9413  ;;  %v7696_v34 = vpack.c.bf16 %v3663_v57, %v3655_v44  ;;  %v3716_v57 = vld [vmem:[#allocation12 + $0x500] sm:$0xff] }
 0x818   :  { %v11406_v36 = vmul.f32 %v9414_v52, %v9412_v35  ;;  %v7694_v35 = vpack.c.bf16 %v3646_v12, %v3638_v27  ;;  %v3653_v52 = vld [vmem:[#allocation12 + $0x308] sm:$0xff]  ;;  %v3710_v27 = vld [vmem:[#allocation12 + $0x4d0] sm:$0xff] }
 0x819   :  { %7619 = vmatpush1.bf16.msra.mxu0 %v7618_v30  ;;  %7683 = vmatpush1.bf16.msra.mxu1 %v7682_v19  ;;  %v7632_v50 = vpack.c.bf16 %v3661_v48, %v3653_v52  ;;  %v3654_v30 = vld [vmem:[#allocation12 + $0x310] sm:$0xff]  ;;  %v3669_v19 = vld [vmem:[#allocation12 + $0x388] sm:$0xff]  ;;  %v3719_v48 = vld [vmem:[#allocation12 + $0x518] sm:$0xff] }
 0x81a   :  { %3406 = vmatprep.mubr.f32.mxu0 %v11406_v36  ;;  %3483 = vmatprep.mubr.f32.mxu1 %v11406_v36  ;;  %v7698_v41 = vpack.c.bf16 %v3662_v28, %v3654_v30  ;;  %v7636_v11 = vpack.c.bf16 %v3677_v40, %v3669_v19  ;;  %v3725_v52 = vld [vmem:[#allocation12 + $0x548] sm:$0xff]  ;;  %v3726_v30 = vld [vmem:[#allocation12 + $0x550] sm:$0xff]  ;;  %v3735_v40 = vld [vmem:[#allocation12 + $0x598] sm:$0xff] }
 0x81b   :  { %3407 = vmatmul.mubr.f32.gmra.mrb[16].mxu0 %v12605_v25  ;;  %3484 = vmatmul.mubr.f32.gmra.mrb[16].mxu1 %v12605_v25  ;;  %v3741_v19 = vld [vmem:[#allocation12 + $0x5c8] sm:$0xff] }
 0x81c   :  { %7621 = vmatprep.subr.bf16.mxu0 %v7620_v55  ;;  %7685 = vmatprep.subr.bf16.mxu1 %v7684_v62  ;;  %v3679_v55 = vld [vmem:[#allocation12 + $0x3d8] sm:$0xff]  ;;  %v7638_v62 = vpack.c.bf16 %v3676_v9, %v3668_v24  ;;  %v3740_v24 = vld [vmem:[#allocation12 + $0x5c0] sm:$0xff] }
 0x81d   :  { %7623 = vmatpush1.bf16.msra.mxu0 %v7622_v16  ;;  %7687 = vmatpush1.bf16.msra.mxu1 %v7686_v63  ;;  %v7700_v32 = vpack.c.bf16 %v3679_v55, %v3671_v2  ;;  %v3670_v16 = vld [vmem:[#allocation12 + $0x390] sm:$0xff]  ;;  %v3685_v63 = vld [vmem:[#allocation12 + $0x408] sm:$0xff]  ;;  %v3732_v55 = vld [vmem:[#allocation12 + $0x580] sm:$0xff] }
 0x81e   :  { %7625 = vmatprep.subr.bf16.mxu0 %v7624_v13  ;;  %7689 = vmatprep.subr.bf16.mxu1 %v7688_v3  ;;  %v7702_v6 = vpack.c.bf16 %v3678_v47, %v3670_v16  ;;  %v7640_v31 = vpack.c.bf16 %v3693_v4, %v3685_v63  ;;  %v3695_v13 = vld [vmem:[#allocation12 + $0x458] sm:$0xff]  ;;  %v7642_v3 = vpack.c.bf16 %v3692_v53, %v3684_v26  ;;  %v3742_v16 = vld [vmem:[#allocation12 + $0x5d0] sm:$0xff]  ;;  %v3757_v63 = vld [vmem:[#allocation12 + $0x648] sm:$0xff] }
 0x81f   :  { %v7704_v58 = vpack.c.bf16 %v3695_v13, %v3687_v23  ;;  %v3751_v4 = vld [vmem:[#allocation12 + $0x618] sm:$0xff]  ;;  %v3748_v13 = vld [vmem:[#allocation12 + $0x600] sm:$0xff] }
 0x820   :  { %v3756_v26 = vld [vmem:[#allocation12 + $0x640] sm:$0xff] }
 0x821   :  { %7627 = vmatpush1.bf16.msra.mxu0 %v7626_v14  ;;  %7691 = vmatpush1.bf16.msra.mxu1 %v7690_v60  ;;  %v3686_v14 = vld [vmem:[#allocation12 + $0x410] sm:$0xff]  ;;  %v3701_v60 = vld [vmem:[#allocation12 + $0x488] sm:$0xff] }
 0x822   :  { %7629 = vmatprep.subr.bf16.mxu0 %v7628_v8  ;;  %7693 = vmatprep.subr.bf16.mxu1 %v7692_v38  ;;  %v7706_v43 = vpack.c.bf16 %v3694_v59, %v3686_v14  ;;  %v7644_v56 = vpack.c.bf16 %v3709_v29, %v3701_v60  ;;  %v3711_v8 = vld [vmem:[#allocation12 + $0x4d8] sm:$0xff]  ;;  %v7646_v38 = vpack.c.bf16 %v3708_v5, %v3700_v20  ;;  %v3758_v14 = vld [vmem:[#allocation12 + $0x650] sm:$0xff]  ;;  %v3765_v59 = vld [vmem:[#allocation12 + $0x688] sm:$0xff] }
 0x823   :  { %v7708_v51 = vpack.c.bf16 %v3711_v8, %v3703_v1  ;;  %v3773_v60 = vld [vmem:[#allocation12 + $0x6c8] sm:$0xff]  ;;  %v3767_v29 = vld [vmem:[#allocation12 + $0x698] sm:$0xff]  ;;  %v3764_v20 = vld [vmem:[#allocation12 + $0x680] sm:$0xff] }
 0x824   :  { %v3775_v1 = vld [vmem:[#allocation12 + $0x6d8] sm:$0xff]  ;;  %v3772_v5 = vld [vmem:[#allocation12 + $0x6c0] sm:$0xff] }
 0x825   :  { %7631 = vmatpush1.bf16.msra.mxu0 %v7630_v15  ;;  %7695 = vmatpush1.bf16.msra.mxu1 %v7694_v35  ;;  %v3702_v15 = vld [vmem:[#allocation12 + $0x490] sm:$0xff]  ;;  %v3717_v35 = vld [vmem:[#allocation12 + $0x508] sm:$0xff]  ;;  %v7724_v8 = vpack.c.bf16 %v3775_v1, %v3767_v29 }
 0x826   :  { %7633 = vmatprep.subr.bf16.mxu0 %v7632_v50  ;;  %7697 = vmatprep.subr.bf16.mxu1 %v7696_v34  ;;  %v7710_v12 = vpack.c.bf16 %v3710_v27, %v3702_v15  ;;  %v7648_v44 = vpack.c.bf16 %v3725_v52, %v3717_v35  ;;  %v3727_v50 = vld [vmem:[#allocation12 + $0x558] sm:$0xff]  ;;  %v7650_v34 = vpack.c.bf16 %v3724_v54, %v3716_v57  ;;  %v3774_v15 = vld [vmem:[#allocation12 + $0x6d0] sm:$0xff]  ;;  %v3781_v27 = vld [vmem:[#allocation12 + $0x708] sm:$0xff] }
 0x827   :  { %v7712_v49 = vpack.c.bf16 %v3727_v50, %v3719_v48  ;;  %v3783_v48 = vld [vmem:[#allocation12 + $0x718] sm:$0xff]  ;;  %v3780_v50 = vld [vmem:[#allocation12 + $0x700] sm:$0xff] }
 0x828   :  { %v3788_v54 = vld [vmem:[#allocation12 + $0x740] sm:$0xff] }
 0x829   :  { %7635 = vmatpush1.bf16.msra.mxu0 %v7634_v45  ;;  %7699 = vmatpush1.bf16.msra.mxu1 %v7698_v41  ;;  %v3718_v45 = vld [vmem:[#allocation12 + $0x510] sm:$0xff]  ;;  %v3733_v41 = vld [vmem:[#allocation12 + $0x588] sm:$0xff] }
 0x82a   :  { %7637 = vmatprep.subr.bf16.mxu0 %v7636_v11  ;;  %7701 = vmatprep.subr.bf16.mxu1 %v7700_v32  ;;  %v7714_v28 = vpack.c.bf16 %v3726_v30, %v3718_v45  ;;  %v7652_v2 = vpack.c.bf16 %v3741_v19, %v3733_v41  ;;  %v3743_v11 = vld [vmem:[#allocation12 + $0x5d8] sm:$0xff]  ;;  %v7654_v32 = vpack.c.bf16 %v3740_v24, %v3732_v55  ;;  %v3797_v30 = vld [vmem:[#allocation12 + $0x788] sm:$0xff]  ;;  %v3804_v55 = vld [vmem:[#allocation12 + $0x7c0] sm:$0xff] }
 0x82b   :  { %v7716_v9 = vpack.c.bf16 %v3743_v11, %v3735_v40  ;;  %v7666_v45 = vpack.c.bf16 %v3788_v54, %v3780_v50  ;;  %v3799_v41 = vld [vmem:[#allocation12 + $0x798] sm:$0xff]  ;;  %v3796_v11 = vld [vmem:[#allocation12 + $0x780] sm:$0xff] }
 0x82d   :  { %7639 = vmatpush1.bf16.msra.mxu0 %v7638_v62  ;;  %7703 = vmatpush1.bf16.msra.mxu1 %v7702_v6  ;;  %v3734_v62 = vld [vmem:[#allocation12 + $0x590] sm:$0xff]  ;;  %v3749_v6 = vld [vmem:[#allocation12 + $0x608] sm:$0xff] }
 0x82e   :  { %7641 = vmatprep.subr.bf16.mxu0 %v7640_v31  ;;  %7705 = vmatprep.subr.bf16.mxu1 %v7704_v58  ;;  %v7718_v47 = vpack.c.bf16 %v3742_v16, %v3734_v62  ;;  %v7656_v23 = vpack.c.bf16 %v3757_v63, %v3749_v6  ;;  %v3759_v31 = vld [vmem:[#allocation12 + $0x658] sm:$0xff]  ;;  %v7658_v58 = vpack.c.bf16 %v3756_v26, %v3748_v13  ;;  %v3569_v6 = vld [vmem:[#allocation12 + $0x68] sm:$0xff] }
 0x82f   :  { %v7720_v53 = vpack.c.bf16 %v3759_v31, %v3751_v4  ;;  %v7670_v62 = vpack.c.bf16 %v3804_v55, %v3796_v11  ;;  %v3563_v63 = vld [vmem:[#allocation12 + $0x38] sm:$0xff] }
 0x831   :  { %7643 = vmatpush1.bf16.msra.mxu0 %v7642_v3  ;;  %7707 = vmatpush1.bf16.msra.mxu1 %v7706_v43  ;;  %v3750_v3 = vld [vmem:[#allocation12 + $0x610] sm:$0xff] }
 0x832   :  { %7645 = vmatprep.subr.bf16.mxu0 %v7644_v56  ;;  %7709 = vmatprep.subr.bf16.mxu1 %v7708_v51  ;;  %v7722_v43 = vpack.c.bf16 %v3758_v14, %v3750_v3  ;;  %v7660_v56 = vpack.c.bf16 %v3773_v60, %v3765_v59  ;;  %v3766_v51 = vld [vmem:[#allocation12 + $0x690] sm:$0xff] }
 0x833   :  { %v7726_v35 = vpack.c.bf16 %v3774_v15, %v3766_v51 }
 0x835   :  { %7647 = vmatpush1.bf16.msra.mxu0 %v7646_v38  ;;  %7711 = vmatpush1.bf16.msra.mxu1 %v7710_v12  ;;  %v7662_v38 = vpack.c.bf16 %v3772_v5, %v3764_v20  ;;  %v3789_v12 = vld [vmem:[#allocation12 + $0x748] sm:$0xff] }
 0x836   :  { %7649 = vmatprep.subr.bf16.mxu0 %v7648_v44  ;;  %7713 = vmatprep.subr.bf16.mxu1 %v7712_v49  ;;  %v7664_v52 = vpack.c.bf16 %v3789_v12, %v3781_v27  ;;  %v3791_v44 = vld [vmem:[#allocation12 + $0x758] sm:$0xff]  ;;  %v3782_v49 = vld [vmem:[#allocation12 + $0x710] sm:$0xff] }
 0x837   :  { %v7728_v57 = vpack.c.bf16 %v3791_v44, %v3783_v48 }
 0x839   :  { %7651 = vmatpush1.bf16.msra.mxu0 %v7650_v34  ;;  %7715 = vmatpush1.bf16.msra.mxu1 %v7714_v28  ;;  %v3790_v34 = vld [vmem:[#allocation12 + $0x750] sm:$0xff]  ;;  %v3805_v28 = vld [vmem:[#allocation12 + $0x7c8] sm:$0xff] }
 0x83a   :  { %7653 = vmatprep.subr.bf16.mxu0 %v7652_v2  ;;  %7717 = vmatprep.subr.bf16.mxu1 %v7716_v9  ;;  %v7730_v19 = vpack.c.bf16 %v3790_v34, %v3782_v49  ;;  %v7668_v40 = vpack.c.bf16 %v3805_v28, %v3797_v30  ;;  %v3807_v2 = vld [vmem:[#allocation12 + $0x7d8] sm:$0xff]  ;;  %v3798_v9 = vld [vmem:[#allocation12 + $0x790] sm:$0xff] }
 0x83b   :  { %v7732_v24 = vpack.c.bf16 %v3807_v2, %v3799_v41 }
 0x83d   :  { %7655 = vmatpush1.bf16.msra.mxu0 %v7654_v32  ;;  %7719 = vmatpush1.bf16.msra.mxu1 %v7718_v47  ;;  %v3806_v32 = vld [vmem:[#allocation12 + $0x7d0] sm:$0xff]  ;;  %v3561_v47 = vld [vmem:[#allocation12 + $0x28] sm:$0xff] }
 0x83e   :  { %7657 = vmatprep.subr.bf16.mxu0 %v7656_v23  ;;  %7721 = vmatprep.subr.bf16.mxu1 %v7720_v53  ;;  %v7734_v16 = vpack.c.bf16 %v3806_v32, %v3798_v9  ;;  %v7736_v4 = vpack.c.bf16 %v3569_v6, %v3561_v47  ;;  %v3571_v23 = vld [vmem:[#allocation12 + $0x78] sm:$0xff]  ;;  %v3570_v47 = vld [vmem:[#allocation12 + $0x70] sm:$0xff] }
 0x83f   :  { %v7800_v31 = vpack.c.bf16 %v3571_v23, %v3563_v63  ;;  %v3577_v63 = vld [vmem:[#allocation12 + $0xa8] sm:$0xff] }
 0x840   :  { %v3585_v23 = vld [vmem:[#allocation12 + $0xe8] sm:$0xff] }
 0x841   :  { %7659 = vmatpush1.bf16.msra.mxu0 %v7658_v58  ;;  %7723 = vmatpush1.bf16.msra.mxu1 %v7722_v43 }
 0x842   :  { %7661 = vmatprep.subr.bf16.mxu0 %v7660_v56  ;;  %7725 = vmatprep.subr.bf16.mxu1 %v7724_v8 }
 0x845   :  { %7663 = vmatpush1.bf16.msra.mxu0 %v7662_v38  ;;  %7727 = vmatpush1.bf16.msra.mxu1 %v7726_v35 }
 0x846   :  { %7665 = vmatprep.subr.bf16.mxu0 %v7664_v52  ;;  %7729 = vmatprep.subr.bf16.mxu1 %v7728_v57 }
 0x849   :  { %7667 = vmatpush1.bf16.msra.mxu0 %v7666_v45  ;;  %7731 = vmatpush1.bf16.msra.mxu1 %v7730_v19 }
 0x84a   :  { %7669 = vmatprep.subr.bf16.mxu0 %v7668_v40  ;;  %7733 = vmatprep.subr.bf16.mxu1 %v7732_v24 }
 0x84d   :  { %7671 = vmatpush1.bf16.msra.mxu0 %v7670_v62  ;;  %7735 = vmatpush1.bf16.msra.mxu1 %v7734_v16  ;;  %v3568_v62 = vld [vmem:[#allocation12 + $0x60] sm:$0xff]  ;;  %v3562_v16 = vld [vmem:[#allocation12 + $0x30] sm:$0xff] }
 0x84e   :  { %7737 = vmatprep.subr.bf16.mxu0 %v7736_v4  ;;  %7801 = vmatprep.subr.bf16.mxu1 %v7800_v31  ;;  %v3579_v31 = vld [vmem:[#allocation12 + $0xb8] sm:$0xff] }
 0x8e3   :  { %v3402_v13 = vpop.f32.mrb[14].mxu0  ;;  %v3479_v26 = vpop.f32.mrb[14].mxu1 }
 0x8e4   :  { %v8934_v53 = vadd.f32 %v3402_v13, %v12784_v37  ;;  %v3404_v58 = vpop.f32.mrb[15].mxu0  ;;  %v3481_v3 = vpop.f32.mrb[15].mxu1  ;;  %v8950_v29 = vadd.f32 %v3479_v26, %v10456_v10  ;;  %v3587_v13 = vld [vmem:[#allocation12 + $0xf8] sm:$0xff] }
 0x8e5   :  { %v8935_v14 = vadd.f32 %v3404_v58, %v10427_v39  ;;  %v8951_v60 = vadd.f32 %v3481_v3, %v10443_v22  ;;  %v3576_v58 = vld [vmem:[#allocation12 + $0xa0] sm:$0xff] }
 0x8e6   :  { %v6366_v59 = vmul.f32 -1.442695, %v8934_v53  ;;  %v7802_v53 = vpack.c.bf16 %v3570_v47, %v3562_v16  ;;  %v3584_v3 = vld [vmem:[#allocation12 + $0xe0] sm:$0xff]  ;;  %v12789_v16 = vld [vmem:[#allocation55_spill] sm:$0xff]  ;;  %v3649_v47 = vld [vmem:[#allocation12 + $0x2e8] sm:$0xff] }
 0x8e7   :  { %v6368_v43 = vmul.f32 -1.442695, %v8935_v14  ;;  %v6370_v1 = vmul.f32 -1.442695, %v8951_v60  ;;  %v3578_v14 = vld [vmem:[#allocation12 + $0xb0] sm:$0xff]  ;;  %v7804_v60 = vpack.c.bf16 %v3587_v13, %v3579_v31  ;;  %v3640_v31 = vld [vmem:[#allocation12 + $0x2a0] sm:$0xff] }
 0x8e8   :  { %9415 = vpow2.f32 %v6366_v59  ;;  %v3586_v59 = vld [vmem:[#allocation12 + $0xf0] sm:$0xff]  ;;  %v12790_v13 = vld [vmem:[#allocation56_spill] sm:$0xff] }
 0x8e9   :  { %9417 = vpow2.f32 %v6368_v43  ;;  %v7740_v43 = vpack.c.bf16 %v3585_v23, %v3577_v63  ;;  %v3651_v63 = vld [vmem:[#allocation12 + $0x2f8] sm:$0xff] }
 0x8ea   :  { %9419 = vtanh.f32 %v8950_v29  ;;  %v3593_v29 = vld [vmem:[#allocation12 + $0x128] sm:$0xff] }
 0x8eb   :  { %9421 = vpow2.f32 %v6370_v1  ;;  %v12785_v1 = vld [vmem:[#allocation25_spill] sm:$0xff] }
 0x8ee   :  { %v3408_v56 = vpop.f32.mrb[16].mxu0  ;;  %v3485_v8 = vpop.f32.mrb[16].mxu1 }
 0x8ef   :  { %v8952_v20 = vadd.f32 %v3408_v56, %v12674_v21  ;;  %v3410_v5 = vpop.f32.mrb[17].mxu0  ;;  %v3487_v51 = vpop.f32.mrb[17].mxu1  ;;  %v8968_v52 = vadd.f32 %v3485_v8, %v10463_v46  ;;  %v3601_v56 = vld [vmem:[#allocation12 + $0x168] sm:$0xff]  ;;  %v3595_v8 = vld [vmem:[#allocation12 + $0x138] sm:$0xff] }
 0x8f0   :  { %v8953_v37 = vadd.f32 %v3410_v5, %v10439_v18  ;;  %v8969_v10 = vadd.f32 %v3487_v51, %v10452_v0  ;;  %v7742_v5 = vpack.c.bf16 %v3584_v3, %v3576_v58  ;;  %v7806_v51 = vpack.c.bf16 %v3586_v59, %v3578_v14  ;;  %v3650_v58 = vld [vmem:[#allocation12 + $0x2f0] sm:$0xff]  ;;  %v3657_v59 = vld [vmem:[#allocation12 + $0x328] sm:$0xff] }
 0x8f1   :  { %v6367_v38 = vmul.f32 -1.442695, %v8952_v20  ;;  %v3603_v20 = vld [vmem:[#allocation12 + $0x178] sm:$0xff] }
 0x8f2   :  { %v9416_v39 = vpop.eup %9415  ;;  %v6369_v15 = vmul.f32 -1.442695, %v8953_v37  ;;  %v6371_v35 = vmul.f32 -1.442695, %v8969_v10  ;;  %v3592_v37 = vld [vmem:[#allocation12 + $0x120] sm:$0xff]  ;;  %v12786_v10 = vld [vmem:[#allocation52_spill] sm:$0xff] }
 0x8f3   :  { %v9418_v27 = vpop.eup %9417  ;;  %v3496_v12 = vadd.f32 1.0, %v9416_v39  ;;  %9423 = vpow2.f32 %v6367_v38  ;;  %v3600_v38 = vld [vmem:[#allocation12 + $0x160] sm:$0xff]  ;;  %v3594_v39 = vld [vmem:[#allocation12 + $0x130] sm:$0xff] }
 0x8f4   :  { %v3508_v22 = vadd.f32 1.0, %v9418_v27  ;;  %9425 = vpow2.f32 %v6369_v15  ;;  %v9420_v21 = vpop.eup %9419  ;;  %v3602_v15 = vld [vmem:[#allocation12 + $0x170] sm:$0xff]  ;;  %v7744_v27 = vpack.c.bf16 %v3601_v56, %v3593_v29  ;;  %v3659_v29 = vld [vmem:[#allocation12 + $0x338] sm:$0xff] }
 0x8f5   :  { %9427 = vrcp.f32 %v3496_v12  ;;  %v9422_v48 = vpop.eup %9421  ;;  %v7808_v12 = vpack.c.bf16 %v3603_v20, %v3595_v8  ;;  %v3667_v56 = vld [vmem:[#allocation12 + $0x378] sm:$0xff] }
 0x8f6   :  { %9429 = vrcp.f32 %v3508_v22  ;;  %v3522_v45 = vadd.f32 1.0, %v9422_v48  ;;  %v3609_v22 = vld [vmem:[#allocation12 + $0x1a8] sm:$0xff]  ;;  %v7746_v48 = vpack.c.bf16 %v3600_v38, %v3592_v37  ;;  %v3664_v37 = vld [vmem:[#allocation12 + $0x360] sm:$0xff]  ;;  %v3658_v38 = vld [vmem:[#allocation12 + $0x330] sm:$0xff] }
 0x8f7   :  { %9431 = vpow2.f32 %v6371_v35  ;;  %v3617_v35 = vld [vmem:[#allocation12 + $0x1e8] sm:$0xff] }
 0x8f8   :  { %9433 = vtanh.f32 %v8968_v52  ;;  %v3619_v52 = vld [vmem:[#allocation12 + $0x1f8] sm:$0xff] }
 0x8fd   :  { %v9424_v18 = vpop.eup %9423 }
 0x8fe   :  { %v9426_v44 = vpop.eup %9425  ;;  %v3497_v50 = vadd.f32 1.0, %v9424_v18  ;;  %v7810_v18 = vpack.c.bf16 %v3602_v15, %v3594_v39  ;;  %v3666_v39 = vld [vmem:[#allocation12 + $0x370] sm:$0xff] }
 0x8ff   :  { %v9428_v57 = vpop.eup %9427  ;;  %v3509_v54 = vadd.f32 1.0, %v9426_v44  ;;  %v3608_v44 = vld [vmem:[#allocation12 + $0x1a0] sm:$0xff] }
 0x900   :  { %v9430_v49 = vpop.eup %9429  ;;  %v3530_v34 = vmul.f32 %v9428_v57, %v9420_v21  ;;  %9435 = vrcp.f32 %v3497_v50  ;;  %v3611_v21 = vld [vmem:[#allocation12 + $0x1b8] sm:$0xff]  ;;  %v3616_v50 = vld [vmem:[#allocation12 + $0x1e0] sm:$0xff]  ;;  %v3610_v57 = vld [vmem:[#allocation12 + $0x1b0] sm:$0xff] }
 0x901   :  { %v3528_v30 = vmul.f32 %v9430_v49, %v11395_v17  ;;  %9437 = vrcp.f32 %v3509_v54  ;;  %v9432_v28 = vpop.eup %9431  ;;  %v3560_v17 = vld [vmem:[#allocation12 + $0x20] sm:$0xff]  ;;  %v3618_v54 = vld [vmem:[#allocation12 + $0x1f0] sm:$0xff]  ;;  %v7748_v49 = vpack.c.bf16 %v3617_v35, %v3609_v22  ;;  %v3681_v22 = vld [vmem:[#allocation12 + $0x3e8] sm:$0xff] }
 0x902   :  { %9439 = vrcp.f32 %v3522_v45  ;;  %v9434_v46 = vpop.eup %9433  ;;  %v3523_v2 = vadd.f32 1.0, %v9432_v28  ;;  %v3625_v45 = vld [vmem:[#allocation12 + $0x228] sm:$0xff]  ;;  %v3627_v28 = vld [vmem:[#allocation12 + $0x238] sm:$0xff] }
 0x903   :  { %v3532_v0 = vadd.f32 %v3530_v34, %v3528_v30  ;;  %v7812_v34 = vpack.c.bf16 %v3619_v52, %v3611_v21  ;;  %v12787_v30 = vld [vmem:[#allocation27_spill] sm:$0xff]  ;;  %v3675_v35 = vld [vmem:[#allocation12 + $0x3b8] sm:$0xff] }
 0x904   :  { %v3683_v21 = vld [vmem:[#allocation12 + $0x3f8] sm:$0xff] }
 0x905   :  { %9441 = vtanh.f32 %v3532_v0  ;;  %v3633_v0 = vld [vmem:[#allocation12 + $0x268] sm:$0xff] }
 0x906   :  { %9443 = vrcp.f32 %v3523_v2  ;;  %v12788_v2 = vld [vmem:[#allocation30_spill] sm:$0xff] }
 0x90a   :  { %v9436_v41 = vpop.eup %9435 }
 0x90b   :  { %v9438_v19 = vpop.eup %9437  ;;  %v3531_v40 = vmul.f32 %v9436_v41, %v9434_v46  ;;  %v3635_v46 = vld [vmem:[#allocation12 + $0x278] sm:$0xff]  ;;  %v7750_v41 = vpack.c.bf16 %v3616_v50, %v3608_v44  ;;  %v12793_v44 = vld [vmem:[#allocation53_spill] sm:$0xff] }
 0x90c   :  { %v3529_v11 = vmul.f32 %v9438_v19, %v11399_v61  ;;  %v9440_v55 = vpop.eup %9439  ;;  %v7738_v61 = vpack.c.bf16 %v3568_v62, %v3560_v17  ;;  %v7814_v19 = vpack.c.bf16 %v3618_v54, %v3610_v57  ;;  %v7816_v17 = vpack.c.bf16 %v3635_v46, %v3627_v28  ;;  %v3641_v62 = vld [vmem:[#allocation12 + $0x2a8] sm:$0xff]  ;;  %v3680_v50 = vld [vmem:[#allocation12 + $0x3e0] sm:$0xff]  ;;  %v3674_v57 = vld [vmem:[#allocation12 + $0x3b0] sm:$0xff] }
 0x90d   :  { %v7756_v3 = vpack.c.bf16 %v3649_v47, %v3641_v62  ;;  %v3682_v54 = vld [vmem:[#allocation12 + $0x3f0] sm:$0xff]  ;;  %v3691_v28 = vld [vmem:[#allocation12 + $0x438] sm:$0xff] }
 0x90e   :  { %v3533_v24 = vadd.f32 %v3531_v40, %v3529_v11  ;;  %v3624_v40 = vld [vmem:[#allocation12 + $0x220] sm:$0xff]  ;;  %v3699_v46 = vld [vmem:[#allocation12 + $0x478] sm:$0xff] }
 0x90f   :  { %v9442_v9 = vpop.eup %9441  ;;  %v3632_v11 = vld [vmem:[#allocation12 + $0x260] sm:$0xff]  ;;  %v7832_v47 = vpack.c.bf16 %v3699_v46, %v3691_v28  ;;  %v3755_v28 = vld [vmem:[#allocation12 + $0x638] sm:$0xff] }
 0x910   :  { %9445 = vtanh.f32 %v3533_v24  ;;  %v11422_v32 = vmul.f32 %v9442_v9, %v9440_v55  ;;  %v9444_v6 = vpop.eup %9443  ;;  %v3626_v55 = vld [vmem:[#allocation12 + $0x230] sm:$0xff]  ;;  %v7752_v9 = vpack.c.bf16 %v3633_v0, %v3625_v45  ;;  %v3689_v45 = vld [vmem:[#allocation12 + $0x428] sm:$0xff]  ;;  %v3763_v46 = vld [vmem:[#allocation12 + $0x678] sm:$0xff] }
 0x911   :  { %v3634_v24 = vld [vmem:[#allocation12 + $0x270] sm:$0xff]  ;;  %v3697_v0 = vld [vmem:[#allocation12 + $0x468] sm:$0xff] }
 0x912   :  { %v7818_v23 = vpack.c.bf16 %v3634_v24, %v3626_v55  ;;  %v12794_v55 = vld [vmem:[#allocation26_spill] sm:$0xff]  ;;  %v3690_v24 = vld [vmem:[#allocation12 + $0x430] sm:$0xff]  ;;  %v7768_v62 = vpack.c.bf16 %v3697_v0, %v3689_v45 }
 0x913   :  { %v3753_v45 = vld [vmem:[#allocation12 + $0x628] sm:$0xff] }
 0x914   :  { %v3761_v0 = vld [vmem:[#allocation12 + $0x668] sm:$0xff] }
 0x91a   :  { %v9446_v4 = vpop.eup %9445 }
 0x91b   :  { %v11424_v26 = vmul.f32 %v9446_v4, %v9444_v6  ;;  %v3643_v6 = vld [vmem:[#allocation12 + $0x2b8] sm:$0xff]  ;;  %v7754_v4 = vpack.c.bf16 %v3632_v11, %v3624_v40  ;;  %v3688_v40 = vld [vmem:[#allocation12 + $0x420] sm:$0xff] }
 0x91c   :  { %v7820_v14 = vpack.c.bf16 %v3651_v63, %v3643_v6  ;;  %v3696_v11 = vld [vmem:[#allocation12 + $0x460] sm:$0xff]  ;;  %v3713_v6 = vld [vmem:[#allocation12 + $0x4e8] sm:$0xff]  ;;  %v3707_v63 = vld [vmem:[#allocation12 + $0x4b8] sm:$0xff] }
 0x91d   :  { %3918 = vmatprep.mubr.f32.mxu0 %v11424_v26  ;;  %4031 = vmatprep.mubr.f32.mxu1 %v11424_v26 }
 0x91e   :  { %3919 = vmatmul.mubr.f32.vlgmr.msra.gmra.mrb[32].mxu0 %v12785_v1  ;;  %4032 = vmatmul.mubr.f32.vlgmr.msra.gmra.mrb[32].mxu1 %v12785_v1 }
 0x91f   :  { %7739 = vmatpush1.bf16.msra.mxu0 %v7738_v61  ;;  %7803 = vmatpush1.bf16.msra.mxu1 %v7802_v53  ;;  %v3648_v61 = vld [vmem:[#allocation12 + $0x2e0] sm:$0xff]  ;;  %v3642_v53 = vld [vmem:[#allocation12 + $0x2b0] sm:$0xff] }
 0x920   :  { %3924 = vmatprep.mubr.f32.mxu0 %v11406_v36  ;;  %4037 = vmatprep.mubr.f32.mxu1 %v11406_v36  ;;  %v7758_v8 = vpack.c.bf16 %v3648_v61, %v3640_v31  ;;  %v7822_v20 = vpack.c.bf16 %v3650_v58, %v3642_v53  ;;  %v3704_v61 = vld [vmem:[#allocation12 + $0x4a0] sm:$0xff] }
 0x921   :  { %7741 = vmatprep.subr.bf16.mxu0 %v7740_v43  ;;  %7805 = vmatprep.subr.bf16.mxu1 %v7804_v60  ;;  %v12791_v43 = vld [vmem:[#allocation29_spill] sm:$0xff]  ;;  %v3665_v60 = vld [vmem:[#allocation12 + $0x368] sm:$0xff] }
 0x922   :  { %3925 = vmatmul.mubr.f32.gmra.mrb[34].mxu0 %v12786_v10  ;;  %4038 = vmatmul.mubr.f32.gmra.mrb[34].mxu1 %v12786_v10  ;;  %v7760_v15 = vpack.c.bf16 %v3665_v60, %v3657_v59  ;;  %v3712_v53 = vld [vmem:[#allocation12 + $0x4e0] sm:$0xff]  ;;  %v3714_v59 = vld [vmem:[#allocation12 + $0x4f0] sm:$0xff]  ;;  %v3721_v60 = vld [vmem:[#allocation12 + $0x528] sm:$0xff] }
 0x923   :  { %7743 = vmatpush1.bf16.msra.mxu0 %v7742_v5  ;;  %7807 = vmatpush1.bf16.msra.mxu1 %v7806_v51  ;;  %v3656_v5 = vld [vmem:[#allocation12 + $0x320] sm:$0xff]  ;;  %v12792_v51 = vld [vmem:[#allocation28_spill] sm:$0xff] }
 0x924   :  { %3930 = vmatprep.mubr.f32.mxu0 %v11324_v33  ;;  %4043 = vmatprep.mubr.f32.mxu1 %v11324_v33  ;;  %v7762_v52 = vpack.c.bf16 %v3664_v37, %v3656_v5  ;;  %v3720_v37 = vld [vmem:[#allocation12 + $0x520] sm:$0xff] }
 0x925   :  { %7745 = vmatprep.subr.bf16.mxu0 %v7744_v27  ;;  %7809 = vmatprep.subr.bf16.mxu1 %v7808_v12  ;;  %v7824_v27 = vpack.c.bf16 %v3667_v56, %v3659_v29  ;;  %v3673_v12 = vld [vmem:[#allocation12 + $0x3a8] sm:$0xff]  ;;  %v3723_v56 = vld [vmem:[#allocation12 + $0x538] sm:$0xff] }
 0x926   :  { %3931 = vmatmul.mubr.f32.gmra.mrb[36].mxu0 %v12787_v30  ;;  %4044 = vmatmul.mubr.f32.gmra.mrb[36].mxu1 %v12787_v30  ;;  %v3729_v29 = vld [vmem:[#allocation12 + $0x568] sm:$0xff] }
 0x927   :  { %7747 = vmatpush1.bf16.msra.mxu0 %v7746_v48  ;;  %7811 = vmatpush1.bf16.msra.mxu1 %v7810_v18  ;;  %v7826_v48 = vpack.c.bf16 %v3666_v39, %v3658_v38  ;;  %v3672_v18 = vld [vmem:[#allocation12 + $0x3a0] sm:$0xff]  ;;  %v7776_v39 = vpack.c.bf16 %v3729_v29, %v3721_v60  ;;  %v3785_v60 = vld [vmem:[#allocation12 + $0x728] sm:$0xff] }
 0x928   :  { %3936 = vmatprep.mubr.f32.mxu0 %v12788_v2  ;;  %4049 = vmatprep.mubr.f32.mxu1 %v12788_v2  ;;  %v3728_v38 = vld [vmem:[#allocation12 + $0x560] sm:$0xff]  ;;  %v3793_v29 = vld [vmem:[#allocation12 + $0x768] sm:$0xff] }
 0x929   :  { %7749 = vmatprep.subr.bf16.mxu0 %v7748_v49  ;;  %7813 = vmatprep.subr.bf16.mxu1 %v7812_v34  ;;  %v7764_v49 = vpack.c.bf16 %v3681_v22, %v3673_v12  ;;  %v7828_v34 = vpack.c.bf16 %v3683_v21, %v3675_v35  ;;  %v3737_v12 = vld [vmem:[#allocation12 + $0x5a8] sm:$0xff]  ;;  %v3739_v35 = vld [vmem:[#allocation12 + $0x5b8] sm:$0xff] }
 0x92a   :  { %3937 = vmatmul.mubr.f32.gmra.mrb[38].mxu0 %v12789_v16  ;;  %4050 = vmatmul.mubr.f32.gmra.mrb[38].mxu1 %v12789_v16  ;;  %v3745_v22 = vld [vmem:[#allocation12 + $0x5e8] sm:$0xff]  ;;  %v3747_v21 = vld [vmem:[#allocation12 + $0x5f8] sm:$0xff] }
 0x92b   :  { %7751 = vmatpush1.bf16.msra.mxu0 %v7750_v41  ;;  %7815 = vmatpush1.bf16.msra.mxu1 %v7814_v19  ;;  %v7766_v41 = vpack.c.bf16 %v3680_v50, %v3672_v18  ;;  %v7830_v19 = vpack.c.bf16 %v3682_v54, %v3674_v57  ;;  %v3736_v18 = vld [vmem:[#allocation12 + $0x5a0] sm:$0xff]  ;;  %v7780_v57 = vpack.c.bf16 %v3745_v22, %v3737_v12  ;;  %v3801_v12 = vld [vmem:[#allocation12 + $0x7a8] sm:$0xff] }
 0x92c   :  { %3942 = vmatprep.mubr.f32.mxu0 %v12790_v13  ;;  %4055 = vmatprep.mubr.f32.mxu1 %v12790_v13  ;;  %v3744_v50 = vld [vmem:[#allocation12 + $0x5e0] sm:$0xff]  ;;  %v7844_v54 = vpack.c.bf16 %v3747_v21, %v3739_v35  ;;  %v3809_v22 = vld [vmem:[#allocation12 + $0x7e8] sm:$0xff]  ;;  %v3803_v35 = vld [vmem:[#allocation12 + $0x7b8] sm:$0xff] }
 0x92d   :  { %7753 = vmatprep.subr.bf16.mxu0 %v7752_v9  ;;  %7817 = vmatprep.subr.bf16.mxu1 %v7816_v17  ;;  %v3698_v9 = vld [vmem:[#allocation12 + $0x470] sm:$0xff]  ;;  %v3705_v17 = vld [vmem:[#allocation12 + $0x4a8] sm:$0xff]  ;;  %v3811_v21 = vld [vmem:[#allocation12 + $0x7f8] sm:$0xff] }
 0x92e   :  { %3943 = vmatmul.mubr.f32.gmra.mrb[40].mxu0 %v12791_v43  ;;  %4056 = vmatmul.mubr.f32.gmra.mrb[40].mxu1 %v12791_v43  ;;  %v7834_v31 = vpack.c.bf16 %v3698_v9, %v3690_v24  ;;  %v7772_v58 = vpack.c.bf16 %v3713_v6, %v3705_v17  ;;  %v7784_v24 = vpack.c.bf16 %v3761_v0, %v3753_v45  ;;  %v3754_v17 = vld [vmem:[#allocation12 + $0x630] sm:$0xff]  ;;  %v3777_v6 = vld [vmem:[#allocation12 + $0x6e8] sm:$0xff] }
 0x92f   :  { %7755 = vmatpush1.bf16.msra.mxu0 %v7754_v4  ;;  %7819 = vmatpush1.bf16.msra.mxu1 %v7818_v23  ;;  %v3715_v4 = vld [vmem:[#allocation12 + $0x4f8] sm:$0xff]  ;;  %v7770_v23 = vpack.c.bf16 %v3696_v11, %v3688_v40  ;;  %v3752_v40 = vld [vmem:[#allocation12 + $0x620] sm:$0xff]  ;;  %v7848_v9 = vpack.c.bf16 %v3763_v46, %v3755_v28  ;;  %v4379_v45 = vld [vmem:[#allocation13 + $0x8] sm:$0xff] }
 0x930   :  { %3948 = vmatprep.mubr.f32.mxu0 %v12792_v51  ;;  %4061 = vmatprep.mubr.f32.mxu1 %v12792_v51  ;;  %v3760_v11 = vld [vmem:[#allocation12 + $0x660] sm:$0xff]  ;;  %v4383_v0 = vld [vmem:[#allocation13 + $0x28] sm:$0xff]  ;;  %v4381_v28 = vld [vmem:[#allocation13 + $0x18] sm:$0xff] }
 0x931   :  { %7757 = vmatprep.subr.bf16.mxu0 %v7756_v3  ;;  %7821 = vmatprep.subr.bf16.mxu1 %v7820_v14  ;;  %v7836_v3 = vpack.c.bf16 %v3715_v4, %v3707_v63  ;;  %v3706_v14 = vld [vmem:[#allocation12 + $0x4b0] sm:$0xff]  ;;  %v3771_v63 = vld [vmem:[#allocation12 + $0x6b8] sm:$0xff] }
 0x932   :  { %3949 = vmatmul.mubr.f32.gmra.mrb[42].mxu0 %v11312_v7  ;;  %4062 = vmatmul.mubr.f32.gmra.mrb[42].mxu1 %v11312_v7  ;;  %v7838_v5 = vpack.c.bf16 %v3714_v59, %v3706_v14  ;;  %v3779_v4 = vld [vmem:[#allocation12 + $0x6f8] sm:$0xff]  ;;  %v3770_v14 = vld [vmem:[#allocation12 + $0x6b0] sm:$0xff] }
 0x933   :  { %7759 = vmatpush1.bf16.msra.mxu0 %v7758_v8  ;;  %7823 = vmatpush1.bf16.msra.mxu1 %v7822_v20  ;;  %v3731_v8 = vld [vmem:[#allocation12 + $0x578] sm:$0xff]  ;;  %v7774_v20 = vpack.c.bf16 %v3712_v53, %v3704_v61  ;;  %v3768_v61 = vld [vmem:[#allocation12 + $0x6a0] sm:$0xff]  ;;  %v3778_v59 = vld [vmem:[#allocation12 + $0x6f0] sm:$0xff] }
 0x934   :  { %3954 = vmatprep.mubr.f32.mxu0 %v12793_v44  ;;  %4067 = vmatprep.mubr.f32.mxu1 %v12793_v44  ;;  %v3776_v53 = vld [vmem:[#allocation12 + $0x6e0] sm:$0xff]  ;;  %v4385_v46 = vld [vmem:[#allocation13 + $0x38] sm:$0xff] }
 0x935   :  { %7761 = vmatprep.subr.bf16.mxu0 %v7760_v15  ;;  %7825 = vmatprep.subr.bf16.mxu1 %v7824_v27  ;;  %v3722_v15 = vld [vmem:[#allocation12 + $0x530] sm:$0xff] }
 0x936   :  { %3955 = vmatmul.mubr.f32.gmra.mrb[44].mxu0 %v11402_v42  ;;  %4068 = vmatmul.mubr.f32.gmra.mrb[44].mxu1 %v11402_v42  ;;  %v3730_v27 = vld [vmem:[#allocation12 + $0x570] sm:$0xff] }
 0x937   :  { %7763 = vmatpush1.bf16.msra.mxu0 %v7762_v52  ;;  %7827 = vmatpush1.bf16.msra.mxu1 %v7826_v48  ;;  %v7778_v52 = vpack.c.bf16 %v3728_v38, %v3720_v37  ;;  %v7842_v48 = vpack.c.bf16 %v3730_v27, %v3722_v15  ;;  %v3784_v37 = vld [vmem:[#allocation12 + $0x720] sm:$0xff]  ;;  %v3786_v15 = vld [vmem:[#allocation12 + $0x730] sm:$0xff] }
 0x938   :  { %3960 = vmatprep.mubr.f32.mxu0 %v12794_v55  ;;  %4073 = vmatprep.mubr.f32.mxu1 %v12794_v55  ;;  %v3792_v38 = vld [vmem:[#allocation12 + $0x760] sm:$0xff]  ;;  %v3794_v27 = vld [vmem:[#allocation12 + $0x770] sm:$0xff] }
 0x939   :  { %7765 = vmatprep.subr.bf16.mxu0 %v7764_v49  ;;  %7829 = vmatprep.subr.bf16.mxu1 %v7828_v34  ;;  %v3738_v49 = vld [vmem:[#allocation12 + $0x5b0] sm:$0xff] }
 0x93a   :  { %3961 = vmatmul.mubr.f32.gmra.mrb[46].mxu0 %v11422_v32  ;;  %4074 = vmatmul.mubr.f32.gmra.mrb[46].mxu1 %v11422_v32  ;;  %v3746_v34 = vld [vmem:[#allocation12 + $0x5f0] sm:$0xff] }
 0x93b   :  { %7767 = vmatpush1.bf16.msra.mxu0 %v7766_v41  ;;  %7831 = vmatpush1.bf16.msra.mxu1 %v7830_v19  ;;  %v7782_v41 = vpack.c.bf16 %v3744_v50, %v3736_v18  ;;  %v7846_v19 = vpack.c.bf16 %v3746_v34, %v3738_v49  ;;  %v3800_v18 = vld [vmem:[#allocation12 + $0x7a0] sm:$0xff]  ;;  %v3802_v49 = vld [vmem:[#allocation12 + $0x7b0] sm:$0xff] }
 0x93c   :  { %4144 = vmatprep.mubr.f32.mxu0 %v11424_v26  ;;  %4257 = vmatprep.mubr.f32.mxu1 %v11424_v26  ;;  %v7840_v26 = vpack.c.bf16 %v3731_v8, %v3723_v56  ;;  %v3787_v56 = vld [vmem:[#allocation12 + $0x738] sm:$0xff]  ;;  %v3808_v50 = vld [vmem:[#allocation12 + $0x7e0] sm:$0xff]  ;;  %v3810_v34 = vld [vmem:[#allocation12 + $0x7f0] sm:$0xff] }
 0x93d   :  { %7769 = vmatprep.subr.bf16.mxu0 %v7768_v62  ;;  %7833 = vmatprep.subr.bf16.mxu1 %v7832_v47  ;;  %v3762_v62 = vld [vmem:[#allocation12 + $0x670] sm:$0xff]  ;;  %v3769_v47 = vld [vmem:[#allocation12 + $0x6a8] sm:$0xff]  ;;  %v3795_v8 = vld [vmem:[#allocation12 + $0x778] sm:$0xff] }
 0x93f   :  { %7771 = vmatpush1.bf16.msra.mxu0 %v7770_v23  ;;  %7835 = vmatpush1.bf16.msra.mxu1 %v7834_v31  ;;  %v7786_v23 = vpack.c.bf16 %v3760_v11, %v3752_v40  ;;  %v7850_v31 = vpack.c.bf16 %v3762_v62, %v3754_v17  ;;  %v11460_v40 = vpack.c.bf16 %v4383_v0, %v4379_v45  ;;  %v4380_v17 = vld [vmem:[#allocation13 + $0x10] sm:$0xff] }
 0x940   :  { %7773 = vmatprep.subr.bf16.mxu0 %v7772_v58  ;;  %7837 = vmatprep.subr.bf16.mxu1 %v7836_v3  ;;  %v7788_v58 = vpack.c.bf16 %v3777_v6, %v3769_v47  ;;  %v7852_v3 = vpack.c.bf16 %v3779_v4, %v3771_v63  ;;  %v11462_v11 = vpack.c.bf16 %v4385_v46, %v4381_v28  ;;  %v4384_v62 = vld [vmem:[#allocation13 + $0x30] sm:$0xff]  ;;  %v4387_v47 = vld [vmem:[#allocation13 + $0x48] sm:$0xff]  ;;  %v4389_v63 = vld [vmem:[#allocation13 + $0x58] sm:$0xff] }
 0x941   :  { %12795 = vst [vmem:[#allocation31_spill] sm:$0xff] %v11460_v40  ;;  %v4391_v6 = vld [vmem:[#allocation13 + $0x68] sm:$0xff]  ;;  %v4393_v4 = vld [vmem:[#allocation13 + $0x78] sm:$0xff]  ;;  %v4410_v28 = vld [vmem:[#allocation13 + $0x100] sm:$0xff] }
 0x942   :  { %12796 = vst [vmem:[#allocation32_spill] sm:$0xff] %v11462_v11  ;;  %v4414_v46 = vld [vmem:[#allocation13 + $0x120] sm:$0xff] }
 0x943   :  { %7775 = vmatpush1.bf16.msra.mxu0 %v7774_v20  ;;  %7839 = vmatpush1.bf16.msra.mxu1 %v7838_v5  ;;  %v7790_v20 = vpack.c.bf16 %v3776_v53, %v3768_v61  ;;  %v7854_v5 = vpack.c.bf16 %v3778_v59, %v3770_v14  ;;  %v4386_v61 = vld [vmem:[#allocation13 + $0x40] sm:$0xff]  ;;  %v4388_v14 = vld [vmem:[#allocation13 + $0x50] sm:$0xff] }
 0x944   :  { %7777 = vmatprep.subr.bf16.mxu0 %v7776_v39  ;;  %7841 = vmatprep.subr.bf16.mxu1 %v7840_v26  ;;  %v7792_v39 = vpack.c.bf16 %v3793_v29, %v3785_v60  ;;  %v7856_v26 = vpack.c.bf16 %v3795_v8, %v3787_v56  ;;  %v4390_v53 = vld [vmem:[#allocation13 + $0x60] sm:$0xff]  ;;  %v4392_v59 = vld [vmem:[#allocation13 + $0x70] sm:$0xff]  ;;  %v4395_v60 = vld [vmem:[#allocation13 + $0x88] sm:$0xff] }
 0x945   :  { %v4399_v29 = vld [vmem:[#allocation13 + $0xa8] sm:$0xff]  ;;  %v4397_v56 = vld [vmem:[#allocation13 + $0x98] sm:$0xff] }
 0x946   :  { %v4401_v8 = vld [vmem:[#allocation13 + $0xb8] sm:$0xff] }
 0x947   :  { %7779 = vmatpush1.bf16.msra.mxu0 %v7778_v52  ;;  %7843 = vmatpush1.bf16.msra.mxu1 %v7842_v48  ;;  %v7794_v52 = vpack.c.bf16 %v3792_v38, %v3784_v37  ;;  %v7858_v48 = vpack.c.bf16 %v3794_v27, %v3786_v15  ;;  %v4394_v37 = vld [vmem:[#allocation13 + $0x80] sm:$0xff]  ;;  %v4403_v15 = vld [vmem:[#allocation13 + $0xc8] sm:$0xff] }
 0x948   :  { %7781 = vmatprep.subr.bf16.mxu0 %v7780_v57  ;;  %7845 = vmatprep.subr.bf16.mxu1 %v7844_v54  ;;  %v7796_v57 = vpack.c.bf16 %v3809_v22, %v3801_v12  ;;  %v7860_v54 = vpack.c.bf16 %v3811_v21, %v3803_v35  ;;  %v4398_v38 = vld [vmem:[#allocation13 + $0xa0] sm:$0xff]  ;;  %v4407_v27 = vld [vmem:[#allocation13 + $0xe8] sm:$0xff]  ;;  %v4405_v12 = vld [vmem:[#allocation13 + $0xd8] sm:$0xff] }
 0x949   :  { %v4409_v22 = vld [vmem:[#allocation13 + $0xf8] sm:$0xff]  ;;  %v11496_v35 = vpack.c.bf16 %v4398_v38, %v4394_v37  ;;  %v4426_v37 = vld [vmem:[#allocation13 + $0x180] sm:$0xff] }
 0x94a   :  { %v4430_v38 = vld [vmem:[#allocation13 + $0x1a0] sm:$0xff] }
 0x94b   :  { %7783 = vmatpush1.bf16.msra.mxu0 %v7782_v41  ;;  %7847 = vmatpush1.bf16.msra.mxu1 %v7846_v19  ;;  %v7798_v41 = vpack.c.bf16 %v3808_v50, %v3800_v18  ;;  %v7862_v19 = vpack.c.bf16 %v3810_v34, %v3802_v49  ;;  %v11504_v18 = vpack.c.bf16 %v4409_v22, %v4405_v12  ;;  %v4404_v50 = vld [vmem:[#allocation13 + $0xd0] sm:$0xff]  ;;  %v4413_v49 = vld [vmem:[#allocation13 + $0x118] sm:$0xff] }
 0x94c   :  { %7785 = vmatprep.subr.bf16.mxu0 %v7784_v24  ;;  %7849 = vmatprep.subr.bf16.mxu1 %v7848_v9  ;;  %v4378_v24 = vld [vmem:[#allocation13] sm:$0xff]  ;;  %v4417_v34 = vld [vmem:[#allocation13 + $0x138] sm:$0xff] }
 0x94d   :  { %v4382_v9 = vld [vmem:[#allocation13 + $0x20] sm:$0xff]  ;;  %v4437_v12 = vld [vmem:[#allocation13 + $0x1d8] sm:$0xff] }
 0x94e   :  { %v4441_v22 = vld [vmem:[#allocation13 + $0x1f8] sm:$0xff] }
 0x94f   :  { %7787 = vmatpush1.bf16.msra.mxu0 %v7786_v23  ;;  %7851 = vmatpush1.bf16.msra.mxu1 %v7850_v31  ;;  %v11466_v23 = vpack.c.bf16 %v4382_v9, %v4378_v24  ;;  %v11468_v31 = vpack.c.bf16 %v4384_v62, %v4380_v17  ;;  %v4419_v24 = vld [vmem:[#allocation13 + $0x148] sm:$0xff]  ;;  %v4421_v17 = vld [vmem:[#allocation13 + $0x158] sm:$0xff] }
 0x950   :  { %7789 = vmatprep.subr.bf16.mxu0 %v7788_v58  ;;  %7853 = vmatprep.subr.bf16.mxu1 %v7852_v3  ;;  %v11470_v58 = vpack.c.bf16 %v4391_v6, %v4387_v47  ;;  %v11472_v3 = vpack.c.bf16 %v4393_v4, %v4389_v63  ;;  %v4423_v9 = vld [vmem:[#allocation13 + $0x168] sm:$0xff]  ;;  %v4425_v62 = vld [vmem:[#allocation13 + $0x178] sm:$0xff]  ;;  %v11528_v47 = vpack.c.bf16 %v4414_v46, %v4410_v28  ;;  %v4418_v63 = vld [vmem:[#allocation13 + $0x140] sm:$0xff] }
 0x951   :  { %v4422_v4 = vld [vmem:[#allocation13 + $0x160] sm:$0xff]  ;;  %v4445_v28 = vld [vmem:[#allocation13 + $0x218] sm:$0xff] }
 0x952   :  { %v4449_v46 = vld [vmem:[#allocation13 + $0x238] sm:$0xff] }
 0x953   :  { %7791 = vmatpush1.bf16.msra.mxu0 %v7790_v20  ;;  %7855 = vmatpush1.bf16.msra.mxu1 %v7854_v5  ;;  %v11480_v20 = vpack.c.bf16 %v4390_v53, %v4386_v61  ;;  %v11482_v5 = vpack.c.bf16 %v4392_v59, %v4388_v14  ;;  %v11536_v61 = vpack.c.bf16 %v4425_v62, %v4421_v17  ;;  %v4420_v53 = vld [vmem:[#allocation13 + $0x150] sm:$0xff]  ;;  %v4427_v14 = vld [vmem:[#allocation13 + $0x188] sm:$0xff] }
 0x954   :  { %7793 = vmatprep.subr.bf16.mxu0 %v7792_v39  ;;  %7857 = vmatprep.subr.bf16.mxu1 %v7856_v26  ;;  %v11488_v39 = vpack.c.bf16 %v4401_v8, %v4397_v56  ;;  %v4396_v26 = vld [vmem:[#allocation13 + $0x90] sm:$0xff]  ;;  %v4431_v59 = vld [vmem:[#allocation13 + $0x1a8] sm:$0xff]  ;;  %v11544_v56 = vpack.c.bf16 %v4422_v4, %v4418_v63  ;;  %v11584_v17 = vpack.c.bf16 %v4449_v46, %v4445_v28 }
 0x955   :  { %v4444_v62 = vld [vmem:[#allocation13 + $0x210] sm:$0xff]  ;;  %v4451_v63 = vld [vmem:[#allocation13 + $0x248] sm:$0xff] }
 0x956   :  { %v4455_v4 = vld [vmem:[#allocation13 + $0x268] sm:$0xff]  ;;  %v4464_v28 = vld [vmem:[#allocation13 + $0x2b0] sm:$0xff] }
 0x957   :  { %7795 = vmatpush1.bf16.msra.mxu0 %v7794_v52  ;;  %7859 = vmatpush1.bf16.msra.mxu1 %v7858_v48  ;;  %v4402_v52 = vld [vmem:[#allocation13 + $0xc0] sm:$0xff]  ;;  %v4467_v46 = vld [vmem:[#allocation13 + $0x2c8] sm:$0xff] }
 0x958   :  { %7797 = vmatprep.subr.bf16.mxu0 %v7796_v57  ;;  %7861 = vmatprep.subr.bf16.mxu1 %v7860_v54  ;;  %v4406_v48 = vld [vmem:[#allocation13 + $0xe0] sm:$0xff]  ;;  %v4411_v57 = vld [vmem:[#allocation13 + $0x108] sm:$0xff] }
 0x959   :  { %v4415_v54 = vld [vmem:[#allocation13 + $0x128] sm:$0xff]  ;;  %v11512_v45 = vpack.c.bf16 %v4406_v48, %v4402_v52  ;;  %v11560_v52 = vpack.c.bf16 %v4430_v38, %v4426_v37  ;;  %v4452_v38 = vld [vmem:[#allocation13 + $0x250] sm:$0xff] }
 0x95b   :  { %7799 = vmatpush1.bf16.msra.mxu0 %v7798_v41  ;;  %7863 = vmatpush1.bf16.msra.mxu1 %v7862_v19  ;;  %v11520_v41 = vpack.c.bf16 %v4417_v34, %v4413_v49  ;;  %v4412_v19 = vld [vmem:[#allocation13 + $0x110] sm:$0xff]  ;;  %v4443_v49 = vld [vmem:[#allocation13 + $0x208] sm:$0xff] }
 0x95c   :  { %7865 = vmatprep.subr.bf16.mxu0 %v11460_v40  ;;  %7929 = vmatprep.subr.bf16.mxu1 %v11462_v11  ;;  %v4447_v34 = vld [vmem:[#allocation13 + $0x228] sm:$0xff] }
 0x95e   :  { %4145 = vmatmul.mubr.f32.vlgmr.msra.gmra.mrb[48].mxu0 %v12785_v1  ;;  %4258 = vmatmul.mubr.f32.vlgmr.msra.gmra.mrb[48].mxu1 %v12785_v1  ;;  %v11486_v1 = vpack.c.bf16 %v4399_v29, %v4395_v60  ;;  %v4429_v60 = vld [vmem:[#allocation13 + $0x198] sm:$0xff] }
 0x95f   :  { %4150 = vmatprep.mubr.f32.mxu0 %v11406_v36  ;;  %4263 = vmatprep.mubr.f32.mxu1 %v11406_v36  ;;  %v4400_v36 = vld [vmem:[#allocation13 + $0xb0] sm:$0xff]  ;;  %v4433_v29 = vld [vmem:[#allocation13 + $0x1b8] sm:$0xff] }
 0x960   :  { %7867 = vmatpush1.bf16.msra.mxu0 %v11466_v23  ;;  %7931 = vmatpush1.bf16.msra.mxu1 %v11468_v31  ;;  %v11498_v21 = vpack.c.bf16 %v4400_v36, %v4396_v26  ;;  %v11552_v26 = vpack.c.bf16 %v4433_v29, %v4429_v60  ;;  %v4428_v36 = vld [vmem:[#allocation13 + $0x190] sm:$0xff]  ;;  %v4450_v60 = vld [vmem:[#allocation13 + $0x240] sm:$0xff] }
 0x961   :  { %7869 = vmatprep.subr.bf16.mxu0 %v11470_v58  ;;  %7933 = vmatprep.subr.bf16.mxu1 %v11472_v3  ;;  %v4454_v29 = vld [vmem:[#allocation13 + $0x260] sm:$0xff] }
 0x962   :  { %4151 = vmatmul.mubr.f32.gmra.mrb[50].mxu0 %v12786_v10  ;;  %4264 = vmatmul.mubr.f32.gmra.mrb[50].mxu1 %v12786_v10  ;;  %v11502_v10 = vpack.c.bf16 %v4407_v27, %v4403_v15  ;;  %v4435_v15 = vld [vmem:[#allocation13 + $0x1c8] sm:$0xff] }
 0x963   :  { %4156 = vmatprep.mubr.f32.mxu0 %v11324_v33  ;;  %4269 = vmatprep.mubr.f32.mxu1 %v11324_v33  ;;  %v4408_v33 = vld [vmem:[#allocation13 + $0xf0] sm:$0xff]  ;;  %v4439_v27 = vld [vmem:[#allocation13 + $0x1e8] sm:$0xff] }
 0x964   :  { %7871 = vmatpush1.bf16.msra.mxu0 %v11480_v20  ;;  %7935 = vmatpush1.bf16.msra.mxu1 %v11482_v5  ;;  %v11514_v0 = vpack.c.bf16 %v4408_v33, %v4404_v50  ;;  %v4434_v50 = vld [vmem:[#allocation13 + $0x1c0] sm:$0xff] }
 0x965   :  { %7873 = vmatprep.subr.bf16.mxu0 %v11486_v1  ;;  %7937 = vmatprep.subr.bf16.mxu1 %v11488_v39  ;;  %v4438_v33 = vld [vmem:[#allocation13 + $0x1e0] sm:$0xff] }
 0x966   :  { %4157 = vmatmul.mubr.f32.gmra.mrb[52].mxu0 %v12787_v30  ;;  %4270 = vmatmul.mubr.f32.gmra.mrb[52].mxu1 %v12787_v30  ;;  %v11518_v30 = vpack.c.bf16 %v4415_v54, %v4411_v57  ;;  %v11568_v57 = vpack.c.bf16 %v4441_v22, %v4437_v12  ;;  %v4436_v54 = vld [vmem:[#allocation13 + $0x1d0] sm:$0xff]  ;;  %v4465_v12 = vld [vmem:[#allocation13 + $0x2b8] sm:$0xff]  ;;  %v11604_v22 = vpack.c.bf16 %v4454_v29, %v4450_v60 }
 0x967   :  { %4162 = vmatprep.mubr.f32.mxu0 %v12788_v2  ;;  %4275 = vmatprep.mubr.f32.mxu1 %v12788_v2  ;;  %v4416_v2 = vld [vmem:[#allocation13 + $0x130] sm:$0xff] }
 0x968   :  { %7875 = vmatpush1.bf16.msra.mxu0 %v11496_v35  ;;  %7939 = vmatpush1.bf16.msra.mxu1 %v11498_v21  ;;  %v11530_v6 = vpack.c.bf16 %v4416_v2, %v4412_v19  ;;  %v11576_v19 = vpack.c.bf16 %v4438_v33, %v4434_v50  ;;  %12799 = vst [vmem:[#allocation35_spill] sm:$0xff] %v11604_v22  ;;  %v4458_v33 = vld [vmem:[#allocation13 + $0x280] sm:$0xff]  ;;  %v4468_v29 = vld [vmem:[#allocation13 + $0x2d0] sm:$0xff] }
 0x969   :  { %7877 = vmatprep.subr.bf16.mxu0 %v11502_v10  ;;  %7941 = vmatprep.subr.bf16.mxu1 %v11504_v18 }
 0x96a   :  { %4163 = vmatmul.mubr.f32.gmra.mrb[54].mxu0 %v12789_v16  ;;  %4276 = vmatmul.mubr.f32.gmra.mrb[54].mxu1 %v12789_v16  ;;  %v11534_v16 = vpack.c.bf16 %v4423_v9, %v4419_v24  ;;  %v4442_v24 = vld [vmem:[#allocation13 + $0x200] sm:$0xff] }
 0x96b   :  { %4168 = vmatprep.mubr.f32.mxu0 %v12790_v13  ;;  %4281 = vmatprep.mubr.f32.mxu1 %v12790_v13  ;;  %v4424_v13 = vld [vmem:[#allocation13 + $0x170] sm:$0xff]  ;;  %v4446_v9 = vld [vmem:[#allocation13 + $0x220] sm:$0xff] }
 0x96c   :  { %7879 = vmatpush1.bf16.msra.mxu0 %v11512_v45  ;;  %7943 = vmatpush1.bf16.msra.mxu1 %v11514_v0  ;;  %v11546_v8 = vpack.c.bf16 %v4424_v13, %v4420_v53  ;;  %v4453_v53 = vld [vmem:[#allocation13 + $0x258] sm:$0xff] }
 0x96d   :  { %7881 = vmatprep.subr.bf16.mxu0 %v11518_v30  ;;  %7945 = vmatprep.subr.bf16.mxu1 %v11520_v41  ;;  %v4457_v13 = vld [vmem:[#allocation13 + $0x278] sm:$0xff] }
 0x96e   :  { %4169 = vmatmul.mubr.f32.gmra.mrb[56].mxu0 %v12791_v43  ;;  %4282 = vmatmul.mubr.f32.gmra.mrb[56].mxu1 %v12791_v43  ;;  %v11550_v43 = vpack.c.bf16 %v4431_v59, %v4427_v14  ;;  %v11592_v14 = vpack.c.bf16 %v4446_v9, %v4442_v24  ;;  %v11600_v37 = vpack.c.bf16 %v4457_v13, %v4453_v53  ;;  %v4471_v24 = vld [vmem:[#allocation13 + $0x2e8] sm:$0xff]  ;;  %v4469_v9 = vld [vmem:[#allocation13 + $0x2d8] sm:$0xff]  ;;  %v4470_v53 = vld [vmem:[#allocation13 + $0x2e0] sm:$0xff] }
 0x96f   :  { %4174 = vmatprep.mubr.f32.mxu0 %v12792_v51  ;;  %4287 = vmatprep.mubr.f32.mxu1 %v12792_v51  ;;  %v4432_v51 = vld [vmem:[#allocation13 + $0x1b0] sm:$0xff]  ;;  %v11622_v13 = vpack.c.bf16 %v4471_v24, %v4467_v46 }
 0x970   :  { %7883 = vmatpush1.bf16.msra.mxu0 %v11528_v47  ;;  %7947 = vmatpush1.bf16.msra.mxu1 %v11530_v6  ;;  %v11562_v48 = vpack.c.bf16 %v4432_v51, %v4428_v36  ;;  %12798 = vst [vmem:[#allocation34_spill] sm:$0xff] %v11600_v37  ;;  %v4456_v36 = vld [vmem:[#allocation13 + $0x270] sm:$0xff]  ;;  %v4459_v51 = vld [vmem:[#allocation13 + $0x288] sm:$0xff] }
 0x971   :  { %7885 = vmatprep.subr.bf16.mxu0 %v11534_v16  ;;  %7949 = vmatprep.subr.bf16.mxu1 %v11536_v61  ;;  %v11606_v50 = vpack.c.bf16 %v4456_v36, %v4452_v38  ;;  %12805 = vst [vmem:[#allocation41_spill] sm:$0xff] %v11622_v13  ;;  %v4472_v38 = vld [vmem:[#allocation13 + $0x2f0] sm:$0xff]  ;;  %v4475_v36 = vld [vmem:[#allocation13 + $0x308] sm:$0xff] }
 0x972   :  { %4175 = vmatmul.mubr.f32.gmra.mrb[58].mxu0 %v11312_v7  ;;  %4288 = vmatmul.mubr.f32.gmra.mrb[58].mxu1 %v11312_v7  ;;  %v11566_v7 = vpack.c.bf16 %v4439_v27, %v4435_v15  ;;  %v4463_v15 = vld [vmem:[#allocation13 + $0x2a8] sm:$0xff]  ;;  %v4461_v27 = vld [vmem:[#allocation13 + $0x298] sm:$0xff]  ;;  %v4476_v24 = vld [vmem:[#allocation13 + $0x310] sm:$0xff] }
 0x973   :  { %4180 = vmatprep.mubr.f32.mxu0 %v12793_v44  ;;  %4293 = vmatprep.mubr.f32.mxu1 %v12793_v44  ;;  %v4440_v44 = vld [vmem:[#allocation13 + $0x1f0] sm:$0xff]  ;;  %12800 = vst [vmem:[#allocation36_spill] sm:$0xff] %v11606_v50 }
 0x974   :  { %7887 = vmatpush1.bf16.msra.mxu0 %v11544_v56  ;;  %7951 = vmatpush1.bf16.msra.mxu1 %v11546_v8  ;;  %v11578_v2 = vpack.c.bf16 %v4440_v44, %v4436_v54  ;;  %v4462_v54 = vld [vmem:[#allocation13 + $0x2a0] sm:$0xff]  ;;  %v11610_v44 = vpack.c.bf16 %v4463_v15, %v4459_v51  ;;  %v4479_v51 = vld [vmem:[#allocation13 + $0x328] sm:$0xff]  ;;  %v4477_v15 = vld [vmem:[#allocation13 + $0x318] sm:$0xff] }
 0x975   :  { %7889 = vmatprep.subr.bf16.mxu0 %v11550_v43  ;;  %7953 = vmatprep.subr.bf16.mxu1 %v11552_v26 }
 0x976   :  { %4181 = vmatmul.mubr.f32.gmra.mrb[60].mxu0 %v11402_v42  ;;  %4294 = vmatmul.mubr.f32.gmra.mrb[60].mxu1 %v11402_v42  ;;  %v11582_v42 = vpack.c.bf16 %v4447_v34, %v4443_v49  ;;  %12801 = vst [vmem:[#allocation37_spill] sm:$0xff] %v11610_v44  ;;  %v11612_v49 = vpack.c.bf16 %v4465_v12, %v4461_v27  ;;  %v4460_v34 = vld [vmem:[#allocation13 + $0x290] sm:$0xff]  ;;  %v4481_v27 = vld [vmem:[#allocation13 + $0x338] sm:$0xff] }
 0x977   :  { %4186 = vmatprep.mubr.f32.mxu0 %v12794_v55  ;;  %4299 = vmatprep.mubr.f32.mxu1 %v12794_v55  ;;  %v4448_v55 = vld [vmem:[#allocation13 + $0x230] sm:$0xff]  ;;  %v11636_v46 = vpack.c.bf16 %v4481_v27, %v4477_v15 }
 0x978   :  { %7891 = vmatpush1.bf16.msra.mxu0 %v11560_v52  ;;  %7955 = vmatpush1.bf16.msra.mxu1 %v11562_v48  ;;  %v11594_v59 = vpack.c.bf16 %v4448_v55, %v4444_v62  ;;  %12802 = vst [vmem:[#allocation38_spill] sm:$0xff] %v11612_v49  ;;  %v4473_v62 = vld [vmem:[#allocation13 + $0x2f8] sm:$0xff]  ;;  %v11616_v55 = vpack.c.bf16 %v4462_v54, %v4458_v33  ;;  %v4474_v54 = vld [vmem:[#allocation13 + $0x300] sm:$0xff]  ;;  %v4484_v15 = vld [vmem:[#allocation13 + $0x350] sm:$0xff] }
 0x979   :  { %7893 = vmatprep.subr.bf16.mxu0 %v11566_v7  ;;  %7957 = vmatprep.subr.bf16.mxu1 %v11568_v57  ;;  %v11624_v60 = vpack.c.bf16 %v4473_v62, %v4469_v9  ;;  %v11630_v33 = vpack.c.bf16 %v4472_v38, %v4468_v29  ;;  %12810 = vst [vmem:[#allocation46_spill] sm:$0xff] %v11636_v46  ;;  %v4480_v9 = vld [vmem:[#allocation13 + $0x330] sm:$0xff]  ;;  %v4483_v62 = vld [vmem:[#allocation13 + $0x348] sm:$0xff]  ;;  %v4482_v29 = vld [vmem:[#allocation13 + $0x340] sm:$0xff] }
 0x97a   :  { %4187 = vmatmul.mubr.f32.gmra.mrb[62].mxu0 %v11422_v32  ;;  %4300 = vmatmul.mubr.f32.gmra.mrb[62].mxu1 %v11422_v32  ;;  %v11598_v32 = vpack.c.bf16 %v4455_v4, %v4451_v63  ;;  %12803 = vst [vmem:[#allocation39_spill] sm:$0xff] %v11616_v55  ;;  %v11618_v63 = vpack.c.bf16 %v4464_v28, %v4460_v34  ;;  %v4466_v4 = vld [vmem:[#allocation13 + $0x2c0] sm:$0xff]  ;;  %v4488_v27 = vld [vmem:[#allocation13 + $0x370] sm:$0xff] }
 0x97b   :  { %4570 = vmatprep.mubr.f32.mxu0 %v12605_v25  ;;  %4647 = vmatprep.mubr.f32.mxu1 %v12605_v25  ;;  %12806 = vst [vmem:[#allocation42_spill] sm:$0xff] %v11624_v60  ;;  %v11628_v12 = vpack.c.bf16 %v4470_v53, %v4466_v4  ;;  %12808 = vst [vmem:[#allocation44_spill] sm:$0xff] %v11630_v33  ;;  %v4478_v34 = vld [vmem:[#allocation13 + $0x320] sm:$0xff]  ;;  %v11634_v28 = vpack.c.bf16 %v4479_v51, %v4475_v36 }
 0x97c   :  { %7895 = vmatpush1.bf16.msra.mxu0 %v11576_v19  ;;  %7959 = vmatpush1.bf16.msra.mxu1 %v11578_v2  ;;  %12797 = vst [vmem:[#allocation33_spill] sm:$0xff] %v11598_v32  ;;  %12804 = vst [vmem:[#allocation40_spill] sm:$0xff] %v11618_v63  ;;  %v11640_v4 = vpack.c.bf16 %v4478_v34, %v4474_v54  ;;  %v11642_v53 = vpack.c.bf16 %v4480_v9, %v4476_v24  ;;  %v4486_v38 = vld [vmem:[#allocation13 + $0x360] sm:$0xff] }
 0x97d   :  { %7897 = vmatprep.subr.bf16.mxu0 %v11582_v42  ;;  %7961 = vmatprep.subr.bf16.mxu1 %v11584_v17  ;;  %12807 = vst [vmem:[#allocation43_spill] sm:$0xff] %v11628_v12  ;;  %12809 = vst [vmem:[#allocation45_spill] sm:$0xff] %v11634_v28  ;;  %v11652_v54 = vpack.c.bf16 %v4486_v38, %v4482_v29  ;;  %v11654_v34 = vpack.c.bf16 %v4488_v27, %v4484_v15  ;;  %v4490_v24 = vld [vmem:[#allocation13 + $0x380] sm:$0xff]  ;;  %v4504_v27 = vld [vmem:[#allocation13 + $0x3f0] sm:$0xff] }
 0x97e   :  { %12811 = vst [vmem:[#allocation47_spill] sm:$0xff] %v11640_v4  ;;  %12812 = vst [vmem:[#allocation48_spill] sm:$0xff] %v11642_v53  ;;  %v4494_v9 = vld [vmem:[#allocation13 + $0x3a0] sm:$0xff] }
 0x97f   :  { %12815 = vst [vmem:[#allocation51_spill] sm:$0xff] %v11652_v54  ;;  %12816 = vst [vmem:[#allocation24_spill] sm:$0xff] %v11654_v34  ;;  %v11664_v29 = vpack.c.bf16 %v4494_v9, %v4490_v24  ;;  %v4498_v15 = vld [vmem:[#allocation13 + $0x3c0] sm:$0xff] }
 0x980   :  { %7899 = vmatpush1.bf16.msra.mxu0 %v11592_v14  ;;  %7963 = vmatpush1.bf16.msra.mxu1 %v11594_v59 }
 0x981   :  { %7901 = vmatprep.subr.bf16.mxu0 %v11598_v32  ;;  %7965 = vmatprep.subr.bf16.mxu1 %v11600_v37  ;;  %12819 = vst [vmem:[#allocation58_spill] sm:$0xff] %v11664_v29 }
 0x984   :  { %7903 = vmatpush1.bf16.msra.mxu0 %v11604_v22  ;;  %7967 = vmatpush1.bf16.msra.mxu1 %v11606_v50 }
 0x985   :  { %7905 = vmatprep.subr.bf16.mxu0 %v11610_v44  ;;  %7969 = vmatprep.subr.bf16.mxu1 %v11612_v49  ;;  %v4485_v49 = vld [vmem:[#allocation13 + $0x358] sm:$0xff] }
 0x988   :  { %7907 = vmatpush1.bf16.msra.mxu0 %v11616_v55  ;;  %7971 = vmatpush1.bf16.msra.mxu1 %v11618_v63  ;;  %v4487_v55 = vld [vmem:[#allocation13 + $0x368] sm:$0xff]  ;;  %v4489_v63 = vld [vmem:[#allocation13 + $0x378] sm:$0xff] }
 0x989   :  { %7909 = vmatprep.subr.bf16.mxu0 %v11622_v13  ;;  %7973 = vmatprep.subr.bf16.mxu1 %v11624_v60  ;;  %v11646_v36 = vpack.c.bf16 %v4487_v55, %v4483_v62  ;;  %v11648_v51 = vpack.c.bf16 %v4489_v63, %v4485_v49  ;;  %v4491_v60 = vld [vmem:[#allocation13 + $0x388] sm:$0xff]  ;;  %v4493_v13 = vld [vmem:[#allocation13 + $0x398] sm:$0xff]  ;;  %v4492_v63 = vld [vmem:[#allocation13 + $0x390] sm:$0xff] }
 0x98a   :  { %v4496_v62 = vld [vmem:[#allocation13 + $0x3b0] sm:$0xff] }
 0x98b   :  { %12813 = vst [vmem:[#allocation49_spill] sm:$0xff] %v11646_v36  ;;  %12814 = vst [vmem:[#allocation50_spill] sm:$0xff] %v11648_v51  ;;  %v11666_v38 = vpack.c.bf16 %v4496_v62, %v4492_v63  ;;  %v12829_v63 = vld [vmem:[#allocation42_spill] sm:$0xff]  ;;  %v12830_v62 = vld [vmem:[#allocation43_spill] sm:$0xff] }
 0x98c   :  { %7911 = vmatpush1.bf16.msra.mxu0 %v11628_v12  ;;  %7975 = vmatpush1.bf16.msra.mxu1 %v11630_v33  ;;  %v4495_v12 = vld [vmem:[#allocation13 + $0x3a8] sm:$0xff]  ;;  %v4497_v33 = vld [vmem:[#allocation13 + $0x3b8] sm:$0xff] }
 0x98d   :  { %7913 = vmatprep.subr.bf16.mxu0 %v11634_v28  ;;  %7977 = vmatprep.subr.bf16.mxu1 %v11636_v46  ;;  %v11658_v49 = vpack.c.bf16 %v4495_v12, %v4491_v60  ;;  %v11660_v55 = vpack.c.bf16 %v4497_v33, %v4493_v13  ;;  %v4499_v46 = vld [vmem:[#allocation13 + $0x3c8] sm:$0xff]  ;;  %v4501_v28 = vld [vmem:[#allocation13 + $0x3d8] sm:$0xff]  ;;  %12820 = vst [vmem:[#allocation59_spill] sm:$0xff] %v11666_v38  ;;  %v4502_v12 = vld [vmem:[#allocation13 + $0x3e0] sm:$0xff] }
 0x98e   :  { %v4500_v33 = vld [vmem:[#allocation13 + $0x3d0] sm:$0xff]  ;;  %v11676_v24 = vpack.c.bf16 %v4502_v12, %v4498_v15  ;;  %v12831_v15 = vld [vmem:[#allocation44_spill] sm:$0xff]  ;;  %v12832_v12 = vld [vmem:[#allocation45_spill] sm:$0xff] }
 0x98f   :  { %12817 = vst [vmem:[#allocation54_spill] sm:$0xff] %v11658_v49  ;;  %12818 = vst [vmem:[#allocation57_spill] sm:$0xff] %v11660_v55  ;;  %v11678_v9 = vpack.c.bf16 %v4504_v27, %v4500_v33  ;;  %v12833_v33 = vld [vmem:[#allocation46_spill] sm:$0xff]  ;;  %v12834_v27 = vld [vmem:[#allocation47_spill] sm:$0xff] }
 0x990   :  { %7915 = vmatpush1.bf16.msra.mxu0 %v11640_v4  ;;  %7979 = vmatpush1.bf16.msra.mxu1 %v11642_v53  ;;  %v4503_v4 = vld [vmem:[#allocation13 + $0x3e8] sm:$0xff]  ;;  %v4505_v53 = vld [vmem:[#allocation13 + $0x3f8] sm:$0xff]  ;;  %12823 = vst [vmem:[#allocation52_spill] sm:$0xff] %v11676_v24 }
 0x991   :  { %7917 = vmatprep.subr.bf16.mxu0 %v11646_v36  ;;  %7981 = vmatprep.subr.bf16.mxu1 %v11648_v51  ;;  %v11670_v13 = vpack.c.bf16 %v4503_v4, %v4499_v46  ;;  %v11672_v60 = vpack.c.bf16 %v4505_v53, %v4501_v28  ;;  %12824 = vst [vmem:[#allocation27_spill] sm:$0xff] %v11678_v9  ;;  %v12825_v28 = vld [vmem:[#allocation38_spill] sm:$0xff]  ;;  %v12826_v46 = vld [vmem:[#allocation39_spill] sm:$0xff]  ;;  %v12827_v4 = vld [vmem:[#allocation40_spill] sm:$0xff] }
 0x992   :  { %v12828_v53 = vld [vmem:[#allocation41_spill] sm:$0xff] }
 0x993   :  { %12821 = vst [vmem:[#allocation23_spill] sm:$0xff] %v11670_v13  ;;  %12822 = vst [vmem:[#allocation25_spill] sm:$0xff] %v11672_v60 }
 0x994   :  { %7919 = vmatpush1.bf16.msra.mxu0 %v11652_v54  ;;  %7983 = vmatpush1.bf16.msra.mxu1 %v11654_v34 }
 0x995   :  { %7921 = vmatprep.subr.bf16.mxu0 %v11658_v49  ;;  %7985 = vmatprep.subr.bf16.mxu1 %v11660_v55 }
 0x998   :  { %7923 = vmatpush1.bf16.msra.mxu0 %v11664_v29  ;;  %7987 = vmatpush1.bf16.msra.mxu1 %v11666_v38 }
 0x999   :  { %7925 = vmatprep.subr.bf16.mxu0 %v11670_v13  ;;  %7989 = vmatprep.subr.bf16.mxu1 %v11672_v60 }
 0x99c   :  { %7927 = vmatpush1.bf16.msra.mxu0 %v11676_v24  ;;  %7991 = vmatpush1.bf16.msra.mxu1 %v11678_v9 }
 0x99d   :  { %7993 = vmatprep.subr.bf16.mxu0 %v11460_v40  ;;  %8057 = vmatprep.subr.bf16.mxu1 %v11462_v11 }
 0x99f   :  { %4571 = vmatmul.mubr.f32.vlgmr.msra.gmra.mrb[32].mxu0 %v12605_v25  ;;  %4648 = vmatmul.mubr.f32.vlgmr.msra.gmra.mrb[32].mxu1 %v12605_v25 }
 0x9a0   :  { %4576 = vmatprep.mubr.f32.mxu0 %v12605_v25  ;;  %4653 = vmatprep.mubr.f32.mxu1 %v12605_v25 }
 0x9a1   :  { %7995 = vmatpush1.bf16.msra.mxu0 %v11466_v23  ;;  %8059 = vmatpush1.bf16.msra.mxu1 %v11468_v31 }
 0x9a2   :  { %7997 = vmatprep.subr.bf16.mxu0 %v11470_v58  ;;  %8061 = vmatprep.subr.bf16.mxu1 %v11472_v3 }
 0x9a3   :  { %4577 = vmatmul.mubr.f32.gmra.mrb[62].mxu0 %v12605_v25  ;;  %4654 = vmatmul.mubr.f32.gmra.mrb[62].mxu1 %v12605_v25 }
 0x9a4   :  { %4782 = vmatprep.mubr.f32.mxu0 %v12605_v25  ;;  %4859 = vmatprep.mubr.f32.mxu1 %v12605_v25 }
 0x9a5   :  { %7999 = vmatpush1.bf16.msra.mxu0 %v11480_v20  ;;  %8063 = vmatpush1.bf16.msra.mxu1 %v11482_v5 }
 0x9a6   :  { %8001 = vmatprep.subr.bf16.mxu0 %v11486_v1  ;;  %8065 = vmatprep.subr.bf16.mxu1 %v11488_v39 }
 0x9a9   :  { %8003 = vmatpush1.bf16.msra.mxu0 %v11496_v35  ;;  %8067 = vmatpush1.bf16.msra.mxu1 %v11498_v21 }
 0x9aa   :  { %8005 = vmatprep.subr.bf16.mxu0 %v11502_v10  ;;  %8069 = vmatprep.subr.bf16.mxu1 %v11504_v18 }
 0x9ad   :  { %8007 = vmatpush1.bf16.msra.mxu0 %v11512_v45  ;;  %8071 = vmatpush1.bf16.msra.mxu1 %v11514_v0 }
 0x9ae   :  { %8009 = vmatprep.subr.bf16.mxu0 %v11518_v30  ;;  %8073 = vmatprep.subr.bf16.mxu1 %v11520_v41 }
 0x9b1   :  { %8011 = vmatpush1.bf16.msra.mxu0 %v11528_v47  ;;  %8075 = vmatpush1.bf16.msra.mxu1 %v11530_v6 }
 0x9b2   :  { %8013 = vmatprep.subr.bf16.mxu0 %v11534_v16  ;;  %8077 = vmatprep.subr.bf16.mxu1 %v11536_v61 }
 0x9b5   :  { %8015 = vmatpush1.bf16.msra.mxu0 %v11544_v56  ;;  %8079 = vmatpush1.bf16.msra.mxu1 %v11546_v8 }
 0x9b6   :  { %8017 = vmatprep.subr.bf16.mxu0 %v11550_v43  ;;  %8081 = vmatprep.subr.bf16.mxu1 %v11552_v26 }
 0x9b9   :  { %8019 = vmatpush1.bf16.msra.mxu0 %v11560_v52  ;;  %8083 = vmatpush1.bf16.msra.mxu1 %v11562_v48 }
 0x9ba   :  { %8021 = vmatprep.subr.bf16.mxu0 %v11566_v7  ;;  %8085 = vmatprep.subr.bf16.mxu1 %v11568_v57 }
 0x9bd   :  { %8023 = vmatpush1.bf16.msra.mxu0 %v11576_v19  ;;  %8087 = vmatpush1.bf16.msra.mxu1 %v11578_v2 }
 0x9be   :  { %8025 = vmatprep.subr.bf16.mxu0 %v11582_v42  ;;  %8089 = vmatprep.subr.bf16.mxu1 %v11584_v17 }
 0x9c1   :  { %8027 = vmatpush1.bf16.msra.mxu0 %v11592_v14  ;;  %8091 = vmatpush1.bf16.msra.mxu1 %v11594_v59 }
 0x9c2   :  { %8029 = vmatprep.subr.bf16.mxu0 %v11598_v32  ;;  %8093 = vmatprep.subr.bf16.mxu1 %v11600_v37 }
 0x9c5   :  { %8031 = vmatpush1.bf16.msra.mxu0 %v11604_v22  ;;  %8095 = vmatpush1.bf16.msra.mxu1 %v11606_v50 }
 0x9c6   :  { %8033 = vmatprep.subr.bf16.mxu0 %v11610_v44  ;;  %8097 = vmatprep.subr.bf16.mxu1 %v12825_v28  ;;  %v12835_v44 = vld [vmem:[#allocation48_spill] sm:$0xff] }
 0x9c9   :  { %8035 = vmatpush1.bf16.msra.mxu0 %v12826_v46  ;;  %8099 = vmatpush1.bf16.msra.mxu1 %v12827_v4 }
 0x9ca   :  { %8037 = vmatprep.subr.bf16.mxu0 %v12828_v53  ;;  %8101 = vmatprep.subr.bf16.mxu1 %v12829_v63 }
 0x9cd   :  { %8039 = vmatpush1.bf16.msra.mxu0 %v12830_v62  ;;  %8103 = vmatpush1.bf16.msra.mxu1 %v12831_v15 }
 0x9ce   :  { %8041 = vmatprep.subr.bf16.mxu0 %v12832_v12  ;;  %8105 = vmatprep.subr.bf16.mxu1 %v12833_v33 }
 0x9d1   :  { %8043 = vmatpush1.bf16.msra.mxu0 %v12834_v27  ;;  %8107 = vmatpush1.bf16.msra.mxu1 %v12835_v44 }
 0x9d2   :  { %8045 = vmatprep.subr.bf16.mxu0 %v11646_v36  ;;  %8109 = vmatprep.subr.bf16.mxu1 %v11648_v51 }
 0x9d5   :  { %8047 = vmatpush1.bf16.msra.mxu0 %v11652_v54  ;;  %8111 = vmatpush1.bf16.msra.mxu1 %v11654_v34 }
 0x9d6   :  { %8049 = vmatprep.subr.bf16.mxu0 %v11658_v49  ;;  %8113 = vmatprep.subr.bf16.mxu1 %v11660_v55  ;;  %v3812_v55 = vld [vmem:[%s12391_s5] sm:$0xff]  ;;  %v12836_v49 = vld [vmem:[#allocation22_spill] sm:$0xff] }
 0x9d7   :  { %v12843_v44 = vsub.s32 5, %v12836_v49 }
 0x9d9   :  { %8051 = vmatpush1.bf16.msra.mxu0 %v11664_v29  ;;  %8115 = vmatpush1.bf16.msra.mxu1 %v11666_v38  ;;  %v12837_v29 = vsub.s32 0, %v12836_v49 }
 0x9da   :  { %8053 = vmatprep.subr.bf16.mxu0 %v11670_v13  ;;  %8117 = vmatprep.subr.bf16.mxu1 %v11672_v60  ;;  %v12839_v13 = vsub.s32 1, %v12836_v49 }
 0x9db   :  { %v11763_v34 = vrot.slane %v3812_v55, %v12837_v29  ;;  %v11777_v29 = vrot.slane %v3812_v55, %v12843_v44 }
 0x9dc   :  { %v11767_v38 = vrot.slane %v3812_v55, %v12839_v13  ;;  %v12845_v13 = vsub.s32 3, %v12836_v49 }
 0x9dd   :  { %8055 = vmatpush1.bf16.msra.mxu0 %v11676_v24  ;;  %8119 = vmatpush1.bf16.msra.mxu1 %v11678_v9  ;;  %12838 = vst [vmem:[#allocation30_spill] sm:$0xff] %v11763_v34  ;;  %12844 = vst [vmem:[#allocation29_spill] sm:$0xff] %v11777_v29 }
 0x9de   :  { %8121 = vmatprep.subr.bf16.mxu0 %v11460_v40  ;;  %8185 = vmatprep.subr.bf16.mxu1 %v11462_v11  ;;  %12840 = vst [vmem:[#allocation55_spill] sm:$0xff] %v11767_v38  ;;  %v12841_v11 = vsub.s32 4, %v12836_v49  ;;  %v11781_v12 = vrot.slane %v3812_v55, %v12845_v13  ;;  %v12848_v13 = vsub.s32 2, %v12836_v49 }
 0x9e0   :  { %v11772_v51 = vrot.slane %v3812_v55, %v12841_v11  ;;  %12846 = vst [vmem:[#allocation28_spill] sm:$0xff] %v11781_v12  ;;  %v11792_v53 = vrot.slane %v3812_v55, %v12848_v13 }
 0x9e2   :  { %12842 = vst [vmem:[#allocation56_spill] sm:$0xff] %v11772_v51 }
 0xa72   :  { %v4572_v60 = vpop.f32.mrb[32].mxu0  ;;  %v4649_v24 = vpop.f32.mrb[32].mxu1 }
 0xa73   :  { %v8984_v9 = vadd.f32 %v4572_v60, %v11763_v34  ;;  %v4574_v54 = vpop.f32.mrb[33].mxu0  ;;  %v4651_v40 = vpop.f32.mrb[33].mxu1 }
 0xa74   :  { %v8985_v36 = vadd.f32 %v4574_v54, %v11767_v38  ;;  %v9001_v44 = vadd.f32 %v4651_v40, %v11781_v12 }
 0xa75   :  { %v6372_v27 = vmul.f32 -1.442695, %v8984_v9 }
 0xa76   :  { %v6374_v33 = vmul.f32 -1.442695, %v8985_v36  ;;  %v4578_v15 = vpop.f32.mrb[62].mxu0  ;;  %v4655_v60 = vpop.f32.mrb[62].mxu1  ;;  %v12847_v36 = vsub.s32 7, %v12836_v49 }
 0xa77   :  { %9447 = vpow2.f32 %v6372_v27  ;;  %v9030_v34 = vadd.f32 %v4578_v15, %v11772_v51  ;;  %v4580_v62 = vpop.f32.mrb[63].mxu0  ;;  %v4657_v11 = vpop.f32.mrb[63].mxu1  ;;  %v6376_v15 = vmul.f32 -1.442695, %v9001_v44 }
 0xa78   :  { %9449 = vpow2.f32 %v6374_v33  ;;  %v9031_v54 = vadd.f32 %v4580_v62, %v11777_v29  ;;  %v11788_v9 = vrot.slane %v3812_v55, %v12847_v36  ;;  %v9000_v33 = vadd.f32 %v4649_v24, %v11792_v53 }
 0xa79   :  { %v6373_v38 = vmul.f32 -1.442695, %v9030_v34  ;;  %v12849_v34 = vsub.s32 6, %v12836_v49 }
 0xa7a   :  { %v6375_v63 = vmul.f32 -1.442695, %v9031_v54  ;;  %v9047_v27 = vadd.f32 %v4657_v11, %v11788_v9 }
 0xa7b   :  { %9451 = vpow2.f32 %v6373_v38  ;;  %v11798_v62 = vrot.slane %v3812_v55, %v12849_v34 }
 0xa7c   :  { %9453 = vpow2.f32 %v6375_v63  ;;  %v6377_v36 = vmul.f32 -1.442695, %v9047_v27 }
 0xa7d   :  { %9455 = vpow2.f32 %v6376_v15  ;;  %v9046_v13 = vadd.f32 %v4655_v60, %v11798_v62 }
 0xa7e   :  { %9457 = vtanh.f32 %v9000_v33 }
 0xa81   :  { %v9448_v40 = vpop.eup %9447 }
 0xa82   :  { %v9450_v54 = vpop.eup %9449  ;;  %v4666_v12 = vadd.f32 1.0, %v9448_v40 }
 0xa83   :  { %v4678_v29 = vadd.f32 1.0, %v9450_v54 }
 0xa84   :  { %9459 = vrcp.f32 %v4666_v12 }
 0xa85   :  { %v9452_v38 = vpop.eup %9451  ;;  %9461 = vrcp.f32 %v4678_v29 }
 0xa86   :  { %v9454_v63 = vpop.eup %9453  ;;  %v4667_v11 = vadd.f32 1.0, %v9452_v38  ;;  %9463 = vpow2.f32 %v6377_v36 }
 0xa87   :  { %9465 = vtanh.f32 %v9046_v13  ;;  %v4679_v24 = vadd.f32 1.0, %v9454_v63  ;;  %v9456_v49 = vpop.eup %9455 }
 0xa88   :  { %9467 = vrcp.f32 %v4667_v11  ;;  %v9458_v55 = vpop.eup %9457  ;;  %v4692_v27 = vadd.f32 1.0, %v9456_v49 }
 0xa89   :  { %9469 = vrcp.f32 %v4679_v24 }
 0xa8a   :  { %9471 = vrcp.f32 %v4692_v27  ;;  %v12853_v27 = vld [vmem:[#allocation41_spill] sm:$0xff] }
 0xa8e   :  { %v9460_v44 = vpop.eup %9459 }
 0xa8f   :  { %v9462_v34 = vpop.eup %9461  ;;  %v4700_v15 = vmul.f32 %v9460_v44, %v9458_v55 }
 0xa90   :  { %v9464_v33 = vpop.eup %9463  ;;  %v4698_v40 = vmul.f32 0.0, %v9462_v34 }
 0xa91   :  { %v9466_v54 = vpop.eup %9465  ;;  %v4693_v36 = vadd.f32 1.0, %v9464_v33  ;;  %v12854_v33 = vld [vmem:[#allocation42_spill] sm:$0xff] }
 0xa92   :  { %v9468_v60 = vpop.eup %9467  ;;  %v11801_v12 = vadd.f32 %v4700_v15, %v4698_v40  ;;  %v12852_v15 = vld [vmem:[#allocation37_spill] sm:$0xff]  ;;  %v12855_v40 = vld [vmem:[#allocation43_spill] sm:$0xff] }
 0xa93   :  { %v9470_v29 = vpop.eup %9469  ;;  %v4701_v38 = vmul.f32 %v9468_v60, %v9466_v54  ;;  %v12856_v54 = vld [vmem:[#allocation44_spill] sm:$0xff]  ;;  %v12857_v60 = vld [vmem:[#allocation45_spill] sm:$0xff] }
 0xa94   :  { %9473 = vtanh.f32 %v11801_v12  ;;  %v4699_v13 = vmul.f32 0.0, %v9470_v29  ;;  %v9472_v11 = vpop.eup %9471  ;;  %v12858_v29 = vld [vmem:[#allocation46_spill] sm:$0xff] }
 0xa95   :  { %9475 = vrcp.f32 %v4693_v36  ;;  %v12860_v36 = vld [vmem:[#allocation48_spill] sm:$0xff] }
 0xa96   :  { %v11804_v63 = vadd.f32 %v4701_v38, %v4699_v13  ;;  %v12859_v38 = vld [vmem:[#allocation47_spill] sm:$0xff]  ;;  %v12861_v13 = vld [vmem:[#allocation49_spill] sm:$0xff] }
 0xa98   :  { %9477 = vtanh.f32 %v11804_v63 }
 0xa9e   :  { %v9474_v24 = vpop.eup %9473 }
 0xa9f   :  { %v11807_v49 = vmul.f32 %v9474_v24, %v9472_v11  ;;  %v9476_v55 = vpop.eup %9475  ;;  %v12862_v11 = vld [vmem:[#allocation50_spill] sm:$0xff]  ;;  %v12863_v24 = vld [vmem:[#allocation51_spill] sm:$0xff] }
 0xaa1   :  { %12850 = vst [vmem:[#allocation53_spill] sm:$0xff] %v11807_v49  ;;  %4783 = vmatmul.mubr.f32.vlgmr.msra.gmra.mrb[34].mxu0 %v11807_v49  ;;  %4860 = vmatmul.mubr.f32.vlgmr.msra.gmra.mrb[34].mxu1 %v11807_v49  ;;  %v12867_v49 = vld [vmem:[#allocation58_spill] sm:$0xff] }
 0xaa2   :  { %v9478_v44 = vpop.eup %9477  ;;  %8123 = vmatpush1.bf16.msra.mxu0 %v11466_v23  ;;  %8187 = vmatpush1.bf16.msra.mxu1 %v11468_v31 }
 0xaa3   :  { %v11813_v34 = vmul.f32 %v9478_v44, %v9476_v55  ;;  %8125 = vmatprep.subr.bf16.mxu0 %v11470_v58  ;;  %8189 = vmatprep.subr.bf16.mxu1 %v11472_v3  ;;  %v12864_v55 = vld [vmem:[#allocation24_spill] sm:$0xff]  ;;  %v12865_v44 = vld [vmem:[#allocation54_spill] sm:$0xff] }
 0xaa5   :  { %12851 = vst [vmem:[#allocation26_spill] sm:$0xff] %v11813_v34  ;;  %4788 = vmatprep.mubr.f32.mxu0 %v11813_v34  ;;  %4865 = vmatprep.mubr.f32.mxu1 %v11813_v34  ;;  %v12866_v34 = vld [vmem:[#allocation57_spill] sm:$0xff] }
 0xaa6   :  { %4789 = vmatmul.mubr.f32.gmra.mrb[60].mxu0 %v12605_v25  ;;  %4866 = vmatmul.mubr.f32.gmra.mrb[60].mxu1 %v12605_v25 }
 0xaa7   :  { %8127 = vmatpush1.bf16.msra.mxu0 %v11480_v20  ;;  %8191 = vmatpush1.bf16.msra.mxu1 %v11482_v5 }
 0xaa8   :  { %8129 = vmatprep.subr.bf16.mxu0 %v11486_v1  ;;  %8193 = vmatprep.subr.bf16.mxu1 %v11488_v39 }
 0xaa9   :  { %4994 = vmatprep.mubr.f32.mxu0 %v12605_v25  ;;  %5071 = vmatprep.mubr.f32.mxu1 %v12605_v25 }
 0xaab   :  { %8131 = vmatpush1.bf16.msra.mxu0 %v11496_v35  ;;  %8195 = vmatpush1.bf16.msra.mxu1 %v11498_v21 }
 0xaac   :  { %8133 = vmatprep.subr.bf16.mxu0 %v11502_v10  ;;  %8197 = vmatprep.subr.bf16.mxu1 %v11504_v18 }
 0xaaf   :  { %8135 = vmatpush1.bf16.msra.mxu0 %v11512_v45  ;;  %8199 = vmatpush1.bf16.msra.mxu1 %v11514_v0 }
 0xab0   :  { %8137 = vmatprep.subr.bf16.mxu0 %v11518_v30  ;;  %8201 = vmatprep.subr.bf16.mxu1 %v11520_v41 }
 0xab3   :  { %8139 = vmatpush1.bf16.msra.mxu0 %v11528_v47  ;;  %8203 = vmatpush1.bf16.msra.mxu1 %v11530_v6 }
 0xab4   :  { %8141 = vmatprep.subr.bf16.mxu0 %v11534_v16  ;;  %8205 = vmatprep.subr.bf16.mxu1 %v11536_v61 }
 0xab7   :  { %8143 = vmatpush1.bf16.msra.mxu0 %v11544_v56  ;;  %8207 = vmatpush1.bf16.msra.mxu1 %v11546_v8 }
 0xab8   :  { %8145 = vmatprep.subr.bf16.mxu0 %v11550_v43  ;;  %8209 = vmatprep.subr.bf16.mxu1 %v11552_v26 }
 0xabb   :  { %8147 = vmatpush1.bf16.msra.mxu0 %v11560_v52  ;;  %8211 = vmatpush1.bf16.msra.mxu1 %v11562_v48 }
 0xabc   :  { %8149 = vmatprep.subr.bf16.mxu0 %v11566_v7  ;;  %8213 = vmatprep.subr.bf16.mxu1 %v11568_v57 }
 0xabf   :  { %8151 = vmatpush1.bf16.msra.mxu0 %v11576_v19  ;;  %8215 = vmatpush1.bf16.msra.mxu1 %v11578_v2 }
 0xac0   :  { %8153 = vmatprep.subr.bf16.mxu0 %v11582_v42  ;;  %8217 = vmatprep.subr.bf16.mxu1 %v11584_v17 }
 0xac3   :  { %8155 = vmatpush1.bf16.msra.mxu0 %v11592_v14  ;;  %8219 = vmatpush1.bf16.msra.mxu1 %v11594_v59 }
 0xac4   :  { %8157 = vmatprep.subr.bf16.mxu0 %v11598_v32  ;;  %8221 = vmatprep.subr.bf16.mxu1 %v11600_v37 }
 0xac7   :  { %8159 = vmatpush1.bf16.msra.mxu0 %v11604_v22  ;;  %8223 = vmatpush1.bf16.msra.mxu1 %v11606_v50 }
 0xac8   :  { %8161 = vmatprep.subr.bf16.mxu0 %v12852_v15  ;;  %8225 = vmatprep.subr.bf16.mxu1 %v12825_v28  ;;  %v12878_v28 = vld [vmem:[#allocation28_spill] sm:$0xff] }
 0xacb   :  { %8163 = vmatpush1.bf16.msra.mxu0 %v12826_v46  ;;  %8227 = vmatpush1.bf16.msra.mxu1 %v12827_v4  ;;  %v12877_v46 = vld [vmem:[#allocation29_spill] sm:$0xff] }
 0xacc   :  { %8165 = vmatprep.subr.bf16.mxu0 %v12853_v27  ;;  %8229 = vmatprep.subr.bf16.mxu1 %v12854_v33  ;;  %v12876_v33 = vld [vmem:[#allocation55_spill] sm:$0xff] }
 0xacf   :  { %8167 = vmatpush1.bf16.msra.mxu0 %v12855_v40  ;;  %8231 = vmatpush1.bf16.msra.mxu1 %v12856_v54  ;;  %v12875_v54 = vld [vmem:[#allocation30_spill] sm:$0xff] }
 0xad0   :  { %8169 = vmatprep.subr.bf16.mxu0 %v12857_v60  ;;  %8233 = vmatprep.subr.bf16.mxu1 %v12858_v29  ;;  %v12868_v60 = vld [vmem:[#allocation59_spill] sm:$0xff] }
 0xad1   :  { %v12869_v29 = vld [vmem:[#allocation23_spill] sm:$0xff] }
 0xad3   :  { %8171 = vmatpush1.bf16.msra.mxu0 %v12859_v38  ;;  %8235 = vmatpush1.bf16.msra.mxu1 %v12860_v36  ;;  %v12870_v38 = vld [vmem:[#allocation25_spill] sm:$0xff]  ;;  %v12871_v36 = vld [vmem:[#allocation52_spill] sm:$0xff] }
 0xad4   :  { %8173 = vmatprep.subr.bf16.mxu0 %v12861_v13  ;;  %8237 = vmatprep.subr.bf16.mxu1 %v12862_v11  ;;  %v12872_v13 = vld [vmem:[#allocation27_spill] sm:$0xff] }
 0xad5   :  { %v12873_v11 = vld [vmem:[#allocation31_spill] sm:$0xff] }
 0xad7   :  { %8175 = vmatpush1.bf16.msra.mxu0 %v12863_v24  ;;  %8239 = vmatpush1.bf16.msra.mxu1 %v12864_v55  ;;  %v12874_v24 = vld [vmem:[#allocation32_spill] sm:$0xff] }
 0xad8   :  { %8177 = vmatprep.subr.bf16.mxu0 %v12865_v44  ;;  %8241 = vmatprep.subr.bf16.mxu1 %v12866_v34 }
 0xadb   :  { %8179 = vmatpush1.bf16.msra.mxu0 %v12867_v49  ;;  %8243 = vmatpush1.bf16.msra.mxu1 %v12868_v60 }
 0xadc   :  { %8181 = vmatprep.subr.bf16.mxu0 %v12869_v29  ;;  %8245 = vmatprep.subr.bf16.mxu1 %v12870_v38 }
 0xadf   :  { %8183 = vmatpush1.bf16.msra.mxu0 %v12871_v36  ;;  %8247 = vmatpush1.bf16.msra.mxu1 %v12872_v13 }
 0xae0   :  { %8249 = vmatprep.subr.bf16.mxu0 %v12873_v11  ;;  %8313 = vmatprep.subr.bf16.mxu1 %v12874_v24 }
 0xb74   :  { %v4784_v55 = vpop.f32.mrb[34].mxu0  ;;  %v4861_v44 = vpop.f32.mrb[34].mxu1 }
 0xb75   :  { %v8986_v34 = vadd.f32 %v4784_v55, %v12875_v54  ;;  %v4786_v40 = vpop.f32.mrb[35].mxu0  ;;  %v4863_v49 = vpop.f32.mrb[35].mxu1 }
 0xb76   :  { %v8987_v60 = vadd.f32 %v4786_v40, %v12876_v33  ;;  %v9003_v15 = vadd.f32 %v4863_v49, %v12878_v28 }
 0xb77   :  { %v6378_v27 = vmul.f32 -1.442695, %v8986_v34  ;;  %v9002_v34 = vadd.f32 %v4861_v44, %v11792_v53 }
 0xb78   :  { %v6380_v29 = vmul.f32 -1.442695, %v8987_v60  ;;  %v6382_v54 = vmul.f32 -1.442695, %v9003_v15 }
 0xb79   :  { %9479 = vpow2.f32 %v6378_v27  ;;  %v4790_v38 = vpop.f32.mrb[60].mxu0  ;;  %v4867_v4 = vpop.f32.mrb[60].mxu1 }
 0xb7a   :  { %9481 = vpow2.f32 %v6380_v29  ;;  %v9028_v13 = vadd.f32 %v4790_v38, %v11772_v51  ;;  %v4792_v36 = vpop.f32.mrb[61].mxu0  ;;  %v4869_v11 = vpop.f32.mrb[61].mxu1 }
 0xb7b   :  { %v9029_v24 = vadd.f32 %v4792_v36, %v12877_v46  ;;  %v9045_v27 = vadd.f32 %v4869_v11, %v11788_v9  ;;  %v9044_v36 = vadd.f32 %v4867_v4, %v11798_v62 }
 0xb7c   :  { %v6379_v50 = vmul.f32 -1.442695, %v9028_v13 }
 0xb7d   :  { %v6381_v55 = vmul.f32 -1.442695, %v9029_v24  ;;  %v6383_v51 = vmul.f32 -1.442695, %v9045_v27 }
 0xb7e   :  { %9483 = vpow2.f32 %v6379_v50 }
 0xb7f   :  { %9485 = vpow2.f32 %v6381_v55 }
 0xb80   :  { %9487 = vpow2.f32 %v6382_v54 }
 0xb81   :  { %9489 = vtanh.f32 %v9002_v34 }
 0xb83   :  { %v9480_v40 = vpop.eup %9479 }
 0xb84   :  { %v9482_v60 = vpop.eup %9481  ;;  %v4878_v29 = vadd.f32 1.0, %v9480_v40 }
 0xb85   :  { %v4890_v38 = vadd.f32 1.0, %v9482_v60 }
 0xb86   :  { %9491 = vrcp.f32 %v4878_v29 }
 0xb87   :  { %9493 = vrcp.f32 %v4890_v38 }
 0xb88   :  { %v9484_v49 = vpop.eup %9483  ;;  %9495 = vpow2.f32 %v6383_v51 }
 0xb89   :  { %v9486_v13 = vpop.eup %9485  ;;  %v4879_v50 = vadd.f32 1.0, %v9484_v49  ;;  %9497 = vtanh.f32 %v9044_v36 }
 0xb8a   :  { %v4891_v15 = vadd.f32 1.0, %v9486_v13  ;;  %v9488_v11 = vpop.eup %9487 }
 0xb8b   :  { %9499 = vrcp.f32 %v4879_v50  ;;  %v9490_v24 = vpop.eup %9489  ;;  %v4904_v34 = vadd.f32 1.0, %v9488_v11 }
 0xb8c   :  { %9501 = vrcp.f32 %v4891_v15 }
 0xb8d   :  { %9503 = vrcp.f32 %v4904_v34  ;;  %v12882_v34 = vld [vmem:[#allocation39_spill] sm:$0xff] }
 0xb90   :  { %v9492_v44 = vpop.eup %9491 }
 0xb91   :  { %v9494_v55 = vpop.eup %9493  ;;  %v4912_v54 = vmul.f32 %v9492_v44, %v9490_v24  ;;  %v12879_v44 = vld [vmem:[#allocation36_spill] sm:$0xff] }
 0xb92   :  { %v4910_v27 = vmul.f32 %v9494_v55, %v11801_v12  ;;  %v9496_v40 = vpop.eup %9495  ;;  %v12880_v55 = vld [vmem:[#allocation37_spill] sm:$0xff] }
 0xb93   :  { %v9498_v60 = vpop.eup %9497  ;;  %v4905_v36 = vadd.f32 1.0, %v9496_v40  ;;  %v12884_v40 = vld [vmem:[#allocation41_spill] sm:$0xff] }
 0xb94   :  { %v11892_v4 = vadd.f32 %v4912_v54, %v4910_v27  ;;  %v12881_v54 = vld [vmem:[#allocation38_spill] sm:$0xff]  ;;  %v12883_v27 = vld [vmem:[#allocation40_spill] sm:$0xff] }
 0xb95   :  { %v9500_v29 = vpop.eup %9499 }
 0xb96   :  { %v9502_v38 = vpop.eup %9501  ;;  %9505 = vtanh.f32 %v11892_v4  ;;  %v4913_v51 = vmul.f32 %v9500_v29, %v9498_v60  ;;  %v12885_v60 = vld [vmem:[#allocation42_spill] sm:$0xff]  ;;  %v12886_v29 = vld [vmem:[#allocation43_spill] sm:$0xff] }
 0xb97   :  { %v4911_v49 = vmul.f32 %v9502_v38, %v11804_v63  ;;  %9507 = vrcp.f32 %v4905_v36  ;;  %v9504_v50 = vpop.eup %9503  ;;  %v12887_v38 = vld [vmem:[#allocation44_spill] sm:$0xff]  ;;  %v12889_v36 = vld [vmem:[#allocation46_spill] sm:$0xff] }
 0xb99   :  { %v11896_v13 = vadd.f32 %v4913_v51, %v4911_v49  ;;  %v12888_v51 = vld [vmem:[#allocation45_spill] sm:$0xff]  ;;  %v12890_v49 = vld [vmem:[#allocation47_spill] sm:$0xff] }
 0xb9b   :  { %9509 = vtanh.f32 %v11896_v13 }
 0xba0   :  { %v9506_v12 = vpop.eup %9505 }
 0xba1   :  { %v11899_v15 = vmul.f32 %v9506_v12, %v9504_v50  ;;  %v9508_v11 = vpop.eup %9507  ;;  %v12891_v50 = vld [vmem:[#allocation48_spill] sm:$0xff]  ;;  %v12892_v12 = vld [vmem:[#allocation49_spill] sm:$0xff] }
 0xba3   :  { %4995 = vmatmul.mubr.f32.vlgmr.msra.gmra.mrb[36].mxu0 %v11899_v15  ;;  %5072 = vmatmul.mubr.f32.vlgmr.msra.gmra.mrb[36].mxu1 %v11899_v15 }
 0xba4   :  { %8251 = vmatpush1.bf16.msra.mxu0 %v11466_v23  ;;  %8315 = vmatpush1.bf16.msra.mxu1 %v11468_v31 }
 0xba5   :  { %v9510_v24 = vpop.eup %9509  ;;  %8253 = vmatprep.subr.bf16.mxu0 %v11470_v58  ;;  %8317 = vmatprep.subr.bf16.mxu1 %v11472_v3 }
 0xba6   :  { %v11907_v63 = vmul.f32 %v9510_v24, %v9508_v11  ;;  %v12893_v11 = vld [vmem:[#allocation50_spill] sm:$0xff]  ;;  %v12894_v24 = vld [vmem:[#allocation51_spill] sm:$0xff] }
 0xba8   :  { %5000 = vmatprep.mubr.f32.mxu0 %v11907_v63  ;;  %5077 = vmatprep.mubr.f32.mxu1 %v11907_v63 }
 0xba9   :  { %5001 = vmatmul.mubr.f32.gmra.mrb[58].mxu0 %v12605_v25  ;;  %5078 = vmatmul.mubr.f32.gmra.mrb[58].mxu1 %v12605_v25 }
 0xbaa   :  { %8255 = vmatpush1.bf16.msra.mxu0 %v11480_v20  ;;  %8319 = vmatpush1.bf16.msra.mxu1 %v11482_v5 }
 0xbab   :  { %8257 = vmatprep.subr.bf16.mxu0 %v11486_v1  ;;  %8321 = vmatprep.subr.bf16.mxu1 %v11488_v39 }
 0xbac   :  { %5206 = vmatprep.mubr.f32.mxu0 %v12605_v25  ;;  %5283 = vmatprep.mubr.f32.mxu1 %v12605_v25 }
 0xbae   :  { %8259 = vmatpush1.bf16.msra.mxu0 %v11496_v35  ;;  %8323 = vmatpush1.bf16.msra.mxu1 %v11498_v21 }
 0xbaf   :  { %8261 = vmatprep.subr.bf16.mxu0 %v11502_v10  ;;  %8325 = vmatprep.subr.bf16.mxu1 %v11504_v18 }
 0xbb2   :  { %8263 = vmatpush1.bf16.msra.mxu0 %v11512_v45  ;;  %8327 = vmatpush1.bf16.msra.mxu1 %v11514_v0 }
 0xbb3   :  { %8265 = vmatprep.subr.bf16.mxu0 %v11518_v30  ;;  %8329 = vmatprep.subr.bf16.mxu1 %v11520_v41 }
 0xbb6   :  { %8267 = vmatpush1.bf16.msra.mxu0 %v11528_v47  ;;  %8331 = vmatpush1.bf16.msra.mxu1 %v11530_v6 }
 0xbb7   :  { %8269 = vmatprep.subr.bf16.mxu0 %v11534_v16  ;;  %8333 = vmatprep.subr.bf16.mxu1 %v11536_v61 }
 0xbba   :  { %8271 = vmatpush1.bf16.msra.mxu0 %v11544_v56  ;;  %8335 = vmatpush1.bf16.msra.mxu1 %v11546_v8 }
 0xbbb   :  { %8273 = vmatprep.subr.bf16.mxu0 %v11550_v43  ;;  %8337 = vmatprep.subr.bf16.mxu1 %v11552_v26 }
 0xbbe   :  { %8275 = vmatpush1.bf16.msra.mxu0 %v11560_v52  ;;  %8339 = vmatpush1.bf16.msra.mxu1 %v11562_v48 }
 0xbbf   :  { %8277 = vmatprep.subr.bf16.mxu0 %v11566_v7  ;;  %8341 = vmatprep.subr.bf16.mxu1 %v11568_v57 }
 0xbc2   :  { %8279 = vmatpush1.bf16.msra.mxu0 %v11576_v19  ;;  %8343 = vmatpush1.bf16.msra.mxu1 %v11578_v2 }
 0xbc3   :  { %8281 = vmatprep.subr.bf16.mxu0 %v11582_v42  ;;  %8345 = vmatprep.subr.bf16.mxu1 %v11584_v17 }
 0xbc6   :  { %8283 = vmatpush1.bf16.msra.mxu0 %v11592_v14  ;;  %8347 = vmatpush1.bf16.msra.mxu1 %v11594_v59 }
 0xbc7   :  { %8285 = vmatprep.subr.bf16.mxu0 %v11598_v32  ;;  %8349 = vmatprep.subr.bf16.mxu1 %v11600_v37 }
 0xbca   :  { %8287 = vmatpush1.bf16.msra.mxu0 %v11604_v22  ;;  %8351 = vmatpush1.bf16.msra.mxu1 %v12879_v44 }
 0xbcb   :  { %8289 = vmatprep.subr.bf16.mxu0 %v12880_v55  ;;  %8353 = vmatprep.subr.bf16.mxu1 %v12881_v54  ;;  %v12907_v55 = vld [vmem:[#allocation56_spill] sm:$0xff] }
 0xbce   :  { %8291 = vmatpush1.bf16.msra.mxu0 %v12882_v34  ;;  %8355 = vmatpush1.bf16.msra.mxu1 %v12883_v27  ;;  %v12906_v27 = vld [vmem:[#allocation30_spill] sm:$0xff] }
 0xbcf   :  { %8293 = vmatprep.subr.bf16.mxu0 %v12884_v40  ;;  %8357 = vmatprep.subr.bf16.mxu1 %v12885_v60  ;;  %v12895_v40 = vld [vmem:[#allocation24_spill] sm:$0xff]  ;;  %v12896_v60 = vld [vmem:[#allocation54_spill] sm:$0xff] }
 0xbd2   :  { %8295 = vmatpush1.bf16.msra.mxu0 %v12886_v29  ;;  %8359 = vmatpush1.bf16.msra.mxu1 %v12887_v38  ;;  %v12897_v29 = vld [vmem:[#allocation57_spill] sm:$0xff]  ;;  %v12898_v38 = vld [vmem:[#allocation58_spill] sm:$0xff] }
 0xbd3   :  { %8297 = vmatprep.subr.bf16.mxu0 %v12888_v51  ;;  %8361 = vmatprep.subr.bf16.mxu1 %v12889_v36  ;;  %v12899_v51 = vld [vmem:[#allocation59_spill] sm:$0xff] }
 0xbd4   :  { %v12900_v36 = vld [vmem:[#allocation23_spill] sm:$0xff] }
 0xbd6   :  { %8299 = vmatpush1.bf16.msra.mxu0 %v12890_v49  ;;  %8363 = vmatpush1.bf16.msra.mxu1 %v12891_v50  ;;  %v12901_v49 = vld [vmem:[#allocation25_spill] sm:$0xff]  ;;  %v12902_v50 = vld [vmem:[#allocation52_spill] sm:$0xff] }
 0xbd7   :  { %8301 = vmatprep.subr.bf16.mxu0 %v12892_v12  ;;  %8365 = vmatprep.subr.bf16.mxu1 %v12893_v11  ;;  %v12903_v12 = vld [vmem:[#allocation27_spill] sm:$0xff] }
 0xbd8   :  { %v12904_v11 = vld [vmem:[#allocation31_spill] sm:$0xff] }
 0xbda   :  { %8303 = vmatpush1.bf16.msra.mxu0 %v12894_v24  ;;  %8367 = vmatpush1.bf16.msra.mxu1 %v12895_v40  ;;  %v12905_v24 = vld [vmem:[#allocation32_spill] sm:$0xff] }
 0xbdb   :  { %8305 = vmatprep.subr.bf16.mxu0 %v12896_v60  ;;  %8369 = vmatprep.subr.bf16.mxu1 %v12897_v29 }
 0xbde   :  { %8307 = vmatpush1.bf16.msra.mxu0 %v12898_v38  ;;  %8371 = vmatpush1.bf16.msra.mxu1 %v12899_v51 }
 0xbdf   :  { %8309 = vmatprep.subr.bf16.mxu0 %v12900_v36  ;;  %8373 = vmatprep.subr.bf16.mxu1 %v12901_v49 }
 0xbe2   :  { %8311 = vmatpush1.bf16.msra.mxu0 %v12902_v50  ;;  %8375 = vmatpush1.bf16.msra.mxu1 %v12903_v12 }
 0xbe3   :  { %8377 = vmatprep.subr.bf16.mxu0 %v12904_v11  ;;  %8441 = vmatprep.subr.bf16.mxu1 %v12905_v24 }
 0xc76   :  { %v4996_v40 = vpop.f32.mrb[36].mxu0  ;;  %v5073_v60 = vpop.f32.mrb[36].mxu1 }
 0xc77   :  { %v8988_v29 = vadd.f32 %v4996_v40, %v12906_v27  ;;  %v4998_v34 = vpop.f32.mrb[37].mxu0  ;;  %v5075_v38 = vpop.f32.mrb[37].mxu1 }
 0xc78   :  { %v8989_v51 = vadd.f32 %v4998_v34, %v12876_v33  ;;  %v9005_v24 = vadd.f32 %v5075_v38, %v12878_v28  ;;  %v9004_v34 = vadd.f32 %v5073_v60, %v11792_v53 }
 0xc79   :  { %v6384_v54 = vmul.f32 -1.442695, %v8988_v29 }
 0xc7a   :  { %v6386_v36 = vmul.f32 -1.442695, %v8989_v51  ;;  %v6388_v27 = vmul.f32 -1.442695, %v9005_v24 }
 0xc7b   :  { %9511 = vpow2.f32 %v6384_v54 }
 0xc7c   :  { %9513 = vpow2.f32 %v6386_v36  ;;  %v5002_v49 = vpop.f32.mrb[58].mxu0  ;;  %v5079_v50 = vpop.f32.mrb[58].mxu1 }
 0xc7d   :  { %v9026_v12 = vadd.f32 %v5002_v49, %v12907_v55  ;;  %v5004_v44 = vpop.f32.mrb[59].mxu0  ;;  %v5081_v11 = vpop.f32.mrb[59].mxu1 }
 0xc7e   :  { %v9027_v22 = vadd.f32 %v5004_v44, %v12877_v46  ;;  %v9043_v54 = vadd.f32 %v5081_v11, %v11788_v9  ;;  %v9042_v44 = vadd.f32 %v5079_v50, %v11798_v62 }
 0xc7f   :  { %v6385_v37 = vmul.f32 -1.442695, %v9026_v12 }
 0xc80   :  { %v6387_v40 = vmul.f32 -1.442695, %v9027_v22  ;;  %v6389_v55 = vmul.f32 -1.442695, %v9043_v54 }
 0xc81   :  { %9515 = vpow2.f32 %v6385_v37 }
 0xc82   :  { %9517 = vpow2.f32 %v6387_v40 }
 0xc83   :  { %9519 = vpow2.f32 %v6388_v27 }
 0xc84   :  { %9521 = vtanh.f32 %v9004_v34 }
 0xc85   :  { %v9512_v29 = vpop.eup %9511 }
 0xc86   :  { %v9514_v51 = vpop.eup %9513  ;;  %v5090_v36 = vadd.f32 1.0, %v9512_v29 }
 0xc87   :  { %v5102_v49 = vadd.f32 1.0, %v9514_v51 }
 0xc88   :  { %9523 = vrcp.f32 %v5090_v36 }
 0xc89   :  { %9525 = vrcp.f32 %v5102_v49 }
 0xc8a   :  { %9527 = vpow2.f32 %v6389_v55 }
 0xc8b   :  { %v9516_v38 = vpop.eup %9515  ;;  %9529 = vtanh.f32 %v9042_v44 }
 0xc8c   :  { %v9518_v22 = vpop.eup %9517  ;;  %v5091_v37 = vadd.f32 1.0, %v9516_v38 }
 0xc8d   :  { %v5103_v12 = vadd.f32 1.0, %v9518_v22  ;;  %v9520_v60 = vpop.eup %9519 }
 0xc8e   :  { %9531 = vrcp.f32 %v5091_v37  ;;  %v9522_v11 = vpop.eup %9521  ;;  %v5116_v34 = vadd.f32 1.0, %v9520_v60 }
 0xc8f   :  { %9533 = vrcp.f32 %v5103_v12  ;;  %v12908_v12 = vld [vmem:[#allocation53_spill] sm:$0xff] }
 0xc90   :  { %9535 = vrcp.f32 %v5116_v34  ;;  %v4920_v60 = vadd.f32 %v11899_v15, %v12908_v12  ;;  %v12920_v12 = vld [vmem:[#allocation44_spill] sm:$0xff] }
 0xc92   :  { %v9524_v24 = vpop.eup %9523 }
 0xc93   :  { %v9526_v40 = vpop.eup %9525  ;;  %v5124_v27 = vmul.f32 %v9524_v24, %v9522_v11 }
 0xc94   :  { %v5122_v29 = vmul.f32 %v9526_v40, %v11892_v4  ;;  %v9528_v54 = vpop.eup %9527 }
 0xc95   :  { %v9530_v50 = vpop.eup %9529  ;;  %v5117_v44 = vadd.f32 1.0, %v9528_v54  ;;  %v12911_v54 = vld [vmem:[#allocation35_spill] sm:$0xff] }
 0xc96   :  { %v11984_v51 = vadd.f32 %v5124_v27, %v5122_v29  ;;  %v12909_v27 = vld [vmem:[#allocation26_spill] sm:$0xff] }
 0xc97   :  { %v4921_v34 = vadd.f32 %v11907_v63, %v12909_v27  ;;  %v12910_v63 = vld [vmem:[#allocation34_spill] sm:$0xff]  ;;  %v12925_v27 = vld [vmem:[#allocation49_spill] sm:$0xff] }
 0xc98   :  { %v9532_v36 = vpop.eup %9531  ;;  %9537 = vtanh.f32 %v11984_v51 }
 0xc99   :  { %v9534_v55 = vpop.eup %9533  ;;  %v5125_v49 = vmul.f32 %v9532_v36, %v9530_v50  ;;  %9539 = vrcp.f32 %v5117_v44  ;;  %v12912_v50 = vld [vmem:[#allocation36_spill] sm:$0xff]  ;;  %v12913_v36 = vld [vmem:[#allocation37_spill] sm:$0xff] }
 0xc9a   :  { %v5123_v38 = vmul.f32 %v9534_v55, %v11896_v13  ;;  %v9536_v37 = vpop.eup %9535  ;;  %v12914_v55 = vld [vmem:[#allocation38_spill] sm:$0xff]  ;;  %v12916_v44 = vld [vmem:[#allocation40_spill] sm:$0xff] }
 0xc9c   :  { %v11988_v22 = vadd.f32 %v5125_v49, %v5123_v38  ;;  %v12915_v49 = vld [vmem:[#allocation39_spill] sm:$0xff]  ;;  %v12917_v38 = vld [vmem:[#allocation41_spill] sm:$0xff] }
 0xc9e   :  { %9541 = vtanh.f32 %v11988_v22 }
 0xca2   :  { %v9538_v4 = vpop.eup %9537 }
 0xca3   :  { %v5130_v11 = vmul.f32 %v9538_v4, %v9536_v37  ;;  %v9540_v13 = vpop.eup %9539  ;;  %v12918_v37 = vld [vmem:[#allocation42_spill] sm:$0xff]  ;;  %v12919_v4 = vld [vmem:[#allocation43_spill] sm:$0xff] }
 0xca5   :  { %v11993_v24 = vadd.f32 %v5130_v11, %v4920_v60  ;;  %5207 = vmatmul.mubr.f32.vlgmr.msra.gmra.mrb[38].mxu0 %v5130_v11  ;;  %5284 = vmatmul.mubr.f32.vlgmr.msra.gmra.mrb[38].mxu1 %v5130_v11  ;;  %v12921_v60 = vld [vmem:[#allocation45_spill] sm:$0xff]  ;;  %v12922_v11 = vld [vmem:[#allocation46_spill] sm:$0xff] }
 0xca6   :  { %8379 = vmatpush1.bf16.msra.mxu0 %v11466_v23  ;;  %8443 = vmatpush1.bf16.msra.mxu1 %v11468_v31 }
 0xca7   :  { %8381 = vmatprep.subr.bf16.mxu0 %v11470_v58  ;;  %8445 = vmatprep.subr.bf16.mxu1 %v11472_v3 }
 0xca8   :  { %v9542_v40 = vpop.eup %9541 }
 0xca9   :  { %v5131_v29 = vmul.f32 %v9542_v40, %v9540_v13  ;;  %v12923_v13 = vld [vmem:[#allocation47_spill] sm:$0xff]  ;;  %v12924_v40 = vld [vmem:[#allocation48_spill] sm:$0xff] }
 0xcaa   :  { %8383 = vmatpush1.bf16.msra.mxu0 %v11480_v20  ;;  %8447 = vmatpush1.bf16.msra.mxu1 %v11482_v5 }
 0xcab   :  { %v12003_v15 = vadd.f32 %v5131_v29, %v4921_v34  ;;  %5212 = vmatprep.mubr.f32.mxu0 %v5131_v29  ;;  %5289 = vmatprep.mubr.f32.mxu1 %v5131_v29  ;;  %v12926_v34 = vld [vmem:[#allocation50_spill] sm:$0xff]  ;;  %v12927_v29 = vld [vmem:[#allocation51_spill] sm:$0xff] }
 0xcac   :  { %5213 = vmatmul.mubr.f32.gmra.mrb[56].mxu0 %v12605_v25  ;;  %5290 = vmatmul.mubr.f32.gmra.mrb[56].mxu1 %v12605_v25 }
 0xcad   :  { %8385 = vmatprep.subr.bf16.mxu0 %v11486_v1  ;;  %8449 = vmatprep.subr.bf16.mxu1 %v11488_v39 }
 0xcae   :  { %8387 = vmatpush1.bf16.msra.mxu0 %v11496_v35  ;;  %8451 = vmatpush1.bf16.msra.mxu1 %v11498_v21 }
 0xcaf   :  { %8389 = vmatprep.subr.bf16.mxu0 %v11502_v10  ;;  %8453 = vmatprep.subr.bf16.mxu1 %v11504_v18 }
 0xcb0   :  { %5418 = vmatprep.mubr.f32.mxu0 %v12605_v25  ;;  %5495 = vmatprep.mubr.f32.mxu1 %v12605_v25 }
 0xcb2   :  { %8391 = vmatpush1.bf16.msra.mxu0 %v11512_v45  ;;  %8455 = vmatpush1.bf16.msra.mxu1 %v11514_v0 }
 0xcb3   :  { %8393 = vmatprep.subr.bf16.mxu0 %v11518_v30  ;;  %8457 = vmatprep.subr.bf16.mxu1 %v11520_v41 }
 0xcb6   :  { %8395 = vmatpush1.bf16.msra.mxu0 %v11528_v47  ;;  %8459 = vmatpush1.bf16.msra.mxu1 %v11530_v6 }
 0xcb7   :  { %8397 = vmatprep.subr.bf16.mxu0 %v11534_v16  ;;  %8461 = vmatprep.subr.bf16.mxu1 %v11536_v61 }
 0xcba   :  { %8399 = vmatpush1.bf16.msra.mxu0 %v11544_v56  ;;  %8463 = vmatpush1.bf16.msra.mxu1 %v11546_v8 }
 0xcbb   :  { %8401 = vmatprep.subr.bf16.mxu0 %v11550_v43  ;;  %8465 = vmatprep.subr.bf16.mxu1 %v11552_v26 }
 0xcbe   :  { %8403 = vmatpush1.bf16.msra.mxu0 %v11560_v52  ;;  %8467 = vmatpush1.bf16.msra.mxu1 %v11562_v48 }
 0xcbf   :  { %8405 = vmatprep.subr.bf16.mxu0 %v11566_v7  ;;  %8469 = vmatprep.subr.bf16.mxu1 %v11568_v57 }
 0xcc2   :  { %8407 = vmatpush1.bf16.msra.mxu0 %v11576_v19  ;;  %8471 = vmatpush1.bf16.msra.mxu1 %v11578_v2 }
 0xcc3   :  { %8409 = vmatprep.subr.bf16.mxu0 %v11582_v42  ;;  %8473 = vmatprep.subr.bf16.mxu1 %v11584_v17 }
 0xcc6   :  { %8411 = vmatpush1.bf16.msra.mxu0 %v11592_v14  ;;  %8475 = vmatpush1.bf16.msra.mxu1 %v11594_v59 }
 0xcc7   :  { %8413 = vmatprep.subr.bf16.mxu0 %v11598_v32  ;;  %8477 = vmatprep.subr.bf16.mxu1 %v12910_v63 }
 0xcca   :  { %8415 = vmatpush1.bf16.msra.mxu0 %v12911_v54  ;;  %8479 = vmatpush1.bf16.msra.mxu1 %v12912_v50 }
 0xccb   :  { %8417 = vmatprep.subr.bf16.mxu0 %v12913_v36  ;;  %8481 = vmatprep.subr.bf16.mxu1 %v12914_v55  ;;  %v12940_v36 = vld [vmem:[#allocation56_spill] sm:$0xff] }
 0xcce   :  { %8419 = vmatpush1.bf16.msra.mxu0 %v12915_v49  ;;  %8483 = vmatpush1.bf16.msra.mxu1 %v12916_v44  ;;  %v12939_v44 = vld [vmem:[#allocation30_spill] sm:$0xff] }
 0xccf   :  { %8421 = vmatprep.subr.bf16.mxu0 %v12917_v38  ;;  %8485 = vmatprep.subr.bf16.mxu1 %v12918_v37  ;;  %v12928_v38 = vld [vmem:[#allocation24_spill] sm:$0xff]  ;;  %v12929_v37 = vld [vmem:[#allocation54_spill] sm:$0xff] }
 0xcd2   :  { %8423 = vmatpush1.bf16.msra.mxu0 %v12919_v4  ;;  %8487 = vmatpush1.bf16.msra.mxu1 %v12920_v12  ;;  %v12930_v4 = vld [vmem:[#allocation57_spill] sm:$0xff]  ;;  %v12931_v12 = vld [vmem:[#allocation58_spill] sm:$0xff] }
 0xcd3   :  { %8425 = vmatprep.subr.bf16.mxu0 %v12921_v60  ;;  %8489 = vmatprep.subr.bf16.mxu1 %v12922_v11  ;;  %v12932_v60 = vld [vmem:[#allocation59_spill] sm:$0xff] }
 0xcd4   :  { %v12933_v11 = vld [vmem:[#allocation23_spill] sm:$0xff] }
 0xcd6   :  { %8427 = vmatpush1.bf16.msra.mxu0 %v12923_v13  ;;  %8491 = vmatpush1.bf16.msra.mxu1 %v12924_v40  ;;  %v12934_v13 = vld [vmem:[#allocation25_spill] sm:$0xff]  ;;  %v12935_v40 = vld [vmem:[#allocation52_spill] sm:$0xff] }
 0xcd7   :  { %8429 = vmatprep.subr.bf16.mxu0 %v12925_v27  ;;  %8493 = vmatprep.subr.bf16.mxu1 %v12926_v34  ;;  %v12936_v27 = vld [vmem:[#allocation27_spill] sm:$0xff] }
 0xcd8   :  { %v12937_v34 = vld [vmem:[#allocation31_spill] sm:$0xff] }
 0xcda   :  { %8431 = vmatpush1.bf16.msra.mxu0 %v12927_v29  ;;  %8495 = vmatpush1.bf16.msra.mxu1 %v12928_v38  ;;  %v12938_v29 = vld [vmem:[#allocation32_spill] sm:$0xff] }
 0xcdb   :  { %8433 = vmatprep.subr.bf16.mxu0 %v12929_v37  ;;  %8497 = vmatprep.subr.bf16.mxu1 %v12930_v4 }
 0xcde   :  { %8435 = vmatpush1.bf16.msra.mxu0 %v12931_v12  ;;  %8499 = vmatpush1.bf16.msra.mxu1 %v12932_v60 }
 0xcdf   :  { %8437 = vmatprep.subr.bf16.mxu0 %v12933_v11  ;;  %8501 = vmatprep.subr.bf16.mxu1 %v12934_v13 }
 0xce2   :  { %8439 = vmatpush1.bf16.msra.mxu0 %v12935_v40  ;;  %8503 = vmatpush1.bf16.msra.mxu1 %v12936_v27 }
 0xce3   :  { %8505 = vmatprep.subr.bf16.mxu0 %v12937_v34  ;;  %8569 = vmatprep.subr.bf16.mxu1 %v12938_v29 }
 0xd78   :  { %v5208_v38 = vpop.f32.mrb[38].mxu0  ;;  %v5285_v37 = vpop.f32.mrb[38].mxu1 }
 0xd79   :  { %v8990_v4 = vadd.f32 %v5208_v38, %v12939_v44  ;;  %v5210_v49 = vpop.f32.mrb[39].mxu0  ;;  %v5287_v12 = vpop.f32.mrb[39].mxu1 }
 0xd7a   :  { %v8991_v60 = vadd.f32 %v5210_v49, %v12876_v33  ;;  %v9007_v27 = vadd.f32 %v5287_v12, %v12878_v28  ;;  %v9006_v49 = vadd.f32 %v5285_v37, %v11792_v53 }
 0xd7b   :  { %v6390_v55 = vmul.f32 -1.442695, %v8990_v4 }
 0xd7c   :  { %v6392_v11 = vmul.f32 -1.442695, %v8991_v60  ;;  %v6394_v44 = vmul.f32 -1.442695, %v9007_v27 }
 0xd7d   :  { %9543 = vpow2.f32 %v6390_v55 }
 0xd7e   :  { %9545 = vpow2.f32 %v6392_v11 }
 0xd7f   :  { %v5214_v13 = vpop.f32.mrb[56].mxu0  ;;  %v5291_v40 = vpop.f32.mrb[56].mxu1 }
 0xd80   :  { %v9024_v34 = vadd.f32 %v5214_v13, %v12940_v36  ;;  %v5216_v50 = vpop.f32.mrb[57].mxu0  ;;  %v5293_v29 = vpop.f32.mrb[57].mxu1 }
 0xd81   :  { %v9025_v54 = vadd.f32 %v5216_v50, %v12877_v46  ;;  %v9041_v55 = vadd.f32 %v5293_v29, %v11788_v9  ;;  %v9040_v50 = vadd.f32 %v5291_v40, %v11798_v62 }
 0xd82   :  { %v6391_v63 = vmul.f32 -1.442695, %v9024_v34 }
 0xd83   :  { %v6393_v38 = vmul.f32 -1.442695, %v9025_v54  ;;  %v6395_v13 = vmul.f32 -1.442695, %v9041_v55 }
 0xd84   :  { %9547 = vpow2.f32 %v6391_v63 }
 0xd85   :  { %9549 = vpow2.f32 %v6393_v38 }
 0xd86   :  { %9551 = vpow2.f32 %v6394_v44 }
 0xd87   :  { %v9544_v4 = vpop.eup %9543  ;;  %9553 = vtanh.f32 %v9006_v49 }
 0xd88   :  { %v9546_v60 = vpop.eup %9545  ;;  %v5302_v11 = vadd.f32 1.0, %v9544_v4 }
 0xd89   :  { %v5314_v12 = vadd.f32 1.0, %v9546_v60 }
 0xd8a   :  { %9555 = vrcp.f32 %v5302_v11 }
 0xd8b   :  { %9557 = vrcp.f32 %v5314_v12 }
 0xd8c   :  { %9559 = vpow2.f32 %v6395_v13 }
 0xd8d   :  { %9561 = vtanh.f32 %v9040_v50 }
 0xd8e   :  { %v9548_v34 = vpop.eup %9547 }
 0xd8f   :  { %v9550_v54 = vpop.eup %9549  ;;  %v5303_v27 = vadd.f32 1.0, %v9548_v34 }
 0xd90   :  { %v5315_v63 = vadd.f32 1.0, %v9550_v54  ;;  %v9552_v37 = vpop.eup %9551 }
 0xd91   :  { %9563 = vrcp.f32 %v5303_v27  ;;  %v9554_v29 = vpop.eup %9553  ;;  %v5328_v49 = vadd.f32 1.0, %v9552_v37 }
 0xd92   :  { %9565 = vrcp.f32 %v5315_v63 }
 0xd93   :  { %9567 = vrcp.f32 %v5328_v49  ;;  %v12943_v49 = vld [vmem:[#allocation36_spill] sm:$0xff] }
 0xd94   :  { %v9556_v38 = vpop.eup %9555 }
 0xd95   :  { %v9558_v4 = vpop.eup %9557  ;;  %v5336_v44 = vmul.f32 %v9556_v38, %v9554_v29 }
 0xd96   :  { %v5334_v60 = vmul.f32 %v9558_v4, %v11984_v51  ;;  %v9560_v55 = vpop.eup %9559 }
 0xd97   :  { %v9562_v40 = vpop.eup %9561  ;;  %v5329_v34 = vadd.f32 1.0, %v9560_v55  ;;  %v12945_v55 = vld [vmem:[#allocation38_spill] sm:$0xff] }
 0xd98   :  { %v12076_v11 = vadd.f32 %v5336_v44, %v5334_v60  ;;  %v12942_v44 = vld [vmem:[#allocation35_spill] sm:$0xff]  ;;  %v12944_v60 = vld [vmem:[#allocation37_spill] sm:$0xff] }
 0xd9a   :  { %9569 = vtanh.f32 %v12076_v11 }
 0xd9b   :  { %v9564_v12 = vpop.eup %9563  ;;  %9571 = vrcp.f32 %v5329_v34  ;;  %v12950_v34 = vld [vmem:[#allocation43_spill] sm:$0xff] }
 0xd9c   :  { %v9566_v13 = vpop.eup %9565  ;;  %v5337_v50 = vmul.f32 %v9564_v12, %v9562_v40  ;;  %v12946_v40 = vld [vmem:[#allocation39_spill] sm:$0xff]  ;;  %v12947_v12 = vld [vmem:[#allocation40_spill] sm:$0xff] }
 0xd9d   :  { %v5335_v54 = vmul.f32 %v9566_v13, %v11988_v22  ;;  %v9568_v63 = vpop.eup %9567  ;;  %v12948_v13 = vld [vmem:[#allocation41_spill] sm:$0xff] }
 0xd9f   :  { %v12080_v27 = vadd.f32 %v5337_v50, %v5335_v54  ;;  %v12949_v50 = vld [vmem:[#allocation42_spill] sm:$0xff]  ;;  %v12951_v54 = vld [vmem:[#allocation44_spill] sm:$0xff] }
 0xda1   :  { %9573 = vtanh.f32 %v12080_v27 }
 0xda4   :  { %v9570_v51 = vpop.eup %9569 }
 0xda5   :  { %v5342_v37 = vmul.f32 %v9570_v51, %v9568_v63  ;;  %v9572_v22 = vpop.eup %9571  ;;  %v12952_v63 = vld [vmem:[#allocation45_spill] sm:$0xff]  ;;  %v12953_v51 = vld [vmem:[#allocation46_spill] sm:$0xff] }
 0xda7   :  { %v12084_v29 = vadd.f32 %v5342_v37, %v11993_v24  ;;  %5419 = vmatmul.mubr.f32.vlgmr.msra.gmra.mrb[40].mxu0 %v5342_v37  ;;  %5496 = vmatmul.mubr.f32.vlgmr.msra.gmra.mrb[40].mxu1 %v5342_v37  ;;  %v12954_v37 = vld [vmem:[#allocation47_spill] sm:$0xff] }
 0xda8   :  { %8507 = vmatpush1.bf16.msra.mxu0 %v11466_v23  ;;  %8571 = vmatpush1.bf16.msra.mxu1 %v11468_v31 }
 0xda9   :  { %8509 = vmatprep.subr.bf16.mxu0 %v11470_v58  ;;  %8573 = vmatprep.subr.bf16.mxu1 %v11472_v3 }
 0xdab   :  { %v9574_v38 = vpop.eup %9573 }
 0xdac   :  { %v5343_v4 = vmul.f32 %v9574_v38, %v9572_v22  ;;  %8511 = vmatpush1.bf16.msra.mxu0 %v11480_v20  ;;  %8575 = vmatpush1.bf16.msra.mxu1 %v11482_v5  ;;  %v12955_v22 = vld [vmem:[#allocation48_spill] sm:$0xff]  ;;  %v12956_v38 = vld [vmem:[#allocation49_spill] sm:$0xff] }
 0xdad   :  { %8513 = vmatprep.subr.bf16.mxu0 %v11486_v1  ;;  %8577 = vmatprep.subr.bf16.mxu1 %v11488_v39 }
 0xdae   :  { %v12095_v24 = vadd.f32 %v5343_v4, %v12003_v15  ;;  %5424 = vmatprep.mubr.f32.mxu0 %v5343_v4  ;;  %5501 = vmatprep.mubr.f32.mxu1 %v5343_v4  ;;  %v12941_v15 = vld [vmem:[#allocation34_spill] sm:$0xff] }
 0xdaf   :  { %5425 = vmatmul.mubr.f32.gmra.mrb[54].mxu0 %v12605_v25  ;;  %5502 = vmatmul.mubr.f32.gmra.mrb[54].mxu1 %v12605_v25  ;;  %v12957_v4 = vld [vmem:[#allocation50_spill] sm:$0xff] }
 0xdb0   :  { %8515 = vmatpush1.bf16.msra.mxu0 %v11496_v35  ;;  %8579 = vmatpush1.bf16.msra.mxu1 %v11498_v21 }
 0xdb1   :  { %8517 = vmatprep.subr.bf16.mxu0 %v11502_v10  ;;  %8581 = vmatprep.subr.bf16.mxu1 %v11504_v18 }
 0xdb2   :  { %5630 = vmatprep.mubr.f32.mxu0 %v12605_v25  ;;  %5707 = vmatprep.mubr.f32.mxu1 %v12605_v25 }
 0xdb4   :  { %8519 = vmatpush1.bf16.msra.mxu0 %v11512_v45  ;;  %8583 = vmatpush1.bf16.msra.mxu1 %v11514_v0 }
 0xdb5   :  { %8521 = vmatprep.subr.bf16.mxu0 %v11518_v30  ;;  %8585 = vmatprep.subr.bf16.mxu1 %v11520_v41 }
 0xdb8   :  { %8523 = vmatpush1.bf16.msra.mxu0 %v11528_v47  ;;  %8587 = vmatpush1.bf16.msra.mxu1 %v11530_v6 }
 0xdb9   :  { %8525 = vmatprep.subr.bf16.mxu0 %v11534_v16  ;;  %8589 = vmatprep.subr.bf16.mxu1 %v11536_v61 }
 0xdbc   :  { %8527 = vmatpush1.bf16.msra.mxu0 %v11544_v56  ;;  %8591 = vmatpush1.bf16.msra.mxu1 %v11546_v8 }
 0xdbd   :  { %8529 = vmatprep.subr.bf16.mxu0 %v11550_v43  ;;  %8593 = vmatprep.subr.bf16.mxu1 %v11552_v26 }
 0xdc0   :  { %8531 = vmatpush1.bf16.msra.mxu0 %v11560_v52  ;;  %8595 = vmatpush1.bf16.msra.mxu1 %v11562_v48 }
 0xdc1   :  { %8533 = vmatprep.subr.bf16.mxu0 %v11566_v7  ;;  %8597 = vmatprep.subr.bf16.mxu1 %v11568_v57 }
 0xdc4   :  { %8535 = vmatpush1.bf16.msra.mxu0 %v11576_v19  ;;  %8599 = vmatpush1.bf16.msra.mxu1 %v11578_v2 }
 0xdc5   :  { %8537 = vmatprep.subr.bf16.mxu0 %v11582_v42  ;;  %8601 = vmatprep.subr.bf16.mxu1 %v11584_v17 }
 0xdc8   :  { %8539 = vmatpush1.bf16.msra.mxu0 %v11592_v14  ;;  %8603 = vmatpush1.bf16.msra.mxu1 %v11594_v59 }
 0xdc9   :  { %8541 = vmatprep.subr.bf16.mxu0 %v11598_v32  ;;  %8605 = vmatprep.subr.bf16.mxu1 %v12941_v15 }
 0xdcc   :  { %8543 = vmatpush1.bf16.msra.mxu0 %v12942_v44  ;;  %8607 = vmatpush1.bf16.msra.mxu1 %v12943_v49 }
 0xdcd   :  { %8545 = vmatprep.subr.bf16.mxu0 %v12944_v60  ;;  %8609 = vmatprep.subr.bf16.mxu1 %v12945_v55 }
 0xdd0   :  { %8547 = vmatpush1.bf16.msra.mxu0 %v12946_v40  ;;  %8611 = vmatpush1.bf16.msra.mxu1 %v12947_v12  ;;  %v12958_v12 = vld [vmem:[#allocation51_spill] sm:$0xff]  ;;  %v12970_v40 = vld [vmem:[#allocation30_spill] sm:$0xff] }
 0xdd1   :  { %8549 = vmatprep.subr.bf16.mxu0 %v12948_v13  ;;  %8613 = vmatprep.subr.bf16.mxu1 %v12949_v50  ;;  %v12959_v13 = vld [vmem:[#allocation24_spill] sm:$0xff]  ;;  %v12960_v50 = vld [vmem:[#allocation54_spill] sm:$0xff] }
 0xdd4   :  { %8551 = vmatpush1.bf16.msra.mxu0 %v12950_v34  ;;  %8615 = vmatpush1.bf16.msra.mxu1 %v12951_v54  ;;  %v12961_v34 = vld [vmem:[#allocation57_spill] sm:$0xff]  ;;  %v12962_v54 = vld [vmem:[#allocation58_spill] sm:$0xff] }
 0xdd5   :  { %8553 = vmatprep.subr.bf16.mxu0 %v12952_v63  ;;  %8617 = vmatprep.subr.bf16.mxu1 %v12953_v51  ;;  %v12963_v63 = vld [vmem:[#allocation59_spill] sm:$0xff] }
 0xdd6   :  { %v12964_v51 = vld [vmem:[#allocation23_spill] sm:$0xff] }
 0xdd8   :  { %8555 = vmatpush1.bf16.msra.mxu0 %v12954_v37  ;;  %8619 = vmatpush1.bf16.msra.mxu1 %v12955_v22  ;;  %v12965_v37 = vld [vmem:[#allocation25_spill] sm:$0xff]  ;;  %v12966_v22 = vld [vmem:[#allocation52_spill] sm:$0xff] }
 0xdd9   :  { %8557 = vmatprep.subr.bf16.mxu0 %v12956_v38  ;;  %8621 = vmatprep.subr.bf16.mxu1 %v12957_v4  ;;  %v12967_v38 = vld [vmem:[#allocation27_spill] sm:$0xff] }
 0xdda   :  { %v12968_v4 = vld [vmem:[#allocation31_spill] sm:$0xff] }
 0xddc   :  { %8559 = vmatpush1.bf16.msra.mxu0 %v12958_v12  ;;  %8623 = vmatpush1.bf16.msra.mxu1 %v12959_v13  ;;  %v12969_v12 = vld [vmem:[#allocation32_spill] sm:$0xff] }
 0xddd   :  { %8561 = vmatprep.subr.bf16.mxu0 %v12960_v50  ;;  %8625 = vmatprep.subr.bf16.mxu1 %v12961_v34 }
 0xde0   :  { %8563 = vmatpush1.bf16.msra.mxu0 %v12962_v54  ;;  %8627 = vmatpush1.bf16.msra.mxu1 %v12963_v63 }
 0xde1   :  { %8565 = vmatprep.subr.bf16.mxu0 %v12964_v51  ;;  %8629 = vmatprep.subr.bf16.mxu1 %v12965_v37 }
 0xde4   :  { %8567 = vmatpush1.bf16.msra.mxu0 %v12966_v22  ;;  %8631 = vmatpush1.bf16.msra.mxu1 %v12967_v38 }
 0xde5   :  { %8633 = vmatprep.subr.bf16.mxu0 %v12968_v4  ;;  %8697 = vmatprep.subr.bf16.mxu1 %v12969_v12 }
 0xe7a   :  { %v5420_v13 = vpop.f32.mrb[40].mxu0  ;;  %v5497_v50 = vpop.f32.mrb[40].mxu1 }
 0xe7b   :  { %v8992_v34 = vadd.f32 %v5420_v13, %v12970_v40  ;;  %v5422_v55 = vpop.f32.mrb[41].mxu0  ;;  %v5499_v54 = vpop.f32.mrb[41].mxu1  ;;  %v9008_v32 = vadd.f32 %v5497_v50, %v11792_v53 }
 0xe7c   :  { %v8993_v63 = vadd.f32 %v5422_v55, %v12876_v33  ;;  %v9009_v22 = vadd.f32 %v5499_v54, %v12878_v28 }
 0xe7d   :  { %v6396_v60 = vmul.f32 -1.442695, %v8992_v34 }
 0xe7e   :  { %v6398_v51 = vmul.f32 -1.442695, %v8993_v63  ;;  %v6400_v13 = vmul.f32 -1.442695, %v9009_v22 }
 0xe7f   :  { %9575 = vpow2.f32 %v6396_v60 }
 0xe80   :  { %9577 = vpow2.f32 %v6398_v51 }
 0xe82   :  { %v5426_v37 = vpop.f32.mrb[54].mxu0  ;;  %v5503_v38 = vpop.f32.mrb[54].mxu1 }
 0xe83   :  { %v9022_v4 = vadd.f32 %v5426_v37, %v12940_v36  ;;  %v5428_v49 = vpop.f32.mrb[55].mxu0  ;;  %v5505_v12 = vpop.f32.mrb[55].mxu1 }
 0xe84   :  { %v9023_v44 = vadd.f32 %v5428_v49, %v12877_v46  ;;  %v9039_v54 = vadd.f32 %v5505_v12, %v11788_v9  ;;  %v9038_v49 = vadd.f32 %v5503_v38, %v11798_v62 }
 0xe85   :  { %v6397_v15 = vmul.f32 -1.442695, %v9022_v4 }
 0xe86   :  { %v6399_v40 = vmul.f32 -1.442695, %v9023_v44  ;;  %v6401_v51 = vmul.f32 -1.442695, %v9039_v54 }
 0xe87   :  { %9579 = vpow2.f32 %v6397_v15 }
 0xe88   :  { %9581 = vpow2.f32 %v6399_v40 }
 0xe89   :  { %v9576_v55 = vpop.eup %9575  ;;  %9583 = vpow2.f32 %v6400_v13 }
 0xe8a   :  { %v9578_v60 = vpop.eup %9577  ;;  %v5514_v34 = vadd.f32 1.0, %v9576_v55  ;;  %9585 = vtanh.f32 %v9008_v32 }
 0xe8b   :  { %v5526_v63 = vadd.f32 1.0, %v9578_v60 }
 0xe8c   :  { %9587 = vrcp.f32 %v5514_v34 }
 0xe8d   :  { %9589 = vrcp.f32 %v5526_v63 }
 0xe8e   :  { %9591 = vpow2.f32 %v6401_v51 }
 0xe8f   :  { %9593 = vtanh.f32 %v9038_v49 }
 0xe91   :  { %v9580_v37 = vpop.eup %9579 }
 0xe92   :  { %v9582_v22 = vpop.eup %9581  ;;  %v5515_v44 = vadd.f32 1.0, %v9580_v37 }
 0xe93   :  { %v5527_v15 = vadd.f32 1.0, %v9582_v22  ;;  %v9584_v40 = vpop.eup %9583 }
 0xe94   :  { %9595 = vrcp.f32 %v5515_v44  ;;  %v9586_v50 = vpop.eup %9585  ;;  %v5540_v32 = vadd.f32 1.0, %v9584_v40 }
 0xe95   :  { %9597 = vrcp.f32 %v5527_v15 }
 0xe96   :  { %v9588_v4 = vpop.eup %9587  ;;  %9599 = vrcp.f32 %v5540_v32  ;;  %v12974_v32 = vld [vmem:[#allocation36_spill] sm:$0xff] }
 0xe97   :  { %v9590_v13 = vpop.eup %9589  ;;  %v5548_v12 = vmul.f32 %v9588_v4, %v9586_v50 }
 0xe98   :  { %v5546_v55 = vmul.f32 %v9590_v13, %v12076_v11  ;;  %v9592_v38 = vpop.eup %9591  ;;  %v12972_v13 = vld [vmem:[#allocation34_spill] sm:$0xff] }
 0xe99   :  { %v9594_v34 = vpop.eup %9593  ;;  %v5541_v49 = vadd.f32 1.0, %v9592_v38  ;;  %v12976_v38 = vld [vmem:[#allocation38_spill] sm:$0xff] }
 0xe9a   :  { %v12166_v60 = vadd.f32 %v5548_v12, %v5546_v55  ;;  %v12973_v12 = vld [vmem:[#allocation35_spill] sm:$0xff]  ;;  %v12975_v55 = vld [vmem:[#allocation37_spill] sm:$0xff] }
 0xe9c   :  { %9601 = vtanh.f32 %v12166_v60 }
 0xe9d   :  { %9603 = vrcp.f32 %v5541_v49  ;;  %v12981_v49 = vld [vmem:[#allocation43_spill] sm:$0xff] }
 0xe9e   :  { %v9596_v54 = vpop.eup %9595 }
 0xe9f   :  { %v9598_v63 = vpop.eup %9597  ;;  %v5549_v51 = vmul.f32 %v9596_v54, %v9594_v34  ;;  %v12977_v34 = vld [vmem:[#allocation39_spill] sm:$0xff]  ;;  %v12978_v54 = vld [vmem:[#allocation40_spill] sm:$0xff] }
 0xea0   :  { %v5547_v37 = vmul.f32 %v9598_v63, %v12080_v27  ;;  %v9600_v44 = vpop.eup %9599  ;;  %v12979_v63 = vld [vmem:[#allocation41_spill] sm:$0xff] }
 0xea2   :  { %v12170_v22 = vadd.f32 %v5549_v51, %v5547_v37  ;;  %v12980_v51 = vld [vmem:[#allocation42_spill] sm:$0xff]  ;;  %v12982_v37 = vld [vmem:[#allocation44_spill] sm:$0xff] }
 0xea4   :  { %9605 = vtanh.f32 %v12170_v22 }
 0xea6   :  { %v9602_v11 = vpop.eup %9601 }
 0xea7   :  { %v5554_v15 = vmul.f32 %v9602_v11, %v9600_v44  ;;  %v9604_v27 = vpop.eup %9603  ;;  %v12983_v44 = vld [vmem:[#allocation45_spill] sm:$0xff]  ;;  %v12984_v11 = vld [vmem:[#allocation46_spill] sm:$0xff] }
 0xea9   :  { %v12174_v40 = vadd.f32 %v5554_v15, %v12084_v29  ;;  %5631 = vmatmul.mubr.f32.vlgmr.msra.gmra.mrb[42].mxu0 %v5554_v15  ;;  %5708 = vmatmul.mubr.f32.vlgmr.msra.gmra.mrb[42].mxu1 %v5554_v15  ;;  %v12985_v15 = vld [vmem:[#allocation47_spill] sm:$0xff] }
 0xeaa   :  { %8635 = vmatpush1.bf16.msra.mxu0 %v11466_v23  ;;  %8699 = vmatpush1.bf16.msra.mxu1 %v11468_v31 }
 0xeab   :  { %8637 = vmatprep.subr.bf16.mxu0 %v11470_v58  ;;  %8701 = vmatprep.subr.bf16.mxu1 %v11472_v3 }
 0xeae   :  { %v9606_v50 = vpop.eup %9605  ;;  %8639 = vmatpush1.bf16.msra.mxu0 %v11480_v20  ;;  %8703 = vmatpush1.bf16.msra.mxu1 %v11482_v5 }
 0xeaf   :  { %v5555_v4 = vmul.f32 %v9606_v50, %v9604_v27  ;;  %8641 = vmatprep.subr.bf16.mxu0 %v11486_v1  ;;  %8705 = vmatprep.subr.bf16.mxu1 %v11488_v39  ;;  %v12986_v27 = vld [vmem:[#allocation48_spill] sm:$0xff]  ;;  %v12987_v50 = vld [vmem:[#allocation49_spill] sm:$0xff] }
 0xeb1   :  { %v12185_v29 = vadd.f32 %v5555_v4, %v12095_v24  ;;  %5636 = vmatprep.mubr.f32.mxu0 %v5555_v4  ;;  %5713 = vmatprep.mubr.f32.mxu1 %v5555_v4  ;;  %v12971_v24 = vld [vmem:[#allocation33_spill] sm:$0xff]  ;;  %v12988_v4 = vld [vmem:[#allocation50_spill] sm:$0xff] }
 0xeb2   :  { %5637 = vmatmul.mubr.f32.gmra.mrb[52].mxu0 %v12605_v25  ;;  %5714 = vmatmul.mubr.f32.gmra.mrb[52].mxu1 %v12605_v25 }
 0xeb3   :  { %8643 = vmatpush1.bf16.msra.mxu0 %v11496_v35  ;;  %8707 = vmatpush1.bf16.msra.mxu1 %v11498_v21 }
 0xeb4   :  { %8645 = vmatprep.subr.bf16.mxu0 %v11502_v10  ;;  %8709 = vmatprep.subr.bf16.mxu1 %v11504_v18 }
 0xeb5   :  { %5842 = vmatprep.mubr.f32.mxu0 %v12605_v25  ;;  %5919 = vmatprep.mubr.f32.mxu1 %v12605_v25 }
 0xeb7   :  { %8647 = vmatpush1.bf16.msra.mxu0 %v11512_v45  ;;  %8711 = vmatpush1.bf16.msra.mxu1 %v11514_v0 }
 0xeb8   :  { %8649 = vmatprep.subr.bf16.mxu0 %v11518_v30  ;;  %8713 = vmatprep.subr.bf16.mxu1 %v11520_v41 }
 0xebb   :  { %8651 = vmatpush1.bf16.msra.mxu0 %v11528_v47  ;;  %8715 = vmatpush1.bf16.msra.mxu1 %v11530_v6 }
 0xebc   :  { %8653 = vmatprep.subr.bf16.mxu0 %v11534_v16  ;;  %8717 = vmatprep.subr.bf16.mxu1 %v11536_v61 }
 0xebf   :  { %8655 = vmatpush1.bf16.msra.mxu0 %v11544_v56  ;;  %8719 = vmatpush1.bf16.msra.mxu1 %v11546_v8 }
 0xec0   :  { %8657 = vmatprep.subr.bf16.mxu0 %v11550_v43  ;;  %8721 = vmatprep.subr.bf16.mxu1 %v11552_v26 }
 0xec3   :  { %8659 = vmatpush1.bf16.msra.mxu0 %v11560_v52  ;;  %8723 = vmatpush1.bf16.msra.mxu1 %v11562_v48 }
 0xec4   :  { %8661 = vmatprep.subr.bf16.mxu0 %v11566_v7  ;;  %8725 = vmatprep.subr.bf16.mxu1 %v11568_v57 }
 0xec7   :  { %8663 = vmatpush1.bf16.msra.mxu0 %v11576_v19  ;;  %8727 = vmatpush1.bf16.msra.mxu1 %v11578_v2 }
 0xec8   :  { %8665 = vmatprep.subr.bf16.mxu0 %v11582_v42  ;;  %8729 = vmatprep.subr.bf16.mxu1 %v11584_v17 }
 0xecb   :  { %8667 = vmatpush1.bf16.msra.mxu0 %v11592_v14  ;;  %8731 = vmatpush1.bf16.msra.mxu1 %v11594_v59 }
 0xecc   :  { %8669 = vmatprep.subr.bf16.mxu0 %v12971_v24  ;;  %8733 = vmatprep.subr.bf16.mxu1 %v12972_v13 }
 0xecf   :  { %8671 = vmatpush1.bf16.msra.mxu0 %v12973_v12  ;;  %8735 = vmatpush1.bf16.msra.mxu1 %v12974_v32 }
 0xed0   :  { %8673 = vmatprep.subr.bf16.mxu0 %v12975_v55  ;;  %8737 = vmatprep.subr.bf16.mxu1 %v12976_v38 }
 0xed3   :  { %8675 = vmatpush1.bf16.msra.mxu0 %v12977_v34  ;;  %8739 = vmatpush1.bf16.msra.mxu1 %v12978_v54  ;;  %v12989_v54 = vld [vmem:[#allocation51_spill] sm:$0xff]  ;;  %v13001_v34 = vld [vmem:[#allocation30_spill] sm:$0xff] }
 0xed4   :  { %8677 = vmatprep.subr.bf16.mxu0 %v12979_v63  ;;  %8741 = vmatprep.subr.bf16.mxu1 %v12980_v51  ;;  %v12990_v63 = vld [vmem:[#allocation24_spill] sm:$0xff]  ;;  %v12991_v51 = vld [vmem:[#allocation54_spill] sm:$0xff] }
 0xed7   :  { %8679 = vmatpush1.bf16.msra.mxu0 %v12981_v49  ;;  %8743 = vmatpush1.bf16.msra.mxu1 %v12982_v37  ;;  %v12992_v49 = vld [vmem:[#allocation57_spill] sm:$0xff]  ;;  %v12993_v37 = vld [vmem:[#allocation58_spill] sm:$0xff] }
 0xed8   :  { %8681 = vmatprep.subr.bf16.mxu0 %v12983_v44  ;;  %8745 = vmatprep.subr.bf16.mxu1 %v12984_v11  ;;  %v12994_v44 = vld [vmem:[#allocation59_spill] sm:$0xff] }
 0xed9   :  { %v12995_v11 = vld [vmem:[#allocation23_spill] sm:$0xff] }
 0xedb   :  { %8683 = vmatpush1.bf16.msra.mxu0 %v12985_v15  ;;  %8747 = vmatpush1.bf16.msra.mxu1 %v12986_v27  ;;  %v12996_v15 = vld [vmem:[#allocation25_spill] sm:$0xff]  ;;  %v12997_v27 = vld [vmem:[#allocation52_spill] sm:$0xff] }
 0xedc   :  { %8685 = vmatprep.subr.bf16.mxu0 %v12987_v50  ;;  %8749 = vmatprep.subr.bf16.mxu1 %v12988_v4  ;;  %v12998_v50 = vld [vmem:[#allocation27_spill] sm:$0xff] }
 0xedd   :  { %v12999_v4 = vld [vmem:[#allocation31_spill] sm:$0xff] }
 0xedf   :  { %8687 = vmatpush1.bf16.msra.mxu0 %v12989_v54  ;;  %8751 = vmatpush1.bf16.msra.mxu1 %v12990_v63  ;;  %v13000_v54 = vld [vmem:[#allocation32_spill] sm:$0xff] }
 0xee0   :  { %8689 = vmatprep.subr.bf16.mxu0 %v12991_v51  ;;  %8753 = vmatprep.subr.bf16.mxu1 %v12992_v49 }
 0xee3   :  { %8691 = vmatpush1.bf16.msra.mxu0 %v12993_v37  ;;  %8755 = vmatpush1.bf16.msra.mxu1 %v12994_v44 }
 0xee4   :  { %8693 = vmatprep.subr.bf16.mxu0 %v12995_v11  ;;  %8757 = vmatprep.subr.bf16.mxu1 %v12996_v15 }
 0xee7   :  { %8695 = vmatpush1.bf16.msra.mxu0 %v12997_v27  ;;  %8759 = vmatpush1.bf16.msra.mxu1 %v12998_v50 }
 0xee8   :  { %8761 = vmatprep.subr.bf16.mxu0 %v12999_v4  ;;  %8825 = vmatprep.subr.bf16.mxu1 %v13000_v54 }
 0xf7c   :  { %v5632_v63 = vpop.f32.mrb[42].mxu0  ;;  %v5709_v51 = vpop.f32.mrb[42].mxu1 }
 0xf7d   :  { %v8994_v49 = vadd.f32 %v5632_v63, %v13001_v34  ;;  %v5634_v38 = vpop.f32.mrb[43].mxu0  ;;  %v5711_v37 = vpop.f32.mrb[43].mxu1  ;;  %v9010_v34 = vadd.f32 %v5709_v51, %v11792_v53 }
 0xf7e   :  { %v8995_v44 = vadd.f32 %v5634_v38, %v12876_v33  ;;  %v9011_v27 = vadd.f32 %v5711_v37, %v12878_v28 }
 0xf7f   :  { %v6402_v55 = vmul.f32 -1.442695, %v8994_v49 }
 0xf80   :  { %v6404_v11 = vmul.f32 -1.442695, %v8995_v44  ;;  %v6406_v13 = vmul.f32 -1.442695, %v9011_v27 }
 0xf81   :  { %9607 = vpow2.f32 %v6402_v55 }
 0xf82   :  { %9609 = vpow2.f32 %v6404_v11 }
 0xf85   :  { %v5638_v15 = vpop.f32.mrb[52].mxu0  ;;  %v5715_v50 = vpop.f32.mrb[52].mxu1 }
 0xf86   :  { %v9020_v4 = vadd.f32 %v5638_v15, %v12940_v36  ;;  %v5640_v32 = vpop.f32.mrb[53].mxu0  ;;  %v5717_v54 = vpop.f32.mrb[53].mxu1 }
 0xf87   :  { %v9021_v12 = vadd.f32 %v5640_v32, %v12877_v46  ;;  %v9037_v44 = vadd.f32 %v5717_v54, %v11788_v9  ;;  %v9036_v32 = vadd.f32 %v5715_v50, %v11798_v62 }
 0xf88   :  { %v6403_v63 = vmul.f32 -1.442695, %v9020_v4 }
 0xf89   :  { %v6405_v24 = vmul.f32 -1.442695, %v9021_v12  ;;  %v6407_v11 = vmul.f32 -1.442695, %v9037_v44 }
 0xf8a   :  { %9611 = vpow2.f32 %v6403_v63 }
 0xf8b   :  { %v9608_v38 = vpop.eup %9607  ;;  %9613 = vpow2.f32 %v6405_v24 }
 0xf8c   :  { %v9610_v55 = vpop.eup %9609  ;;  %v5726_v49 = vadd.f32 1.0, %v9608_v38  ;;  %9615 = vpow2.f32 %v6406_v13 }
 0xf8d   :  { %9617 = vtanh.f32 %v9010_v34  ;;  %v5738_v37 = vadd.f32 1.0, %v9610_v55 }
 0xf8e   :  { %9619 = vrcp.f32 %v5726_v49 }
 0xf8f   :  { %9621 = vrcp.f32 %v5738_v37 }
 0xf90   :  { %9623 = vpow2.f32 %v6407_v11 }
 0xf91   :  { %9625 = vtanh.f32 %v9036_v32 }
 0xf94   :  { %v9612_v15 = vpop.eup %9611 }
 0xf95   :  { %v9614_v27 = vpop.eup %9613  ;;  %v5727_v4 = vadd.f32 1.0, %v9612_v15 }
 0xf96   :  { %v9616_v12 = vpop.eup %9615  ;;  %v5739_v51 = vadd.f32 1.0, %v9614_v27 }
 0xf97   :  { %v9618_v24 = vpop.eup %9617  ;;  %9627 = vrcp.f32 %v5727_v4  ;;  %v5752_v38 = vadd.f32 1.0, %v9616_v12 }
 0xf98   :  { %v9620_v63 = vpop.eup %9619  ;;  %9629 = vrcp.f32 %v5739_v51 }
 0xf99   :  { %v9622_v13 = vpop.eup %9621  ;;  %v5760_v34 = vmul.f32 %v9620_v63, %v9618_v24  ;;  %9631 = vrcp.f32 %v5752_v38 }
 0xf9a   :  { %v5758_v54 = vmul.f32 %v9622_v13, %v12166_v60  ;;  %v9624_v50 = vpop.eup %9623 }
 0xf9b   :  { %v9626_v49 = vpop.eup %9625  ;;  %v5753_v32 = vadd.f32 1.0, %v9624_v50 }
 0xf9c   :  { %v12256_v55 = vadd.f32 %v5760_v34, %v5758_v54 }
 0xf9e   :  { %9633 = vtanh.f32 %v12256_v55 }
 0xf9f   :  { %9635 = vrcp.f32 %v5753_v32 }
 0xfa1   :  { %v9628_v37 = vpop.eup %9627 }
 0xfa2   :  { %v9630_v44 = vpop.eup %9629  ;;  %v5761_v11 = vmul.f32 %v9628_v37, %v9626_v49 }
 0xfa3   :  { %v5759_v15 = vmul.f32 %v9630_v44, %v12170_v22  ;;  %v9632_v4 = vpop.eup %9631 }
 0xfa5   :  { %v12260_v27 = vadd.f32 %v5761_v11, %v5759_v15 }
 0xfa7   :  { %9637 = vtanh.f32 %v12260_v27 }
 0xfa8   :  { %v9634_v60 = vpop.eup %9633 }
 0xfa9   :  { %v5766_v12 = vmul.f32 %v9634_v60, %v9632_v4  ;;  %v9636_v22 = vpop.eup %9635 }
 0xfab   :  { %5843 = vmatmul.mubr.f32.vlgmr.msra.gmra.mrb[44].mxu0 %v5766_v12  ;;  %5920 = vmatmul.mubr.f32.vlgmr.msra.gmra.mrb[44].mxu1 %v5766_v12  ;;  %v12264_v51 = vadd.f32 %v5766_v12, %v12174_v40 }
 0xfac   :  { %8763 = vmatpush1.bf16.msra.mxu0 %v11466_v23  ;;  %8827 = vmatpush1.bf16.msra.mxu1 %v11468_v31  ;;  %v13002_v31 = vld [vmem:[#allocation33_spill] sm:$0xff] }
 0xfad   :  { %8765 = vmatprep.subr.bf16.mxu0 %v11470_v58  ;;  %8829 = vmatprep.subr.bf16.mxu1 %v11472_v3  ;;  %v13003_v58 = vld [vmem:[#allocation34_spill] sm:$0xff]  ;;  %v13004_v3 = vld [vmem:[#allocation35_spill] sm:$0xff] }
 0xfb0   :  { %8767 = vmatpush1.bf16.msra.mxu0 %v11480_v20  ;;  %8831 = vmatpush1.bf16.msra.mxu1 %v11482_v5  ;;  %v13005_v20 = vld [vmem:[#allocation36_spill] sm:$0xff]  ;;  %v13006_v5 = vld [vmem:[#allocation37_spill] sm:$0xff] }
 0xfb1   :  { %v9638_v24 = vpop.eup %9637  ;;  %8769 = vmatprep.subr.bf16.mxu0 %v11486_v1  ;;  %8833 = vmatprep.subr.bf16.mxu1 %v11488_v39  ;;  %v13007_v1 = vld [vmem:[#allocation38_spill] sm:$0xff]  ;;  %v13008_v39 = vld [vmem:[#allocation39_spill] sm:$0xff] }
 0xfb2   :  { %v5767_v40 = vmul.f32 %v9638_v24, %v9636_v22 }
 0xfb4   :  { %5848 = vmatprep.mubr.f32.mxu0 %v5767_v40  ;;  %5925 = vmatprep.mubr.f32.mxu1 %v5767_v40  ;;  %v12275_v23 = vadd.f32 %v5767_v40, %v12185_v29 }
 0xfb5   :  { %5849 = vmatmul.mubr.f32.gmra.mrb[50].mxu0 %v12605_v25  ;;  %5926 = vmatmul.mubr.f32.gmra.mrb[50].mxu1 %v12605_v25 }
 0xfb6   :  { %8771 = vmatpush1.bf16.msra.mxu0 %v11496_v35  ;;  %8835 = vmatpush1.bf16.msra.mxu1 %v11498_v21  ;;  %v13009_v35 = vld [vmem:[#allocation40_spill] sm:$0xff]  ;;  %v13010_v21 = vld [vmem:[#allocation41_spill] sm:$0xff] }
 0xfb7   :  { %8773 = vmatprep.subr.bf16.mxu0 %v11502_v10  ;;  %8837 = vmatprep.subr.bf16.mxu1 %v11504_v18  ;;  %v13011_v10 = vld [vmem:[#allocation42_spill] sm:$0xff]  ;;  %v13012_v18 = vld [vmem:[#allocation43_spill] sm:$0xff] }
 0xfb8   :  { %6054 = vmatprep.mubr.f32.mxu0 %v12605_v25  ;;  %6131 = vmatprep.mubr.f32.mxu1 %v12605_v25 }
 0xfba   :  { %8775 = vmatpush1.bf16.msra.mxu0 %v11512_v45  ;;  %8839 = vmatpush1.bf16.msra.mxu1 %v11514_v0  ;;  %v13013_v45 = vld [vmem:[#allocation44_spill] sm:$0xff]  ;;  %v13014_v0 = vld [vmem:[#allocation45_spill] sm:$0xff] }
 0xfbb   :  { %8777 = vmatprep.subr.bf16.mxu0 %v11518_v30  ;;  %8841 = vmatprep.subr.bf16.mxu1 %v11520_v41  ;;  %v13015_v30 = vld [vmem:[#allocation46_spill] sm:$0xff]  ;;  %v13016_v41 = vld [vmem:[#allocation47_spill] sm:$0xff] }
 0xfbe   :  { %8779 = vmatpush1.bf16.msra.mxu0 %v11528_v47  ;;  %8843 = vmatpush1.bf16.msra.mxu1 %v11530_v6  ;;  %v13017_v47 = vld [vmem:[#allocation48_spill] sm:$0xff]  ;;  %v13018_v6 = vld [vmem:[#allocation49_spill] sm:$0xff] }
 0xfbf   :  { %8781 = vmatprep.subr.bf16.mxu0 %v11534_v16  ;;  %8845 = vmatprep.subr.bf16.mxu1 %v11536_v61  ;;  %v13019_v16 = vld [vmem:[#allocation50_spill] sm:$0xff]  ;;  %v13020_v61 = vld [vmem:[#allocation51_spill] sm:$0xff] }
 0xfc2   :  { %8783 = vmatpush1.bf16.msra.mxu0 %v11544_v56  ;;  %8847 = vmatpush1.bf16.msra.mxu1 %v11546_v8  ;;  %v13021_v56 = vld [vmem:[#allocation24_spill] sm:$0xff]  ;;  %v13022_v8 = vld [vmem:[#allocation54_spill] sm:$0xff] }
 0xfc3   :  { %8785 = vmatprep.subr.bf16.mxu0 %v11550_v43  ;;  %8849 = vmatprep.subr.bf16.mxu1 %v11552_v26  ;;  %v13023_v43 = vld [vmem:[#allocation57_spill] sm:$0xff]  ;;  %v13024_v26 = vld [vmem:[#allocation58_spill] sm:$0xff] }
 0xfc6   :  { %8787 = vmatpush1.bf16.msra.mxu0 %v11560_v52  ;;  %8851 = vmatpush1.bf16.msra.mxu1 %v11562_v48  ;;  %v13025_v52 = vld [vmem:[#allocation59_spill] sm:$0xff] }
 0xfc7   :  { %8789 = vmatprep.subr.bf16.mxu0 %v11566_v7  ;;  %8853 = vmatprep.subr.bf16.mxu1 %v11568_v57  ;;  %v13026_v48 = vld [vmem:[#allocation23_spill] sm:$0xff]  ;;  %v13027_v7 = vld [vmem:[#allocation25_spill] sm:$0xff]  ;;  %v13028_v57 = vld [vmem:[#allocation52_spill] sm:$0xff] }
 0xfca   :  { %8791 = vmatpush1.bf16.msra.mxu0 %v11576_v19  ;;  %8855 = vmatpush1.bf16.msra.mxu1 %v11578_v2  ;;  %v13029_v19 = vld [vmem:[#allocation27_spill] sm:$0xff] }
 0xfcb   :  { %8793 = vmatprep.subr.bf16.mxu0 %v11582_v42  ;;  %8857 = vmatprep.subr.bf16.mxu1 %v11584_v17  ;;  %v13030_v17 = vld [vmem:[#allocation30_spill] sm:$0xff] }
 0xfce   :  { %8795 = vmatpush1.bf16.msra.mxu0 %v11592_v14  ;;  %8859 = vmatpush1.bf16.msra.mxu1 %v11594_v59 }
 0xfcf   :  { %8797 = vmatprep.subr.bf16.mxu0 %v13002_v31  ;;  %8861 = vmatprep.subr.bf16.mxu1 %v13003_v58 }
 0xfd2   :  { %8799 = vmatpush1.bf16.msra.mxu0 %v13004_v3  ;;  %8863 = vmatpush1.bf16.msra.mxu1 %v13005_v20 }
 0xfd3   :  { %8801 = vmatprep.subr.bf16.mxu0 %v13006_v5  ;;  %8865 = vmatprep.subr.bf16.mxu1 %v13007_v1 }
 0xfd6   :  { %8803 = vmatpush1.bf16.msra.mxu0 %v13008_v39  ;;  %8867 = vmatpush1.bf16.msra.mxu1 %v13009_v35 }
 0xfd7   :  { %8805 = vmatprep.subr.bf16.mxu0 %v13010_v21  ;;  %8869 = vmatprep.subr.bf16.mxu1 %v13011_v10 }
 0xfda   :  { %8807 = vmatpush1.bf16.msra.mxu0 %v13012_v18  ;;  %8871 = vmatpush1.bf16.msra.mxu1 %v13013_v45 }
 0xfdb   :  { %8809 = vmatprep.subr.bf16.mxu0 %v13014_v0  ;;  %8873 = vmatprep.subr.bf16.mxu1 %v13015_v30 }
 0xfde   :  { %8811 = vmatpush1.bf16.msra.mxu0 %v13016_v41  ;;  %8875 = vmatpush1.bf16.msra.mxu1 %v13017_v47 }
 0xfdf   :  { %8813 = vmatprep.subr.bf16.mxu0 %v13018_v6  ;;  %8877 = vmatprep.subr.bf16.mxu1 %v13019_v16 }
 0xfe2   :  { %8815 = vmatpush1.bf16.msra.mxu0 %v13020_v61  ;;  %8879 = vmatpush1.bf16.msra.mxu1 %v13021_v56 }
 0xfe3   :  { %8817 = vmatprep.subr.bf16.mxu0 %v13022_v8  ;;  %8881 = vmatprep.subr.bf16.mxu1 %v13023_v43 }
 0xfe6   :  { %8819 = vmatpush1.bf16.msra.mxu0 %v13024_v26  ;;  %8883 = vmatpush1.bf16.msra.mxu1 %v13025_v52 }
 0xfe7   :  { %8821 = vmatprep.subr.bf16.mxu0 %v13026_v48  ;;  %8885 = vmatprep.subr.bf16.mxu1 %v13027_v7 }
 0xfea   :  { %8823 = vmatpush1.bf16.msra.mxu0 %v13028_v57  ;;  %8887 = vmatpush1.bf16.msra.mxu1 %v13029_v19 }
0x107e   :  { %v5844_v2 = vpop.f32.mrb[44].mxu0  ;;  %v5921_v42 = vpop.f32.mrb[44].mxu1 }
0x107f   :  { %v8996_v14 = vadd.f32 %v5844_v2, %v13030_v17  ;;  %v5846_v59 = vpop.f32.mrb[45].mxu0  ;;  %v5923_v29 = vpop.f32.mrb[45].mxu1  ;;  %v9012_v15 = vadd.f32 %v5921_v42, %v11792_v53  ;;  %v6212_v42 = vld [vmem:[#allocation15 + $0x80] sm:$0xff] }
0x1080   :  { %v8997_v63 = vadd.f32 %v5846_v59, %v12876_v33  ;;  %v9013_v38 = vadd.f32 %v5923_v29, %v12878_v28  ;;  %v6196_v29 = vld [vmem:[#allocation15] sm:$0xff] }
0x1081   :  { %v6408_v13 = vmul.f32 -1.442695, %v8996_v14  ;;  %v6213_v14 = vld [vmem:[#allocation15 + $0x88] sm:$0xff] }
0x1082   :  { %v6410_v34 = vmul.f32 -1.442695, %v8997_v63  ;;  %v6412_v54 = vmul.f32 -1.442695, %v9013_v38  ;;  %v8888_v59 = vpack.c.bf16 %v6213_v14, %v6212_v42  ;;  %v6197_v63 = vld [vmem:[#allocation15 + $0x8] sm:$0xff] }
0x1083   :  { %9639 = vpow2.f32 %v6408_v13  ;;  %v8890_v13 = vpack.c.bf16 %v6197_v63, %v6196_v29 }
0x1084   :  { %9641 = vpow2.f32 %v6410_v34  ;;  %8889 = vmatprep.subr.bf16.mxu0 %v8888_v59  ;;  %v6215_v34 = vld [vmem:[#allocation15 + $0x98] sm:$0xff] }
0x1085   :  { %9643 = vpow2.f32 %v6412_v54  ;;  %v6198_v54 = vld [vmem:[#allocation15 + $0x10] sm:$0xff] }
0x1088   :  { %v5850_v50 = vpop.f32.mrb[50].mxu0  ;;  %v5927_v49 = vpop.f32.mrb[50].mxu1 }
0x1089   :  { %v9018_v37 = vadd.f32 %v5850_v50, %v12940_v36  ;;  %v5852_v44 = vpop.f32.mrb[51].mxu0  ;;  %v5929_v11 = vpop.f32.mrb[51].mxu1  ;;  %v9034_v3 = vadd.f32 %v5927_v49, %v11798_v62  ;;  %v6199_v50 = vld [vmem:[#allocation15 + $0x18] sm:$0xff] }
0x108a   :  { %v9019_v32 = vadd.f32 %v5852_v44, %v12877_v46  ;;  %v9035_v31 = vadd.f32 %v5929_v11, %v11788_v9  ;;  %v8894_v49 = vpack.c.bf16 %v6199_v50, %v6198_v54  ;;  %v6201_v11 = vld [vmem:[#allocation15 + $0x28] sm:$0xff] }
0x108b   :  { %v6409_v4 = vmul.f32 -1.442695, %v9018_v37  ;;  %v6217_v37 = vld [vmem:[#allocation15 + $0xa8] sm:$0xff] }
0x108c   :  { %v6411_v60 = vmul.f32 -1.442695, %v9019_v32  ;;  %v6413_v58 = vmul.f32 -1.442695, %v9035_v31 }
0x108d   :  { %v9640_v12 = vpop.eup %9639  ;;  %9645 = vpow2.f32 %v6409_v4  ;;  %v6219_v4 = vld [vmem:[#allocation15 + $0xb8] sm:$0xff] }
0x108e   :  { %v9642_v22 = vpop.eup %9641  ;;  %v5938_v24 = vadd.f32 1.0, %v9640_v12  ;;  %9647 = vpow2.f32 %v6411_v60  ;;  %v6202_v60 = vld [vmem:[#allocation15 + $0x30] sm:$0xff] }
0x108f   :  { %9649 = vtanh.f32 %v9012_v15  ;;  %v5950_v40 = vadd.f32 1.0, %v9642_v22  ;;  %v9644_v20 = vpop.eup %9643  ;;  %v6218_v15 = vld [vmem:[#allocation15 + $0xb0] sm:$0xff]  ;;  %v6203_v22 = vld [vmem:[#allocation15 + $0x38] sm:$0xff] }
0x1090   :  { %9651 = vrcp.f32 %v5938_v24  ;;  %v5964_v0 = vadd.f32 1.0, %v9644_v20  ;;  %v8900_v12 = vpack.c.bf16 %v6219_v4, %v6218_v15  ;;  %v6220_v24 = vld [vmem:[#allocation15 + $0xc0] sm:$0xff]  ;;  %v8902_v31 = vpack.c.bf16 %v6203_v22, %v6202_v60  ;;  %v6205_v20 = vld [vmem:[#allocation15 + $0x48] sm:$0xff] }
0x1091   :  { %9653 = vrcp.f32 %v5950_v40  ;;  %v6221_v40 = vld [vmem:[#allocation15 + $0xc8] sm:$0xff] }
0x1092   :  { %9655 = vpow2.f32 %v6413_v58  ;;  %v8904_v58 = vpack.c.bf16 %v6221_v40, %v6220_v24 }
0x1093   :  { %9657 = vtanh.f32 %v9034_v3  ;;  %v6204_v3 = vld [vmem:[#allocation15 + $0x40] sm:$0xff] }
0x1097   :  { %v9646_v5 = vpop.eup %9645 }
0x1098   :  { %v9648_v1 = vpop.eup %9647  ;;  %v5939_v39 = vadd.f32 1.0, %v9646_v5  ;;  %v6222_v5 = vld [vmem:[#allocation15 + $0xd0] sm:$0xff] }
0x1099   :  { %v9650_v35 = vpop.eup %9649  ;;  %v5951_v21 = vadd.f32 1.0, %v9648_v1  ;;  %v6223_v1 = vld [vmem:[#allocation15 + $0xd8] sm:$0xff] }
0x109a   :  { %v9652_v10 = vpop.eup %9651  ;;  %9659 = vrcp.f32 %v5939_v39  ;;  %v8906_v39 = vpack.c.bf16 %v6205_v20, %v6204_v3 }
0x109b   :  { %v9654_v18 = vpop.eup %9653  ;;  %v5972_v45 = vmul.f32 %v9652_v10, %v9650_v35  ;;  %9661 = vrcp.f32 %v5951_v21  ;;  %v8908_v35 = vpack.c.bf16 %v6223_v1, %v6222_v5  ;;  %v6206_v21 = vld [vmem:[#allocation15 + $0x50] sm:$0xff]  ;;  %v6207_v10 = vld [vmem:[#allocation15 + $0x58] sm:$0xff] }
0x109c   :  { %v5970_v30 = vmul.f32 %v9654_v18, %v12256_v55  ;;  %9663 = vrcp.f32 %v5964_v0  ;;  %v9656_v47 = vpop.eup %9655  ;;  %v6224_v18 = vld [vmem:[#allocation15 + $0xe0] sm:$0xff]  ;;  %v8910_v0 = vpack.c.bf16 %v6207_v10, %v6206_v21 }
0x109d   :  { %v9658_v6 = vpop.eup %9657  ;;  %v5965_v8 = vadd.f32 1.0, %v9656_v47  ;;  %v6208_v47 = vld [vmem:[#allocation15 + $0x60] sm:$0xff] }
0x109e   :  { %v12344_v41 = vadd.f32 %v5972_v45, %v5970_v30  ;;  %v6225_v45 = vld [vmem:[#allocation15 + $0xe8] sm:$0xff] }
0x109f   :  { %v8912_v30 = vpack.c.bf16 %v6225_v45, %v6224_v18 }
0x10a0   :  { %9665 = vtanh.f32 %v12344_v41 }
0x10a1   :  { %9667 = vrcp.f32 %v5965_v8 }
0x10a4   :  { %v9660_v16 = vpop.eup %9659 }
0x10a5   :  { %v9662_v61 = vpop.eup %9661  ;;  %v5973_v56 = vmul.f32 %v9660_v16, %v9658_v6  ;;  %v6209_v6 = vld [vmem:[#allocation15 + $0x68] sm:$0xff]  ;;  %v6226_v16 = vld [vmem:[#allocation15 + $0xf0] sm:$0xff] }
0x10a6   :  { %v5971_v43 = vmul.f32 %v9662_v61, %v12260_v27  ;;  %v9664_v52 = vpop.eup %9663  ;;  %v6227_v61 = vld [vmem:[#allocation15 + $0xf8] sm:$0xff] }
0x10a7   :  { %v8916_v8 = vpack.c.bf16 %v6227_v61, %v6226_v16 }
0x10a8   :  { %v12348_v26 = vadd.f32 %v5973_v56, %v5971_v43  ;;  %v8914_v56 = vpack.c.bf16 %v6209_v6, %v6208_v47  ;;  %v6210_v43 = vld [vmem:[#allocation15 + $0x70] sm:$0xff] }
0x10aa   :  { %v9666_v48 = vpop.eup %9665  ;;  %9669 = vtanh.f32 %v12348_v26 }
0x10ab   :  { %v5978_v55 = vmul.f32 %v9666_v48, %v9664_v52  ;;  %v9668_v57 = vpop.eup %9667  ;;  %v6211_v52 = vld [vmem:[#allocation15 + $0x78] sm:$0xff] }
0x10ac   :  { %v8918_v48 = vpack.c.bf16 %v6211_v52, %v6210_v43 }
0x10ad   :  { %6055 = vmatmul.mubr.f32.vlgmr.msra.gmra.mrb[46].mxu0 %v5978_v55  ;;  %6132 = vmatmul.mubr.f32.vlgmr.msra.gmra.mrb[46].mxu1 %v5978_v55  ;;  %v12352_v7 = vadd.f32 %v5978_v55, %v12264_v51  ;;  %v6214_v51 = vld [vmem:[#allocation15 + $0x90] sm:$0xff] }
0x10ae   :  { %8891 = vmatpush3.bf16.msra.mxu0 %v8890_v13  ;;  %v8892_v38 = vpack.c.bf16 %v6215_v34, %v6214_v51 }
0x10b0   :  { %8893 = vmatprep.subr.bf16.mxu0 %v8892_v38 }
0x10b2   :  { %8895 = vmatpush3.bf16.msra.mxu0 %v8894_v49 }
0x10b4   :  { %v9670_v19 = vpop.eup %9669 }
0x10b5   :  { %v5979_v2 = vmul.f32 %v9670_v19, %v9668_v57 }
0x10b7   :  { %6060 = vmatprep.mubr.f32.mxu0 %v5979_v2  ;;  %6137 = vmatprep.mubr.f32.mxu1 %v5979_v2  ;;  %v12355_v27 = vadd.f32 %v5979_v2, %v12275_v23  ;;  %v6216_v23 = vld [vmem:[#allocation15 + $0xa0] sm:$0xff] }
0x10b8   :  { %6061 = vmatmul.mubr.f32.gmra.mrb[48].mxu0 %v12605_v25  ;;  %6138 = vmatmul.mubr.f32.gmra.mrb[48].mxu1 %v12605_v25  ;;  %v8896_v44 = vpack.c.bf16 %v6217_v37, %v6216_v23  ;;  %v6200_v25 = vld [vmem:[#allocation15 + $0x20] sm:$0xff] }
0x10b9   :  { %v8898_v32 = vpack.c.bf16 %v6201_v11, %v6200_v25 }
0x10ba   :  { %8897 = vmatprep.subr.bf16.mxu0 %v8896_v44 }
0x10bb   :  { %8899 = vmatpush3.bf16.msra.mxu0 %v8898_v32 }
0x10bc   :  { %8901 = vmatprep.subr.bf16.mxu0 %v8900_v12 }
0x10bf   :  { %8903 = vmatpush3.bf16.msra.mxu0 %v8902_v31 }
0x10c0   :  { %8905 = vmatprep.subr.bf16.mxu0 %v8904_v58 }
0x10c3   :  { %8907 = vmatpush3.bf16.msra.mxu0 %v8906_v39 }
0x10c4   :  { %8909 = vmatprep.subr.bf16.mxu0 %v8908_v35 }
0x10c7   :  { %8911 = vmatpush3.bf16.msra.mxu0 %v8910_v0 }
0x10c8   :  { %8913 = vmatprep.subr.bf16.mxu0 %v8912_v30 }
0x10cb   :  { %8915 = vmatpush3.bf16.msra.mxu0 %v8914_v56 }
0x10cc   :  { %8917 = vmatprep.subr.bf16.mxu0 %v8916_v8 }
0x10cf   :  { %8919 = vmatpush3.bf16.msra.mxu0 %v8918_v48 }
0x1180   :  { %v6056_v55 = vpop.f32.mrb[46].mxu0  ;;  %v6133_v57 = vpop.f32.mrb[46].mxu1 }
0x1181   :  { %v8998_v19 = vadd.f32 %v6056_v55, %v13030_v17  ;;  %v6058_v2 = vpop.f32.mrb[47].mxu0  ;;  %v6135_v42 = vpop.f32.mrb[47].mxu1  ;;  %v9014_v13 = vadd.f32 %v6133_v57, %v11792_v53 }
0x1182   :  { %v8999_v14 = vadd.f32 %v6058_v2, %v12876_v33  ;;  %v9015_v63 = vadd.f32 %v6135_v42, %v12878_v28 }
0x1183   :  { %v6414_v59 = vmul.f32 -1.442695, %v8998_v19 }
0x1184   :  { %v6416_v29 = vmul.f32 -1.442695, %v8999_v14  ;;  %v6418_v51 = vmul.f32 -1.442695, %v9015_v63 }
0x1185   :  { %9671 = vpow2.f32 %v6414_v59 }
0x1186   :  { %9673 = vpow2.f32 %v6416_v29 }
0x1187   :  { %9675 = vtanh.f32 %v9014_v13 }
0x1188   :  { %9677 = vpow2.f32 %v6418_v51 }
0x118b   :  { %v6062_v34 = vpop.f32.mrb[48].mxu0  ;;  %v6139_v38 = vpop.f32.mrb[48].mxu1 }
0x118c   :  { %v9016_v54 = vadd.f32 %v6062_v34, %v12940_v36  ;;  %v6064_v50 = vpop.f32.mrb[49].mxu0  ;;  %v6141_v49 = vpop.f32.mrb[49].mxu1  ;;  %v9032_v32 = vadd.f32 %v6139_v38, %v11798_v62 }
0x118d   :  { %v9017_v17 = vadd.f32 %v6064_v50, %v12877_v46  ;;  %v9033_v53 = vadd.f32 %v6141_v49, %v11788_v9 }
0x118e   :  { %v6415_v23 = vmul.f32 -1.442695, %v9016_v54 }
0x118f   :  { %v9672_v33 = vpop.eup %9671  ;;  %v6417_v37 = vmul.f32 -1.442695, %v9017_v17  ;;  %v6419_v11 = vmul.f32 -1.442695, %v9033_v53 }
0x1190   :  { %v9674_v44 = vpop.eup %9673  ;;  %v6150_v25 = vadd.f32 1.0, %v9672_v33  ;;  %9679 = vpow2.f32 %v6415_v23 }
0x1191   :  { %v6162_v28 = vadd.f32 1.0, %v9674_v44  ;;  %9681 = vpow2.f32 %v6417_v37  ;;  %v9676_v36 = vpop.eup %9675 }
0x1192   :  { %9683 = vrcp.f32 %v6150_v25  ;;  %v9678_v15 = vpop.eup %9677 }
0x1193   :  { %9685 = vrcp.f32 %v6162_v28  ;;  %v6176_v31 = vadd.f32 1.0, %v9678_v15 }
0x1194   :  { %9687 = vpow2.f32 %v6419_v11 }
0x1195   :  { %9689 = vtanh.f32 %v9032_v32 }
0x119a   :  { %v9680_v46 = vpop.eup %9679 }
0x119b   :  { %v9682_v4 = vpop.eup %9681  ;;  %v6151_v60 = vadd.f32 1.0, %v9680_v46 }
0x119c   :  { %v9684_v12 = vpop.eup %9683  ;;  %v6163_v22 = vadd.f32 1.0, %v9682_v4 }
0x119d   :  { %v9686_v24 = vpop.eup %9685  ;;  %v6184_v40 = vmul.f32 %v9684_v12, %v9676_v36  ;;  %9691 = vrcp.f32 %v6151_v60 }
0x119e   :  { %v6182_v58 = vmul.f32 %v9686_v24, %v12344_v41  ;;  %9693 = vrcp.f32 %v6163_v22  ;;  %v9688_v3 = vpop.eup %9687 }
0x119f   :  { %9695 = vrcp.f32 %v6176_v31  ;;  %v9690_v62 = vpop.eup %9689  ;;  %v6177_v39 = vadd.f32 1.0, %v9688_v3 }
0x11a0   :  { %v6186_v9 = vadd.f32 %v6184_v40, %v6182_v58 }
0x11a2   :  { %9697 = vtanh.f32 %v6186_v9 }
0x11a3   :  { %9699 = vrcp.f32 %v6177_v39 }
0x11a7   :  { %v9692_v20 = vpop.eup %9691 }
0x11a8   :  { %v9694_v5 = vpop.eup %9693  ;;  %v6185_v1 = vmul.f32 %v9692_v20, %v9690_v62 }
0x11a9   :  { %v6183_v35 = vmul.f32 %v9694_v5, %v12348_v26  ;;  %v9696_v21 = vpop.eup %9695  ;;  %v6420_v26 = vld [vmem:[%s12394_s8] ss:$0 sm:$0xff] }
0x11ab   :  { %v6187_v10 = vadd.f32 %v6185_v1, %v6183_v35 }
0x11ac   :  { %v9698_v18 = vpop.eup %9697 }
0x11ad   :  { %9701 = vtanh.f32 %v6187_v10  ;;  %v6190_v45 = vmul.f32 %v9698_v18, %v9696_v21  ;;  %v9700_v0 = vpop.eup %9699 }
0x11af   :  { %v6192_v41 = vadd.f32 %v6190_v45, %v12352_v7 }
0x11b1   :  { %v6194_v61 = vmul.f32 0.125, %v6192_v41 }
0x11b7   :  { %v9702_v30 = vpop.eup %9701 }
0x11b8   :  { %v6191_v47 = vmul.f32 %v9702_v30, %v9700_v0 }
0x11ba   :  { %v6193_v6 = vadd.f32 %v6191_v47, %v12355_v27 }
0x11bc   :  { %v6195_v16 = vmul.f32 0.125, %v6193_v6 }
0x11be   :  { %6299 = vmatprep.mubr.f32.mxu0 %v6195_v16 }
0x11bf   :  { %6300 = vmatmul.mubr.f32.vlgmr.msra.gmra.mrb[64].mxu0 %v6194_v61 }
0x1292   :  { %v6453_v56 = vpop.f32.mrb[64].mxu0 }
0x1293   :  { %v6454_v8 = vpop.f32.mrb[65].mxu0 }
0x1294   :  { %v6455_v43 = vadd.f32 %v6454_v8, %v6453_v56 }
0x1296   :  { %v6302_v52 = vadd.f32 %v6455_v43, %v6420_v26 }
0x1298   :  { %6305 = vst [vmem:[#allocation16] sm:$0xff] %v6302_v52 }
0x1299   :  { %9868 = shalt.err (!%p9865_p4)
}
0x129a   :  { %s9869_s15 = scalar_lea.hbm %s12395_s9, 128 }
0x129b   :  { %p9870_p5 = scmp.ne.s32.totalorder %s12395_s9, %s9869_s15  ;;  %p9873_p6 = scmp.lt.u32.totalorder %s9869_s15, %s12395_s9 }
0x129d   :  { %p9875_p7 = pnand %p9873_p6, %p9870_p5 }
0x129f   :  { %9878 = shalt.err (!%p9875_p7)
}
0x12a0   :  { %6315 = dma.vmem_to_hbm [thread:$0]  %s6313_s26, 128, %s12395_s9, [#allocation6]  }
0x12a1   :  { %9887 = dma.done.wait [#allocation6], 128  }
0x12a2   :  { %9888 = vsyncadd [#allocation6], 4294967168 }
0x12a3   :  { %6319 = vsyncpa [#allocation5], 1 }
0x12a4   :  { %6320 = vsyncpa [#allocation8], 1 }
0x12a5   :  { %6321 = vsyncpa [#allocation11], 1 }
0x12a6   :  { %6322 = vsyncpa [#allocation14], 1 }
0x12a7   :  { %6323 = vsyncpa [#allocation6], 1 }

</bundles_post_ra>
